<compile_context>
chip_gen: v5e
topology: v5e:2x2
jax: 0.10.0
libtpu: 0.0.40
codegen_flags: <defaults>
</compile_context>

<pallas_src>
import numpy as np
import jax
import jax.numpy as jnp
from jax.experimental import pallas as pl
from jax.experimental.pallas import tpu as pltpu

NUM_CLASSES = 10
FILTER_NUM = 2          # matches self.filter_num in the PyTorch module
LANES = 128             # lane-dense padded output width

# TODO(synk): `filters.filter1` / `filters.filter2` are undefined in the original source;
# stand in with fixed 3x3 depthwise Gaussian-blur and Laplacian filters.
_GAUSS = np.array([[1., 2., 1.], [2., 4., 2.], [1., 2., 1.]], np.float32) / 16.0
_LAP = np.array([[0., 1., 0.], [1., -4., 1.], [0., 1., 0.]], np.float32)


def _weight_map(k3, H, W):
    """(H, W) map m with  sum_{h,w} conv3x3_same(x)[h,w] == sum_{r,s} m[r,s] * x[r,s].

    Exactly folds zero-padded SAME 3x3 (cross-)correlation + spatial sum into one
    boundary-corrected weighted spatial sum (kernels here are symmetric, so conv == corr)."""
    m = np.zeros((H, W), np.float32)
    for dh in (-1, 0, 1):
        for dw in (-1, 0, 1):
            m[max(0, dh):H + min(0, dh), max(0, dw):W + min(0, dw)] += k3[dh + 1, dw + 1]
    return m


def _pick_batch_tile(B, chw):
    """Batch tile for the (B, C*HW) stream.

    * Batch rows live on sublanes, so a TB that is a multiple of 8 (or the full batch) is
      stored dense — the VMEM accounting below is exact, no sublane-padding surprise.
    * 20 MiB x double-buffer budget + ~3 MiB resident Wbig + output buffers stays under the
      explicit 32 MiB vmem_limit_bytes (legal on v5e/v6e/v7x).
    * For B >= 16 the tile is capped at ceil(B/2) rounded to 8 so grid >= 2 and a "parallel"
      batch axis can be sharded across both v7x TensorCores."""
    if B < 16:
        return B                                   # single full-batch block (block == full dim)
    row_bytes = chw * 4                            # f32, dense
    x_budget = 20 << 20                            # x is double-buffered
    cap = max(8, (x_budget // (2 * row_bytes) // 8) * 8)
    half_up = ((-(-B // 2)) + 7) // 8 * 8          # keep grid >= 2
    return min(cap, half_up)


def _enhanced_fused_kernel(x_ref, wbig_ref, bias_ref, out_ref):
    """Fully folded forward: one MXU contraction per batch tile.

    x_ref    : (TB, C*HW)   raw input tile, batch on sublanes / features on lanes
    wbig_ref : (C*HW, 128)  folded filter->GAP->feature-linear->fc1 weights (lanes 0..9 live)
    bias_ref : (1, 128)     fused bias (bf@W1[:10] + bf@W1[10:] + b1) in lanes 0..9
    out_ref  : (TB, 128)    lane-dense logits (lanes 10..127 stay zero)
    """
    # TODO(synk): `self.original_model` (GoogLeNet restored from './checkpoint/ckpt.t7') is
    # not reproducible; surrogate = global average pool + Linear(C,10), which folds (with the
    # fixed filters and fc1) into this single matmul.
    acc = jnp.dot(x_ref[...], wbig_ref[...],
                  preferred_element_type=jnp.float32,
                  precision=jax.lax.Precision.HIGHEST)
    out_ref[...] = (acc + bias_ref[...]).astype(out_ref.dtype)


def init_params(key, in_channels):
    """Deterministic parameter init (PyTorch Linear-style uniform bounds)."""
    kf_w, kf_b, k1_w, k1_b = jax.random.split(key, 4)
    bound_f = 1.0 / np.sqrt(in_channels)
    wf = jax.random.uniform(kf_w, (in_channels, NUM_CLASSES), jnp.float32, -bound_f, bound_f)
    bf = jax.random.uniform(kf_b, (1, NUM_CLASSES), jnp.float32, -bound_f, bound_f)
    fan_in = FILTER_NUM * NUM_CLASSES                     # 20, as in nn.Linear(20, 10)
    bound1 = 1.0 / np.sqrt(fan_in)
    w1 = jax.random.uniform(k1_w, (fan_in, NUM_CLASSES), jnp.float32, -bound1, bound1)
    b1 = jax.random.uniform(k1_b, (1, NUM_CLASSES), jnp.float32, -bound1, bound1)
    return {"wf": wf, "bf": bf, "w1": w1, "b1": b1}


def enhanced_forward(x, params):
    """x: (B, C, H, W) float32, NCHW.  Returns (B, 10) logits."""
    B, C, H, W = x.shape
    HW = H * W
    CHW = C * HW
    hi = jax.lax.Precision.HIGHEST

    # ---- Fold everything that does not depend on x into one matrix + one bias row. ----
    # GAP(filter_k(x))[b,c] == sum_s wmap_k[s] * x[b,c,s]   (boundary-corrected, / HW)
    wg = jnp.asarray(_weight_map(_GAUSS, H, W).reshape(-1) / float(HW))       # (HW,)
    wl = jnp.asarray(_weight_map(_LAP, H, W).reshape(-1) / float(HW))         # (HW,)
    w1a = params["w1"][:NUM_CLASSES, :]                                       # fc1 rows for y0
    w1b = params["w1"][NUM_CLASSES:, :]                                       # fc1 rows for y1
    wa = jnp.dot(params["wf"], w1a, precision=hi)                             # (C, 10)
    wb = jnp.dot(params["wf"], w1b, precision=hi)                             # (C, 10)
    # Wbig[c*HW + s, n] = wg[s]*wa[c,n] + wl[s]*wb[c,n]
    wbig = (wg[None, :, None] * wa[:, None, :]
            + wl[None, :, None] * wb[:, None, :]).reshape(CHW, NUM_CLASSES)
    wbig_p = jnp.zeros((CHW, LANES), jnp.float32).at[:, :NUM_CLASSES].set(wbig)
    b_fused = jnp.dot(params["bf"], w1a + w1b, precision=hi) + params["b1"]   # (1, 10)
    bias_p = jnp.zeros((1, LANES), jnp.float32).at[:, :NUM_CLASSES].set(b_fused)

    # Lane/sublane-dense stream: batch on sublanes, C*H*W on lanes (free row-major reshape).
    x_flat = x.reshape(B, CHW).astype(jnp.float32)

    TB = _pick_batch_tile(B, CHW)
    grid = (pl.cdiv(B, TB),)   # partial last block: OOB output rows are dropped by Pallas

    out = pl.pallas_call(
        _enhanced_fused_kernel,
        out_shape=jax.ShapeDtypeStruct((B, LANES), jnp.float32),
        grid=grid,
        in_specs=[
            pl.BlockSpec((TB, CHW), lambda i: (i, 0)),
            pl.BlockSpec((CHW, LANES), lambda i: (0, 0)),   # resident, constant index map
            pl.BlockSpec((1, LANES), lambda i: (0, 0)),
        ],
        out_specs=pl.BlockSpec((TB, LANES), lambda i: (i, 0)),
        compiler_params=pltpu.CompilerParams(
            dimension_semantics=("parallel",),
            vmem_limit_bytes=32 << 20),
        cost_estimate=pl.CostEstimate(
            flops=2 * B * CHW * LANES,
            transcendentals=0,
            bytes_accessed=x_flat.size * 4 + wbig_p.size * 4 + B * LANES * 4),
    )(x_flat, wbig_p, bias_p)
    return out[:, :NUM_CLASSES]


def enhanced_reference(x, params):
    """Pure-JAX reference of the same (surrogate) forward pass."""
    B, C, H, W = x.shape
    hi = jax.lax.Precision.HIGHEST

    def depthwise3x3(img, k):
        kern = jnp.broadcast_to(jnp.asarray(k), (C, 1, 3, 3)).astype(img.dtype)
        return jax.lax.conv_general_dilated(
            img, kern, (1, 1), "SAME",
            dimension_numbers=("NCHW", "OIHW", "NCHW"),
            feature_group_count=C, precision=hi)

    p0 = depthwise3x3(x, _GAUSS).mean(axis=(2, 3))
    p1 = depthwise3x3(x, _LAP).mean(axis=(2, 3))
    y0 = jnp.dot(p0, params["wf"], precision=hi) + params["bf"]
    y1 = jnp.dot(p1, params["wf"], precision=hi) + params["bf"]
    cat = jnp.concatenate([y0, y1], axis=1)   # original's cat([y1, y2]) read as [y0, y1]
    return jnp.dot(cat, params["w1"], precision=hi) + params["b1"]


if __name__ == "__main__":
    key = jax.random.PRNGKey(0)
    k_x, k_p = jax.random.split(key)

    # CIFAR10-like input: batch=2, channels=3, 32x32, NCHW.
    x = jax.random.normal(k_x, (2, 3, 32, 32), dtype=jnp.float32)
    params = init_params(k_p, in_channels=3)

    out = jax.block_until_ready(jax.jit(enhanced_forward)(x, params))
    assert out.shape == (2, NUM_CLASSES) and out.dtype == jnp.float32

    ref = jax.block_until_ready(enhanced_reference(x, params))
    assert float(jnp.max(jnp.abs(out - ref))) < 1e-3, "kernel deviates from pure-JAX reference"
    print("KERNEL_OK")
</pallas_src>

<mosaic_0001>
module attributes {stable_mosaic.version = 11 : i64} {
  func.func @_enhanced_fused_kernel(%arg0: i32, %arg1: memref<2x3072xf32, #tpu.memory_space<vmem>>, %arg2: memref<3072x128xf32, #tpu.memory_space<vmem>>, %arg3: memref<1x128xf32, #tpu.memory_space<vmem>>, %arg4: memref<2x128xf32, #tpu.memory_space<vmem>>) attributes {dimension_semantics = [#tpu.dimension_semantics<parallel>], iteration_bounds = array<i64: 1>, scalar_prefetch = 0 : i64, scratch_operands = 0 : i64, tpu.core_type = #tpu.core_type<tc>, window_params = [{transform_indices = @transform_0, window_bounds = array<i64: 2, 3072>}, {pipeline_mode = #tpu.pipeline_mode<synchronous>, transform_indices = @transform_1, window_bounds = array<i64: 3072, 128>}, {pipeline_mode = #tpu.pipeline_mode<synchronous>, transform_indices = @transform_2, window_bounds = array<i64: 1, 128>}, {transform_indices = @transform_3, window_bounds = array<i64: 2, 128>}]} {
    %c0 = arith.constant 0 : index
    %c0_0 = arith.constant 0 : index
    %0 = vector.load %arg1[%c0, %c0_0] : memref<2x3072xf32, #tpu.memory_space<vmem>>, vector<2x3072xf32>
    %c0_1 = arith.constant 0 : index
    %c0_2 = arith.constant 0 : index
    %1 = vector.load %arg2[%c0_1, %c0_2] : memref<3072x128xf32, #tpu.memory_space<vmem>>, vector<3072x128xf32>
    %cst = arith.constant dense<0.000000e+00> : vector<2x128xf32>
    %2 = tpu.matmul %0, %1, %cst {dimension_numbers = #tpu.dot_dimension_numbers<[1], [0], [0], [1], [0, 0, 1, 1], [], []>, precision = #tpu.contract_precision<fp32>} : vector<2x3072xf32>, vector<3072x128xf32>, vector<2x128xf32> -> vector<2x128xf32>
    %c0_3 = arith.constant 0 : index
    %c0_4 = arith.constant 0 : index
    %3 = vector.load %arg3[%c0_3, %c0_4] : memref<1x128xf32, #tpu.memory_space<vmem>>, vector<1x128xf32>
    %4 = vector.broadcast %3 : vector<1x128xf32> to vector<2x128xf32>
    %5 = arith.addf %2, %4 : vector<2x128xf32>
    %c0_5 = arith.constant 0 : index
    %c0_6 = arith.constant 0 : index
    %6 = vector.load %arg4[%c0_5, %c0_6] : memref<2x128xf32, #tpu.memory_space<vmem>>, vector<2x128xf32>
    tpu.vector_store %arg4[%c0_5, %c0_6], %5 {strides = array<i32>} : memref<2x128xf32, #tpu.memory_space<vmem>>, vector<2x128xf32>,
    return
  }
  func.func @transform_0(%arg0: i32) -> (i32, i32) {
    %c0_i32 = arith.constant 0 : i32
    %c0_i32_0 = arith.constant 0 : i32
    return %arg0, %c0_i32 : i32, i32
  }
  func.func @transform_1(%arg0: i32) -> (i32, i32) {
    %c0_i32 = arith.constant 0 : i32
    %c0_i32_0 = arith.constant 0 : i32
    %c0_i32_1 = arith.constant 0 : i32
    return %c0_i32, %c0_i32_0 : i32, i32
  }
  func.func @transform_2(%arg0: i32) -> (i32, i32) {
    %c0_i32 = arith.constant 0 : i32
    %c0_i32_0 = arith.constant 0 : i32
    %c0_i32_1 = arith.constant 0 : i32
    return %c0_i32, %c0_i32_0 : i32, i32
  }
  func.func @transform_3(%arg0: i32) -> (i32, i32) {
    %c0_i32 = arith.constant 0 : i32
    %c0_i32_0 = arith.constant 0 : i32
    return %arg0, %c0_i32 : i32, i32
  }
}

</mosaic_0001>

<bundles_post_ra>
// kernel: enhanced_forward.1
= control target key start
LH: loop header
LB: loop body
LE: loop exit
PB: predicated region body
PF: predicated region fallthrough
CT: control target
= control target key end

     0   :  { %s16073_s0 = inlined_call_operand.vmem [shape: f32[2,3072], index: 0, kind: input, shape index: {}]   ;;  %s16074_s1 = inlined_call_operand.vmem [shape: f32[3072,128], index: 1, kind: input, shape index: {}]   ;;  %s16075_s2 = inlined_call_operand.vmem [shape: f32[1,128], index: 2, kind: input, shape index: {}]   ;;  %s16076_s3 = inlined_call_operand.hbm [shape: f32[2,128], index: 3, kind: output, shape index: {}]  }
   0x1   :  { %v36_v0 = vld [vmem:[%s16074_s1 + $0x78] sm:$0xff]  ;;  %v35_v1 = vld [vmem:[%s16074_s1 + $0x70] sm:$0xff]  ;;  %v34_v2 = vld [vmem:[%s16074_s1 + $0x68] sm:$0xff] }
   0x2   :  { %v8729_v3 = vand.u32 4294901760, %v36_v0  ;;  %v8731_v4 = vand.u32 4294901760, %v35_v1  ;;  %v8733_v5 = vand.u32 4294901760, %v34_v2  ;;  %v33_v6 = vld [vmem:[%s16074_s1 + $0x60] sm:$0xff]  ;;  %v32_v7 = vld [vmem:[%s16074_s1 + $0x58] sm:$0xff]  ;;  %v31_v8 = vld [vmem:[%s16074_s1 + $0x50] sm:$0xff] }
   0x3   :  { %v8744_v9 = vand.u32 4294901760, %v33_v6  ;;  %v8746_v10 = vand.u32 4294901760, %v32_v7  ;;  %v8748_v11 = vand.u32 4294901760, %v31_v8  ;;  %v30_v12 = vld [vmem:[%s16074_s1 + $0x48] sm:$0xff]  ;;  %v29_v13 = vld [vmem:[%s16074_s1 + $0x40] sm:$0xff]  ;;  %v28_v21 = vld [vmem:[%s16074_s1 + $0x38] sm:$0xff] }
   0x4   :  { %471 = vmatpush.msra.mxu0 %v8729_v3  ;;  %v8758_v14 = vsub.f32 %v36_v0, %v8729_v3  ;;  %v8761_v15 = vsub.f32 %v35_v1, %v8731_v4  ;;  %667 = vmatpush.msra.mxu3 %v8729_v3  ;;  %v8765_v16 = vsub.f32 %v34_v2, %v8733_v5  ;;  %v8767_v17 = vand.u32 4294901760, %v30_v12  ;;  %v27_v26 = vld [vmem:[%s16074_s1 + $0x30] sm:$0xff]  ;;  %v26_v36 = vld [vmem:[%s16074_s1 + $0x28] sm:$0xff] }
   0x5   :  { %v8770_v18 = vsub.f32 %v33_v6, %v8744_v9  ;;  %v8773_v19 = vsub.f32 %v32_v7, %v8746_v10  ;;  %v8776_v20 = vsub.f32 %v31_v8, %v8748_v11  ;;  %v8786_v25 = vand.u32 4294901760, %v29_v13 }
   0x6   :  { %473 = vmatpush.msra.mxu0 %v8731_v4  ;;  %614 = vmatpush.msra.mxu2 %v8758_v14  ;;  %v513_v22 = vand.u32 4294901760, %v8758_v14  ;;  %v16092_v23 = vand.u32 4294901760, %v8761_v15  ;;  %v16090_v24 = vand.u32 4294901760, %v8765_v16  ;;  %v8795_v29 = vsub.f32 %v30_v12, %v8767_v17 }
   0x7   :  { %669 = vmatpush.msra.mxu3 %v8731_v4  ;;  %v16089_v27 = vand.u32 4294901760, %v8770_v18  ;;  %v16086_v28 = vand.u32 4294901760, %v8773_v19  ;;  %v8808_v33 = vand.u32 4294901760, %v28_v21  ;;  %v8811_v34 = vand.u32 4294901760, %v27_v26 }
   0x8   :  { %475 = vmatpush.msra.mxu0 %v8733_v5  ;;  %617 = vmatpush.msra.mxu2 %v8761_v15  ;;  %v514_v30 = vsub.f32 %v8758_v14, %v513_v22  ;;  %v520_v31 = vsub.f32 %v8761_v15, %v16092_v23  ;;  %v526_v32 = vsub.f32 %v8765_v16, %v16090_v24  ;;  %v16084_v35 = vand.u32 4294901760, %v8776_v20 }
   0x9   :  { %671 = vmatpush.msra.mxu3 %v8733_v5 }
   0xa   :  { %8 = vsyncpa [#allocation3], 0  ;;  %477 = vmatpush.msra.mxu0 %v8744_v9  ;;  %v515_v37 = vand.u32 4294901760, %v514_v30  ;;  %620 = vmatpush.msra.mxu2 %v8765_v16  ;;  %v521_v38 = vand.u32 4294901760, %v520_v31  ;;  %v532_v39 = vsub.f32 %v8770_v18, %v16089_v27  ;;  %v8823_v40 = vsub.f32 %v29_v13, %v8786_v25  ;;  %v25_v42 = vld [vmem:[%s16074_s1 + $0x20] sm:$0xff]  ;;  %v24_v47 = vld [vmem:[%s16074_s1 + $0x18] sm:$0xff] }
   0xb   :  { %673 = vmatpush.msra.mxu3 %v8744_v9  ;;  %v538_v41 = vsub.f32 %v8773_v19, %v16086_v28  ;;  %v527_v43 = vand.u32 4294901760, %v526_v32  ;;  %v8833_v44 = vand.u32 4294901760, %v26_v36  ;;  %v16083_v45 = vand.u32 4294901760, %v8795_v29  ;;  %v23_v54 = vld [vmem:[%s16074_s1 + $0x10] sm:$0xff]  ;;  %v15_v55 = vld [vmem:[%s16073_s0] sm:$0xff]  ;;  %v52_v60 = vld [vmem:[%s16074_s1 + $0xf8] sm:$0xff] }
   0xc   :  { %479 = vmatpush.msra.mxu0 %v8746_v10  ;;  %516 = vmatpush.msra.mxu1 %v515_v37  ;;  %v8837_v46 = vsub.f32 %v28_v21, %v8808_v33  ;;  %v544_v48 = vsub.f32 %v8776_v20, %v16084_v35  ;;  %v533_v49 = vand.u32 4294901760, %v532_v39  ;;  %v8848_v50 = vand.u32 4294901760, %v25_v42  ;;  %415 = vst [vmem:[#allocation1] ss:$4 sm:$0xff] %v15_v55  ;;  %v22_v62 = vld [vmem:[%s16074_s1 + $0x8] sm:$0xff]  ;;  %v21_v6 = vld [vmem:[%s16074_s1] sm:$0xff] }
   0xd   :  { %623 = vmatpush.msra.mxu2 %v8770_v18  ;;  %675 = vmatpush.msra.mxu3 %v8746_v10  ;;  %v16082_v51 = vand.u32 4294901760, %v8823_v40  ;;  %v8852_v52 = vsub.f32 %v27_v26, %v8811_v34  ;;  %v8856_v53 = vand.u32 4294901760, %v24_v47  ;;  %v539_v56 = vand.u32 4294901760, %v538_v41  ;;  %v51_v7 = vld [vmem:[%s16074_s1 + $0xf0] sm:$0xff]  ;;  %s8662_s25 = sshll.u32 %s16076_s3, 4  ;;  %s8663_s25 = int_to_ptr.hbm [resolvable:$true] %s8662_s25 }
   0xe   :  { %481 = vmatpush.msra.mxu0 %v8748_v11  ;;  %522 = vmatpush.msra.mxu1 %v521_v38  ;;  %v550_v57 = vsub.f32 %v8795_v29, %v16083_v45  ;;  %v16081_v58 = vand.u32 4294901760, %v8837_v46  ;;  %v8870_v59 = vsub.f32 %v26_v36, %v8833_v44  ;;  %v545_v61 = vand.u32 4294901760, %v544_v48  ;;  %v50_v36 = vld [vmem:[%s16074_s1 + $0xe8] sm:$0xff]  ;;  %v45_v45 = vld [vmem:[%s16074_s1 + $0xc0] sm:$0xff] }
   0xf   :  { %626 = vmatpush.msra.mxu2 %v8773_v19  ;;  %677 = vmatpush.msra.mxu3 %v8748_v11  ;;  %v556_v63 = vsub.f32 %v8823_v40, %v16082_v51  ;;  %v8884_v0 = vand.u32 4294901760, %v23_v54  ;;  %v16080_v1 = vand.u32 4294901760, %v8852_v52  ;;  %v8888_v2 = vsub.f32 %v25_v42, %v8848_v50 }
  0x10   :  { %483 = vmatpush.msra.mxu0 %v8767_v17  ;;  %528 = vmatpush.msra.mxu1 %v527_v43  ;;  %v8899_v8 = vsub.f32 %v24_v47, %v8856_v53  ;;  %v8901_v12 = vand.u32 4294901760, %v52_v60  ;;  %v551_v13 = vand.u32 4294901760, %v550_v57  ;;  %v562_v21 = vsub.f32 %v8837_v46, %v16081_v58  ;;  %v49_v47 = vld [vmem:[%s16074_s1 + $0xe0] sm:$0xff] }
  0x11   :  { %629 = vmatpush.msra.mxu2 %v8776_v20  ;;  %679 = vmatpush.msra.mxu3 %v8767_v17  ;;  %v8907_v26 = vand.u32 4294901760, %v22_v62  ;;  %v16078_v30 = vand.u32 4294901760, %v8870_v59  ;;  %v8912_v31 = vand.u32 4294901760, %v21_v6  ;;  %v8914_v32 = vand.u32 4294901760, %v51_v7 }
  0x12   :  { %485 = vmatpush.msra.mxu0 %v8786_v25  ;;  %534 = vmatpush.msra.mxu1 %v533_v49  ;;  %v557_v37 = vand.u32 4294901760, %v556_v63  ;;  %v568_v38 = vsub.f32 %v8852_v52, %v16080_v1  ;;  %v16077_v39 = vand.u32 4294901760, %v8888_v2  ;;  %v8925_v41 = vsub.f32 %v23_v54, %v8884_v0 }
  0x13   :  { %632 = vmatpush.msra.mxu2 %v8795_v29  ;;  %681 = vmatpush.msra.mxu3 %v8786_v25  ;;  %v16079_v42 = vand.u32 4294901760, %v8899_v8  ;;  %v8931_v43 = vsub.f32 %v52_v60, %v8901_v12  ;;  %v563_v48 = vand.u32 4294901760, %v562_v21  ;;  %v574_v49 = vsub.f32 %v8870_v59, %v16078_v30  ;;  %v48_v60 = vld [vmem:[%s16074_s1 + $0xd8] sm:$0xff]  ;;  %v47_v21 = vld [vmem:[%s16074_s1 + $0xd0] sm:$0xff] }
  0x14   :  { %487 = vmatpush.msra.mxu0 %v8808_v33  ;;  %540 = vmatpush.msra.mxu1 %v539_v56  ;;  %v8941_v54 = vsub.f32 %v22_v62, %v8907_v26  ;;  %v8943_v55 = vand.u32 4294901760, %v50_v36  ;;  %v8948_v56 = vsub.f32 %v21_v6, %v8912_v31  ;;  %v8951_v57 = vsub.f32 %v51_v7, %v8914_v32 }
  0x15   :  { %635 = vmatpush.msra.mxu2 %v8823_v40  ;;  %683 = vmatpush.msra.mxu3 %v8808_v33  ;;  %v580_v62 = vsub.f32 %v8888_v2, %v16077_v39  ;;  %v16085_v63 = vand.u32 4294901760, %v8925_v41  ;;  %v586_v6 = vsub.f32 %v8899_v8, %v16079_v42  ;;  %v16087_v7 = vand.u32 4294901760, %v8931_v43 }
  0x16   :  { %489 = vmatpush.msra.mxu0 %v8811_v34  ;;  %546 = vmatpush.msra.mxu1 %v545_v61  ;;  %16360 = vst [vmem:[#allocation5_spill] sm:$0xff] %v8943_v55  ;;  %v569_v61 = vand.u32 4294901760, %v568_v38  ;;  %v16088_v38 = vand.u32 4294901760, %v8941_v54  ;;  %v8975_v39 = vsub.f32 %v50_v36, %v8943_v55  ;;  %v8977_v30 = vand.u32 4294901760, %v48_v60 }
  0x17   :  { %638 = vmatpush.msra.mxu2 %v8837_v46  ;;  %685 = vmatpush.msra.mxu3 %v8811_v34  ;;  %v16093_v42 = vand.u32 4294901760, %v8948_v56  ;;  %v16091_v1 = vand.u32 4294901760, %v8951_v57  ;;  %v592_v36 = vsub.f32 %v8925_v41, %v16085_v63  ;;  %v8993_v51 = vand.u32 4294901760, %v47_v21 }
  0x18   :  { %491 = vmatpush.msra.mxu0 %v8833_v44  ;;  %552 = vmatpush.msra.mxu1 %v551_v13  ;;  %v8961_v13 = vand.u32 4294901760, %v49_v47  ;;  %v587_v35 = vand.u32 4294901760, %v586_v6  ;;  %v9009_v63 = vsub.f32 %v48_v60, %v8977_v30  ;;  %v44_v6 = vld [vmem:[%s16074_s1 + $0xb8] sm:$0xff] }
  0x19   :  { %641 = vmatpush.msra.mxu2 %v8852_v52  ;;  %687 = vmatpush.msra.mxu3 %v8833_v44  ;;  %v593_v60 = vand.u32 4294901760, %v592_v36  ;;  %v9029_v24 = vsub.f32 %v47_v21, %v8993_v51  ;;  %v9034_v23 = vand.u32 4294901760, %v44_v6 }
  0x1a   :  { %493 = vmatpush.msra.mxu0 %v8848_v50  ;;  %558 = vmatpush.msra.mxu1 %v557_v37  ;;  %v575_v37 = vand.u32 4294901760, %v574_v49  ;;  %v581_v49 = vand.u32 4294901760, %v580_v62  ;;  %v8991_v58 = vsub.f32 %v49_v47, %v8961_v13  ;;  %v598_v47 = vsub.f32 %v8941_v54, %v16088_v38 }
  0x1b   :  { %644 = vmatpush.msra.mxu2 %v8870_v59  ;;  %689 = vmatpush.msra.mxu3 %v8848_v50  ;;  %v16094_v62 = vand.u32 4294901760, %v8975_v39  ;;  %v604_v38 = vsub.f32 %v8948_v56, %v16093_v42  ;;  %v16096_v14 = vand.u32 4294901760, %v9009_v63 }
  0x1c   :  { %495 = vmatpush.msra.mxu0 %v8856_v53  ;;  %564 = vmatpush.msra.mxu1 %v563_v48  ;;  %v46_v48 = vld [vmem:[%s16074_s1 + $0xc8] sm:$0xff]  ;;  %v16095_v27 = vand.u32 4294901760, %v8991_v58  ;;  %v599_v36 = vand.u32 4294901760, %v598_v47 }
  0x1d   :  { %647 = vmatpush.msra.mxu2 %v8888_v2  ;;  %691 = vmatpush.msra.mxu3 %v8856_v53  ;;  %v9011_v28 = vand.u32 4294901760, %v46_v48  ;;  %v867_v21 = vsub.f32 %v8975_v39, %v16094_v62  ;;  %v42_v47 = vld [vmem:[%s16074_s1 + $0xa8] sm:$0xff]  ;;  %v605_v62 = vand.u32 4294901760, %v604_v38 }
  0x1e   :  { %497 = vmatpush.msra.mxu0 %v8884_v0  ;;  %570 = vmatpush.msra.mxu1 %v569_v61  ;;  %v855_v61 = vsub.f32 %v8931_v43, %v16087_v7  ;;  %v9021_v7 = vand.u32 4294901760, %v45_v45 }
  0x1f   :  { %650 = vmatpush.msra.mxu2 %v8899_v8  ;;  %693 = vmatpush.msra.mxu3 %v8884_v0  ;;  %v868_v38 = vand.u32 4294901760, %v867_v21 }
  0x20   :  { %499 = vmatpush.msra.mxu0 %v8907_v26  ;;  %576 = vmatpush.msra.mxu1 %v575_v37  ;;  %v861_v37 = vsub.f32 %v8951_v57, %v16091_v1  ;;  %v856_v1 = vand.u32 4294901760, %v855_v61  ;;  %v16361_v61 = vand.u32 4294901760, %v8761_v15 }
  0x21   :  { %653 = vmatpush.msra.mxu2 %v8925_v41  ;;  %695 = vmatpush.msra.mxu3 %v8907_v26 }
  0x22   :  { %501 = vmatpush.msra.mxu0 %v8912_v31  ;;  %582 = vmatpush.msra.mxu1 %v581_v49  ;;  %v43_v49 = vld [vmem:[%s16074_s1 + $0xb0] sm:$0xff]  ;;  %v862_v42 = vand.u32 4294901760, %v861_v37  ;;  %v16362_v37 = vand.u32 4294901760, %v8765_v16  ;;  %v9076_v16 = vand.u32 4294901760, %v42_v47 }
  0x23   :  { %656 = vmatpush.msra.mxu2 %v8941_v54  ;;  %697 = vmatpush.msra.mxu3 %v8912_v31 }
  0x24   :  { %708 = vmatpush.msrb.mxu0 %v513_v22  ;;  %588 = vmatpush.msra.mxu1 %v587_v35  ;;  %v9045_v22 = vsub.f32 %v46_v48, %v9011_v28  ;;  %v9051_v35 = vsub.f32 %v45_v45, %v9021_v7  ;;  %v873_v48 = vsub.f32 %v8991_v58, %v16095_v27 }
  0x25   :  { %659 = vmatpush.msra.mxu2 %v8948_v56  ;;  %857 = vmatpush.msrb.mxu3 %v856_v1  ;;  %v9066_v45 = vsub.f32 %v44_v6, %v9034_v23  ;;  %v879_v27 = vsub.f32 %v9009_v63, %v16096_v14  ;;  %v16363_v1 = vand.u32 4294901760, %v8770_v18 }
  0x26   :  { %712 = vmatpush.msrb.mxu0 %v16361_v61  ;;  %594 = vmatpush.msra.mxu1 %v593_v60  ;;  %v9061_v61 = vand.u32 4294901760, %v43_v49  ;;  %v41_v60 = vld [vmem:[%s16074_s1 + $0xa0] sm:$0xff]  ;;  %v874_v21 = vand.u32 4294901760, %v873_v48  ;;  %v16366_v6 = vand.u32 4294901760, %v9045_v22 }
  0x27   :  { %812 = vmatpush.msrb.mxu2 %v8901_v12  ;;  %863 = vmatpush.msrb.mxu3 %v862_v42  ;;  %v9091_v18 = vand.u32 4294901760, %v41_v60  ;;  %v16365_v42 = vand.u32 4294901760, %v8773_v19  ;;  %v880_v48 = vand.u32 4294901760, %v879_v27  ;;  %v16367_v19 = vand.u32 4294901760, %v8776_v20  ;;  %v39_v27 = vld [vmem:[%s16074_s1 + $0x90] sm:$0xff] }
  0x28   :  { %716 = vmatpush.msrb.mxu0 %v16362_v37  ;;  %600 = vmatpush.msra.mxu1 %v599_v36  ;;  %v40_v36 = vld [vmem:[%s16074_s1 + $0x98] sm:$0xff]  ;;  %v16364_v37 = vand.u32 4294901760, %v9029_v24  ;;  %v9089_v15 = vsub.f32 %v43_v49, %v9061_v61  ;;  %v9102_v49 = vsub.f32 %v42_v47, %v9076_v16 }
  0x29   :  { %814 = vmatpush.msrb.mxu2 %v8914_v32  ;;  %869 = vmatpush.msrb.mxu3 %v868_v38 }
  0x2a   :  { %720 = vmatpush.msrb.mxu0 %v16363_v1  ;;  %606 = vmatpush.msra.mxu1 %v605_v62  ;;  %v885_v14 = vsub.f32 %v9029_v24, %v16364_v37  ;;  %v16099_v1 = vand.u32 4294901760, %v9066_v45  ;;  %v418_v62 = vld.sshfl [vmem:[#allocation1] sm:$0xff pattern:$0x73625140]  ;;  %v891_v37 = vsub.f32 %v9045_v22, %v16366_v6  ;;  %v16100_v38 = vand.u32 4294901760, %v9089_v15 }
  0x2b   :  { %816 = vmatpush.msrb.mxu2 %v8943_v55  ;;  %v9104_v55 = vand.u32 4294901760, %v40_v36  ;;  %875 = vmatpush.msrb.mxu3 %v874_v21  ;;  %v9118_v6 = vsub.f32 %v41_v60, %v9091_v18  ;;  %v9120_v20 = vand.u32 4294901760, %v418_v62  ;;  %v914_v21 = vand.u32 4294901760, %v9102_v49 }
  0x2c   :  { %724 = vmatpush.msrb.mxu0 %v16365_v42  ;;  %775 = vmatpush.msrb.mxu1 %v8729_v3  ;;  %v16368_v3 = vand.u32 4294901760, %v9051_v35  ;;  %v886_v47 = vand.u32 4294901760, %v885_v14  ;;  %v38_v14 = vld [vmem:[%s16074_s1 + $0x88] sm:$0xff]  ;;  %v892_v60 = vand.u32 4294901760, %v891_v37 }
  0x2d   :  { %818 = vmatpush.msrb.mxu2 %v8961_v13  ;;  %881 = vmatpush.msrb.mxu3 %v880_v48  ;;  %v909_v48 = vsub.f32 %v9089_v15, %v16100_v38  ;;  %v9150_v37 = vsub.f32 %v418_v62, %v9120_v20 }
  0x2e   :  { %728 = vmatpush.msrb.mxu0 %v16367_v19  ;;  %777 = vmatpush.msrb.mxu1 %v8731_v4  ;;  %v897_v42 = vsub.f32 %v9051_v35, %v16368_v3  ;;  %v16369_v4 = vand.u32 4294901760, %v8795_v29  ;;  %v903_v19 = vsub.f32 %v9066_v45, %v16099_v1  ;;  %v9133_v3 = vand.u32 4294901760, %v39_v27  ;;  %v37_v1 = vld [vmem:[%s16074_s1 + $0x80] sm:$0xff] }
  0x2f   :  { %820 = vmatpush.msrb.mxu2 %v8977_v30  ;;  %v9136_v29 = vsub.f32 %v40_v36, %v9104_v55  ;;  %887 = vmatpush.msrb.mxu3 %v886_v47  ;;  %v920_v36 = vand.u32 4294901760, %v9118_v6  ;;  %v915_v47 = vsub.f32 %v9102_v49, %v914_v21  ;;  %v9165_v38 = vand.u32 4294901760, %v37_v1 }
  0x30   :  { %732 = vmatpush.msrb.mxu0 %v16369_v4  ;;  %779 = vmatpush.msrb.mxu1 %v8733_v5  ;;  %v16370_v5 = vand.u32 4294901760, %v8823_v40  ;;  %v898_v4 = vand.u32 4294901760, %v897_v42  ;;  %v9152_v40 = vand.u32 4294901760, %v38_v14  ;;  %v904_v42 = vand.u32 4294901760, %v903_v19 }
  0x31   :  { %822 = vmatpush.msrb.mxu2 %v8993_v51  ;;  %893 = vmatpush.msrb.mxu3 %v892_v60  ;;  %v9163_v62 = vsub.f32 %v39_v27, %v9133_v3  ;;  %v921_v19 = vsub.f32 %v9118_v6, %v920_v36  ;;  %v504_v60 = vand.u32 4294901760, %v9150_v37 }
  0x32   :  { %736 = vmatpush.msrb.mxu0 %v16370_v5  ;;  %781 = vmatpush.msrb.mxu1 %v8744_v9  ;;  %v16371_v9 = vand.u32 4294901760, %v8837_v46  ;;  %v926_v5 = vand.u32 4294901760, %v9136_v29  ;;  %v16372_v46 = vand.u32 4294901760, %v8852_v52  ;;  %v9176_v27 = vsub.f32 %v38_v14, %v9152_v40 }
  0x33   :  { %824 = vmatpush.msrb.mxu2 %v9011_v28  ;;  %899 = vmatpush.msrb.mxu3 %v898_v4  ;;  %v932_v4 = vand.u32 4294901760, %v9163_v62  ;;  %v16374_v14 = vand.u32 4294901760, %v8888_v2 }
  0x34   :  { %740 = vmatpush.msrb.mxu0 %v16371_v9  ;;  %783 = vmatpush.msrb.mxu1 %v8746_v10  ;;  %v910_v10 = vand.u32 4294901760, %v909_v48  ;;  %v16373_v9 = vand.u32 4294901760, %v8870_v59  ;;  %v927_v52 = vsub.f32 %v9136_v29, %v926_v5  ;;  %v9187_v48 = vsub.f32 %v37_v1, %v9165_v38  ;;  %v419_v59 = vld.sshfl [vmem:[#allocation1 + $0x8] sm:$0xff pattern:$0x73625140] }
  0x35   :  { %826 = vmatpush.msrb.mxu2 %v9021_v7  ;;  %905 = vmatpush.msrb.mxu3 %v904_v42  ;;  %v505_v42 = vsub.f32 %v9150_v37, %v504_v60 }
  0x36   :  { %744 = vmatpush.msrb.mxu0 %v16372_v46  ;;  %785 = vmatpush.msrb.mxu1 %v8748_v11  ;;  %v916_v11 = vand.u32 4294901760, %v915_v47  ;;  %v938_v47 = vand.u32 4294901760, %v9176_v27  ;;  %v16375_v46 = vand.u32 4294901760, %v8899_v8  ;;  %v928_v2 = vand.u32 4294901760, %v927_v52 }
  0x37   :  { %828 = vmatpush.msrb.mxu2 %v9034_v23  ;;  %911 = vmatpush.msrb.mxu3 %v910_v10  ;;  %v944_v1 = vand.u32 4294901760, %v9187_v48  ;;  %v9203_v10 = vand.u32 4294901760, %v419_v59  ;;  %v16378_v52 = vand.u32 4294901760, %v8948_v56  ;;  %v16382_v56 = vand.u32 4294901760, %v8991_v58 }
  0x38   :  { %748 = vmatpush.msrb.mxu0 %v16373_v9  ;;  %787 = vmatpush.msrb.mxu1 %v8767_v17  ;;  %v922_v17 = vand.u32 4294901760, %v921_v19  ;;  %v16376_v19 = vand.u32 4294901760, %v8925_v41  ;;  %v939_v8 = vsub.f32 %v9176_v27, %v938_v47  ;;  %v16377_v9 = vand.u32 4294901760, %v8941_v54 }
  0x39   :  { %830 = vmatpush.msrb.mxu2 %v9061_v61  ;;  %917 = vmatpush.msrb.mxu3 %v916_v11  ;;  %v9220_v11 = vsub.f32 %v419_v59, %v9203_v10 }
  0x3a   :  { %752 = vmatpush.msrb.mxu0 %v16374_v14  ;;  %789 = vmatpush.msrb.mxu1 %v8786_v25  ;;  %v933_v25 = vsub.f32 %v9163_v62, %v932_v4 }
  0x3b   :  { %832 = vmatpush.msrb.mxu2 %v9076_v16  ;;  %923 = vmatpush.msrb.mxu3 %v922_v17  ;;  %v845_v14 = vand.u32 4294901760, %v9220_v11  ;;  %v59_v17 = vld [vmem:[%s16074_s1 + $0x130] sm:$0xff] }
  0x3c   :  { %756 = vmatpush.msrb.mxu0 %v16375_v46  ;;  %791 = vmatpush.msrb.mxu1 %v8808_v33  ;;  %v506_v33 = vand.u32 4294901760, %v505_v42  ;;  %v934_v41 = vand.u32 4294901760, %v933_v25  ;;  %v58_v25 = vld [vmem:[%s16074_s1 + $0x128] sm:$0xff] }
  0x3d   :  { %834 = vmatpush.msrb.mxu2 %v9091_v18  ;;  %929 = vmatpush.msrb.mxu3 %v928_v2 }
  0x3e   :  { %760 = vmatpush.msrb.mxu0 %v16376_v19  ;;  %793 = vmatpush.msrb.mxu1 %v8811_v34  ;;  %v945_v34 = vsub.f32 %v9187_v48, %v944_v1  ;;  %v9421_v19 = vand.u32 4294901760, %v59_v17 }
  0x3f   :  { %836 = vmatpush.msrb.mxu2 %v9104_v55  ;;  %507 = vmatmul.f32.vlgmr.msra.gmra.mxu0 %v506_v33 }
  0x40   :  { %764 = vmatpush.msrb.mxu0 %v16377_v9  ;;  %795 = vmatpush.msrb.mxu1 %v8833_v44  ;;  %v940_v44 = vand.u32 4294901760, %v939_v8  ;;  %v946_v54 = vand.u32 4294901760, %v945_v34  ;;  %v57_v8 = vld [vmem:[%s16074_s1 + $0x120] sm:$0xff] }
  0x41   :  { %838 = vmatpush.msrb.mxu2 %v9133_v3  ;;  %935 = vmatpush.msrb.mxu3 %v934_v41  ;;  %v9436_v41 = vand.u32 4294901760, %v58_v25 }
  0x42   :  { %768 = vmatpush.msrb.mxu0 %v16378_v52  ;;  %797 = vmatpush.msrb.mxu1 %v8848_v50  ;;  %v16379_v50 = vand.u32 4294901760, %v8931_v43  ;;  %v420_v52 = vld.sshfl [vmem:[#allocation1 + $0x10] sm:$0xff pattern:$0x73625140] }
  0x43   :  { %840 = vmatpush.msrb.mxu2 %v9152_v40  ;;  %941 = vmatpush.msrb.mxu3 %v940_v44 }
  0x44   :  { %955 = vmatpush.msra.mxu0 %v8931_v43  ;;  %799 = vmatpush.msrb.mxu1 %v8856_v53  ;;  %v846_v53 = vsub.f32 %v9220_v11, %v845_v14 }
  0x45   :  { %842 = vmatpush.msrb.mxu2 %v9165_v38  ;;  %947 = vmatpush.msrb.mxu3 %v946_v54  ;;  %v56_v54 = vld [vmem:[%s16074_s1 + $0x118] sm:$0xff] }
  0x46   :  { %958 = vmatpush.msra.mxu0 %v8951_v57  ;;  %801 = vmatpush.msrb.mxu1 %v8884_v0  ;;  %v16380_v0 = vand.u32 4294901760, %v8951_v57  ;;  %v847_v43 = vand.u32 4294901760, %v846_v53  ;;  %v16389_v57 = vand.u32 4294901760, %v9089_v15 }
  0x47   :  { %662 = vmatmul.f32.vlgmr.msra.gmra.mxu2 %v9150_v37  ;;  %701 = vmatmul.f32.vlgmr.msra.gmra.mxu3 %v504_v60  ;;  %v60_v60 = vld [vmem:[%s16074_s1 + $0x138] sm:$0xff] }
  0x48   :  { %961 = vmatpush.msra.mxu0 %v8975_v39  ;;  %1049 = vmatpush.msra.mxu2 %v16379_v50  ;;  %v9405_v46 = vand.u32 4294901760, %v60_v60  ;;  %v9451_v50 = vand.u32 4294901760, %v57_v8 }
  0x49   :  { %803 = vmatpush.msrb.mxu1 %v8907_v26  ;;  %1116 = vmatpush.msra.mxu3 %v8901_v12  ;;  %v16381_v26 = vand.u32 4294901760, %v8975_v39  ;;  %v16384_v39 = vand.u32 4294901760, %v9009_v63 }
  0x4a   :  { %964 = vmatpush.msra.mxu0 %v8991_v58  ;;  %1053 = vmatpush.msra.mxu2 %v16380_v0  ;;  %v16385_v58 = vand.u32 4294901760, %v9029_v24  ;;  %v9455_v0 = vsub.f32 %v59_v17, %v9421_v19 }
  0x4b   :  { %805 = vmatpush.msrb.mxu1 %v8912_v31  ;;  %1118 = vmatpush.msra.mxu3 %v8914_v32  ;;  %v16383_v31 = vld [vmem:[#allocation5_spill] sm:$0xff] }
  0x4c   :  { %967 = vmatpush.msra.mxu0 %v9009_v63  ;;  %608 = vmatmul.f32.vlgmr.msra.gmra.mxu1 %v9120_v20  ;;  %v66_v63 = vld [vmem:[%s16074_s1 + $0x168] sm:$0xff] }
  0x4d   :  { %1057 = vmatpush.msra.mxu2 %v16381_v26  ;;  %1008 = vmatpush.msra.mxu1 %v8901_v12  ;;  %v16386_v12 = vand.u32 4294901760, %v9045_v22 }
  0x4e   :  { %970 = vmatpush.msra.mxu0 %v9029_v24  ;;  %1120 = vmatpush.msra.mxu3 %v16383_v31  ;;  %v16387_v24 = vand.u32 4294901760, %v9051_v35 }
  0x4f   :  { %1061 = vmatpush.msra.mxu2 %v16382_v56  ;;  %1010 = vmatpush.msra.mxu1 %v8914_v32  ;;  %v16388_v32 = vand.u32 4294901760, %v9066_v45  ;;  %v9462_v56 = vand.u32 4294901760, %v420_v52 }
  0x50   :  { %848 = vmatmul.f32.vlgmr.msrb.gmra.mxu2 %v847_v43  ;;  %973 = vmatpush.msra.mxu0 %v9045_v22  ;;  %v55_v43 = vld [vmem:[%s16074_s1 + $0x110] sm:$0xff] }
  0x51   :  { %1012 = vmatpush.msra.mxu1 %v16383_v31  ;;  %1065 = vmatpush.msra.mxu2 %v16384_v39  ;;  %v9468_v39 = vand.u32 4294901760, %v56_v54 }
  0x52   :  { %1122 = vmatpush.msra.mxu3 %v8961_v13  ;;  %770 = vmatmul.f32.vlgmr.msrb.gmra.mxu0 %v9120_v20 }
  0x53   :  { %949 = vmatmul.f32.vlgmr.msrb.gmra.mxu3 %v9203_v10  ;;  %976 = vmatpush.msra.mxu0 %v9051_v35  ;;  %v64_v35 = vld [vmem:[%s16074_s1 + $0x158] sm:$0xff] }
  0x54   :  { %1014 = vmatpush.msra.mxu1 %v8961_v13  ;;  %1069 = vmatpush.msra.mxu2 %v16385_v58 }
  0x55   :  { %1124 = vmatpush.msra.mxu3 %v8977_v30  ;;  %807 = vmatmul.f32.vlgmr.msrb.gmra.mxu1 %v9120_v20 }
  0x56   :  { %979 = vmatpush.msra.mxu0 %v9066_v45  ;;  %1016 = vmatpush.msra.mxu1 %v8977_v30  ;;  %v68_v30 = vld [vmem:[%s16074_s1 + $0x178] sm:$0xff]  ;;  %v63_v45 = vld [vmem:[%s16074_s1 + $0x150] sm:$0xff] }
  0x57   :  { %1073 = vmatpush.msra.mxu2 %v16386_v12  ;;  %1126 = vmatpush.msra.mxu3 %v8993_v51  ;;  %v9349_v20 = vand.u32 4294901760, %v63_v45  ;;  %v9472_v12 = vsub.f32 %v58_v25, %v9436_v41 }
  0x58   :  { %982 = vmatpush.msra.mxu0 %v9089_v15  ;;  %1018 = vmatpush.msra.mxu1 %v8993_v51  ;;  %v67_v51 = vld [vmem:[%s16074_s1 + $0x170] sm:$0xff] }
  0x59   :  { %1077 = vmatpush.msra.mxu2 %v16387_v24  ;;  %1128 = vmatpush.msra.mxu3 %v9011_v28  ;;  %v9305_v13 = vand.u32 4294901760, %v67_v51 }
  0x5a   :  { %985 = vmatpush.msra.mxu0 %v9102_v49  ;;  %1020 = vmatpush.msra.mxu1 %v9011_v28  ;;  %v9295_v28 = vand.u32 4294901760, %v68_v30  ;;  %v9338_v49 = vand.u32 4294901760, %v64_v35 }
  0x5b   :  { %1081 = vmatpush.msra.mxu2 %v16388_v32  ;;  %1130 = vmatpush.msra.mxu3 %v9021_v7  ;;  %v9480_v32 = vand.u32 4294901760, %v55_v43 }
  0x5c   :  { %988 = vmatpush.msra.mxu0 %v9118_v6  ;;  %1022 = vmatpush.msra.mxu1 %v9021_v7  ;;  %v65_v7 = vld [vmem:[%s16074_s1 + $0x160] sm:$0xff]  ;;  %v9318_v22 = vsub.f32 %v68_v30, %v9295_v28 }
  0x5d   :  { %1085 = vmatpush.msra.mxu2 %v16389_v57  ;;  %1132 = vmatpush.msra.mxu3 %v9034_v23  ;;  %v9328_v15 = vand.u32 4294901760, %v65_v7  ;;  %v9484_v57 = vsub.f32 %v57_v8, %v9451_v50  ;;  %v9518_v25 = vsub.f32 %v55_v43, %v9480_v32 }
  0x5e   :  { %991 = vmatpush.msra.mxu0 %v9136_v29  ;;  %1024 = vmatpush.msra.mxu1 %v9034_v23  ;;  %v9315_v23 = vand.u32 4294901760, %v66_v63 }
  0x5f   :  { %1089 = vmatpush.msra.mxu2 %v914_v21  ;;  %1134 = vmatpush.msra.mxu3 %v9061_v61  ;;  %v9359_v29 = vsub.f32 %v65_v7, %v9328_v15  ;;  %v9492_v7 = vsub.f32 %v420_v52, %v9462_v56 }
  0x60   :  { %994 = vmatpush.msra.mxu0 %v9163_v62  ;;  %1026 = vmatpush.msra.mxu1 %v9061_v61  ;;  %v9331_v61 = vsub.f32 %v67_v51, %v9305_v13  ;;  %v9345_v6 = vsub.f32 %v66_v63, %v9315_v23  ;;  %v9381_v62 = vsub.f32 %v63_v45, %v9349_v20  ;;  %v16104_v51 = vand.u32 4294901760, %v9455_v0  ;;  %v54_v63 = vld [vmem:[%s16074_s1 + $0x108] sm:$0xff] }
  0x61   :  { %1093 = vmatpush.msra.mxu2 %v920_v36  ;;  %1136 = vmatpush.msra.mxu3 %v9076_v16  ;;  %v61_v36 = vld [vmem:[%s16074_s1 + $0x140] sm:$0xff] }
  0x62   :  { %997 = vmatpush.msra.mxu0 %v9176_v27  ;;  %1028 = vmatpush.msra.mxu1 %v9076_v16  ;;  %v1195_v16 = vand.u32 4294901760, %v9318_v22  ;;  %v1201_v21 = vand.u32 4294901760, %v9331_v61  ;;  %v16109_v2 = vand.u32 4294901760, %v9381_v62 }
  0x63   :  { %1097 = vmatpush.msra.mxu2 %v926_v5  ;;  %1138 = vmatpush.msra.mxu3 %v9091_v18 }
  0x64   :  { %1000 = vmatpush.msra.mxu0 %v9187_v48  ;;  %1030 = vmatpush.msra.mxu1 %v9091_v18  ;;  %v62_v18 = vld [vmem:[%s16074_s1 + $0x148] sm:$0xff]  ;;  %v1196_v37 = vsub.f32 %v9318_v22, %v1195_v16  ;;  %v1202_v27 = vsub.f32 %v9331_v61, %v1201_v21  ;;  %v16114_v48 = vand.u32 4294901760, %v9359_v29  ;;  %v1226_v44 = vsub.f32 %v9381_v62, %v16109_v2 }
  0x65   :  { %1101 = vmatpush.msra.mxu2 %v932_v4  ;;  %1140 = vmatpush.msra.mxu3 %v9104_v55  ;;  %v9375_v5 = vand.u32 4294901760, %v62_v18  ;;  %v9391_v4 = vand.u32 4294901760, %v61_v36 }
  0x66   :  { %1003 = vmatmul.f32.vlgmr.msra.gmra.mxu0 %v9220_v11  ;;  %1032 = vmatpush.msra.mxu1 %v9104_v55  ;;  %v9364_v55 = vsub.f32 %v64_v35, %v9338_v49  ;;  %v1197_v42 = vand.u32 4294901760, %v1196_v37  ;;  %v9440_v11 = vsub.f32 %v60_v60, %v9405_v46  ;;  %v1227_v24 = vand.u32 4294901760, %v1226_v44  ;;  %v84_v37 = vld [vmem:[%s16074_s1 + $0x1f8] sm:$0xff] }
  0x67   :  { %1153 = vmatpush.msrb.mxu0 %v9295_v28  ;;  %1105 = vmatpush.msra.mxu2 %v938_v47  ;;  %v9424_v33 = vsub.f32 %v61_v36, %v9391_v4  ;;  %v9500_v36 = vsub.f32 %v56_v54, %v9468_v39  ;;  %v9507_v60 = vand.u32 4294901760, %v54_v63 }
  0x68   :  { %1142 = vmatpush.msra.mxu3 %v9133_v3  ;;  %1034 = vmatpush.msra.mxu1 %v9133_v3  ;;  %v1207_v3 = vand.u32 4294901760, %v9345_v6  ;;  %v16111_v59 = vand.u32 4294901760, %v9364_v55  ;;  %v16105_v58 = vand.u32 4294901760, %v9440_v11 }
  0x69   :  { %1155 = vmatpush.msrb.mxu0 %v9305_v13  ;;  %1109 = vmatpush.msra.mxu2 %v944_v1  ;;  %v1203_v1 = vand.u32 4294901760, %v1202_v27  ;;  %v16106_v53 = vand.u32 4294901760, %v9424_v33  ;;  %v53_v27 = vld [vmem:[%s16074_s1 + $0x100] sm:$0xff]  ;;  %v16103_v44 = vand.u32 4294901760, %v9500_v36  ;;  %v9538_v54 = vsub.f32 %v54_v63, %v9507_v60 }
  0x6a   :  { %1144 = vmatpush.msra.mxu3 %v9152_v40  ;;  %1111 = vmatmul.f32.vlgmr.msra.gmra.mxu2 %v9203_v10  ;;  %v1208_v47 = vsub.f32 %v9345_v6, %v1207_v3  ;;  %v1244_v45 = vsub.f32 %v9440_v11, %v16105_v58  ;;  %v9532_v52 = vand.u32 4294901760, %v53_v27 }
  0x6b   :  { %1157 = vmatpush.msrb.mxu0 %v9315_v23  ;;  %1296 = vmatpush.msrb.mxu2 %v9318_v22  ;;  %v1238_v30 = vsub.f32 %v9424_v33, %v16106_v53  ;;  %v76_v22 = vld [vmem:[%s16074_s1 + $0x1b8] sm:$0xff] }
  0x6c   :  { %1036 = vmatpush.msra.mxu1 %v9152_v40  ;;  %1146 = vmatpush.msra.mxu3 %v9165_v38  ;;  %v9408_v40 = vsub.f32 %v62_v18, %v9375_v5  ;;  %v1209_v9 = vand.u32 4294901760, %v1208_v47  ;;  %v16102_v18 = vand.u32 4294901760, %v9472_v12  ;;  %v16101_v47 = vand.u32 4294901760, %v9484_v57  ;;  %16390 = vst [vmem:[#allocation5_spill] sm:$0xff] %v9532_v52 }
  0x6d   :  { %1148 = vmatmul.f32.vlgmr.msra.gmra.mxu3 %v9203_v10  ;;  %1159 = vmatpush.msrb.mxu0 %v9328_v15  ;;  %v1214_v10 = vsub.f32 %v9359_v29, %v16114_v48  ;;  %v1239_v17 = vand.u32 4294901760, %v1238_v30  ;;  %v1245_v8 = vand.u32 4294901760, %v1244_v45  ;;  %v81_v30 = vld [vmem:[%s16074_s1 + $0x1e0] sm:$0xff] }
  0x6e   :  { %1299 = vmatpush.msrb.mxu2 %v9331_v61  ;;  %1349 = vmatpush.msrb.mxu3 %v9295_v28  ;;  %v16108_v34 = vand.u32 4294901760, %v9408_v40  ;;  %v1262_v43 = vsub.f32 %v9484_v57, %v16101_v47  ;;  %v75_v61 = vld [vmem:[%s16074_s1 + $0x1b0] sm:$0xff] }
  0x6f   :  { %1038 = vmatpush.msra.mxu1 %v9165_v38  ;;  %1161 = vmatpush.msrb.mxu0 %v9338_v49  ;;  %v1220_v38 = vsub.f32 %v9364_v55, %v16111_v59  ;;  %v9684_v48 = vand.u32 4294901760, %v75_v61 }
  0x70   :  { %1042 = vmatmul.f32.vlgmr.msra.gmra.mxu1 %v845_v14  ;;  %1302 = vmatpush.msrb.mxu2 %v9345_v6  ;;  %v1215_v14 = vand.u32 4294901760, %v1214_v10  ;;  %v1232_v31 = vsub.f32 %v9408_v40, %v16108_v34  ;;  %v9523_v10 = vand.u32 4294901760, %v84_v37 }
  0x71   :  { %1198 = vmatpush.msrb.mxu1 %v1197_v42  ;;  %1351 = vmatpush.msrb.mxu3 %v9305_v13  ;;  %v1221_v26 = vand.u32 4294901760, %v1220_v38  ;;  %v1250_v42 = vsub.f32 %v9455_v0, %v16104_v51  ;;  %v83_v38 = vld [vmem:[%s16074_s1 + $0x1f0] sm:$0xff] }
  0x72   :  { %1163 = vmatpush.msrb.mxu0 %v9349_v20  ;;  %1305 = vmatpush.msrb.mxu2 %v9359_v29  ;;  %v1233_v35 = vand.u32 4294901760, %v1232_v31  ;;  %v16107_v31 = vand.u32 4294901760, %v9518_v25 }
  0x73   :  { %1204 = vmatpush.msrb.mxu1 %v1203_v1  ;;  %1353 = vmatpush.msrb.mxu3 %v9315_v23  ;;  %v1186_v1 = vand.u32 4294901760, %v9492_v7 }
  0x74   :  { %1165 = vmatpush.msrb.mxu0 %v9375_v5  ;;  %1308 = vmatpush.msrb.mxu2 %v9364_v55 }
  0x75   :  { %1210 = vmatpush.msrb.mxu1 %v1209_v9  ;;  %1355 = vmatpush.msrb.mxu3 %v9328_v15  ;;  %v1256_v9 = vsub.f32 %v9472_v12, %v16102_v18  ;;  %v1187_v63 = vsub.f32 %v9492_v7, %v1186_v1  ;;  %v80_v18 = vld [vmem:[%s16074_s1 + $0x1d8] sm:$0xff] }
  0x76   :  { %1167 = vmatpush.msrb.mxu0 %v9391_v4  ;;  %1311 = vmatpush.msrb.mxu2 %v9381_v62  ;;  %v9588_v53 = vand.u32 4294901760, %v80_v18 }
  0x77   :  { %1216 = vmatpush.msrb.mxu1 %v1215_v14  ;;  %1357 = vmatpush.msrb.mxu3 %v9338_v49  ;;  %v82_v14 = vld [vmem:[%s16074_s1 + $0x1e8] sm:$0xff]  ;;  %v1257_v45 = vand.u32 4294901760, %v1256_v9  ;;  %v1263_v9 = vand.u32 4294901760, %v1262_v43  ;;  %v1188_v51 = vand.u32 4294901760, %v1187_v63 }
  0x78   :  { %1169 = vmatpush.msrb.mxu0 %v9405_v46  ;;  %1314 = vmatpush.msrb.mxu2 %v9408_v40  ;;  %v9568_v47 = vand.u32 4294901760, %v82_v14 }
  0x79   :  { %1222 = vmatpush.msrb.mxu1 %v1221_v26  ;;  %1359 = vmatpush.msrb.mxu3 %v9349_v20  ;;  %v1251_v26 = vand.u32 4294901760, %v1250_v42  ;;  %v9566_v42 = vsub.f32 %v53_v27, %v9532_v52  ;;  %v1274_v27 = vsub.f32 %v9518_v25, %v16107_v31 }
  0x7a   :  { %1171 = vmatpush.msrb.mxu0 %v9421_v19  ;;  %1317 = vmatpush.msrb.mxu2 %v9424_v33  ;;  %v9596_v31 = vsub.f32 %v82_v14, %v9568_v47 }
  0x7b   :  { %1228 = vmatpush.msrb.mxu1 %v1227_v24  ;;  %1361 = vmatpush.msrb.mxu3 %v9375_v5  ;;  %v9548_v24 = vand.u32 4294901760, %v83_v38  ;;  %v1275_v14 = vand.u32 4294901760, %v1274_v27 }
  0x7c   :  { %1173 = vmatpush.msrb.mxu0 %v9436_v41  ;;  %1320 = vmatpush.msrb.mxu2 %v9440_v11  ;;  %v16115_v27 = vand.u32 4294901760, %v9596_v31 }
  0x7d   :  { %1234 = vmatpush.msrb.mxu1 %v1233_v35  ;;  %1363 = vmatpush.msrb.mxu3 %v9391_v4  ;;  %v9559_v35 = vsub.f32 %v84_v37, %v9523_v10  ;;  %v16110_v37 = vand.u32 4294901760, %v9538_v54 }
  0x7e   :  { %1175 = vmatpush.msrb.mxu0 %v9451_v50  ;;  %1323 = vmatpush.msrb.mxu2 %v9455_v0 }
  0x7f   :  { %1240 = vmatpush.msrb.mxu1 %v1239_v17  ;;  %1365 = vmatpush.msrb.mxu3 %v9405_v46  ;;  %v1268_v17 = vsub.f32 %v9500_v36, %v16103_v44  ;;  %v9583_v44 = vsub.f32 %v83_v38, %v9548_v24  ;;  %v16112_v58 = vand.u32 4294901760, %v9559_v35  ;;  %v16113_v38 = vand.u32 4294901760, %v9566_v42 }
  0x80   :  { %1177 = vmatpush.msrb.mxu0 %v9468_v39  ;;  %1326 = vmatpush.msrb.mxu2 %v9472_v12  ;;  %v1280_v63 = vsub.f32 %v9538_v54, %v16110_v37  ;;  %v9618_v37 = vsub.f32 %v80_v18, %v9588_v53 }
  0x81   :  { %1246 = vmatpush.msrb.mxu1 %v1245_v8  ;;  %1367 = vmatpush.msrb.mxu3 %v9421_v19  ;;  %v9576_v8 = vand.u32 4294901760, %v81_v30  ;;  %v1269_v43 = vand.u32 4294901760, %v1268_v17  ;;  %v16116_v17 = vand.u32 4294901760, %v9583_v44 }
  0x82   :  { %1179 = vmatpush.msrb.mxu0 %v9480_v32  ;;  %1329 = vmatpush.msrb.mxu2 %v9484_v57  ;;  %v1281_v18 = vand.u32 4294901760, %v1280_v63 }
  0x83   :  { %1252 = vmatpush.msrb.mxu1 %v1251_v26  ;;  %1369 = vmatpush.msrb.mxu3 %v9436_v41  ;;  %v79_v26 = vld [vmem:[%s16074_s1 + $0x1d0] sm:$0xff]  ;;  %v9604_v34 = vsub.f32 %v81_v30, %v9576_v8  ;;  %v1537_v30 = vsub.f32 %v9559_v35, %v16112_v58 }
  0x84   :  { %1181 = vmatpush.msrb.mxu0 %v9507_v60  ;;  %1332 = vmatpush.msrb.mxu2 %v9500_v36  ;;  %v9611_v2 = vand.u32 4294901760, %v79_v26 }
  0x85   :  { %1258 = vmatpush.msrb.mxu1 %v1257_v45  ;;  %1371 = vmatpush.msrb.mxu3 %v9451_v50  ;;  %v78_v45 = vld [vmem:[%s16074_s1 + $0x1c8] sm:$0xff]  ;;  %v16117_v58 = vand.u32 4294901760, %v9604_v34  ;;  %v1538_v63 = vand.u32 4294901760, %v1537_v30  ;;  %v9662_v30 = vand.u32 4294901760, %v76_v22 }
  0x86   :  { %1183 = vmatpush.msrb.mxu0 %v9532_v52  ;;  %1335 = vmatpush.msrb.mxu2 %v9518_v25  ;;  %v9629_v59 = vand.u32 4294901760, %v78_v45 }
  0x87   :  { %1264 = vmatpush.msrb.mxu1 %v1263_v9  ;;  %1373 = vmatpush.msrb.mxu3 %v9468_v39  ;;  %v77_v9 = vld [vmem:[%s16074_s1 + $0x1c0] sm:$0xff]  ;;  %v1555_v6 = vsub.f32 %v9604_v34, %v16117_v58 }
  0x88   :  { %1189 = vmatmul.f32.vlgmr.msrb.gmra.mxu0 %v1188_v51  ;;  %1338 = vmatpush.msrb.mxu2 %v9538_v54  ;;  %v1286_v51 = vsub.f32 %v9566_v42, %v16113_v38  ;;  %v9645_v38 = vand.u32 4294901760, %v77_v9 }
  0x89   :  { %1390 = vmatpush.msra.mxu0 %v1195_v16  ;;  %1270 = vmatpush.msrb.mxu1 %v1269_v43  ;;  %v1543_v16 = vsub.f32 %v9583_v44, %v16116_v17  ;;  %v9643_v43 = vsub.f32 %v79_v26, %v9611_v2  ;;  %v1549_v26 = vsub.f32 %v9596_v31, %v16115_v27  ;;  %v9674_v27 = vld.sshfl [vmem:[#allocation1 + $0x18] sm:$0xff pattern:$0x73625140] }
  0x8a   :  { %1375 = vmatpush.msrb.mxu3 %v9480_v32  ;;  %1341 = vmatpush.msrb.mxu2 %v9566_v42  ;;  %v9682_v58 = vsub.f32 %v77_v9, %v9645_v38 }
  0x8b   :  { %1394 = vmatpush.msra.mxu0 %v1201_v21  ;;  %1276 = vmatpush.msrb.mxu1 %v1275_v14  ;;  %v1287_v21 = vand.u32 4294901760, %v1286_v51  ;;  %v9660_v14 = vsub.f32 %v78_v45, %v9629_v59  ;;  %v17_v51 = vld [vmem:[%s16073_s0 + $0x10] sm:$0xff]  ;;  %v16391_v45 = vand.u32 4294901760, %v9359_v29  ;;  %v16119_v17 = vand.u32 4294901760, %v9643_v43  ;;  %v73_v29 = vld [vmem:[%s16074_s1 + $0x1a0] sm:$0xff] }
  0x8c   :  { %1377 = vmatpush.msrb.mxu3 %v9507_v60  ;;  %1344 = vmatmul.f32.vlgmr.msrb.gmra.mxu2 %v9492_v7  ;;  %426 = vst [vmem:[#allocation1] ss:$4 sm:$0xff] %v17_v51  ;;  %v1550_v9 = vand.u32 4294901760, %v1549_v26  ;;  %v9697_v51 = vsub.f32 %v76_v22, %v9662_v30  ;;  %v16120_v22 = vand.u32 4294901760, %v9682_v58  ;;  %v9714_v26 = vand.u32 4294901760, %v73_v29 }
  0x8d   :  { %1398 = vmatpush.msra.mxu0 %v1207_v3  ;;  %1494 = vmatpush.msra.mxu2 %v9523_v10  ;;  %v74_v3 = vld [vmem:[%s16074_s1 + $0x1a8] sm:$0xff] }
  0x8e   :  { %1282 = vmatpush.msrb.mxu1 %v1281_v18  ;;  %1379 = vmatpush.msrb.mxu3 %v9532_v52  ;;  %v1544_v18 = vand.u32 4294901760, %v1543_v16  ;;  %v16392_v52 = vand.u32 4294901760, %v9618_v37  ;;  %v16122_v16 = vand.u32 4294901760, %v9660_v14 }
  0x8f   :  { %1383 = vmatmul.f32.vlgmr.msrb.gmra.mxu3 %v1186_v1  ;;  %1402 = vmatpush.msra.mxu0 %v16391_v45  ;;  %v16393_v1 = vand.u32 4294901760, %v9364_v55  ;;  %v9699_v45 = vand.u32 4294901760, %v74_v3  ;;  %v1567_v55 = vsub.f32 %v9643_v43, %v16119_v17 }
  0x90   :  { %1496 = vmatpush.msra.mxu2 %v9548_v24  ;;  %1539 = vmatpush.msra.mxu3 %v1538_v63  ;;  %v1561_v7 = vsub.f32 %v9618_v37, %v16392_v52  ;;  %v1556_v52 = vand.u32 4294901760, %v1555_v6  ;;  %v72_v63 = vld [vmem:[%s16074_s1 + $0x198] sm:$0xff]  ;;  %v16394_v6 = vand.u32 4294901760, %v9381_v62  ;;  %v71_v62 = vld [vmem:[%s16074_s1 + $0x190] sm:$0xff] }
  0x91   :  { %1288 = vmatpush.msrb.mxu1 %v1287_v21  ;;  %1406 = vmatpush.msra.mxu0 %v16393_v1  ;;  %v9712_v21 = vsub.f32 %v75_v61, %v9684_v48  ;;  %v9725_v61 = vsub.f32 %v74_v3, %v9699_v45  ;;  %v9727_v17 = vand.u32 4294901760, %v72_v63  ;;  %v1579_v3 = vsub.f32 %v9682_v58, %v16120_v22 }
  0x92   :  { %1290 = vmatmul.f32.vlgmr.msrb.gmra.mxu1 %v9462_v56  ;;  %1498 = vmatpush.msra.mxu2 %v9568_v47  ;;  %v1562_v1 = vand.u32 4294901760, %v1561_v7  ;;  %v16395_v7 = vand.u32 4294901760, %v9408_v40  ;;  %v70_v40 = vld [vmem:[%s16074_s1 + $0x188] sm:$0xff] }
  0x93   :  { %1457 = vmatpush.msra.mxu1 %v9295_v28  ;;  %1545 = vmatpush.msra.mxu3 %v1544_v18  ;;  %v1573_v28 = vsub.f32 %v9660_v14, %v16122_v16  ;;  %v16121_v18 = vand.u32 4294901760, %v9697_v51  ;;  %v9757_v22 = vsub.f32 %v72_v63, %v9727_v17 }
  0x94   :  { %1410 = vmatpush.msra.mxu0 %v16394_v6  ;;  %1500 = vmatpush.msra.mxu2 %v9576_v8  ;;  %v9741_v6 = vsub.f32 %v73_v29, %v9714_v26 }
  0x95   :  { %1459 = vmatpush.msra.mxu1 %v9305_v13  ;;  %1551 = vmatpush.msra.mxu3 %v1550_v9  ;;  %v1568_v13 = vand.u32 4294901760, %v1567_v55  ;;  %v1590_v9 = vand.u32 4294901760, %v9712_v21  ;;  %v1585_v29 = vsub.f32 %v9697_v51, %v16121_v18  ;;  %v1596_v55 = vand.u32 4294901760, %v9725_v61 }
  0x96   :  { %1414 = vmatpush.msra.mxu0 %v16395_v7  ;;  %1502 = vmatpush.msra.mxu2 %v9588_v53  ;;  %v16396_v7 = vand.u32 4294901760, %v9424_v33  ;;  %v69_v33 = vld [vmem:[%s16074_s1 + $0x180] sm:$0xff]  ;;  %v1602_v18 = vand.u32 4294901760, %v9741_v6 }
  0x97   :  { %1461 = vmatpush.msra.mxu1 %v9315_v23  ;;  %1557 = vmatpush.msra.mxu3 %v1556_v52  ;;  %v9749_v23 = vand.u32 4294901760, %v71_v62  ;;  %v1574_v52 = vand.u32 4294901760, %v1573_v28  ;;  %v1580_v28 = vand.u32 4294901760, %v1579_v3  ;;  %v1591_v63 = vsub.f32 %v9712_v21, %v1590_v9 }
  0x98   :  { %1418 = vmatpush.msra.mxu0 %v16396_v7  ;;  %1504 = vmatpush.msra.mxu2 %v9611_v2  ;;  %v16397_v7 = vand.u32 4294901760, %v9440_v11  ;;  %v16398_v11 = vand.u32 4294901760, %v9455_v0  ;;  %v9781_v16 = vand.u32 4294901760, %v69_v33  ;;  %v1608_v3 = vand.u32 4294901760, %v9757_v22 }
  0x99   :  { %1463 = vmatpush.msra.mxu1 %v9328_v15  ;;  %1563 = vmatpush.msra.mxu3 %v1562_v1  ;;  %v9765_v15 = vand.u32 4294901760, %v70_v40  ;;  %v9768_v1 = vand.u32 4294901760, %v9674_v27  ;;  %v16399_v0 = vand.u32 4294901760, %v9472_v12  ;;  %v16400_v12 = vand.u32 4294901760, %v9484_v57 }
  0x9a   :  { %1422 = vmatpush.msra.mxu0 %v16397_v7  ;;  %1506 = vmatpush.msra.mxu2 %v9629_v59  ;;  %v9779_v7 = vsub.f32 %v71_v62, %v9749_v23 }
  0x9b   :  { %1465 = vmatpush.msra.mxu1 %v9338_v49  ;;  %1569 = vmatpush.msra.mxu3 %v1568_v13  ;;  %v1586_v49 = vand.u32 4294901760, %v1585_v29  ;;  %v1597_v13 = vsub.f32 %v9725_v61, %v1596_v55  ;;  %v9792_v62 = vsub.f32 %v70_v40, %v9765_v15  ;;  %v9807_v29 = vsub.f32 %v69_v33, %v9781_v16 }
  0x9c   :  { %1426 = vmatpush.msra.mxu0 %v16398_v11  ;;  %1508 = vmatpush.msra.mxu2 %v9645_v38  ;;  %v9796_v11 = vsub.f32 %v9674_v27, %v9768_v1  ;;  %v1614_v40 = vand.u32 4294901760, %v9779_v7  ;;  %v1609_v27 = vsub.f32 %v9757_v22, %v1608_v3 }
  0x9d   :  { %1467 = vmatpush.msra.mxu1 %v9349_v20  ;;  %1575 = vmatpush.msra.mxu3 %v1574_v52  ;;  %v1592_v20 = vand.u32 4294901760, %v1591_v63  ;;  %v1603_v52 = vsub.f32 %v9741_v6, %v1602_v18  ;;  %v1620_v57 = vand.u32 4294901760, %v9792_v62 }
  0x9e   :  { %1430 = vmatpush.msra.mxu0 %v16399_v0  ;;  %1510 = vmatpush.msra.mxu2 %v9662_v30  ;;  %v1527_v63 = vand.u32 4294901760, %v9796_v11  ;;  %v16403_v0 = vand.u32 4294901760, %v9538_v54 }
  0x9f   :  { %1469 = vmatpush.msra.mxu1 %v9375_v5  ;;  %1581 = vmatpush.msra.mxu3 %v1580_v28  ;;  %v1598_v5 = vand.u32 4294901760, %v1597_v13  ;;  %v16401_v28 = vand.u32 4294901760, %v9500_v36  ;;  %v1604_v33 = vand.u32 4294901760, %v1603_v52  ;;  %v1615_v36 = vsub.f32 %v9779_v7, %v1614_v40 }
  0xa0   :  { %1434 = vmatpush.msra.mxu0 %v16400_v12  ;;  %1512 = vmatpush.msra.mxu2 %v9684_v48  ;;  %v1610_v13 = vand.u32 4294901760, %v1609_v27 }
  0xa1   :  { %1471 = vmatpush.msra.mxu1 %v9391_v4  ;;  %1587 = vmatpush.msra.mxu3 %v1586_v49  ;;  %v16402_v4 = vand.u32 4294901760, %v9518_v25  ;;  %v1626_v49 = vand.u32 4294901760, %v9807_v29  ;;  %v1528_v25 = vsub.f32 %v9796_v11, %v1527_v63  ;;  %v1616_v54 = vand.u32 4294901760, %v1615_v36 }
  0xa2   :  { %1438 = vmatpush.msra.mxu0 %v16401_v28  ;;  %1514 = vmatpush.msra.mxu2 %v9699_v45 }
  0xa3   :  { %1473 = vmatpush.msra.mxu1 %v9405_v46  ;;  %1593 = vmatpush.msra.mxu3 %v1592_v20  ;;  %v1621_v46 = vsub.f32 %v9792_v62, %v1620_v57  ;;  %v1627_v20 = vsub.f32 %v9807_v29, %v1626_v49 }
  0xa4   :  { %1442 = vmatpush.msra.mxu0 %v16402_v4  ;;  %1516 = vmatpush.msra.mxu2 %v9714_v26 }
  0xa5   :  { %1475 = vmatpush.msra.mxu1 %v9421_v19  ;;  %1599 = vmatpush.msra.mxu3 %v1598_v5  ;;  %v16404_v19 = vand.u32 4294901760, %v9566_v42  ;;  %v1622_v52 = vand.u32 4294901760, %v1621_v46  ;;  %v1628_v42 = vand.u32 4294901760, %v1627_v20  ;;  %v91_v5 = vld [vmem:[%s16074_s1 + $0x230] sm:$0xff]  ;;  %v88_v20 = vld [vmem:[%s16074_s1 + $0x218] sm:$0xff] }
  0xa6   :  { %1446 = vmatpush.msra.mxu0 %v16403_v0  ;;  %1518 = vmatpush.msra.mxu2 %v9727_v17  ;;  %v89_v0 = vld [vmem:[%s16074_s1 + $0x220] sm:$0xff] }
  0xa7   :  { %1477 = vmatpush.msra.mxu1 %v9436_v41  ;;  %1605 = vmatpush.msra.mxu3 %v1604_v33  ;;  %v1529_v41 = vand.u32 4294901760, %v1528_v25 }
  0xa8   :  { %1450 = vmatpush.msra.mxu0 %v16404_v19  ;;  %1520 = vmatpush.msra.mxu2 %v9749_v23 }
  0xa9   :  { %1479 = vmatpush.msra.mxu1 %v9451_v50  ;;  %1611 = vmatpush.msra.mxu3 %v1610_v13  ;;  %v16405_v50 = vand.u32 4294901760, %v9559_v35 }
  0xaa   :  { %1452 = vmatmul.f32.vlgmr.msra.gmra.mxu0 %v9462_v56  ;;  %1522 = vmatpush.msra.mxu2 %v9765_v15 }
  0xab   :  { %1637 = vmatpush.msrb.mxu0 %v9559_v35  ;;  %1481 = vmatpush.msra.mxu1 %v9468_v39  ;;  %v16406_v39 = vand.u32 4294901760, %v9583_v44  ;;  %v16408_v35 = vand.u32 4294901760, %v9596_v31 }
  0xac   :  { %1617 = vmatpush.msra.mxu3 %v1616_v54  ;;  %1524 = vmatpush.msra.mxu2 %v9781_v16 }
  0xad   :  { %1640 = vmatpush.msrb.mxu0 %v9583_v44  ;;  %1483 = vmatpush.msra.mxu1 %v9480_v32  ;;  %v16407_v32 = vld [vmem:[#allocation5_spill] sm:$0xff]  ;;  %v16412_v44 = vand.u32 4294901760, %v9660_v14 }
  0xae   :  { %1623 = vmatpush.msra.mxu3 %v1622_v52  ;;  %1530 = vmatmul.f32.vlgmr.msra.gmra.mxu2 %v1529_v41  ;;  %v10067_v41 = vand.u32 4294901760, %v89_v0 }
  0xaf   :  { %1643 = vmatpush.msrb.mxu0 %v9596_v31  ;;  %1731 = vmatpush.msrb.mxu2 %v16405_v50  ;;  %v16414_v31 = vand.u32 4294901760, %v9697_v51 }
  0xb0   :  { %1485 = vmatpush.msra.mxu1 %v9507_v60  ;;  %1629 = vmatpush.msra.mxu3 %v1628_v42  ;;  %v16409_v60 = vand.u32 4294901760, %v9604_v34 }
  0xb1   :  { %1631 = vmatmul.f32.vlgmr.msra.gmra.mxu3 %v9768_v1  ;;  %1646 = vmatpush.msrb.mxu0 %v9604_v34  ;;  %v16_v34 = vld [vmem:[%s16073_s0 + $0x8] sm:$0xff] }
  0xb2   :  { %1735 = vmatpush.msrb.mxu2 %v16406_v39  ;;  %1798 = vmatpush.msrb.mxu3 %v9523_v10  ;;  %417 = vst [vmem:[#allocation1 + $0x20] ss:$4 sm:$0xff] %v16_v34 }
  0xb3   :  { %1487 = vmatpush.msra.mxu1 %v16407_v32  ;;  %1649 = vmatpush.msrb.mxu0 %v9618_v37  ;;  %v87_v32 = vld [vmem:[%s16074_s1 + $0x210] sm:$0xff] }
  0xb4   :  { %1489 = vmatmul.f32.vlgmr.msra.gmra.mxu1 %v9462_v56  ;;  %1739 = vmatpush.msrb.mxu2 %v16408_v35  ;;  %v16410_v56 = vand.u32 4294901760, %v9618_v37  ;;  %v97_v37 = vld [vmem:[%s16074_s1 + $0x260] sm:$0xff] }
  0xb5   :  { %1690 = vmatpush.msrb.mxu1 %v9523_v10  ;;  %1800 = vmatpush.msrb.mxu3 %v9548_v24  ;;  %v16411_v10 = vand.u32 4294901760, %v9643_v43 }
  0xb6   :  { %1652 = vmatpush.msrb.mxu0 %v9643_v43  ;;  %1743 = vmatpush.msrb.mxu2 %v16409_v60  ;;  %v96_v43 = vld [vmem:[%s16074_s1 + $0x258] sm:$0xff] }
  0xb7   :  { %1692 = vmatpush.msrb.mxu1 %v9548_v24  ;;  %1802 = vmatpush.msrb.mxu3 %v9568_v47 }
  0xb8   :  { %1655 = vmatpush.msrb.mxu0 %v9660_v14  ;;  %1747 = vmatpush.msrb.mxu2 %v16410_v56  ;;  %v10084_v56 = vand.u32 4294901760, %v88_v20 }
  0xb9   :  { %1694 = vmatpush.msrb.mxu1 %v9568_v47  ;;  %1804 = vmatpush.msrb.mxu3 %v9576_v8  ;;  %v16413_v47 = vand.u32 4294901760, %v9682_v58 }
  0xba   :  { %1658 = vmatpush.msrb.mxu0 %v9682_v58  ;;  %1751 = vmatpush.msrb.mxu2 %v16411_v10 }
  0xbb   :  { %1696 = vmatpush.msrb.mxu1 %v9576_v8  ;;  %1806 = vmatpush.msrb.mxu3 %v9588_v53 }
  0xbc   :  { %1661 = vmatpush.msrb.mxu0 %v9697_v51  ;;  %1755 = vmatpush.msrb.mxu2 %v16412_v44  ;;  %v9955_v51 = vand.u32 4294901760, %v96_v43 }
  0xbd   :  { %1698 = vmatpush.msrb.mxu1 %v9588_v53  ;;  %1808 = vmatpush.msrb.mxu3 %v9611_v2  ;;  %v100_v53 = vld [vmem:[%s16074_s1 + $0x278] sm:$0xff] }
  0xbe   :  { %1664 = vmatpush.msrb.mxu0 %v9712_v21  ;;  %1759 = vmatpush.msrb.mxu2 %v16413_v47  ;;  %v9911_v58 = vand.u32 4294901760, %v100_v53 }
  0xbf   :  { %1700 = vmatpush.msrb.mxu1 %v9611_v2  ;;  %1810 = vmatpush.msrb.mxu3 %v9629_v59  ;;  %v99_v2 = vld [vmem:[%s16074_s1 + $0x270] sm:$0xff] }
  0xc0   :  { %1667 = vmatpush.msrb.mxu0 %v9725_v61  ;;  %1763 = vmatpush.msrb.mxu2 %v16414_v31  ;;  %v9921_v24 = vand.u32 4294901760, %v99_v2  ;;  %v10096_v31 = vand.u32 4294901760, %v87_v32 }
  0xc1   :  { %1702 = vmatpush.msrb.mxu1 %v9629_v59  ;;  %1812 = vmatpush.msrb.mxu3 %v9645_v38  ;;  %v98_v59 = vld [vmem:[%s16074_s1 + $0x268] sm:$0xff] }
  0xc2   :  { %1670 = vmatpush.msrb.mxu0 %v9741_v6  ;;  %1767 = vmatpush.msrb.mxu2 %v1590_v9  ;;  %v9931_v8 = vand.u32 4294901760, %v98_v59  ;;  %v9947_v14 = vsub.f32 %v99_v2, %v9921_v24  ;;  %v9981_v9 = vsub.f32 %v96_v43, %v9955_v51  ;;  %v93_v6 = vld [vmem:[%s16074_s1 + $0x240] sm:$0xff]  ;;  %v10100_v2 = vsub.f32 %v89_v0, %v10067_v41 }
  0xc3   :  { %1704 = vmatpush.msrb.mxu1 %v9645_v38  ;;  %1814 = vmatpush.msrb.mxu3 %v9662_v30  ;;  %v9934_v38 = vsub.f32 %v100_v53, %v9911_v58  ;;  %v10007_v12 = vand.u32 4294901760, %v93_v6 }
  0xc4   :  { %1673 = vmatpush.msrb.mxu0 %v9757_v22  ;;  %1771 = vmatpush.msrb.mxu2 %v1596_v55  ;;  %v9961_v22 = vsub.f32 %v98_v59, %v9931_v8  ;;  %v86_v59 = vld [vmem:[%s16074_s1 + $0x208] sm:$0xff] }
  0xc5   :  { %1706 = vmatpush.msrb.mxu1 %v9662_v30  ;;  %1816 = vmatpush.msrb.mxu3 %v9684_v48  ;;  %v95_v30 = vld [vmem:[%s16074_s1 + $0x250] sm:$0xff]  ;;  %v10040_v13 = vsub.f32 %v93_v6, %v10007_v12  ;;  %v10116_v6 = vsub.f32 %v88_v20, %v10084_v56 }
  0xc6   :  { %1676 = vmatpush.msrb.mxu0 %v9779_v7  ;;  %1775 = vmatpush.msrb.mxu2 %v1602_v18  ;;  %v9966_v21 = vand.u32 4294901760, %v95_v30  ;;  %v94_v18 = vld [vmem:[%s16074_s1 + $0x248] sm:$0xff]  ;;  %v1889_v7 = vand.u32 4294901760, %v9961_v22 }
  0xc7   :  { %1708 = vmatpush.msrb.mxu1 %v9684_v48  ;;  %1818 = vmatpush.msrb.mxu3 %v9699_v45  ;;  %v9944_v48 = vand.u32 4294901760, %v97_v37  ;;  %v9991_v55 = vand.u32 4294901760, %v94_v18  ;;  %v16128_v42 = vand.u32 4294901760, %v10040_v13 }
  0xc8   :  { %1679 = vmatpush.msrb.mxu0 %v9792_v62  ;;  %1779 = vmatpush.msrb.mxu2 %v1608_v3  ;;  %v9997_v3 = vsub.f32 %v95_v30, %v9966_v21  ;;  %v92_v62 = vld [vmem:[%s16074_s1 + $0x238] sm:$0xff]  ;;  %v1890_v28 = vsub.f32 %v9961_v22, %v1889_v7 }
  0xc9   :  { %1710 = vmatpush.msrb.mxu1 %v9699_v45  ;;  %1820 = vmatpush.msrb.mxu3 %v9714_v26  ;;  %v1877_v45 = vand.u32 4294901760, %v9934_v38  ;;  %v9975_v61 = vsub.f32 %v97_v37, %v9944_v48  ;;  %v1920_v47 = vsub.f32 %v10040_v13, %v16128_v42 }
  0xca   :  { %1682 = vmatpush.msrb.mxu0 %v9807_v29  ;;  %1783 = vmatpush.msrb.mxu2 %v1614_v40  ;;  %v16133_v29 = vand.u32 4294901760, %v9981_v9  ;;  %v16131_v33 = vand.u32 4294901760, %v9997_v3  ;;  %v1891_v46 = vand.u32 4294901760, %v1890_v28  ;;  %v16123_v28 = vand.u32 4294901760, %v10100_v2 }
  0xcb   :  { %1712 = vmatpush.msrb.mxu1 %v9714_v26  ;;  %1822 = vmatpush.msrb.mxu3 %v9727_v17  ;;  %v1883_v26 = vand.u32 4294901760, %v9947_v14  ;;  %v16136_v40 = vand.u32 4294901760, %v9975_v61 }
  0xcc   :  { %1685 = vmatmul.f32.vlgmr.msrb.gmra.mxu0 %v9796_v11  ;;  %1787 = vmatpush.msrb.mxu2 %v1620_v57  ;;  %v10021_v57 = vand.u32 4294901760, %v92_v62  ;;  %v1908_v54 = vsub.f32 %v9997_v3, %v16131_v33 }
  0xcd   :  { %1835 = vmatpush.msra.mxu0 %v9911_v58  ;;  %1714 = vmatpush.msrb.mxu1 %v9727_v17  ;;  %v1878_v17 = vsub.f32 %v9934_v38, %v1877_v45  ;;  %v1896_v36 = vsub.f32 %v9975_v61, %v16136_v40 }
  0xce   :  { %1824 = vmatpush.msrb.mxu3 %v9749_v23  ;;  %1791 = vmatpush.msrb.mxu2 %v1626_v49  ;;  %v10037_v49 = vand.u32 4294901760, %v91_v5  ;;  %v10056_v11 = vsub.f32 %v92_v62, %v10021_v57  ;;  %v1909_v44 = vand.u32 4294901760, %v1908_v54  ;;  %v10123_v62 = vand.u32 4294901760, %v86_v59 }
  0xcf   :  { %1837 = vmatpush.msra.mxu0 %v9921_v24  ;;  %1716 = vmatpush.msrb.mxu1 %v9749_v23  ;;  %v1884_v23 = vsub.f32 %v9947_v14, %v1883_v26  ;;  %v1879_v27 = vand.u32 4294901760, %v1878_v17  ;;  %v1897_v52 = vand.u32 4294901760, %v1896_v36  ;;  %v116_v17 = vld [vmem:[%s16074_s1 + $0x2f8] sm:$0xff]  ;;  %v16125_v54 = vand.u32 4294901760, %v10116_v6 }
  0xd0   :  { %1826 = vmatpush.msrb.mxu3 %v9765_v15  ;;  %1793 = vmatmul.f32.vlgmr.msrb.gmra.mxu2 %v9768_v1  ;;  %v10071_v50 = vsub.f32 %v91_v5, %v10037_v49  ;;  %v16127_v10 = vand.u32 4294901760, %v10056_v11  ;;  %v1921_v5 = vand.u32 4294901760, %v1920_v47  ;;  %v10139_v36 = vand.u32 4294901760, %v116_v17  ;;  %v113_v47 = vld [vmem:[%s16074_s1 + $0x2e0] sm:$0xff] }
  0xd1   :  { %1839 = vmatpush.msra.mxu0 %v9931_v8  ;;  %1978 = vmatpush.msra.mxu2 %v9934_v38  ;;  %v1885_v4 = vand.u32 4294901760, %v1884_v23  ;;  %v85_v23 = vld [vmem:[%s16074_s1 + $0x200] sm:$0xff]  ;;  %v10154_v20 = vsub.f32 %v86_v59, %v10123_v62  ;;  %v108_v38 = vld [vmem:[%s16074_s1 + $0x2b8] sm:$0xff] }
  0xd2   :  { %1718 = vmatpush.msrb.mxu1 %v9765_v15  ;;  %1828 = vmatpush.msrb.mxu3 %v9781_v16  ;;  %v10024_v15 = vsub.f32 %v94_v18, %v9991_v55  ;;  %v16126_v53 = vand.u32 4294901760, %v10071_v50  ;;  %v1926_v30 = vsub.f32 %v10056_v11, %v16127_v10 }
  0xd3   :  { %1830 = vmatmul.f32.vlgmr.msrb.gmra.mxu3 %v9768_v1  ;;  %1841 = vmatpush.msra.mxu0 %v9944_v48  ;;  %v90_v1 = vld [vmem:[%s16074_s1 + $0x228] sm:$0xff] }
  0xd4   :  { %1981 = vmatpush.msra.mxu2 %v9947_v14  ;;  %2031 = vmatpush.msra.mxu3 %v9911_v58  ;;  %v10052_v25 = vand.u32 4294901760, %v90_v1  ;;  %v16130_v19 = vand.u32 4294901760, %v10024_v15  ;;  %v1927_v0 = vand.u32 4294901760, %v1926_v30  ;;  %v107_v14 = vld [vmem:[%s16074_s1 + $0x2b0] sm:$0xff] }
  0xd5   :  { %1720 = vmatpush.msrb.mxu1 %v9781_v16  ;;  %1843 = vmatpush.msra.mxu0 %v9955_v51  ;;  %v1902_v16 = vsub.f32 %v9981_v9, %v16133_v29 }
  0xd6   :  { %1724 = vmatmul.f32.vlgmr.msrb.gmra.mxu1 %v1527_v63  ;;  %1984 = vmatpush.msra.mxu2 %v9961_v22  ;;  %v422_v63 = vld.sshfl [vmem:[#allocation1 + $0x20] sm:$0xff pattern:$0x73625140]  ;;  %v1914_v60 = vsub.f32 %v10024_v15, %v16130_v19  ;;  %v10088_v34 = vsub.f32 %v90_v1, %v10052_v25  ;;  %v10134_v1 = vsub.f32 %v87_v32, %v10096_v31 }
  0xd7   :  { %1880 = vmatpush.msra.mxu1 %v1879_v27  ;;  %2033 = vmatpush.msra.mxu3 %v9921_v24  ;;  %v1903_v39 = vand.u32 4294901760, %v1902_v16  ;;  %v10078_v35 = vand.u32 4294901760, %v422_v63  ;;  %v1932_v27 = vsub.f32 %v10071_v50, %v16126_v53  ;;  %v115_v16 = vld [vmem:[%s16074_s1 + $0x2f0] sm:$0xff]  ;;  %v1944_v32 = vsub.f32 %v10100_v2, %v16123_v28 }
  0xd8   :  { %1845 = vmatpush.msra.mxu0 %v9966_v21  ;;  %1987 = vmatpush.msra.mxu2 %v9975_v61  ;;  %v1915_v43 = vand.u32 4294901760, %v1914_v60  ;;  %v16124_v18 = vand.u32 4294901760, %v10088_v34  ;;  %v16129_v60 = vand.u32 4294901760, %v10134_v1 }
  0xd9   :  { %1886 = vmatpush.msra.mxu1 %v1885_v4  ;;  %2035 = vmatpush.msra.mxu3 %v9931_v8  ;;  %v10108_v37 = vsub.f32 %v422_v63, %v10078_v35  ;;  %v10148_v63 = vand.u32 4294901760, %v85_v23 }
  0xda   :  { %1847 = vmatpush.msra.mxu0 %v9991_v55  ;;  %1990 = vmatpush.msra.mxu2 %v9981_v9 }
  0xdb   :  { %1892 = vmatpush.msra.mxu1 %v1891_v46  ;;  %2037 = vmatpush.msra.mxu3 %v9944_v48  ;;  %v1868_v4 = vand.u32 4294901760, %v10108_v37  ;;  %v1938_v46 = vsub.f32 %v10088_v34, %v16124_v18  ;;  %v112_v18 = vld [vmem:[%s16074_s1 + $0x2d8] sm:$0xff] }
  0xdc   :  { %1849 = vmatpush.msra.mxu0 %v10007_v12  ;;  %1993 = vmatpush.msra.mxu2 %v9997_v3  ;;  %v10204_v42 = vand.u32 4294901760, %v112_v18 }
  0xdd   :  { %1898 = vmatpush.msra.mxu1 %v1897_v52  ;;  %2039 = vmatpush.msra.mxu3 %v9955_v51  ;;  %v114_v52 = vld [vmem:[%s16074_s1 + $0x2e8] sm:$0xff]  ;;  %v1869_v59 = vsub.f32 %v10108_v37, %v1868_v4  ;;  %v1939_v30 = vand.u32 4294901760, %v1938_v46  ;;  %v1945_v46 = vand.u32 4294901760, %v1944_v32 }
  0xde   :  { %1851 = vmatpush.msra.mxu0 %v10021_v57  ;;  %1996 = vmatpush.msra.mxu2 %v10024_v15  ;;  %v10184_v28 = vand.u32 4294901760, %v114_v52 }
  0xdf   :  { %1904 = vmatpush.msra.mxu1 %v1903_v39  ;;  %2041 = vmatpush.msra.mxu3 %v9966_v21  ;;  %v1933_v39 = vand.u32 4294901760, %v1932_v27  ;;  %v10182_v27 = vsub.f32 %v85_v23, %v10148_v63  ;;  %v1956_v23 = vsub.f32 %v10134_v1, %v16129_v60  ;;  %v1870_v53 = vand.u32 4294901760, %v1869_v59 }
  0xe0   :  { %1853 = vmatpush.msra.mxu0 %v10037_v49  ;;  %1999 = vmatpush.msra.mxu2 %v10040_v13  ;;  %v10212_v60 = vsub.f32 %v114_v52, %v10184_v28 }
  0xe1   :  { %1910 = vmatpush.msra.mxu1 %v1909_v44  ;;  %2043 = vmatpush.msra.mxu3 %v9991_v55  ;;  %v10164_v44 = vand.u32 4294901760, %v115_v16  ;;  %v1957_v52 = vand.u32 4294901760, %v1956_v23 }
  0xe2   :  { %1855 = vmatpush.msra.mxu0 %v10052_v25  ;;  %2002 = vmatpush.msra.mxu2 %v10056_v11  ;;  %v16137_v23 = vand.u32 4294901760, %v10212_v60 }
  0xe3   :  { %1916 = vmatpush.msra.mxu1 %v1915_v43  ;;  %2045 = vmatpush.msra.mxu3 %v10007_v12  ;;  %v10175_v43 = vsub.f32 %v116_v17, %v10139_v36  ;;  %v16132_v17 = vand.u32 4294901760, %v10154_v20 }
  0xe4   :  { %1857 = vmatpush.msra.mxu0 %v10067_v41  ;;  %2005 = vmatpush.msra.mxu2 %v10071_v50 }
  0xe5   :  { %1922 = vmatpush.msra.mxu1 %v1921_v5  ;;  %2047 = vmatpush.msra.mxu3 %v10021_v57  ;;  %v1950_v5 = vsub.f32 %v10116_v6, %v16125_v54  ;;  %v10199_v54 = vsub.f32 %v115_v16, %v10164_v44  ;;  %v16134_v10 = vand.u32 4294901760, %v10175_v43  ;;  %v16135_v16 = vand.u32 4294901760, %v10182_v27 }
  0xe6   :  { %1859 = vmatpush.msra.mxu0 %v10084_v56  ;;  %2008 = vmatpush.msra.mxu2 %v10088_v34  ;;  %v1962_v59 = vsub.f32 %v10154_v20, %v16132_v17  ;;  %v10234_v17 = vsub.f32 %v112_v18, %v10204_v42 }
  0xe7   :  { %1928 = vmatpush.msra.mxu1 %v1927_v0  ;;  %2049 = vmatpush.msra.mxu3 %v10037_v49  ;;  %v10192_v0 = vand.u32 4294901760, %v113_v47  ;;  %v1951_v32 = vand.u32 4294901760, %v1950_v5  ;;  %v16138_v5 = vand.u32 4294901760, %v10199_v54 }
  0xe8   :  { %1861 = vmatpush.msra.mxu0 %v10096_v31  ;;  %2011 = vmatpush.msra.mxu2 %v10100_v2  ;;  %v1963_v18 = vand.u32 4294901760, %v1962_v59  ;;  %v16140_v40 = vand.u32 4294901760, %v10234_v17 }
  0xe9   :  { %1934 = vmatpush.msra.mxu1 %v1933_v39  ;;  %2051 = vmatpush.msra.mxu3 %v10052_v25  ;;  %v111_v39 = vld [vmem:[%s16074_s1 + $0x2d0] sm:$0xff]  ;;  %v10220_v19 = vsub.f32 %v113_v47, %v10192_v0  ;;  %v2219_v47 = vsub.f32 %v10175_v43, %v16134_v10 }
  0xea   :  { %1863 = vmatpush.msra.mxu0 %v10123_v62  ;;  %2014 = vmatpush.msra.mxu2 %v10116_v6  ;;  %v10227_v33 = vand.u32 4294901760, %v111_v39 }
  0xeb   :  { %1940 = vmatpush.msra.mxu1 %v1939_v30  ;;  %2053 = vmatpush.msra.mxu3 %v10067_v41  ;;  %v110_v30 = vld [vmem:[%s16074_s1 + $0x2c8] sm:$0xff]  ;;  %v16139_v10 = vand.u32 4294901760, %v10220_v19  ;;  %v2220_v59 = vand.u32 4294901760, %v2219_v47  ;;  %v10278_v47 = vand.u32 4294901760, %v108_v38 }
  0xec   :  { %1865 = vmatpush.msra.mxu0 %v10148_v63  ;;  %2017 = vmatpush.msra.mxu2 %v10134_v1  ;;  %v10245_v29 = vand.u32 4294901760, %v110_v30 }
  0xed   :  { %1946 = vmatpush.msra.mxu1 %v1945_v46  ;;  %2055 = vmatpush.msra.mxu3 %v10084_v56  ;;  %v109_v46 = vld [vmem:[%s16074_s1 + $0x2c0] sm:$0xff]  ;;  %v2237_v22 = vsub.f32 %v10220_v19, %v16139_v10  ;;  %v2243_v10 = vsub.f32 %v10234_v17, %v16140_v40 }
  0xee   :  { %1871 = vmatmul.f32.vlgmr.msra.gmra.mxu0 %v1870_v53  ;;  %2020 = vmatpush.msra.mxu2 %v10154_v20  ;;  %v1968_v53 = vsub.f32 %v10182_v27, %v16135_v16  ;;  %v10261_v16 = vand.u32 4294901760, %v109_v46 }
  0xef   :  { %2072 = vmatpush.msrb.mxu0 %v1877_v45  ;;  %1952 = vmatpush.msra.mxu1 %v1951_v32  ;;  %v2225_v45 = vsub.f32 %v10199_v54, %v16138_v5  ;;  %v10259_v32 = vsub.f32 %v111_v39, %v10227_v33  ;;  %v2231_v39 = vsub.f32 %v10212_v60, %v16137_v23  ;;  %v10295_v5 = vand.u32 4294901760, %v107_v14 }
  0xf0   :  { %2057 = vmatpush.msra.mxu3 %v10096_v31  ;;  %2023 = vmatpush.msra.mxu2 %v10182_v27  ;;  %v2244_v40 = vand.u32 4294901760, %v2243_v10  ;;  %v16418_v10 = vand.u32 4294901760, %v10024_v15  ;;  %v102_v15 = vld [vmem:[%s16074_s1 + $0x288] sm:$0xff] }
  0xf1   :  { %2076 = vmatpush.msrb.mxu0 %v1883_v26  ;;  %1958 = vmatpush.msra.mxu1 %v1957_v52  ;;  %v1969_v26 = vand.u32 4294901760, %v1968_v53  ;;  %v10276_v52 = vsub.f32 %v110_v30, %v10245_v29  ;;  %v16415_v53 = vand.u32 4294901760, %v9975_v61  ;;  %v2226_v30 = vand.u32 4294901760, %v2225_v45  ;;  %v105_v61 = vld [vmem:[%s16074_s1 + $0x2a0] sm:$0xff] }
  0xf2   :  { %2059 = vmatpush.msra.mxu3 %v10123_v62  ;;  %2026 = vmatmul.f32.vlgmr.msra.gmra.mxu2 %v10108_v37  ;;  %v16141_v23 = vand.u32 4294901760, %v10259_v32  ;;  %v16416_v37 = vand.u32 4294901760, %v9981_v9  ;;  %v10308_v45 = vsub.f32 %v108_v38, %v10278_v47 }
  0xf3   :  { %2080 = vmatpush.msrb.mxu0 %v1889_v7  ;;  %2176 = vmatpush.msrb.mxu2 %v10139_v36  ;;  %v106_v7 = vld [vmem:[%s16074_s1 + $0x2a8] sm:$0xff] }
  0xf4   :  { %1964 = vmatpush.msra.mxu1 %v1963_v18  ;;  %2061 = vmatpush.msra.mxu3 %v10148_v63  ;;  %v10293_v18 = vsub.f32 %v109_v46, %v10261_v16  ;;  %v16142_v46 = vand.u32 4294901760, %v10276_v52  ;;  %v2249_v9 = vsub.f32 %v10259_v32, %v16141_v23 }
  0xf5   :  { %2065 = vmatmul.f32.vlgmr.msra.gmra.mxu3 %v1868_v4  ;;  %2084 = vmatpush.msrb.mxu0 %v16415_v53  ;;  %v2232_v4 = vand.u32 4294901760, %v2231_v39  ;;  %v10310_v53 = vand.u32 4294901760, %v106_v7  ;;  %v10323_v39 = vsub.f32 %v107_v14, %v10295_v5 }
  0xf6   :  { %2178 = vmatpush.msrb.mxu2 %v10164_v44  ;;  %2221 = vmatpush.msrb.mxu3 %v2220_v59  ;;  %v2238_v59 = vand.u32 4294901760, %v2237_v22  ;;  %v16143_v38 = vand.u32 4294901760, %v10293_v18  ;;  %v16417_v22 = vand.u32 4294901760, %v9997_v3  ;;  %v103_v3 = vld [vmem:[%s16074_s1 + $0x290] sm:$0xff] }
  0xf7   :  { %1970 = vmatpush.msra.mxu1 %v1969_v26  ;;  %2088 = vmatpush.msrb.mxu0 %v16416_v37  ;;  %v104_v26 = vld [vmem:[%s16074_s1 + $0x298] sm:$0xff]  ;;  %v10325_v37 = vand.u32 4294901760, %v105_v61  ;;  %v10336_v14 = vsub.f32 %v106_v7, %v10310_v53 }
  0xf8   :  { %1972 = vmatmul.f32.vlgmr.msra.gmra.mxu1 %v10078_v35  ;;  %2180 = vmatpush.msrb.mxu2 %v10184_v28  ;;  %v10338_v23 = vand.u32 4294901760, %v104_v26  ;;  %v2261_v7 = vsub.f32 %v10293_v18, %v16143_v38 }
  0xf9   :  { %2139 = vmatpush.msrb.mxu1 %v9911_v58  ;;  %2227 = vmatpush.msrb.mxu3 %v2226_v30  ;;  %v2255_v58 = vsub.f32 %v10276_v52, %v16142_v46  ;;  %v16144_v30 = vand.u32 4294901760, %v10308_v45  ;;  %v16419_v46 = vand.u32 4294901760, %v10040_v13  ;;  %v101_v13 = vld [vmem:[%s16074_s1 + $0x280] sm:$0xff] }
  0xfa   :  { %2092 = vmatpush.msrb.mxu0 %v16417_v22  ;;  %2182 = vmatpush.msrb.mxu2 %v10192_v0  ;;  %v10352_v22 = vsub.f32 %v105_v61, %v10325_v37  ;;  %v10368_v38 = vsub.f32 %v104_v26, %v10338_v23 }
  0xfb   :  { %2141 = vmatpush.msrb.mxu1 %v9921_v24  ;;  %2233 = vmatpush.msrb.mxu3 %v2232_v4  ;;  %v2250_v24 = vand.u32 4294901760, %v2249_v9  ;;  %v16145_v4 = vand.u32 4294901760, %v10323_v39  ;;  %v2267_v61 = vsub.f32 %v10308_v45, %v16144_v30  ;;  %v16421_v9 = vand.u32 4294901760, %v10071_v50 }
  0xfc   :  { %2096 = vmatpush.msrb.mxu0 %v16418_v10  ;;  %2184 = vmatpush.msrb.mxu2 %v10204_v42  ;;  %v423_v10 = vld.sshfl [vmem:[#allocation1 + $0x28] sm:$0xff pattern:$0x73625140]  ;;  %v2284_v30 = vand.u32 4294901760, %v10352_v22  ;;  %v16423_v50 = vand.u32 4294901760, %v10088_v34 }
  0xfd   :  { %2143 = vmatpush.msrb.mxu1 %v9931_v8  ;;  %2239 = vmatpush.msrb.mxu3 %v2238_v59  ;;  %v10360_v8 = vand.u32 4294901760, %v103_v3  ;;  %v2256_v59 = vand.u32 4294901760, %v2255_v58  ;;  %v2262_v58 = vand.u32 4294901760, %v2261_v7  ;;  %v2273_v26 = vsub.f32 %v10323_v39, %v16145_v4 }
  0xfe   :  { %2100 = vmatpush.msrb.mxu0 %v16419_v46  ;;  %2186 = vmatpush.msrb.mxu2 %v10227_v33  ;;  %v16420_v46 = vand.u32 4294901760, %v10056_v11  ;;  %v2290_v4 = vand.u32 4294901760, %v10368_v38 }
  0xff   :  { %2145 = vmatpush.msrb.mxu1 %v9944_v48  ;;  %2245 = vmatpush.msrb.mxu3 %v2244_v40  ;;  %v10376_v48 = vand.u32 4294901760, %v102_v15  ;;  %v10378_v40 = vand.u32 4294901760, %v423_v10  ;;  %v10389_v11 = vsub.f32 %v103_v3, %v10360_v8 }
 0x100   :  { %2104 = vmatpush.msrb.mxu0 %v16420_v46  ;;  %2188 = vmatpush.msrb.mxu2 %v10245_v29  ;;  %v10391_v46 = vand.u32 4294901760, %v101_v13 }
 0x101   :  { %2147 = vmatpush.msrb.mxu1 %v9955_v51  ;;  %2251 = vmatpush.msrb.mxu3 %v2250_v24  ;;  %v2268_v51 = vand.u32 4294901760, %v2267_v61  ;;  %v16422_v24 = vand.u32 4294901760, %v10336_v14  ;;  %v10402_v3 = vsub.f32 %v102_v15, %v10376_v48  ;;  %v16424_v61 = vand.u32 4294901760, %v10100_v2 }
 0x102   :  { %2108 = vmatpush.msrb.mxu0 %v16421_v9  ;;  %2190 = vmatpush.msrb.mxu2 %v10261_v16  ;;  %v10405_v9 = vsub.f32 %v423_v10, %v10378_v40  ;;  %v2296_v34 = vand.u32 4294901760, %v10389_v11  ;;  %v10416_v15 = vsub.f32 %v101_v13, %v10391_v46  ;;  %v2291_v10 = vsub.f32 %v10368_v38, %v2290_v4 }
 0x103   :  { %2149 = vmatpush.msrb.mxu1 %v9966_v21  ;;  %2257 = vmatpush.msrb.mxu3 %v2256_v59  ;;  %v2279_v7 = vsub.f32 %v10336_v14, %v16422_v24  ;;  %v2274_v21 = vand.u32 4294901760, %v2273_v26  ;;  %v2285_v59 = vsub.f32 %v10352_v22, %v2284_v30  ;;  %v2302_v2 = vand.u32 4294901760, %v10402_v3 }
 0x104   :  { %2112 = vmatpush.msrb.mxu0 %v16423_v50  ;;  %2192 = vmatpush.msrb.mxu2 %v10278_v47  ;;  %v2209_v26 = vand.u32 4294901760, %v10405_v9  ;;  %v2292_v24 = vand.u32 4294901760, %v2291_v10 }
 0x105   :  { %2151 = vmatpush.msrb.mxu1 %v9991_v55  ;;  %2263 = vmatpush.msrb.mxu3 %v2262_v58  ;;  %v2280_v55 = vand.u32 4294901760, %v2279_v7  ;;  %v16425_v58 = vand.u32 4294901760, %v10116_v6  ;;  %v2286_v13 = vand.u32 4294901760, %v2285_v59  ;;  %v2297_v6 = vsub.f32 %v10389_v11, %v2296_v34  ;;  %v124_v59 = vld [vmem:[%s16074_s1 + $0x338] sm:$0xff] }
 0x106   :  { %2116 = vmatpush.msrb.mxu0 %v16424_v61  ;;  %2194 = vmatpush.msrb.mxu2 %v10295_v5  ;;  %v16427_v7 = vand.u32 4294901760, %v10154_v20 }
 0x107   :  { %2153 = vmatpush.msrb.mxu1 %v10007_v12  ;;  %2269 = vmatpush.msrb.mxu3 %v2268_v51  ;;  %v16426_v12 = vand.u32 4294901760, %v10134_v1  ;;  %v2308_v51 = vand.u32 4294901760, %v10416_v15  ;;  %v2210_v1 = vsub.f32 %v10405_v9, %v2209_v26  ;;  %v2298_v20 = vand.u32 4294901760, %v2297_v6 }
 0x108   :  { %2120 = vmatpush.msrb.mxu0 %v16425_v58  ;;  %2196 = vmatpush.msrb.mxu2 %v10310_v53 }
 0x109   :  { %2155 = vmatpush.msrb.mxu1 %v10021_v57  ;;  %2275 = vmatpush.msrb.mxu3 %v2274_v21  ;;  %v2303_v57 = vsub.f32 %v10402_v3, %v2302_v2  ;;  %v2309_v50 = vsub.f32 %v10416_v15, %v2308_v51 }
 0x10a   :  { %2124 = vmatpush.msrb.mxu0 %v16426_v12  ;;  %2198 = vmatpush.msrb.mxu2 %v10325_v37 }
 0x10b   :  { %2157 = vmatpush.msrb.mxu1 %v10037_v49  ;;  %2281 = vmatpush.msrb.mxu3 %v2280_v55  ;;  %v16428_v49 = vand.u32 4294901760, %v10182_v27  ;;  %v2304_v21 = vand.u32 4294901760, %v2303_v57  ;;  %v2310_v27 = vand.u32 4294901760, %v2309_v50  ;;  %v123_v55 = vld [vmem:[%s16074_s1 + $0x330] sm:$0xff]  ;;  %v120_v50 = vld [vmem:[%s16074_s1 + $0x318] sm:$0xff] }
 0x10c   :  { %2128 = vmatpush.msrb.mxu0 %v16427_v7  ;;  %2200 = vmatpush.msrb.mxu2 %v10338_v23  ;;  %v121_v7 = vld [vmem:[%s16074_s1 + $0x320] sm:$0xff] }
 0x10d   :  { %2159 = vmatpush.msrb.mxu1 %v10052_v25  ;;  %2287 = vmatpush.msrb.mxu3 %v2286_v13  ;;  %v2211_v25 = vand.u32 4294901760, %v2210_v1 }
 0x10e   :  { %2132 = vmatpush.msrb.mxu0 %v16428_v49  ;;  %2202 = vmatpush.msrb.mxu2 %v10360_v8 }
 0x10f   :  { %2161 = vmatpush.msrb.mxu1 %v10067_v41  ;;  %2293 = vmatpush.msrb.mxu3 %v2292_v24  ;;  %v16429_v41 = vand.u32 4294901760, %v10175_v43 }
 0x110   :  { %2134 = vmatmul.f32.vlgmr.msrb.gmra.mxu0 %v10078_v35  ;;  %2204 = vmatpush.msrb.mxu2 %v10376_v48 }
 0x111   :  { %2319 = vmatpush.msra.mxu0 %v10175_v43  ;;  %2163 = vmatpush.msrb.mxu1 %v10084_v56  ;;  %v16430_v56 = vand.u32 4294901760, %v10199_v54 }
 0x112   :  { %2299 = vmatpush.msrb.mxu3 %v2298_v20  ;;  %2206 = vmatpush.msrb.mxu2 %v10391_v46 }
 0x113   :  { %2322 = vmatpush.msra.mxu0 %v10199_v54  ;;  %2165 = vmatpush.msrb.mxu1 %v10096_v31  ;;  %v16431_v31 = vand.u32 4294901760, %v10212_v60  ;;  %v16438_v54 = vand.u32 4294901760, %v10323_v39 }
 0x114   :  { %2305 = vmatpush.msrb.mxu3 %v2304_v21  ;;  %2212 = vmatmul.f32.vlgmr.msrb.gmra.mxu2 %v2211_v25  ;;  %v10673_v25 = vand.u32 4294901760, %v121_v7 }
 0x115   :  { %2325 = vmatpush.msra.mxu0 %v10212_v60  ;;  %2413 = vmatpush.msra.mxu2 %v16429_v41 }
 0x116   :  { %2167 = vmatpush.msrb.mxu1 %v10123_v62  ;;  %2311 = vmatpush.msrb.mxu3 %v2310_v27  ;;  %v16432_v62 = vand.u32 4294901760, %v10220_v19 }
 0x117   :  { %2313 = vmatmul.f32.vlgmr.msrb.gmra.mxu3 %v10378_v40  ;;  %2328 = vmatpush.msra.mxu0 %v10220_v19  ;;  %v16435_v19 = vand.u32 4294901760, %v10276_v52 }
 0x118   :  { %2417 = vmatpush.msra.mxu2 %v16430_v56  ;;  %2480 = vmatpush.msra.mxu3 %v10139_v36 }
 0x119   :  { %2169 = vmatpush.msrb.mxu1 %v10148_v63  ;;  %2331 = vmatpush.msra.mxu0 %v10234_v17  ;;  %v16437_v63 = vand.u32 4294901760, %v10308_v45 }
 0x11a   :  { %2171 = vmatmul.f32.vlgmr.msrb.gmra.mxu1 %v10078_v35  ;;  %2421 = vmatpush.msra.mxu2 %v16431_v31  ;;  %v16433_v35 = vand.u32 4294901760, %v10234_v17  ;;  %v129_v17 = vld [vmem:[%s16074_s1 + $0x360] sm:$0xff]  ;;  %v119_v31 = vld [vmem:[%s16074_s1 + $0x310] sm:$0xff] }
 0x11b   :  { %2372 = vmatpush.msra.mxu1 %v10139_v36  ;;  %2482 = vmatpush.msra.mxu3 %v10164_v44  ;;  %v16434_v36 = vand.u32 4294901760, %v10259_v32 }
 0x11c   :  { %2334 = vmatpush.msra.mxu0 %v10259_v32  ;;  %2425 = vmatpush.msra.mxu2 %v16432_v62  ;;  %v128_v32 = vld [vmem:[%s16074_s1 + $0x358] sm:$0xff] }
 0x11d   :  { %2374 = vmatpush.msra.mxu1 %v10164_v44  ;;  %2484 = vmatpush.msra.mxu3 %v10184_v28  ;;  %v130_v44 = vld [vmem:[%s16074_s1 + $0x368] sm:$0xff] }
 0x11e   :  { %2337 = vmatpush.msra.mxu0 %v10276_v52  ;;  %2429 = vmatpush.msra.mxu2 %v16433_v35 }
 0x11f   :  { %2376 = vmatpush.msra.mxu1 %v10184_v28  ;;  %2486 = vmatpush.msra.mxu3 %v10192_v0  ;;  %v16436_v28 = vand.u32 4294901760, %v10293_v18 }
 0x120   :  { %2340 = vmatpush.msra.mxu0 %v10293_v18  ;;  %2433 = vmatpush.msra.mxu2 %v16434_v36  ;;  %v10561_v18 = vand.u32 4294901760, %v128_v32  ;;  %v10690_v36 = vand.u32 4294901760, %v120_v50 }
 0x121   :  { %2378 = vmatpush.msra.mxu1 %v10192_v0  ;;  %2488 = vmatpush.msra.mxu3 %v10204_v42  ;;  %v10537_v0 = vand.u32 4294901760, %v130_v44 }
 0x122   :  { %2343 = vmatpush.msra.mxu0 %v10308_v45  ;;  %2437 = vmatpush.msra.mxu2 %v16435_v19 }
 0x123   :  { %2380 = vmatpush.msra.mxu1 %v10204_v42  ;;  %2490 = vmatpush.msra.mxu3 %v10227_v33  ;;  %v132_v42 = vld [vmem:[%s16074_s1 + $0x378] sm:$0xff] }
 0x124   :  { %2346 = vmatpush.msra.mxu0 %v10323_v39  ;;  %2441 = vmatpush.msra.mxu2 %v16436_v28  ;;  %v10517_v60 = vand.u32 4294901760, %v132_v42  ;;  %v126_v39 = vld [vmem:[%s16074_s1 + $0x348] sm:$0xff] }
 0x125   :  { %2382 = vmatpush.msra.mxu1 %v10227_v33  ;;  %2492 = vmatpush.msra.mxu3 %v10245_v29  ;;  %v131_v33 = vld [vmem:[%s16074_s1 + $0x370] sm:$0xff] }
 0x126   :  { %2349 = vmatpush.msra.mxu0 %v10336_v14  ;;  %2445 = vmatpush.msra.mxu2 %v16437_v63  ;;  %v10527_v43 = vand.u32 4294901760, %v131_v33 }
 0x127   :  { %2384 = vmatpush.msra.mxu1 %v10245_v29  ;;  %2494 = vmatpush.msra.mxu3 %v10261_v16  ;;  %v16439_v29 = vand.u32 4294901760, %v10336_v14  ;;  %v10587_v14 = vsub.f32 %v128_v32, %v10561_v18 }
 0x128   :  { %2352 = vmatpush.msra.mxu0 %v10352_v22  ;;  %2449 = vmatpush.msra.mxu2 %v16438_v54  ;;  %v10553_v52 = vsub.f32 %v131_v33, %v10527_v43  ;;  %v10597_v22 = vand.u32 4294901760, %v126_v39  ;;  %v10702_v54 = vand.u32 4294901760, %v119_v31 }
 0x129   :  { %2386 = vmatpush.msra.mxu1 %v10261_v16  ;;  %2496 = vmatpush.msra.mxu3 %v10278_v47  ;;  %v10540_v16 = vsub.f32 %v132_v42, %v10517_v60 }
 0x12a   :  { %2355 = vmatpush.msra.mxu0 %v10368_v38  ;;  %2453 = vmatpush.msra.mxu2 %v16439_v29  ;;  %v10706_v29 = vsub.f32 %v121_v7, %v10673_v25 }
 0x12b   :  { %2388 = vmatpush.msra.mxu1 %v10278_v47  ;;  %2498 = vmatpush.msra.mxu3 %v10295_v5  ;;  %v127_v47 = vld [vmem:[%s16074_s1 + $0x350] sm:$0xff]  ;;  %v2559_v45 = vand.u32 4294901760, %v10540_v16 }
 0x12c   :  { %2358 = vmatpush.msra.mxu0 %v10389_v11  ;;  %2457 = vmatpush.msra.mxu2 %v2284_v30  ;;  %v10572_v38 = vand.u32 4294901760, %v127_v47 }
 0x12d   :  { %2390 = vmatpush.msra.mxu1 %v10295_v5  ;;  %2500 = vmatpush.msra.mxu3 %v10310_v53  ;;  %v10550_v5 = vand.u32 4294901760, %v129_v17 }
 0x12e   :  { %2361 = vmatpush.msra.mxu0 %v10402_v3  ;;  %2461 = vmatpush.msra.mxu2 %v2290_v4  ;;  %v125_v4 = vld [vmem:[%s16074_s1 + $0x340] sm:$0xff]  ;;  %v10603_v3 = vsub.f32 %v127_v47, %v10572_v38 }
 0x12f   :  { %2392 = vmatpush.msra.mxu1 %v10310_v53  ;;  %2502 = vmatpush.msra.mxu3 %v10325_v37  ;;  %v10567_v53 = vsub.f32 %v130_v44, %v10537_v0  ;;  %v10581_v30 = vsub.f32 %v129_v17, %v10550_v5  ;;  %v10613_v61 = vand.u32 4294901760, %v125_v4  ;;  %v118_v44 = vld [vmem:[%s16074_s1 + $0x308] sm:$0xff] }
 0x130   :  { %2364 = vmatpush.msra.mxu0 %v10416_v15  ;;  %2465 = vmatpush.msra.mxu2 %v2296_v34  ;;  %v16156_v15 = vand.u32 4294901760, %v10587_v14  ;;  %v16154_v13 = vand.u32 4294901760, %v10603_v3 }
 0x131   :  { %2394 = vmatpush.msra.mxu1 %v10325_v37  ;;  %2504 = vmatpush.msra.mxu3 %v10338_v23  ;;  %v2565_v37 = vand.u32 4294901760, %v10553_v52  ;;  %v2571_v11 = vand.u32 4294901760, %v10567_v53  ;;  %v16159_v34 = vand.u32 4294901760, %v10581_v30  ;;  %v10646_v24 = vsub.f32 %v125_v4, %v10613_v61 }
 0x132   :  { %2367 = vmatmul.f32.vlgmr.msra.gmra.mxu0 %v10405_v9  ;;  %2469 = vmatpush.msra.mxu2 %v2302_v2  ;;  %v10627_v2 = vand.u32 4294901760, %v124_v59  ;;  %v2590_v20 = vsub.f32 %v10603_v3, %v16154_v13  ;;  %v10722_v4 = vsub.f32 %v120_v50, %v10690_v36 }
 0x133   :  { %2517 = vmatpush.msrb.mxu0 %v10517_v60  ;;  %2396 = vmatpush.msra.mxu1 %v10338_v23  ;;  %v2560_v23 = vsub.f32 %v10540_v16, %v2559_v45  ;;  %v2572_v58 = vsub.f32 %v10567_v53, %v2571_v11  ;;  %v2578_v6 = vsub.f32 %v10581_v30, %v16159_v34  ;;  %v16151_v27 = vand.u32 4294901760, %v10646_v24 }
 0x134   :  { %2506 = vmatpush.msra.mxu3 %v10360_v8  ;;  %2473 = vmatpush.msra.mxu2 %v2308_v51  ;;  %v10643_v51 = vand.u32 4294901760, %v123_v55  ;;  %v10662_v9 = vsub.f32 %v124_v59, %v10627_v2  ;;  %v2591_v63 = vand.u32 4294901760, %v2590_v20  ;;  %v10729_v59 = vand.u32 4294901760, %v118_v44 }
 0x135   :  { %2519 = vmatpush.msrb.mxu0 %v10527_v43  ;;  %2398 = vmatpush.msra.mxu1 %v10360_v8  ;;  %v2566_v8 = vsub.f32 %v10553_v52, %v2565_v37  ;;  %v2561_v10 = vand.u32 4294901760, %v2560_v23  ;;  %v2573_v57 = vand.u32 4294901760, %v2572_v58  ;;  %v2579_v21 = vand.u32 4294901760, %v2578_v6  ;;  %v148_v23 = vld [vmem:[%s16074_s1 + $0x3f8] sm:$0xff] }
 0x136   :  { %2508 = vmatpush.msra.mxu3 %v10376_v48  ;;  %2475 = vmatmul.f32.vlgmr.msra.gmra.mxu2 %v10378_v40  ;;  %v10677_v41 = vsub.f32 %v123_v55, %v10643_v51  ;;  %v16150_v19 = vand.u32 4294901760, %v10662_v9  ;;  %v2602_v42 = vsub.f32 %v10646_v24, %v16151_v27  ;;  %v16146_v58 = vand.u32 4294901760, %v10706_v29 }
 0x137   :  { %2521 = vmatpush.msrb.mxu0 %v10537_v0  ;;  %2660 = vmatpush.msrb.mxu2 %v10540_v16  ;;  %v2567_v12 = vand.u32 4294901760, %v2566_v8  ;;  %v117_v8 = vld [vmem:[%s16074_s1 + $0x300] sm:$0xff]  ;;  %v10745_v6 = vand.u32 4294901760, %v148_v23  ;;  %v16148_v20 = vand.u32 4294901760, %v10722_v4  ;;  %v10760_v50 = vsub.f32 %v118_v44, %v10729_v59  ;;  %v140_v16 = vld [vmem:[%s16074_s1 + $0x3b8] sm:$0xff] }
 0x138   :  { %2400 = vmatpush.msra.mxu1 %v10376_v48  ;;  %2510 = vmatpush.msra.mxu3 %v10391_v46  ;;  %v10630_v48 = vsub.f32 %v126_v39, %v10597_v22  ;;  %v16149_v33 = vand.u32 4294901760, %v10677_v41  ;;  %v2608_v47 = vsub.f32 %v10662_v9, %v16150_v19  ;;  %v2603_v55 = vand.u32 4294901760, %v2602_v42  ;;  %v145_v42 = vld [vmem:[%s16074_s1 + $0x3e0] sm:$0xff] }
 0x139   :  { %2512 = vmatmul.f32.vlgmr.msra.gmra.mxu3 %v10378_v40  ;;  %2523 = vmatpush.msrb.mxu0 %v10550_v5  ;;  %v122_v40 = vld [vmem:[%s16074_s1 + $0x328] sm:$0xff] }
 0x13a   :  { %2663 = vmatpush.msrb.mxu2 %v10553_v52  ;;  %2713 = vmatpush.msrb.mxu3 %v10517_v60  ;;  %v10658_v1 = vand.u32 4294901760, %v122_v40  ;;  %v16153_v49 = vand.u32 4294901760, %v10630_v48  ;;  %v2609_v7 = vand.u32 4294901760, %v2608_v47  ;;  %v139_v52 = vld [vmem:[%s16074_s1 + $0x3b0] sm:$0xff] }
 0x13b   :  { %2402 = vmatpush.msra.mxu1 %v10391_v46  ;;  %2525 = vmatpush.msrb.mxu0 %v10561_v18  ;;  %v2584_v46 = vsub.f32 %v10587_v14, %v16156_v15  ;;  %v10906_v34 = vand.u32 4294901760, %v139_v52 }
 0x13c   :  { %2406 = vmatmul.f32.vlgmr.msra.gmra.mxu1 %v2209_v26  ;;  %2666 = vmatpush.msrb.mxu2 %v10567_v53  ;;  %v424_v26 = vld.sshfl [vmem:[#allocation1 + $0x30] sm:$0xff pattern:$0x73625140]  ;;  %v2596_v35 = vsub.f32 %v10630_v48, %v16153_v49  ;;  %v10694_v28 = vsub.f32 %v122_v40, %v10658_v1  ;;  %v10740_v40 = vsub.f32 %v119_v31, %v10702_v54 }
 0x13d   :  { %2562 = vmatpush.msrb.mxu1 %v2561_v10  ;;  %2715 = vmatpush.msrb.mxu3 %v10527_v43  ;;  %v2585_v56 = vand.u32 4294901760, %v2584_v46  ;;  %v10684_v62 = vand.u32 4294901760, %v424_v26  ;;  %v2614_v10 = vsub.f32 %v10677_v41, %v16149_v33  ;;  %v147_v46 = vld [vmem:[%s16074_s1 + $0x3f0] sm:$0xff]  ;;  %v2626_v31 = vsub.f32 %v10706_v29, %v16146_v58 }
 0x13e   :  { %2527 = vmatpush.msrb.mxu0 %v10572_v38  ;;  %2669 = vmatpush.msrb.mxu2 %v10581_v30  ;;  %v2597_v32 = vand.u32 4294901760, %v2596_v35  ;;  %v16147_v39 = vand.u32 4294901760, %v10694_v28  ;;  %v16152_v35 = vand.u32 4294901760, %v10740_v40 }
 0x13f   :  { %2568 = vmatpush.msrb.mxu1 %v2567_v12  ;;  %2717 = vmatpush.msrb.mxu3 %v10537_v0  ;;  %v10714_v17 = vsub.f32 %v424_v26, %v10684_v62  ;;  %v10754_v26 = vand.u32 4294901760, %v117_v8 }
 0x140   :  { %2529 = vmatpush.msrb.mxu0 %v10597_v22  ;;  %2672 = vmatpush.msrb.mxu2 %v10587_v14 }
 0x141   :  { %2574 = vmatpush.msrb.mxu1 %v2573_v57  ;;  %2719 = vmatpush.msrb.mxu3 %v10550_v5  ;;  %v2550_v12 = vand.u32 4294901760, %v10714_v17  ;;  %v2620_v57 = vsub.f32 %v10694_v28, %v16147_v39  ;;  %16440 = vst [vmem:[#allocation5_spill] sm:$0xff] %v10754_v26  ;;  %v144_v39 = vld [vmem:[%s16074_s1 + $0x3d8] sm:$0xff] }
 0x142   :  { %2531 = vmatpush.msrb.mxu0 %v10613_v61  ;;  %2675 = vmatpush.msrb.mxu2 %v10603_v3  ;;  %v10810_v27 = vand.u32 4294901760, %v144_v39 }
 0x143   :  { %2580 = vmatpush.msrb.mxu1 %v2579_v21  ;;  %2721 = vmatpush.msrb.mxu3 %v10561_v18  ;;  %v146_v21 = vld [vmem:[%s16074_s1 + $0x3e8] sm:$0xff]  ;;  %v2551_v44 = vsub.f32 %v10714_v17, %v2550_v12  ;;  %v2621_v47 = vand.u32 4294901760, %v2620_v57  ;;  %v2627_v57 = vand.u32 4294901760, %v2626_v31 }
 0x144   :  { %2533 = vmatpush.msrb.mxu0 %v10627_v2  ;;  %2678 = vmatpush.msrb.mxu2 %v10630_v48  ;;  %v10790_v58 = vand.u32 4294901760, %v146_v21 }
 0x145   :  { %2586 = vmatpush.msrb.mxu1 %v2585_v56  ;;  %2723 = vmatpush.msrb.mxu3 %v10572_v38  ;;  %v2615_v56 = vand.u32 4294901760, %v2614_v10  ;;  %v10788_v10 = vsub.f32 %v117_v8, %v10754_v26  ;;  %v2638_v8 = vsub.f32 %v10740_v40, %v16152_v35  ;;  %v2552_v33 = vand.u32 4294901760, %v2551_v44 }
 0x146   :  { %2535 = vmatpush.msrb.mxu0 %v10643_v51  ;;  %2681 = vmatpush.msrb.mxu2 %v10646_v24  ;;  %v10818_v35 = vsub.f32 %v146_v21, %v10790_v58 }
 0x147   :  { %2592 = vmatpush.msrb.mxu1 %v2591_v63  ;;  %2725 = vmatpush.msrb.mxu3 %v10597_v22  ;;  %v10770_v63 = vand.u32 4294901760, %v147_v46  ;;  %v2639_v21 = vand.u32 4294901760, %v2638_v8 }
 0x148   :  { %2537 = vmatpush.msrb.mxu0 %v10658_v1  ;;  %2684 = vmatpush.msrb.mxu2 %v10662_v9  ;;  %v16160_v8 = vand.u32 4294901760, %v10818_v35 }
 0x149   :  { %2598 = vmatpush.msrb.mxu1 %v2597_v32  ;;  %2727 = vmatpush.msrb.mxu3 %v10613_v61  ;;  %v10781_v32 = vsub.f32 %v148_v23, %v10745_v6  ;;  %v16155_v23 = vand.u32 4294901760, %v10760_v50 }
 0x14a   :  { %2539 = vmatpush.msrb.mxu0 %v10673_v25  ;;  %2687 = vmatpush.msrb.mxu2 %v10677_v41 }
 0x14b   :  { %2604 = vmatpush.msrb.mxu1 %v2603_v55  ;;  %2729 = vmatpush.msrb.mxu3 %v10627_v2  ;;  %v2632_v55 = vsub.f32 %v10722_v4, %v16148_v20  ;;  %v10805_v20 = vsub.f32 %v147_v46, %v10770_v63  ;;  %v16157_v19 = vand.u32 4294901760, %v10781_v32  ;;  %v16158_v46 = vand.u32 4294901760, %v10788_v10 }
 0x14c   :  { %2541 = vmatpush.msrb.mxu0 %v10690_v36  ;;  %2690 = vmatpush.msrb.mxu2 %v10694_v28  ;;  %v2644_v44 = vsub.f32 %v10760_v50, %v16155_v23  ;;  %v10840_v23 = vsub.f32 %v144_v39, %v10810_v27 }
 0x14d   :  { %2610 = vmatpush.msrb.mxu1 %v2609_v7  ;;  %2731 = vmatpush.msrb.mxu3 %v10643_v51  ;;  %v10798_v7 = vand.u32 4294901760, %v145_v42  ;;  %v2633_v31 = vand.u32 4294901760, %v2632_v55  ;;  %v16161_v55 = vand.u32 4294901760, %v10805_v20 }
 0x14e   :  { %2543 = vmatpush.msrb.mxu0 %v10702_v54  ;;  %2693 = vmatpush.msrb.mxu2 %v10706_v29  ;;  %v2645_v39 = vand.u32 4294901760, %v2644_v44 }
 0x14f   :  { %2616 = vmatpush.msrb.mxu1 %v2615_v56  ;;  %2733 = vmatpush.msrb.mxu3 %v10658_v1  ;;  %v143_v56 = vld [vmem:[%s16074_s1 + $0x3d0] sm:$0xff]  ;;  %v10826_v49 = vsub.f32 %v145_v42, %v10798_v7  ;;  %v2901_v42 = vsub.f32 %v10781_v32, %v16157_v19 }
 0x150   :  { %2545 = vmatpush.msrb.mxu0 %v10729_v59  ;;  %2696 = vmatpush.msrb.mxu2 %v10722_v4  ;;  %v10833_v13 = vand.u32 4294901760, %v143_v56 }
 0x151   :  { %2622 = vmatpush.msrb.mxu1 %v2621_v47  ;;  %2735 = vmatpush.msrb.mxu3 %v10673_v25  ;;  %v142_v47 = vld [vmem:[%s16074_s1 + $0x3c8] sm:$0xff]  ;;  %v16162_v19 = vand.u32 4294901760, %v10826_v49  ;;  %v2902_v44 = vand.u32 4294901760, %v2901_v42  ;;  %v10884_v42 = vand.u32 4294901760, %v140_v16 }
 0x152   :  { %2547 = vmatpush.msrb.mxu0 %v10754_v26  ;;  %2699 = vmatpush.msrb.mxu2 %v10740_v40  ;;  %v10851_v15 = vand.u32 4294901760, %v142_v47 }
 0x153   :  { %2628 = vmatpush.msrb.mxu1 %v2627_v57  ;;  %2737 = vmatpush.msrb.mxu3 %v10690_v36  ;;  %v141_v57 = vld [vmem:[%s16074_s1 + $0x3c0] sm:$0xff]  ;;  %v2919_v53 = vsub.f32 %v10826_v49, %v16162_v19 }
 0x154   :  { %2553 = vmatmul.f32.vlgmr.msrb.gmra.mxu0 %v2552_v33  ;;  %2702 = vmatpush.msrb.mxu2 %v10760_v50  ;;  %v2650_v33 = vsub.f32 %v10788_v10, %v16158_v46  ;;  %v10867_v46 = vand.u32 4294901760, %v141_v57 }
 0x155   :  { %2754 = vmatpush.msra.mxu0 %v2559_v45  ;;  %2634 = vmatpush.msrb.mxu1 %v2633_v31  ;;  %v2907_v45 = vsub.f32 %v10805_v20, %v16161_v55  ;;  %v10865_v31 = vsub.f32 %v143_v56, %v10833_v13  ;;  %v2913_v56 = vsub.f32 %v10818_v35, %v16160_v8  ;;  %v10896_v8 = vld.sshfl [vmem:[#allocation1 + $0x38] sm:$0xff pattern:$0x73625140] }
 0x156   :  { %2739 = vmatpush.msrb.mxu3 %v10702_v54  ;;  %2705 = vmatpush.msrb.mxu2 %v10788_v10  ;;  %v10904_v19 = vsub.f32 %v141_v57, %v10867_v46 }
 0x157   :  { %2758 = vmatpush.msra.mxu0 %v2565_v37  ;;  %2640 = vmatpush.msrb.mxu1 %v2639_v21  ;;  %v2651_v37 = vand.u32 4294901760, %v2650_v33  ;;  %v10882_v21 = vsub.f32 %v142_v47, %v10851_v15  ;;  %v18_v33 = vld [vmem:[%s16073_s0 + $0x18] sm:$0xff]  ;;  %v16441_v47 = vand.u32 4294901760, %v10581_v30  ;;  %v16164_v55 = vand.u32 4294901760, %v10865_v31  ;;  %v137_v30 = vld [vmem:[%s16074_s1 + $0x3a0] sm:$0xff] }
 0x158   :  { %2741 = vmatpush.msrb.mxu3 %v10729_v59  ;;  %2708 = vmatmul.f32.vlgmr.msrb.gmra.mxu2 %v10714_v17  ;;  %427 = vst [vmem:[#allocation1 + $0x20] ss:$4 sm:$0xff] %v18_v33  ;;  %v2914_v57 = vand.u32 4294901760, %v2913_v56  ;;  %v10919_v33 = vsub.f32 %v140_v16, %v10884_v42  ;;  %v16165_v16 = vand.u32 4294901760, %v10904_v19  ;;  %v10936_v56 = vand.u32 4294901760, %v137_v30 }
 0x159   :  { %2762 = vmatpush.msra.mxu0 %v2571_v11  ;;  %2858 = vmatpush.msra.mxu2 %v10745_v6  ;;  %v138_v11 = vld [vmem:[%s16074_s1 + $0x3a8] sm:$0xff] }
 0x15a   :  { %2646 = vmatpush.msrb.mxu1 %v2645_v39  ;;  %2743 = vmatpush.msrb.mxu3 %v10754_v26  ;;  %v2908_v39 = vand.u32 4294901760, %v2907_v45  ;;  %v16442_v26 = vand.u32 4294901760, %v10840_v23  ;;  %v16167_v45 = vand.u32 4294901760, %v10882_v21 }
 0x15b   :  { %2747 = vmatmul.f32.vlgmr.msrb.gmra.mxu3 %v2550_v12  ;;  %2766 = vmatpush.msra.mxu0 %v16441_v47  ;;  %v16443_v12 = vand.u32 4294901760, %v10587_v14  ;;  %v10921_v47 = vand.u32 4294901760, %v138_v11  ;;  %v2931_v14 = vsub.f32 %v10865_v31, %v16164_v55 }
 0x15c   :  { %2860 = vmatpush.msra.mxu2 %v10770_v63  ;;  %2903 = vmatpush.msra.mxu3 %v2902_v44  ;;  %v2925_v17 = vsub.f32 %v10840_v23, %v16442_v26  ;;  %v2920_v26 = vand.u32 4294901760, %v2919_v53  ;;  %v136_v44 = vld [vmem:[%s16074_s1 + $0x398] sm:$0xff]  ;;  %v16444_v53 = vand.u32 4294901760, %v10603_v3  ;;  %v135_v3 = vld [vmem:[%s16074_s1 + $0x390] sm:$0xff] }
 0x15d   :  { %2652 = vmatpush.msrb.mxu1 %v2651_v37  ;;  %2770 = vmatpush.msra.mxu0 %v16443_v12  ;;  %v10934_v37 = vsub.f32 %v139_v52, %v10906_v34  ;;  %v10947_v52 = vsub.f32 %v138_v11, %v10921_v47  ;;  %v10949_v55 = vand.u32 4294901760, %v136_v44  ;;  %v2943_v11 = vsub.f32 %v10904_v19, %v16165_v16 }
 0x15e   :  { %2654 = vmatmul.f32.vlgmr.msrb.gmra.mxu1 %v10684_v62  ;;  %2862 = vmatpush.msra.mxu2 %v10790_v58  ;;  %v2926_v12 = vand.u32 4294901760, %v2925_v17  ;;  %v16445_v17 = vand.u32 4294901760, %v10630_v48  ;;  %v134_v48 = vld [vmem:[%s16074_s1 + $0x388] sm:$0xff] }
 0x15f   :  { %2821 = vmatpush.msra.mxu1 %v10517_v60  ;;  %2909 = vmatpush.msra.mxu3 %v2908_v39  ;;  %v2937_v60 = vsub.f32 %v10882_v21, %v16167_v45  ;;  %v16166_v39 = vand.u32 4294901760, %v10919_v33  ;;  %v10979_v16 = vsub.f32 %v136_v44, %v10949_v55 }
 0x160   :  { %2774 = vmatpush.msra.mxu0 %v16444_v53  ;;  %2864 = vmatpush.msra.mxu2 %v10798_v7  ;;  %v10963_v53 = vsub.f32 %v137_v30, %v10936_v56 }
 0x161   :  { %2823 = vmatpush.msra.mxu1 %v10527_v43  ;;  %2915 = vmatpush.msra.mxu3 %v2914_v57  ;;  %v2932_v43 = vand.u32 4294901760, %v2931_v14  ;;  %v2954_v57 = vand.u32 4294901760, %v10934_v37  ;;  %v2949_v30 = vsub.f32 %v10919_v33, %v16166_v39  ;;  %v2960_v14 = vand.u32 4294901760, %v10947_v52 }
 0x162   :  { %2778 = vmatpush.msra.mxu0 %v16445_v17  ;;  %2866 = vmatpush.msra.mxu2 %v10810_v27  ;;  %v16446_v17 = vand.u32 4294901760, %v10646_v24  ;;  %v133_v24 = vld [vmem:[%s16074_s1 + $0x380] sm:$0xff]  ;;  %v2966_v39 = vand.u32 4294901760, %v10963_v53 }
 0x163   :  { %2825 = vmatpush.msra.mxu1 %v10537_v0  ;;  %2921 = vmatpush.msra.mxu3 %v2920_v26  ;;  %v10971_v0 = vand.u32 4294901760, %v135_v3  ;;  %v2938_v26 = vand.u32 4294901760, %v2937_v60  ;;  %v2944_v60 = vand.u32 4294901760, %v2943_v11  ;;  %v2955_v44 = vsub.f32 %v10934_v37, %v2954_v57 }
 0x164   :  { %2782 = vmatpush.msra.mxu0 %v16446_v17  ;;  %2868 = vmatpush.msra.mxu2 %v10833_v13  ;;  %v16447_v17 = vand.u32 4294901760, %v10662_v9  ;;  %v16448_v9 = vand.u32 4294901760, %v10677_v41  ;;  %v11003_v45 = vand.u32 4294901760, %v133_v24  ;;  %v2972_v11 = vand.u32 4294901760, %v10979_v16 }
 0x165   :  { %2827 = vmatpush.msra.mxu1 %v10550_v5  ;;  %2927 = vmatpush.msra.mxu3 %v2926_v12  ;;  %v10987_v5 = vand.u32 4294901760, %v134_v48  ;;  %v10990_v12 = vand.u32 4294901760, %v10896_v8  ;;  %v16449_v41 = vand.u32 4294901760, %v10694_v28  ;;  %v16450_v28 = vand.u32 4294901760, %v10706_v29 }
 0x166   :  { %2786 = vmatpush.msra.mxu0 %v16447_v17  ;;  %2870 = vmatpush.msra.mxu2 %v10851_v15  ;;  %v11001_v17 = vsub.f32 %v135_v3, %v10971_v0 }
 0x167   :  { %2829 = vmatpush.msra.mxu1 %v10561_v18  ;;  %2933 = vmatpush.msra.mxu3 %v2932_v43  ;;  %v2950_v18 = vand.u32 4294901760, %v2949_v30  ;;  %v2961_v43 = vsub.f32 %v10947_v52, %v2960_v14  ;;  %v11014_v3 = vsub.f32 %v134_v48, %v10987_v5  ;;  %v11029_v30 = vsub.f32 %v133_v24, %v11003_v45 }
 0x168   :  { %2790 = vmatpush.msra.mxu0 %v16448_v9  ;;  %2872 = vmatpush.msra.mxu2 %v10867_v46  ;;  %v11018_v9 = vsub.f32 %v10896_v8, %v10990_v12  ;;  %v2978_v48 = vand.u32 4294901760, %v11001_v17  ;;  %v2973_v8 = vsub.f32 %v10979_v16, %v2972_v11 }
 0x169   :  { %2831 = vmatpush.msra.mxu1 %v10572_v38  ;;  %2939 = vmatpush.msra.mxu3 %v2938_v26  ;;  %v2956_v38 = vand.u32 4294901760, %v2955_v44  ;;  %v2967_v26 = vsub.f32 %v10963_v53, %v2966_v39  ;;  %v2984_v29 = vand.u32 4294901760, %v11014_v3 }
 0x16a   :  { %2794 = vmatpush.msra.mxu0 %v16449_v41  ;;  %2874 = vmatpush.msra.mxu2 %v10884_v42  ;;  %v2891_v44 = vand.u32 4294901760, %v11018_v9  ;;  %v16453_v41 = vand.u32 4294901760, %v10760_v50 }
 0x16b   :  { %2833 = vmatpush.msra.mxu1 %v10597_v22  ;;  %2945 = vmatpush.msra.mxu3 %v2944_v60  ;;  %v2962_v22 = vand.u32 4294901760, %v2961_v43  ;;  %v16451_v60 = vand.u32 4294901760, %v10722_v4  ;;  %v2968_v24 = vand.u32 4294901760, %v2967_v26  ;;  %v2979_v4 = vsub.f32 %v11001_v17, %v2978_v48 }
 0x16c   :  { %2798 = vmatpush.msra.mxu0 %v16450_v28  ;;  %2876 = vmatpush.msra.mxu2 %v10906_v34  ;;  %v2974_v43 = vand.u32 4294901760, %v2973_v8 }
 0x16d   :  { %2835 = vmatpush.msra.mxu1 %v10613_v61  ;;  %2951 = vmatpush.msra.mxu3 %v2950_v18  ;;  %v16452_v61 = vand.u32 4294901760, %v10740_v40  ;;  %v2990_v18 = vand.u32 4294901760, %v11029_v30  ;;  %v2892_v40 = vsub.f32 %v11018_v9, %v2891_v44  ;;  %v2980_v50 = vand.u32 4294901760, %v2979_v4 }
 0x16e   :  { %2802 = vmatpush.msra.mxu0 %v16451_v60  ;;  %2878 = vmatpush.msra.mxu2 %v10921_v47 }
 0x16f   :  { %2837 = vmatpush.msra.mxu1 %v10627_v2  ;;  %2957 = vmatpush.msra.mxu3 %v2956_v38  ;;  %v2985_v2 = vsub.f32 %v11014_v3, %v2984_v29  ;;  %v2991_v38 = vsub.f32 %v11029_v30, %v2990_v18 }
 0x170   :  { %2806 = vmatpush.msra.mxu0 %v16452_v61  ;;  %2880 = vmatpush.msra.mxu2 %v10936_v56 }
 0x171   :  { %2839 = vmatpush.msra.mxu1 %v10643_v51  ;;  %2963 = vmatpush.msra.mxu3 %v2962_v22  ;;  %v16454_v51 = vand.u32 4294901760, %v10788_v10  ;;  %v2986_v26 = vand.u32 4294901760, %v2985_v2  ;;  %v2992_v10 = vand.u32 4294901760, %v2991_v38 }
 0x172   :  { %2810 = vmatpush.msra.mxu0 %v16453_v41  ;;  %2882 = vmatpush.msra.mxu2 %v10949_v55 }
 0x173   :  { %2841 = vmatpush.msra.mxu1 %v10658_v1  ;;  %2969 = vmatpush.msra.mxu3 %v2968_v24  ;;  %v2893_v1 = vand.u32 4294901760, %v2892_v40 }
 0x174   :  { %2814 = vmatpush.msra.mxu0 %v16454_v51  ;;  %2884 = vmatpush.msra.mxu2 %v10971_v0 }
 0x175   :  { %2843 = vmatpush.msra.mxu1 %v10673_v25  ;;  %2975 = vmatpush.msra.mxu3 %v2974_v43  ;;  %v16455_v25 = vand.u32 4294901760, %v10781_v32  ;;  %v153_v43 = vld [vmem:[%s16074_s1 + $0x420] sm:$0xff] }
 0x176   :  { %2816 = vmatmul.f32.vlgmr.msra.gmra.mxu0 %v10684_v62  ;;  %2886 = vmatpush.msra.mxu2 %v10987_v5 }
 0x177   :  { %3001 = vmatpush.msrb.mxu0 %v10781_v32  ;;  %2845 = vmatpush.msra.mxu1 %v10690_v36  ;;  %v16456_v36 = vand.u32 4294901760, %v10805_v20  ;;  %v16458_v32 = vand.u32 4294901760, %v10818_v35 }
 0x178   :  { %2981 = vmatpush.msra.mxu3 %v2980_v50  ;;  %2888 = vmatpush.msra.mxu2 %v11003_v45  ;;  %v152_v50 = vld [vmem:[%s16074_s1 + $0x418] sm:$0xff] }
 0x179   :  { %3004 = vmatpush.msrb.mxu0 %v10805_v20  ;;  %2847 = vmatpush.msra.mxu1 %v10702_v54  ;;  %v16457_v54 = vld [vmem:[#allocation5_spill] sm:$0xff]  ;;  %v16464_v20 = vand.u32 4294901760, %v10919_v33 }
 0x17a   :  { %2987 = vmatpush.msra.mxu3 %v2986_v26  ;;  %2894 = vmatmul.f32.vlgmr.msra.gmra.mxu2 %v2893_v1  ;;  %v11286_v26 = vand.u32 4294901760, %v153_v43 }
 0x17b   :  { %3007 = vmatpush.msrb.mxu0 %v10818_v35  ;;  %3095 = vmatpush.msrb.mxu2 %v16455_v25 }
 0x17c   :  { %2849 = vmatpush.msra.mxu1 %v10729_v59  ;;  %2993 = vmatpush.msra.mxu3 %v2992_v10  ;;  %v16459_v59 = vand.u32 4294901760, %v10826_v49 }
 0x17d   :  { %2995 = vmatmul.f32.vlgmr.msra.gmra.mxu3 %v10990_v12  ;;  %3010 = vmatpush.msrb.mxu0 %v10826_v49  ;;  %v16462_v49 = vand.u32 4294901760, %v10882_v21 }
 0x17e   :  { %3099 = vmatpush.msrb.mxu2 %v16456_v36  ;;  %3162 = vmatpush.msrb.mxu3 %v10745_v6  ;;  %v151_v36 = vld [vmem:[%s16074_s1 + $0x410] sm:$0xff] }
 0x17f   :  { %2851 = vmatpush.msra.mxu1 %v16457_v54  ;;  %3013 = vmatpush.msrb.mxu0 %v10840_v23 }
 0x180   :  { %2853 = vmatmul.f32.vlgmr.msra.gmra.mxu1 %v10684_v62  ;;  %3103 = vmatpush.msrb.mxu2 %v16458_v32  ;;  %v16460_v62 = vand.u32 4294901760, %v10840_v23 }
 0x181   :  { %3054 = vmatpush.msrb.mxu1 %v10745_v6  ;;  %3164 = vmatpush.msrb.mxu3 %v10770_v63  ;;  %v16461_v6 = vand.u32 4294901760, %v10865_v31 }
 0x182   :  { %3016 = vmatpush.msrb.mxu0 %v10865_v31  ;;  %3107 = vmatpush.msrb.mxu2 %v16459_v59  ;;  %v11303_v59 = vand.u32 4294901760, %v152_v50 }
 0x183   :  { %3056 = vmatpush.msrb.mxu1 %v10770_v63  ;;  %3166 = vmatpush.msrb.mxu3 %v10790_v58  ;;  %v161_v63 = vld [vmem:[%s16074_s1 + $0x460] sm:$0xff] }
 0x184   :  { %3019 = vmatpush.msrb.mxu0 %v10882_v21  ;;  %3111 = vmatpush.msrb.mxu2 %v16460_v62  ;;  %v159_v21 = vld [vmem:[%s16074_s1 + $0x450] sm:$0xff] }
 0x185   :  { %3058 = vmatpush.msrb.mxu1 %v10790_v58  ;;  %3168 = vmatpush.msrb.mxu3 %v10798_v7  ;;  %v16463_v58 = vand.u32 4294901760, %v10904_v19 }
 0x186   :  { %3022 = vmatpush.msrb.mxu0 %v10904_v19  ;;  %3115 = vmatpush.msrb.mxu2 %v16461_v6 }
 0x187   :  { %3060 = vmatpush.msrb.mxu1 %v10798_v7  ;;  %3170 = vmatpush.msrb.mxu3 %v10810_v27 }
 0x188   :  { %3025 = vmatpush.msrb.mxu0 %v10919_v33  ;;  %3119 = vmatpush.msrb.mxu2 %v16462_v49 }
 0x189   :  { %3062 = vmatpush.msrb.mxu1 %v10810_v27  ;;  %3172 = vmatpush.msrb.mxu3 %v10833_v13  ;;  %v164_v27 = vld [vmem:[%s16074_s1 + $0x478] sm:$0xff] }
 0x18a   :  { %3028 = vmatpush.msrb.mxu0 %v10934_v37  ;;  %3123 = vmatpush.msrb.mxu2 %v16463_v58  ;;  %v11130_v19 = vand.u32 4294901760, %v164_v27  ;;  %v158_v37 = vld [vmem:[%s16074_s1 + $0x448] sm:$0xff] }
 0x18b   :  { %3064 = vmatpush.msrb.mxu1 %v10833_v13  ;;  %3174 = vmatpush.msrb.mxu3 %v10851_v15  ;;  %v163_v13 = vld [vmem:[%s16074_s1 + $0x470] sm:$0xff] }
 0x18c   :  { %3031 = vmatpush.msrb.mxu0 %v10947_v52  ;;  %3127 = vmatpush.msrb.mxu2 %v16464_v20  ;;  %v11140_v35 = vand.u32 4294901760, %v163_v13  ;;  %v11153_v7 = vsub.f32 %v164_v27, %v11130_v19  ;;  %v11315_v20 = vand.u32 4294901760, %v151_v36 }
 0x18d   :  { %3066 = vmatpush.msrb.mxu1 %v10851_v15  ;;  %3176 = vmatpush.msrb.mxu3 %v10867_v46  ;;  %v162_v15 = vld [vmem:[%s16074_s1 + $0x468] sm:$0xff] }
 0x18e   :  { %3034 = vmatpush.msrb.mxu0 %v10963_v53  ;;  %3131 = vmatpush.msrb.mxu2 %v2954_v57  ;;  %v11150_v23 = vand.u32 4294901760, %v162_v15  ;;  %v11166_v31 = vsub.f32 %v163_v13, %v11140_v35  ;;  %v3241_v33 = vand.u32 4294901760, %v11153_v7  ;;  %v157_v57 = vld [vmem:[%s16074_s1 + $0x440] sm:$0xff]  ;;  %v11210_v53 = vand.u32 4294901760, %v158_v37 }
 0x18f   :  { %3068 = vmatpush.msrb.mxu1 %v10867_v46  ;;  %3178 = vmatpush.msrb.mxu3 %v10884_v42  ;;  %v160_v46 = vld [vmem:[%s16074_s1 + $0x458] sm:$0xff]  ;;  %v11319_v13 = vsub.f32 %v153_v43, %v11286_v26 }
 0x190   :  { %3037 = vmatpush.msrb.mxu0 %v10979_v16  ;;  %3135 = vmatpush.msrb.mxu2 %v2960_v14  ;;  %v11185_v16 = vand.u32 4294901760, %v159_v21 }
 0x191   :  { %3070 = vmatpush.msrb.mxu1 %v10884_v42  ;;  %3180 = vmatpush.msrb.mxu3 %v10906_v34  ;;  %v11174_v42 = vand.u32 4294901760, %v160_v46 }
 0x192   :  { %3040 = vmatpush.msrb.mxu0 %v11001_v17  ;;  %3139 = vmatpush.msrb.mxu2 %v2966_v39  ;;  %v11216_v17 = vsub.f32 %v159_v21, %v11185_v16 }
 0x193   :  { %3072 = vmatpush.msrb.mxu1 %v10906_v34  ;;  %3182 = vmatpush.msrb.mxu3 %v10921_v47  ;;  %v11163_v34 = vand.u32 4294901760, %v161_v63  ;;  %v11200_v52 = vsub.f32 %v160_v46, %v11174_v42 }
 0x194   :  { %3043 = vmatpush.msrb.mxu0 %v11014_v3  ;;  %3143 = vmatpush.msrb.mxu2 %v2972_v11  ;;  %v156_v11 = vld [vmem:[%s16074_s1 + $0x438] sm:$0xff]  ;;  %v11226_v3 = vand.u32 4294901760, %v157_v57 }
 0x195   :  { %3074 = vmatpush.msrb.mxu1 %v10921_v47  ;;  %3184 = vmatpush.msrb.mxu3 %v10936_v56  ;;  %v11180_v47 = vsub.f32 %v162_v15, %v11150_v23  ;;  %v11194_v39 = vsub.f32 %v161_v63, %v11163_v34  ;;  %v11240_v60 = vand.u32 4294901760, %v156_v11  ;;  %v150_v15 = vld [vmem:[%s16074_s1 + $0x408] sm:$0xff] }
 0x196   :  { %3046 = vmatpush.msrb.mxu0 %v11029_v30  ;;  %3147 = vmatpush.msrb.mxu2 %v2978_v48  ;;  %v16178_v48 = vand.u32 4294901760, %v11200_v52  ;;  %v155_v30 = vld [vmem:[%s16074_s1 + $0x430] sm:$0xff] }
 0x197   :  { %3076 = vmatpush.msrb.mxu1 %v10936_v56  ;;  %3186 = vmatpush.msrb.mxu3 %v10949_v55  ;;  %v3247_v56 = vand.u32 4294901760, %v11166_v31  ;;  %v3253_v14 = vand.u32 4294901760, %v11180_v47  ;;  %v16181_v28 = vand.u32 4294901760, %v11194_v39  ;;  %v11256_v4 = vand.u32 4294901760, %v155_v30 }
 0x198   :  { %3049 = vmatmul.f32.vlgmr.msrb.gmra.mxu0 %v11018_v9  ;;  %3151 = vmatpush.msrb.mxu2 %v2984_v29  ;;  %v16176_v29 = vand.u32 4294901760, %v11216_v17  ;;  %v11275_v9 = vsub.f32 %v156_v11, %v11240_v60  ;;  %v11342_v11 = vand.u32 4294901760, %v150_v15 }
 0x199   :  { %3199 = vmatpush.msra.mxu0 %v11130_v19  ;;  %3078 = vmatpush.msrb.mxu1 %v10949_v55  ;;  %v3242_v55 = vsub.f32 %v11153_v7, %v3241_v33  ;;  %v3254_v8 = vsub.f32 %v11180_v47, %v3253_v14  ;;  %v3260_v61 = vsub.f32 %v11194_v39, %v16181_v28 }
 0x19a   :  { %3188 = vmatpush.msrb.mxu3 %v10971_v0  ;;  %3155 = vmatpush.msrb.mxu2 %v2990_v18  ;;  %v11259_v18 = vsub.f32 %v157_v57, %v11226_v3  ;;  %v3272_v51 = vsub.f32 %v11216_v17, %v16176_v29  ;;  %v11290_v10 = vsub.f32 %v155_v30, %v11256_v4  ;;  %v16172_v62 = vand.u32 4294901760, %v11275_v9 }
 0x19b   :  { %3201 = vmatpush.msra.mxu0 %v11140_v35  ;;  %3080 = vmatpush.msrb.mxu1 %v10971_v0  ;;  %v3248_v0 = vsub.f32 %v11166_v31, %v3247_v56  ;;  %v3243_v22 = vand.u32 4294901760, %v3242_v55  ;;  %v3255_v41 = vand.u32 4294901760, %v3254_v8  ;;  %v3261_v38 = vand.u32 4294901760, %v3260_v61  ;;  %v180_v55 = vld [vmem:[%s16074_s1 + $0x4f8] sm:$0xff] }
 0x19c   :  { %3190 = vmatpush.msrb.mxu3 %v10987_v5  ;;  %3157 = vmatmul.f32.vlgmr.msrb.gmra.mxu2 %v10990_v12  ;;  %v16173_v1 = vand.u32 4294901760, %v11259_v18  ;;  %v3273_v49 = vand.u32 4294901760, %v3272_v51  ;;  %v16171_v27 = vand.u32 4294901760, %v11290_v10  ;;  %v3290_v21 = vsub.f32 %v11275_v9, %v16172_v62 }
 0x19d   :  { %3203 = vmatpush.msra.mxu0 %v11150_v23  ;;  %3342 = vmatpush.msra.mxu2 %v11153_v7  ;;  %v3249_v24 = vand.u32 4294901760, %v3248_v0  ;;  %v11335_v57 = vsub.f32 %v152_v50, %v11303_v59  ;;  %v149_v0 = vld [vmem:[%s16074_s1 + $0x400] sm:$0xff]  ;;  %v16168_v8 = vand.u32 4294901760, %v11319_v13  ;;  %v11358_v61 = vand.u32 4294901760, %v180_v55  ;;  %v172_v7 = vld [vmem:[%s16074_s1 + $0x4b8] sm:$0xff] }
 0x19e   :  { %3082 = vmatpush.msrb.mxu1 %v10987_v5  ;;  %3192 = vmatpush.msrb.mxu3 %v11003_v45  ;;  %v11243_v5 = vsub.f32 %v158_v37, %v11210_v53  ;;  %v3284_v58 = vsub.f32 %v11259_v18, %v16173_v1  ;;  %v3291_v43 = vand.u32 4294901760, %v3290_v21  ;;  %v11373_v50 = vsub.f32 %v150_v15, %v11342_v11 }
 0x19f   :  { %3194 = vmatmul.f32.vlgmr.msrb.gmra.mxu3 %v10990_v12  ;;  %3205 = vmatpush.msra.mxu0 %v11163_v34  ;;  %v154_v12 = vld [vmem:[%s16074_s1 + $0x428] sm:$0xff]  ;;  %v16170_v51 = vand.u32 4294901760, %v11335_v57 }
 0x1a0   :  { %3345 = vmatpush.msra.mxu2 %v11166_v31  ;;  %3395 = vmatpush.msra.mxu3 %v11130_v19  ;;  %v11271_v2 = vand.u32 4294901760, %v154_v12  ;;  %v16175_v40 = vand.u32 4294901760, %v11243_v5  ;;  %v3285_v30 = vand.u32 4294901760, %v3284_v58  ;;  %v177_v58 = vld [vmem:[%s16074_s1 + $0x4e0] sm:$0xff]  ;;  %v171_v31 = vld [vmem:[%s16074_s1 + $0x4b0] sm:$0xff] }
 0x1a1   :  { %3084 = vmatpush.msrb.mxu1 %v11003_v45  ;;  %3207 = vmatpush.msra.mxu0 %v11174_v42  ;;  %v3266_v45 = vsub.f32 %v11200_v52, %v16178_v48 }
 0x1a2   :  { %3088 = vmatmul.f32.vlgmr.msrb.gmra.mxu1 %v2891_v44  ;;  %3348 = vmatpush.msra.mxu2 %v11180_v47  ;;  %v428_v44 = vld.sshfl [vmem:[#allocation1] sm:$0xff pattern:$0x73625140]  ;;  %v3278_v32 = vsub.f32 %v11243_v5, %v16175_v40  ;;  %v11307_v6 = vsub.f32 %v154_v12, %v11271_v2  ;;  %v11353_v12 = vsub.f32 %v151_v36, %v11315_v20 }
 0x1a3   :  { %3244 = vmatpush.msra.mxu1 %v3243_v22  ;;  %3397 = vmatpush.msra.mxu3 %v11140_v35  ;;  %v3267_v25 = vand.u32 4294901760, %v3266_v45  ;;  %v11297_v54 = vand.u32 4294901760, %v428_v44  ;;  %v3296_v22 = vsub.f32 %v11290_v10, %v16171_v27  ;;  %v179_v45 = vld [vmem:[%s16074_s1 + $0x4f0] sm:$0xff]  ;;  %v3308_v36 = vsub.f32 %v11319_v13, %v16168_v8 }
 0x1a4   :  { %3209 = vmatpush.msra.mxu0 %v11185_v16  ;;  %3351 = vmatpush.msra.mxu2 %v11194_v39  ;;  %v3279_v46 = vand.u32 4294901760, %v3278_v32  ;;  %v16169_v37 = vand.u32 4294901760, %v11307_v6  ;;  %v16174_v32 = vand.u32 4294901760, %v11353_v12 }
 0x1a5   :  { %3250 = vmatpush.msra.mxu1 %v3249_v24  ;;  %3399 = vmatpush.msra.mxu3 %v11150_v23  ;;  %v11327_v63 = vsub.f32 %v428_v44, %v11297_v54  ;;  %v11367_v44 = vand.u32 4294901760, %v149_v0 }
 0x1a6   :  { %3211 = vmatpush.msra.mxu0 %v11210_v53  ;;  %3354 = vmatpush.msra.mxu2 %v11200_v52 }
 0x1a7   :  { %3256 = vmatpush.msra.mxu1 %v3255_v41  ;;  %3401 = vmatpush.msra.mxu3 %v11163_v34  ;;  %v3232_v24 = vand.u32 4294901760, %v11327_v63  ;;  %v3302_v41 = vsub.f32 %v11307_v6, %v16169_v37  ;;  %v176_v37 = vld [vmem:[%s16074_s1 + $0x4d8] sm:$0xff] }
 0x1a8   :  { %3213 = vmatpush.msra.mxu0 %v11226_v3  ;;  %3357 = vmatpush.msra.mxu2 %v11216_v17  ;;  %v11423_v1 = vand.u32 4294901760, %v176_v37 }
 0x1a9   :  { %3262 = vmatpush.msra.mxu1 %v3261_v38  ;;  %3403 = vmatpush.msra.mxu3 %v11174_v42  ;;  %v178_v38 = vld [vmem:[%s16074_s1 + $0x4e8] sm:$0xff]  ;;  %v3233_v15 = vsub.f32 %v11327_v63, %v3232_v24  ;;  %v3303_v21 = vand.u32 4294901760, %v3302_v41  ;;  %v3309_v41 = vand.u32 4294901760, %v3308_v36 }
 0x1aa   :  { %3215 = vmatpush.msra.mxu0 %v11240_v60  ;;  %3360 = vmatpush.msra.mxu2 %v11243_v5  ;;  %v11403_v8 = vand.u32 4294901760, %v178_v38 }
 0x1ab   :  { %3268 = vmatpush.msra.mxu1 %v3267_v25  ;;  %3405 = vmatpush.msra.mxu3 %v11185_v16  ;;  %v3297_v25 = vand.u32 4294901760, %v3296_v22  ;;  %v11401_v22 = vsub.f32 %v149_v0, %v11367_v44  ;;  %v3320_v0 = vsub.f32 %v11353_v12, %v16174_v32  ;;  %v3234_v27 = vand.u32 4294901760, %v3233_v15 }
 0x1ac   :  { %3217 = vmatpush.msra.mxu0 %v11256_v4  ;;  %3363 = vmatpush.msra.mxu2 %v11259_v18  ;;  %v11431_v32 = vsub.f32 %v178_v38, %v11403_v8 }
 0x1ad   :  { %3274 = vmatpush.msra.mxu1 %v3273_v49  ;;  %3407 = vmatpush.msra.mxu3 %v11210_v53  ;;  %v11383_v49 = vand.u32 4294901760, %v179_v45  ;;  %v3321_v38 = vand.u32 4294901760, %v3320_v0 }
 0x1ae   :  { %3219 = vmatpush.msra.mxu0 %v11271_v2  ;;  %3366 = vmatpush.msra.mxu2 %v11275_v9  ;;  %v16182_v0 = vand.u32 4294901760, %v11431_v32 }
 0x1af   :  { %3280 = vmatpush.msra.mxu1 %v3279_v46  ;;  %3409 = vmatpush.msra.mxu3 %v11226_v3  ;;  %v11394_v46 = vsub.f32 %v180_v55, %v11358_v61  ;;  %v16177_v55 = vand.u32 4294901760, %v11373_v50 }
 0x1b0   :  { %3221 = vmatpush.msra.mxu0 %v11286_v26  ;;  %3369 = vmatpush.msra.mxu2 %v11290_v10 }
 0x1b1   :  { %3286 = vmatpush.msra.mxu1 %v3285_v30  ;;  %3411 = vmatpush.msra.mxu3 %v11240_v60  ;;  %v3314_v30 = vsub.f32 %v11335_v57, %v16170_v51  ;;  %v11418_v51 = vsub.f32 %v179_v45, %v11383_v49  ;;  %v16179_v62 = vand.u32 4294901760, %v11394_v46  ;;  %v16180_v45 = vand.u32 4294901760, %v11401_v22 }
 0x1b2   :  { %3223 = vmatpush.msra.mxu0 %v11303_v59  ;;  %3372 = vmatpush.msra.mxu2 %v11307_v6  ;;  %v3326_v15 = vsub.f32 %v11373_v50, %v16177_v55  ;;  %v11453_v55 = vsub.f32 %v176_v37, %v11423_v1 }
 0x1b3   :  { %3292 = vmatpush.msra.mxu1 %v3291_v43  ;;  %3413 = vmatpush.msra.mxu3 %v11256_v4  ;;  %v11411_v43 = vand.u32 4294901760, %v177_v58  ;;  %v3315_v36 = vand.u32 4294901760, %v3314_v30  ;;  %v16183_v30 = vand.u32 4294901760, %v11418_v51 }
 0x1b4   :  { %3225 = vmatpush.msra.mxu0 %v11315_v20  ;;  %3375 = vmatpush.msra.mxu2 %v11319_v13  ;;  %v3327_v37 = vand.u32 4294901760, %v3326_v15  ;;  %v16185_v28 = vand.u32 4294901760, %v11453_v55 }
 0x1b5   :  { %3298 = vmatpush.msra.mxu1 %v3297_v25  ;;  %3415 = vmatpush.msra.mxu3 %v11271_v2  ;;  %v175_v25 = vld [vmem:[%s16074_s1 + $0x4d0] sm:$0xff]  ;;  %v11439_v40 = vsub.f32 %v177_v58, %v11411_v43  ;;  %v3583_v58 = vsub.f32 %v11394_v46, %v16179_v62 }
 0x1b6   :  { %3227 = vmatpush.msra.mxu0 %v11342_v11  ;;  %3378 = vmatpush.msra.mxu2 %v11335_v57  ;;  %v11446_v29 = vand.u32 4294901760, %v175_v25 }
 0x1b7   :  { %3304 = vmatpush.msra.mxu1 %v3303_v21  ;;  %3417 = vmatpush.msra.mxu3 %v11286_v26  ;;  %v174_v21 = vld [vmem:[%s16074_s1 + $0x4c8] sm:$0xff]  ;;  %v16184_v62 = vand.u32 4294901760, %v11439_v40  ;;  %v3584_v15 = vand.u32 4294901760, %v3583_v58  ;;  %v11497_v58 = vand.u32 4294901760, %v172_v7 }
 0x1b8   :  { %3229 = vmatpush.msra.mxu0 %v11367_v44  ;;  %3381 = vmatpush.msra.mxu2 %v11353_v12  ;;  %v11464_v48 = vand.u32 4294901760, %v174_v21 }
 0x1b9   :  { %3310 = vmatpush.msra.mxu1 %v3309_v41  ;;  %3419 = vmatpush.msra.mxu3 %v11303_v59  ;;  %v173_v41 = vld [vmem:[%s16074_s1 + $0x4c0] sm:$0xff]  ;;  %v3601_v47 = vsub.f32 %v11439_v40, %v16184_v62  ;;  %v3607_v62 = vsub.f32 %v11453_v55, %v16185_v28 }
 0x1ba   :  { %3235 = vmatmul.f32.vlgmr.msra.gmra.mxu0 %v3234_v27  ;;  %3384 = vmatpush.msra.mxu2 %v11373_v50  ;;  %v3332_v27 = vsub.f32 %v11401_v22, %v16180_v45  ;;  %v11480_v45 = vand.u32 4294901760, %v173_v41 }
 0x1bb   :  { %3436 = vmatpush.msrb.mxu0 %v3241_v33  ;;  %3316 = vmatpush.msra.mxu1 %v3315_v36  ;;  %v3589_v33 = vsub.f32 %v11418_v51, %v16183_v30  ;;  %v11478_v36 = vsub.f32 %v175_v25, %v11446_v29  ;;  %v3595_v25 = vsub.f32 %v11431_v32, %v16182_v0  ;;  %v11514_v30 = vand.u32 4294901760, %v171_v31 }
 0x1bc   :  { %3421 = vmatpush.msra.mxu3 %v11315_v20  ;;  %3387 = vmatpush.msra.mxu2 %v11401_v22  ;;  %v3608_v28 = vand.u32 4294901760, %v3607_v62  ;;  %v16468_v62 = vand.u32 4294901760, %v11243_v5  ;;  %v166_v5 = vld [vmem:[%s16074_s1 + $0x488] sm:$0xff] }
 0x1bd   :  { %3440 = vmatpush.msrb.mxu0 %v3247_v56  ;;  %3322 = vmatpush.msra.mxu1 %v3321_v38  ;;  %v3333_v56 = vand.u32 4294901760, %v3332_v27  ;;  %v11495_v38 = vsub.f32 %v174_v21, %v11464_v48  ;;  %v16465_v27 = vand.u32 4294901760, %v11194_v39  ;;  %v3590_v21 = vand.u32 4294901760, %v3589_v33  ;;  %v169_v39 = vld [vmem:[%s16074_s1 + $0x4a0] sm:$0xff] }
 0x1be   :  { %3423 = vmatpush.msra.mxu3 %v11342_v11  ;;  %3390 = vmatmul.f32.vlgmr.msra.gmra.mxu2 %v11327_v63  ;;  %v16186_v0 = vand.u32 4294901760, %v11478_v36  ;;  %v16466_v63 = vand.u32 4294901760, %v11200_v52  ;;  %v11527_v33 = vsub.f32 %v172_v7, %v11497_v58 }
 0x1bf   :  { %3444 = vmatpush.msrb.mxu0 %v3253_v14  ;;  %3540 = vmatpush.msrb.mxu2 %v11358_v61  ;;  %v170_v14 = vld [vmem:[%s16074_s1 + $0x4a8] sm:$0xff] }
 0x1c0   :  { %3328 = vmatpush.msra.mxu1 %v3327_v37  ;;  %3425 = vmatpush.msra.mxu3 %v11367_v44  ;;  %v11512_v37 = vsub.f32 %v173_v41, %v11480_v45  ;;  %v16187_v41 = vand.u32 4294901760, %v11495_v38  ;;  %v3613_v52 = vsub.f32 %v11478_v36, %v16186_v0 }
 0x1c1   :  { %3429 = vmatmul.f32.vlgmr.msra.gmra.mxu3 %v3232_v24  ;;  %3448 = vmatpush.msrb.mxu0 %v16465_v27  ;;  %v3596_v24 = vand.u32 4294901760, %v3595_v25  ;;  %v11529_v27 = vand.u32 4294901760, %v170_v14  ;;  %v11542_v25 = vsub.f32 %v171_v31, %v11514_v30 }
 0x1c2   :  { %3542 = vmatpush.msrb.mxu2 %v11383_v49  ;;  %3585 = vmatpush.msrb.mxu3 %v3584_v15  ;;  %v3602_v15 = vand.u32 4294901760, %v3601_v47  ;;  %v16188_v7 = vand.u32 4294901760, %v11512_v37  ;;  %v16467_v47 = vand.u32 4294901760, %v11216_v17  ;;  %v167_v17 = vld [vmem:[%s16074_s1 + $0x490] sm:$0xff] }
 0x1c3   :  { %3334 = vmatpush.msra.mxu1 %v3333_v56  ;;  %3452 = vmatpush.msrb.mxu0 %v16466_v63  ;;  %v168_v56 = vld [vmem:[%s16074_s1 + $0x498] sm:$0xff]  ;;  %v11544_v63 = vand.u32 4294901760, %v169_v39  ;;  %v11555_v31 = vsub.f32 %v170_v14, %v11529_v27 }
 0x1c4   :  { %3336 = vmatmul.f32.vlgmr.msra.gmra.mxu1 %v11297_v54  ;;  %3544 = vmatpush.msrb.mxu2 %v11403_v8  ;;  %v11557_v0 = vand.u32 4294901760, %v168_v56  ;;  %v3625_v14 = vsub.f32 %v11512_v37, %v16188_v7 }
 0x1c5   :  { %3503 = vmatpush.msrb.mxu1 %v11130_v19  ;;  %3591 = vmatpush.msrb.mxu3 %v3590_v21  ;;  %v3619_v19 = vsub.f32 %v11495_v38, %v16187_v41  ;;  %v16189_v21 = vand.u32 4294901760, %v11527_v33  ;;  %v16469_v41 = vand.u32 4294901760, %v11259_v18  ;;  %v165_v18 = vld [vmem:[%s16074_s1 + $0x480] sm:$0xff] }
 0x1c6   :  { %3456 = vmatpush.msrb.mxu0 %v16467_v47  ;;  %3546 = vmatpush.msrb.mxu2 %v11411_v43  ;;  %v11571_v47 = vsub.f32 %v169_v39, %v11544_v63  ;;  %v11587_v7 = vsub.f32 %v168_v56, %v11557_v0 }
 0x1c7   :  { %3505 = vmatpush.msrb.mxu1 %v11140_v35  ;;  %3597 = vmatpush.msrb.mxu3 %v3596_v24  ;;  %v3614_v35 = vand.u32 4294901760, %v3613_v52  ;;  %v16190_v24 = vand.u32 4294901760, %v11542_v25  ;;  %v3631_v39 = vsub.f32 %v11527_v33, %v16189_v21  ;;  %v16471_v52 = vand.u32 4294901760, %v11290_v10 }
 0x1c8   :  { %3460 = vmatpush.msrb.mxu0 %v16468_v62  ;;  %3548 = vmatpush.msrb.mxu2 %v11423_v1  ;;  %v429_v62 = vld.sshfl [vmem:[#allocation1 + $0x8] sm:$0xff pattern:$0x73625140]  ;;  %v3648_v21 = vand.u32 4294901760, %v11571_v47  ;;  %v16473_v10 = vand.u32 4294901760, %v11307_v6 }
 0x1c9   :  { %3507 = vmatpush.msrb.mxu1 %v11150_v23  ;;  %3603 = vmatpush.msrb.mxu3 %v3602_v15  ;;  %v11579_v23 = vand.u32 4294901760, %v167_v17  ;;  %v3620_v15 = vand.u32 4294901760, %v3619_v19  ;;  %v3626_v19 = vand.u32 4294901760, %v3625_v14  ;;  %v3637_v56 = vsub.f32 %v11542_v25, %v16190_v24 }
 0x1ca   :  { %3464 = vmatpush.msrb.mxu0 %v16469_v41  ;;  %3550 = vmatpush.msrb.mxu2 %v11446_v29  ;;  %v16470_v41 = vand.u32 4294901760, %v11275_v9  ;;  %v3654_v24 = vand.u32 4294901760, %v11587_v7 }
 0x1cb   :  { %3509 = vmatpush.msrb.mxu1 %v11163_v34  ;;  %3609 = vmatpush.msrb.mxu3 %v3608_v28  ;;  %v11595_v34 = vand.u32 4294901760, %v166_v5  ;;  %v11597_v28 = vand.u32 4294901760, %v429_v62  ;;  %v11608_v9 = vsub.f32 %v167_v17, %v11579_v23 }
 0x1cc   :  { %3468 = vmatpush.msrb.mxu0 %v16470_v41  ;;  %3552 = vmatpush.msrb.mxu2 %v11464_v48  ;;  %v11610_v41 = vand.u32 4294901760, %v165_v18 }
 0x1cd   :  { %3511 = vmatpush.msrb.mxu1 %v11174_v42  ;;  %3615 = vmatpush.msrb.mxu3 %v3614_v35  ;;  %v3632_v42 = vand.u32 4294901760, %v3631_v39  ;;  %v16472_v35 = vand.u32 4294901760, %v11555_v31  ;;  %v11621_v17 = vsub.f32 %v166_v5, %v11595_v34  ;;  %v16474_v39 = vand.u32 4294901760, %v11319_v13 }
 0x1ce   :  { %3472 = vmatpush.msrb.mxu0 %v16471_v52  ;;  %3554 = vmatpush.msrb.mxu2 %v11480_v45  ;;  %v11624_v52 = vsub.f32 %v429_v62, %v11597_v28  ;;  %v3660_v6 = vand.u32 4294901760, %v11608_v9  ;;  %v11635_v5 = vsub.f32 %v165_v18, %v11610_v41  ;;  %v3655_v62 = vsub.f32 %v11587_v7, %v3654_v24 }
 0x1cf   :  { %3513 = vmatpush.msrb.mxu1 %v11185_v16  ;;  %3621 = vmatpush.msrb.mxu3 %v3620_v15  ;;  %v3643_v14 = vsub.f32 %v11555_v31, %v16472_v35  ;;  %v3638_v16 = vand.u32 4294901760, %v3637_v56  ;;  %v3649_v15 = vsub.f32 %v11571_v47, %v3648_v21  ;;  %v3666_v13 = vand.u32 4294901760, %v11621_v17 }
 0x1d0   :  { %3476 = vmatpush.msrb.mxu0 %v16473_v10  ;;  %3556 = vmatpush.msrb.mxu2 %v11497_v58  ;;  %v3573_v56 = vand.u32 4294901760, %v11624_v52  ;;  %v3656_v35 = vand.u32 4294901760, %v3655_v62 }
 0x1d1   :  { %3515 = vmatpush.msrb.mxu1 %v11210_v53  ;;  %3627 = vmatpush.msrb.mxu3 %v3626_v19  ;;  %v3644_v53 = vand.u32 4294901760, %v3643_v14  ;;  %v16475_v19 = vand.u32 4294901760, %v11335_v57  ;;  %v3650_v18 = vand.u32 4294901760, %v3649_v15  ;;  %v3661_v57 = vsub.f32 %v11608_v9, %v3660_v6  ;;  %v188_v15 = vld [vmem:[%s16074_s1 + $0x538] sm:$0xff] }
 0x1d2   :  { %3480 = vmatpush.msrb.mxu0 %v16474_v39  ;;  %3558 = vmatpush.msrb.mxu2 %v11514_v30  ;;  %v16477_v14 = vand.u32 4294901760, %v11373_v50 }
 0x1d3   :  { %3517 = vmatpush.msrb.mxu1 %v11226_v3  ;;  %3633 = vmatpush.msrb.mxu3 %v3632_v42  ;;  %v16476_v3 = vand.u32 4294901760, %v11353_v12  ;;  %v3672_v42 = vand.u32 4294901760, %v11635_v5  ;;  %v3574_v12 = vsub.f32 %v11624_v52, %v3573_v56  ;;  %v3662_v50 = vand.u32 4294901760, %v3661_v57 }
 0x1d4   :  { %3484 = vmatpush.msrb.mxu0 %v16475_v19  ;;  %3560 = vmatpush.msrb.mxu2 %v11529_v27 }
 0x1d5   :  { %3519 = vmatpush.msrb.mxu1 %v11240_v60  ;;  %3639 = vmatpush.msrb.mxu3 %v3638_v16  ;;  %v3667_v60 = vsub.f32 %v11621_v17, %v3666_v13  ;;  %v3673_v10 = vsub.f32 %v11635_v5, %v3672_v42 }
 0x1d6   :  { %3488 = vmatpush.msrb.mxu0 %v16476_v3  ;;  %3562 = vmatpush.msrb.mxu2 %v11544_v63 }
 0x1d7   :  { %3521 = vmatpush.msrb.mxu1 %v11256_v4  ;;  %3645 = vmatpush.msrb.mxu3 %v3644_v53  ;;  %v16478_v4 = vand.u32 4294901760, %v11401_v22  ;;  %v3668_v16 = vand.u32 4294901760, %v3667_v60  ;;  %v3674_v22 = vand.u32 4294901760, %v3673_v10  ;;  %v187_v53 = vld [vmem:[%s16074_s1 + $0x530] sm:$0xff]  ;;  %v184_v10 = vld [vmem:[%s16074_s1 + $0x518] sm:$0xff] }
 0x1d8   :  { %3492 = vmatpush.msrb.mxu0 %v16477_v14  ;;  %3564 = vmatpush.msrb.mxu2 %v11557_v0  ;;  %v185_v14 = vld [vmem:[%s16074_s1 + $0x520] sm:$0xff] }
 0x1d9   :  { %3523 = vmatpush.msrb.mxu1 %v11271_v2  ;;  %3651 = vmatpush.msrb.mxu3 %v3650_v18  ;;  %v3575_v2 = vand.u32 4294901760, %v3574_v12 }
 0x1da   :  { %3496 = vmatpush.msrb.mxu0 %v16478_v4  ;;  %3566 = vmatpush.msrb.mxu2 %v11579_v23 }
 0x1db   :  { %3525 = vmatpush.msrb.mxu1 %v11286_v26  ;;  %3657 = vmatpush.msrb.mxu3 %v3656_v35  ;;  %v16479_v26 = vand.u32 4294901760, %v11394_v46 }
 0x1dc   :  { %3498 = vmatmul.f32.vlgmr.msrb.gmra.mxu0 %v11297_v54  ;;  %3568 = vmatpush.msrb.mxu2 %v11595_v34 }
 0x1dd   :  { %3683 = vmatpush.msra.mxu0 %v11394_v46  ;;  %3527 = vmatpush.msrb.mxu1 %v11303_v59  ;;  %v16480_v59 = vand.u32 4294901760, %v11418_v51 }
 0x1de   :  { %3663 = vmatpush.msrb.mxu3 %v3662_v50  ;;  %3570 = vmatpush.msrb.mxu2 %v11610_v41 }
 0x1df   :  { %3686 = vmatpush.msra.mxu0 %v11418_v51  ;;  %3529 = vmatpush.msrb.mxu1 %v11315_v20  ;;  %v16481_v20 = vand.u32 4294901760, %v11431_v32  ;;  %v16488_v51 = vand.u32 4294901760, %v11542_v25 }
 0x1e0   :  { %3669 = vmatpush.msrb.mxu3 %v3668_v16  ;;  %3576 = vmatmul.f32.vlgmr.msrb.gmra.mxu2 %v3575_v2  ;;  %v11892_v2 = vand.u32 4294901760, %v185_v14 }
 0x1e1   :  { %3689 = vmatpush.msra.mxu0 %v11431_v32  ;;  %3777 = vmatpush.msra.mxu2 %v16479_v26 }
 0x1e2   :  { %3531 = vmatpush.msrb.mxu1 %v11342_v11  ;;  %3675 = vmatpush.msrb.mxu3 %v3674_v22  ;;  %v16482_v11 = vand.u32 4294901760, %v11439_v40 }
 0x1e3   :  { %3677 = vmatmul.f32.vlgmr.msrb.gmra.mxu3 %v11597_v28  ;;  %3692 = vmatpush.msra.mxu0 %v11439_v40  ;;  %v16485_v40 = vand.u32 4294901760, %v11495_v38 }
 0x1e4   :  { %3781 = vmatpush.msra.mxu2 %v16480_v59  ;;  %3844 = vmatpush.msra.mxu3 %v11358_v61 }
 0x1e5   :  { %3533 = vmatpush.msrb.mxu1 %v11367_v44  ;;  %3695 = vmatpush.msra.mxu0 %v11453_v55  ;;  %v16487_v44 = vand.u32 4294901760, %v11527_v33 }
 0x1e6   :  { %3535 = vmatmul.f32.vlgmr.msrb.gmra.mxu1 %v11297_v54  ;;  %3785 = vmatpush.msra.mxu2 %v16481_v20  ;;  %v16483_v54 = vand.u32 4294901760, %v11453_v55  ;;  %v193_v55 = vld [vmem:[%s16074_s1 + $0x560] sm:$0xff]  ;;  %v183_v20 = vld [vmem:[%s16074_s1 + $0x510] sm:$0xff] }
 0x1e7   :  { %3736 = vmatpush.msra.mxu1 %v11358_v61  ;;  %3846 = vmatpush.msra.mxu3 %v11383_v49  ;;  %v16484_v61 = vand.u32 4294901760, %v11478_v36 }
 0x1e8   :  { %3698 = vmatpush.msra.mxu0 %v11478_v36  ;;  %3789 = vmatpush.msra.mxu2 %v16482_v11  ;;  %v192_v36 = vld [vmem:[%s16074_s1 + $0x558] sm:$0xff] }
 0x1e9   :  { %3738 = vmatpush.msra.mxu1 %v11383_v49  ;;  %3848 = vmatpush.msra.mxu3 %v11403_v8  ;;  %v194_v49 = vld [vmem:[%s16074_s1 + $0x568] sm:$0xff] }
 0x1ea   :  { %3701 = vmatpush.msra.mxu0 %v11495_v38  ;;  %3793 = vmatpush.msra.mxu2 %v16483_v54 }
 0x1eb   :  { %3740 = vmatpush.msra.mxu1 %v11403_v8  ;;  %3850 = vmatpush.msra.mxu3 %v11411_v43  ;;  %v16486_v8 = vand.u32 4294901760, %v11512_v37 }
 0x1ec   :  { %3704 = vmatpush.msra.mxu0 %v11512_v37  ;;  %3797 = vmatpush.msra.mxu2 %v16484_v61  ;;  %v11780_v37 = vand.u32 4294901760, %v192_v36  ;;  %v11909_v61 = vand.u32 4294901760, %v184_v10 }
 0x1ed   :  { %3742 = vmatpush.msra.mxu1 %v11411_v43  ;;  %3852 = vmatpush.msra.mxu3 %v11423_v1  ;;  %v11756_v43 = vand.u32 4294901760, %v194_v49 }
 0x1ee   :  { %3707 = vmatpush.msra.mxu0 %v11527_v33  ;;  %3801 = vmatpush.msra.mxu2 %v16485_v40 }
 0x1ef   :  { %3744 = vmatpush.msra.mxu1 %v11423_v1  ;;  %3854 = vmatpush.msra.mxu3 %v11446_v29  ;;  %v196_v1 = vld [vmem:[%s16074_s1 + $0x578] sm:$0xff] }
 0x1f0   :  { %3710 = vmatpush.msra.mxu0 %v11542_v25  ;;  %3805 = vmatpush.msra.mxu2 %v16486_v8  ;;  %v11736_v32 = vand.u32 4294901760, %v196_v1  ;;  %v190_v25 = vld [vmem:[%s16074_s1 + $0x548] sm:$0xff] }
 0x1f1   :  { %3746 = vmatpush.msra.mxu1 %v11446_v29  ;;  %3856 = vmatpush.msra.mxu3 %v11464_v48  ;;  %v195_v29 = vld [vmem:[%s16074_s1 + $0x570] sm:$0xff] }
 0x1f2   :  { %3713 = vmatpush.msra.mxu0 %v11555_v31  ;;  %3809 = vmatpush.msra.mxu2 %v16487_v44  ;;  %v11746_v46 = vand.u32 4294901760, %v195_v29 }
 0x1f3   :  { %3748 = vmatpush.msra.mxu1 %v11464_v48  ;;  %3858 = vmatpush.msra.mxu3 %v11480_v45  ;;  %v16489_v48 = vand.u32 4294901760, %v11555_v31  ;;  %v11806_v31 = vsub.f32 %v192_v36, %v11780_v37 }
 0x1f4   :  { %3716 = vmatpush.msra.mxu0 %v11571_v47  ;;  %3813 = vmatpush.msra.mxu2 %v16488_v51  ;;  %v11772_v38 = vsub.f32 %v195_v29, %v11746_v46  ;;  %v11816_v47 = vand.u32 4294901760, %v190_v25  ;;  %v11921_v51 = vand.u32 4294901760, %v183_v20 }
 0x1f5   :  { %3750 = vmatpush.msra.mxu1 %v11480_v45  ;;  %3860 = vmatpush.msra.mxu3 %v11497_v58  ;;  %v11759_v45 = vsub.f32 %v196_v1, %v11736_v32 }
 0x1f6   :  { %3719 = vmatpush.msra.mxu0 %v11587_v7  ;;  %3817 = vmatpush.msra.mxu2 %v16489_v48  ;;  %v11925_v48 = vsub.f32 %v185_v14, %v11892_v2 }
 0x1f7   :  { %3752 = vmatpush.msra.mxu1 %v11497_v58  ;;  %3862 = vmatpush.msra.mxu3 %v11514_v30  ;;  %v191_v58 = vld [vmem:[%s16074_s1 + $0x550] sm:$0xff]  ;;  %v3923_v33 = vand.u32 4294901760, %v11759_v45 }
 0x1f8   :  { %3722 = vmatpush.msra.mxu0 %v11608_v9  ;;  %3821 = vmatpush.msra.mxu2 %v3648_v21  ;;  %v11791_v7 = vand.u32 4294901760, %v191_v58 }
 0x1f9   :  { %3754 = vmatpush.msra.mxu1 %v11514_v30  ;;  %3864 = vmatpush.msra.mxu3 %v11529_v27  ;;  %v11769_v30 = vand.u32 4294901760, %v193_v55 }
 0x1fa   :  { %3725 = vmatpush.msra.mxu0 %v11621_v17  ;;  %3825 = vmatpush.msra.mxu2 %v3654_v24  ;;  %v189_v24 = vld [vmem:[%s16074_s1 + $0x540] sm:$0xff]  ;;  %v11822_v17 = vsub.f32 %v191_v58, %v11791_v7 }
 0x1fb   :  { %3756 = vmatpush.msra.mxu1 %v11529_v27  ;;  %3866 = vmatpush.msra.mxu3 %v11544_v63  ;;  %v11786_v27 = vsub.f32 %v194_v49, %v11756_v43  ;;  %v11800_v21 = vsub.f32 %v193_v55, %v11769_v30  ;;  %v11832_v39 = vand.u32 4294901760, %v189_v24  ;;  %v182_v49 = vld [vmem:[%s16074_s1 + $0x508] sm:$0xff] }
 0x1fc   :  { %3728 = vmatpush.msra.mxu0 %v11635_v5  ;;  %3829 = vmatpush.msra.mxu2 %v3660_v6  ;;  %v16201_v5 = vand.u32 4294901760, %v11806_v31  ;;  %v16199_v18 = vand.u32 4294901760, %v11822_v17 }
 0x1fd   :  { %3758 = vmatpush.msra.mxu1 %v11544_v63  ;;  %3868 = vmatpush.msra.mxu3 %v11557_v0  ;;  %v3929_v63 = vand.u32 4294901760, %v11772_v38  ;;  %v3935_v9 = vand.u32 4294901760, %v11786_v27  ;;  %v16204_v6 = vand.u32 4294901760, %v11800_v21  ;;  %v11865_v35 = vsub.f32 %v189_v24, %v11832_v39 }
 0x1fe   :  { %3731 = vmatmul.f32.vlgmr.msra.gmra.mxu0 %v11624_v52  ;;  %3833 = vmatpush.msra.mxu2 %v3666_v13  ;;  %v11846_v13 = vand.u32 4294901760, %v188_v15  ;;  %v3954_v50 = vsub.f32 %v11822_v17, %v16199_v18  ;;  %v11941_v24 = vsub.f32 %v184_v10, %v11909_v61 }
 0x1ff   :  { %3881 = vmatpush.msrb.mxu0 %v11736_v32  ;;  %3760 = vmatpush.msra.mxu1 %v11557_v0  ;;  %v3924_v0 = vsub.f32 %v11759_v45, %v3923_v33  ;;  %v3936_v19 = vsub.f32 %v11786_v27, %v3935_v9  ;;  %v3942_v57 = vsub.f32 %v11800_v21, %v16204_v6  ;;  %v16196_v22 = vand.u32 4294901760, %v11865_v35 }
 0x200   :  { %3870 = vmatpush.msra.mxu3 %v11579_v23  ;;  %3837 = vmatpush.msra.mxu2 %v3672_v42  ;;  %v11862_v42 = vand.u32 4294901760, %v187_v53  ;;  %v11881_v52 = vsub.f32 %v188_v15, %v11846_v13  ;;  %v3955_v44 = vand.u32 4294901760, %v3954_v50  ;;  %v11948_v15 = vand.u32 4294901760, %v182_v49 }
 0x201   :  { %3883 = vmatpush.msrb.mxu0 %v11746_v46  ;;  %3762 = vmatpush.msra.mxu1 %v11579_v23  ;;  %v3930_v23 = vsub.f32 %v11772_v38, %v3929_v63  ;;  %v3925_v62 = vand.u32 4294901760, %v3924_v0  ;;  %v3937_v60 = vand.u32 4294901760, %v3936_v19  ;;  %v3943_v16 = vand.u32 4294901760, %v3942_v57  ;;  %v212_v0 = vld [vmem:[%s16074_s1 + $0x5f8] sm:$0xff] }
 0x202   :  { %3872 = vmatpush.msra.mxu3 %v11595_v34  ;;  %3839 = vmatmul.f32.vlgmr.msra.gmra.mxu2 %v11597_v28  ;;  %v11896_v26 = vsub.f32 %v187_v53, %v11862_v42  ;;  %v16195_v40 = vand.u32 4294901760, %v11881_v52  ;;  %v3966_v1 = vsub.f32 %v11865_v35, %v16196_v22  ;;  %v16191_v19 = vand.u32 4294901760, %v11925_v48 }
 0x203   :  { %3885 = vmatpush.msrb.mxu0 %v11756_v43  ;;  %4024 = vmatpush.msrb.mxu2 %v11759_v45  ;;  %v3931_v3 = vand.u32 4294901760, %v3930_v23  ;;  %v181_v23 = vld [vmem:[%s16074_s1 + $0x500] sm:$0xff]  ;;  %v11964_v57 = vand.u32 4294901760, %v212_v0  ;;  %v16193_v50 = vand.u32 4294901760, %v11941_v24  ;;  %v11979_v10 = vsub.f32 %v182_v49, %v11948_v15  ;;  %v204_v45 = vld [vmem:[%s16074_s1 + $0x5b8] sm:$0xff] }
 0x204   :  { %3764 = vmatpush.msra.mxu1 %v11595_v34  ;;  %3874 = vmatpush.msra.mxu3 %v11610_v41  ;;  %v11849_v34 = vsub.f32 %v190_v25, %v11816_v47  ;;  %v16194_v29 = vand.u32 4294901760, %v11896_v26  ;;  %v3972_v58 = vsub.f32 %v11881_v52, %v16195_v40  ;;  %v3967_v53 = vand.u32 4294901760, %v3966_v1  ;;  %v209_v1 = vld [vmem:[%s16074_s1 + $0x5e0] sm:$0xff] }
 0x205   :  { %3876 = vmatmul.f32.vlgmr.msra.gmra.mxu3 %v11597_v28  ;;  %3887 = vmatpush.msrb.mxu0 %v11769_v30  ;;  %v186_v28 = vld [vmem:[%s16074_s1 + $0x528] sm:$0xff] }
 0x206   :  { %4027 = vmatpush.msrb.mxu2 %v11772_v38  ;;  %4077 = vmatpush.msrb.mxu3 %v11736_v32  ;;  %v11877_v12 = vand.u32 4294901760, %v186_v28  ;;  %v16198_v4 = vand.u32 4294901760, %v11849_v34  ;;  %v3973_v14 = vand.u32 4294901760, %v3972_v58  ;;  %v203_v38 = vld [vmem:[%s16074_s1 + $0x5b0] sm:$0xff] }
 0x207   :  { %3766 = vmatpush.msra.mxu1 %v11610_v41  ;;  %3889 = vmatpush.msrb.mxu0 %v11780_v37  ;;  %v3948_v41 = vsub.f32 %v11806_v31, %v16201_v5  ;;  %v12125_v6 = vand.u32 4294901760, %v203_v38 }
 0x208   :  { %3770 = vmatmul.f32.vlgmr.msra.gmra.mxu1 %v3573_v56  ;;  %4030 = vmatpush.msrb.mxu2 %v11786_v27  ;;  %v430_v56 = vld.sshfl [vmem:[#allocation1 + $0x10] sm:$0xff pattern:$0x73625140]  ;;  %v3960_v54 = vsub.f32 %v11849_v34, %v16198_v4  ;;  %v11913_v8 = vsub.f32 %v186_v28, %v11877_v12  ;;  %v11959_v28 = vsub.f32 %v183_v20, %v11921_v51 }
 0x209   :  { %3926 = vmatpush.msrb.mxu1 %v3925_v62  ;;  %4079 = vmatpush.msrb.mxu3 %v11746_v46  ;;  %v3949_v59 = vand.u32 4294901760, %v3948_v41  ;;  %v11903_v11 = vand.u32 4294901760, %v430_v56  ;;  %v3978_v62 = vsub.f32 %v11896_v26, %v16194_v29  ;;  %v211_v41 = vld [vmem:[%s16074_s1 + $0x5f0] sm:$0xff]  ;;  %v3990_v20 = vsub.f32 %v11925_v48, %v16191_v19 }
 0x20a   :  { %3891 = vmatpush.msrb.mxu0 %v11791_v7  ;;  %4033 = vmatpush.msrb.mxu2 %v11800_v21  ;;  %v3961_v36 = vand.u32 4294901760, %v3960_v54  ;;  %v16192_v25 = vand.u32 4294901760, %v11913_v8  ;;  %v16197_v54 = vand.u32 4294901760, %v11959_v28 }
 0x20b   :  { %3932 = vmatpush.msrb.mxu1 %v3931_v3  ;;  %4081 = vmatpush.msrb.mxu3 %v11756_v43  ;;  %v11933_v55 = vsub.f32 %v430_v56, %v11903_v11  ;;  %v11973_v56 = vand.u32 4294901760, %v181_v23 }
 0x20c   :  { %3893 = vmatpush.msrb.mxu0 %v11816_v47  ;;  %4036 = vmatpush.msrb.mxu2 %v11806_v31 }
 0x20d   :  { %3938 = vmatpush.msrb.mxu1 %v3937_v60  ;;  %4083 = vmatpush.msrb.mxu3 %v11769_v30  ;;  %v3914_v3 = vand.u32 4294901760, %v11933_v55  ;;  %v3984_v60 = vsub.f32 %v11913_v8, %v16192_v25  ;;  %16490 = vst [vmem:[#allocation5_spill] sm:$0xff] %v11973_v56  ;;  %v208_v25 = vld [vmem:[%s16074_s1 + $0x5d8] sm:$0xff] }
 0x20e   :  { %3895 = vmatpush.msrb.mxu0 %v11832_v39  ;;  %4039 = vmatpush.msrb.mxu2 %v11822_v17  ;;  %v12029_v22 = vand.u32 4294901760, %v208_v25 }
 0x20f   :  { %3944 = vmatpush.msrb.mxu1 %v3943_v16  ;;  %4085 = vmatpush.msrb.mxu3 %v11780_v37  ;;  %v210_v16 = vld [vmem:[%s16074_s1 + $0x5e8] sm:$0xff]  ;;  %v3915_v49 = vsub.f32 %v11933_v55, %v3914_v3  ;;  %v3985_v58 = vand.u32 4294901760, %v3984_v60  ;;  %v3991_v60 = vand.u32 4294901760, %v3990_v20 }
 0x210   :  { %3897 = vmatpush.msrb.mxu0 %v11846_v13  ;;  %4042 = vmatpush.msrb.mxu2 %v11849_v34  ;;  %v12009_v19 = vand.u32 4294901760, %v210_v16 }
 0x211   :  { %3950 = vmatpush.msrb.mxu1 %v3949_v59  ;;  %4087 = vmatpush.msrb.mxu3 %v11791_v7  ;;  %v3979_v59 = vand.u32 4294901760, %v3978_v62  ;;  %v12007_v62 = vsub.f32 %v181_v23, %v11973_v56  ;;  %v4002_v23 = vsub.f32 %v11959_v28, %v16197_v54  ;;  %v3916_v29 = vand.u32 4294901760, %v3915_v49 }
 0x212   :  { %3899 = vmatpush.msrb.mxu0 %v11862_v42  ;;  %4045 = vmatpush.msrb.mxu2 %v11865_v35  ;;  %v12037_v54 = vsub.f32 %v210_v16, %v12009_v19 }
 0x213   :  { %3956 = vmatpush.msrb.mxu1 %v3955_v44  ;;  %4089 = vmatpush.msrb.mxu3 %v11816_v47  ;;  %v11989_v44 = vand.u32 4294901760, %v211_v41  ;;  %v4003_v16 = vand.u32 4294901760, %v4002_v23 }
 0x214   :  { %3901 = vmatpush.msrb.mxu0 %v11877_v12  ;;  %4048 = vmatpush.msrb.mxu2 %v11881_v52  ;;  %v16205_v23 = vand.u32 4294901760, %v12037_v54 }
 0x215   :  { %3962 = vmatpush.msrb.mxu1 %v3961_v36  ;;  %4091 = vmatpush.msrb.mxu3 %v11832_v39  ;;  %v12000_v36 = vsub.f32 %v212_v0, %v11964_v57  ;;  %v16200_v0 = vand.u32 4294901760, %v11979_v10 }
 0x216   :  { %3903 = vmatpush.msrb.mxu0 %v11892_v2  ;;  %4051 = vmatpush.msrb.mxu2 %v11896_v26 }
 0x217   :  { %3968 = vmatpush.msrb.mxu1 %v3967_v53  ;;  %4093 = vmatpush.msrb.mxu3 %v11846_v13  ;;  %v3996_v53 = vsub.f32 %v11941_v24, %v16193_v50  ;;  %v12024_v50 = vsub.f32 %v211_v41, %v11989_v44  ;;  %v16202_v40 = vand.u32 4294901760, %v12000_v36  ;;  %v16203_v41 = vand.u32 4294901760, %v12007_v62 }
 0x218   :  { %3905 = vmatpush.msrb.mxu0 %v11909_v61  ;;  %4054 = vmatpush.msrb.mxu2 %v11913_v8  ;;  %v4008_v49 = vsub.f32 %v11979_v10, %v16200_v0  ;;  %v12059_v0 = vsub.f32 %v208_v25, %v12029_v22 }
 0x219   :  { %3974 = vmatpush.msrb.mxu1 %v3973_v14  ;;  %4095 = vmatpush.msrb.mxu3 %v11862_v42  ;;  %v12017_v14 = vand.u32 4294901760, %v209_v1  ;;  %v3997_v20 = vand.u32 4294901760, %v3996_v53  ;;  %v16206_v53 = vand.u32 4294901760, %v12024_v50 }
 0x21a   :  { %3907 = vmatpush.msrb.mxu0 %v11921_v51  ;;  %4057 = vmatpush.msrb.mxu2 %v11925_v48  ;;  %v4009_v25 = vand.u32 4294901760, %v4008_v49 }
 0x21b   :  { %3980 = vmatpush.msrb.mxu1 %v3979_v59  ;;  %4097 = vmatpush.msrb.mxu3 %v11877_v12  ;;  %v207_v59 = vld [vmem:[%s16074_s1 + $0x5d0] sm:$0xff]  ;;  %v12045_v4 = vsub.f32 %v209_v1, %v12017_v14  ;;  %v4265_v1 = vsub.f32 %v12000_v36, %v16202_v40 }
 0x21c   :  { %3909 = vmatpush.msrb.mxu0 %v11948_v15  ;;  %4060 = vmatpush.msrb.mxu2 %v11941_v24  ;;  %v12052_v18 = vand.u32 4294901760, %v207_v59 }
 0x21d   :  { %3986 = vmatpush.msrb.mxu1 %v3985_v58  ;;  %4099 = vmatpush.msrb.mxu3 %v11892_v2  ;;  %v206_v58 = vld [vmem:[%s16074_s1 + $0x5c8] sm:$0xff]  ;;  %v16207_v40 = vand.u32 4294901760, %v12045_v4  ;;  %v4266_v49 = vand.u32 4294901760, %v4265_v1  ;;  %v12103_v1 = vand.u32 4294901760, %v204_v45 }
 0x21e   :  { %3911 = vmatpush.msrb.mxu0 %v11973_v56  ;;  %4063 = vmatpush.msrb.mxu2 %v11959_v28  ;;  %v12070_v5 = vand.u32 4294901760, %v206_v58 }
 0x21f   :  { %3992 = vmatpush.msrb.mxu1 %v3991_v60  ;;  %4101 = vmatpush.msrb.mxu3 %v11909_v61  ;;  %v205_v60 = vld [vmem:[%s16074_s1 + $0x5c0] sm:$0xff]  ;;  %v4283_v27 = vsub.f32 %v12045_v4, %v16207_v40 }
 0x220   :  { %3917 = vmatmul.f32.vlgmr.msrb.gmra.mxu0 %v3916_v29  ;;  %4066 = vmatpush.msrb.mxu2 %v11979_v10  ;;  %v4014_v29 = vsub.f32 %v12007_v62, %v16203_v41  ;;  %v12086_v41 = vand.u32 4294901760, %v205_v60 }
 0x221   :  { %4118 = vmatpush.msra.mxu0 %v3923_v33  ;;  %3998 = vmatpush.msrb.mxu1 %v3997_v20  ;;  %v4271_v33 = vsub.f32 %v12024_v50, %v16206_v53  ;;  %v12084_v20 = vsub.f32 %v207_v59, %v12052_v18  ;;  %v4277_v59 = vsub.f32 %v12037_v54, %v16205_v23  ;;  %v12115_v23 = vld.sshfl [vmem:[#allocation1 + $0x18] sm:$0xff pattern:$0x73625140] }
 0x222   :  { %4103 = vmatpush.msrb.mxu3 %v11921_v51  ;;  %4069 = vmatpush.msrb.mxu2 %v12007_v62  ;;  %v12123_v40 = vsub.f32 %v205_v60, %v12086_v41 }
 0x223   :  { %4122 = vmatpush.msra.mxu0 %v3929_v63  ;;  %4004 = vmatpush.msrb.mxu1 %v4003_v16  ;;  %v4015_v63 = vand.u32 4294901760, %v4014_v29  ;;  %v12101_v16 = vsub.f32 %v206_v58, %v12070_v5  ;;  %v19_v29 = vld [vmem:[%s16073_s0 + $0x20] sm:$0xff]  ;;  %v16491_v58 = vand.u32 4294901760, %v11800_v21  ;;  %v16209_v53 = vand.u32 4294901760, %v12084_v20 }
 0x224   :  { %4105 = vmatpush.msrb.mxu3 %v11948_v15  ;;  %4072 = vmatmul.f32.vlgmr.msrb.gmra.mxu2 %v11933_v55  ;;  %436 = vst [vmem:[#allocation1] ss:$4 sm:$0xff] %v19_v29  ;;  %v201_v21 = vld [vmem:[%s16074_s1 + $0x5a0] sm:$0xff]  ;;  %v4278_v60 = vand.u32 4294901760, %v4277_v59  ;;  %v12138_v29 = vsub.f32 %v204_v45, %v12103_v1  ;;  %v16210_v45 = vand.u32 4294901760, %v12123_v40 }
 0x225   :  { %4126 = vmatpush.msra.mxu0 %v3935_v9  ;;  %4222 = vmatpush.msra.mxu2 %v11964_v57  ;;  %v202_v9 = vld [vmem:[%s16074_s1 + $0x5a8] sm:$0xff]  ;;  %v12155_v59 = vand.u32 4294901760, %v201_v21 }
 0x226   :  { %4010 = vmatpush.msrb.mxu1 %v4009_v25  ;;  %4107 = vmatpush.msrb.mxu3 %v11973_v56  ;;  %v4272_v25 = vand.u32 4294901760, %v4271_v33  ;;  %v16492_v56 = vand.u32 4294901760, %v12059_v0  ;;  %v16212_v33 = vand.u32 4294901760, %v12101_v16 }
 0x227   :  { %4111 = vmatmul.f32.vlgmr.msrb.gmra.mxu3 %v3914_v3  ;;  %4130 = vmatpush.msra.mxu0 %v16491_v58  ;;  %v16493_v3 = vand.u32 4294901760, %v11806_v31  ;;  %v12140_v58 = vand.u32 4294901760, %v202_v9  ;;  %v4295_v31 = vsub.f32 %v12084_v20, %v16209_v53 }
 0x228   :  { %4224 = vmatpush.msra.mxu2 %v11989_v44  ;;  %4267 = vmatpush.msra.mxu3 %v4266_v49  ;;  %v4289_v55 = vsub.f32 %v12059_v0, %v16492_v56  ;;  %v4284_v56 = vand.u32 4294901760, %v4283_v27  ;;  %v200_v49 = vld [vmem:[%s16074_s1 + $0x598] sm:$0xff]  ;;  %v16494_v27 = vand.u32 4294901760, %v11822_v17  ;;  %v199_v17 = vld [vmem:[%s16074_s1 + $0x590] sm:$0xff] }
 0x229   :  { %4016 = vmatpush.msrb.mxu1 %v4015_v63  ;;  %4134 = vmatpush.msra.mxu0 %v16493_v3  ;;  %v12153_v63 = vsub.f32 %v203_v38, %v12125_v6  ;;  %v12166_v38 = vsub.f32 %v202_v9, %v12140_v58  ;;  %v12168_v53 = vand.u32 4294901760, %v200_v49  ;;  %v4307_v9 = vsub.f32 %v12123_v40, %v16210_v45 }
 0x22a   :  { %4018 = vmatmul.f32.vlgmr.msrb.gmra.mxu1 %v11903_v11  ;;  %4226 = vmatpush.msra.mxu2 %v12009_v19  ;;  %v4290_v3 = vand.u32 4294901760, %v4289_v55  ;;  %v16495_v55 = vand.u32 4294901760, %v11849_v34  ;;  %v198_v34 = vld [vmem:[%s16074_s1 + $0x588] sm:$0xff] }
 0x22b   :  { %4185 = vmatpush.msra.mxu1 %v11736_v32  ;;  %4273 = vmatpush.msra.mxu3 %v4272_v25  ;;  %v4301_v32 = vsub.f32 %v12101_v16, %v16212_v33  ;;  %v16211_v25 = vand.u32 4294901760, %v12138_v29  ;;  %v12198_v45 = vsub.f32 %v200_v49, %v12168_v53 }
 0x22c   :  { %4138 = vmatpush.msra.mxu0 %v16494_v27  ;;  %4228 = vmatpush.msra.mxu2 %v12017_v14  ;;  %v12182_v27 = vsub.f32 %v201_v21, %v12155_v59 }
 0x22d   :  { %4187 = vmatpush.msra.mxu1 %v11746_v46  ;;  %4279 = vmatpush.msra.mxu3 %v4278_v60  ;;  %v4296_v46 = vand.u32 4294901760, %v4295_v31  ;;  %v4318_v60 = vand.u32 4294901760, %v12153_v63  ;;  %v4313_v21 = vsub.f32 %v12138_v29, %v16211_v25  ;;  %v4324_v31 = vand.u32 4294901760, %v12166_v38 }
 0x22e   :  { %4142 = vmatpush.msra.mxu0 %v16495_v55  ;;  %4230 = vmatpush.msra.mxu2 %v12029_v22  ;;  %v16496_v55 = vand.u32 4294901760, %v11865_v35  ;;  %v197_v35 = vld [vmem:[%s16074_s1 + $0x580] sm:$0xff]  ;;  %v4330_v25 = vand.u32 4294901760, %v12182_v27 }
 0x22f   :  { %4189 = vmatpush.msra.mxu1 %v11756_v43  ;;  %4285 = vmatpush.msra.mxu3 %v4284_v56  ;;  %v12190_v43 = vand.u32 4294901760, %v199_v17  ;;  %v4302_v56 = vand.u32 4294901760, %v4301_v32  ;;  %v4308_v32 = vand.u32 4294901760, %v4307_v9  ;;  %v4319_v49 = vsub.f32 %v12153_v63, %v4318_v60 }
 0x230   :  { %4146 = vmatpush.msra.mxu0 %v16496_v55  ;;  %4232 = vmatpush.msra.mxu2 %v12052_v18  ;;  %v16497_v55 = vand.u32 4294901760, %v11881_v52  ;;  %v16498_v52 = vand.u32 4294901760, %v11896_v26  ;;  %v12222_v33 = vand.u32 4294901760, %v197_v35  ;;  %v4336_v9 = vand.u32 4294901760, %v12198_v45 }
 0x231   :  { %4191 = vmatpush.msra.mxu1 %v11769_v30  ;;  %4291 = vmatpush.msra.mxu3 %v4290_v3  ;;  %v12206_v30 = vand.u32 4294901760, %v198_v34  ;;  %v12209_v3 = vand.u32 4294901760, %v12115_v23  ;;  %v16499_v26 = vand.u32 4294901760, %v11913_v8  ;;  %v16500_v8 = vand.u32 4294901760, %v11925_v48 }
 0x232   :  { %4150 = vmatpush.msra.mxu0 %v16497_v55  ;;  %4234 = vmatpush.msra.mxu2 %v12070_v5  ;;  %v12220_v55 = vsub.f32 %v199_v17, %v12190_v43 }
 0x233   :  { %4193 = vmatpush.msra.mxu1 %v11780_v37  ;;  %4297 = vmatpush.msra.mxu3 %v4296_v46  ;;  %v4314_v37 = vand.u32 4294901760, %v4313_v21  ;;  %v4325_v46 = vsub.f32 %v12166_v38, %v4324_v31  ;;  %v12233_v17 = vsub.f32 %v198_v34, %v12206_v30  ;;  %v12248_v21 = vsub.f32 %v197_v35, %v12222_v33 }
 0x234   :  { %4154 = vmatpush.msra.mxu0 %v16498_v52  ;;  %4236 = vmatpush.msra.mxu2 %v12086_v41  ;;  %v12237_v52 = vsub.f32 %v12115_v23, %v12209_v3  ;;  %v4342_v34 = vand.u32 4294901760, %v12220_v55  ;;  %v4337_v23 = vsub.f32 %v12198_v45, %v4336_v9 }
 0x235   :  { %4195 = vmatpush.msra.mxu1 %v11791_v7  ;;  %4303 = vmatpush.msra.mxu3 %v4302_v56  ;;  %v4320_v7 = vand.u32 4294901760, %v4319_v49  ;;  %v4331_v56 = vsub.f32 %v12182_v27, %v4330_v25  ;;  %v4348_v48 = vand.u32 4294901760, %v12233_v17 }
 0x236   :  { %4158 = vmatpush.msra.mxu0 %v16499_v26  ;;  %4238 = vmatpush.msra.mxu2 %v12103_v1  ;;  %v4255_v49 = vand.u32 4294901760, %v12237_v52  ;;  %v16503_v26 = vand.u32 4294901760, %v11979_v10 }
 0x237   :  { %4197 = vmatpush.msra.mxu1 %v11816_v47  ;;  %4309 = vmatpush.msra.mxu3 %v4308_v32  ;;  %v4326_v47 = vand.u32 4294901760, %v4325_v46  ;;  %v16501_v32 = vand.u32 4294901760, %v11941_v24  ;;  %v4332_v35 = vand.u32 4294901760, %v4331_v56  ;;  %v4343_v24 = vsub.f32 %v12220_v55, %v4342_v34 }
 0x238   :  { %4162 = vmatpush.msra.mxu0 %v16500_v8  ;;  %4240 = vmatpush.msra.mxu2 %v12125_v6  ;;  %v4338_v46 = vand.u32 4294901760, %v4337_v23 }
 0x239   :  { %4199 = vmatpush.msra.mxu1 %v11832_v39  ;;  %4315 = vmatpush.msra.mxu3 %v4314_v37  ;;  %v16502_v39 = vand.u32 4294901760, %v11959_v28  ;;  %v4354_v37 = vand.u32 4294901760, %v12248_v21  ;;  %v4256_v28 = vsub.f32 %v12237_v52, %v4255_v49  ;;  %v4344_v10 = vand.u32 4294901760, %v4343_v24 }
 0x23a   :  { %4166 = vmatpush.msra.mxu0 %v16501_v32  ;;  %4242 = vmatpush.msra.mxu2 %v12140_v58 }
 0x23b   :  { %4201 = vmatpush.msra.mxu1 %v11846_v13  ;;  %4321 = vmatpush.msra.mxu3 %v4320_v7  ;;  %v4349_v13 = vsub.f32 %v12233_v17, %v4348_v48  ;;  %v4355_v7 = vsub.f32 %v12248_v21, %v4354_v37 }
 0x23c   :  { %4170 = vmatpush.msra.mxu0 %v16502_v39  ;;  %4244 = vmatpush.msra.mxu2 %v12155_v59 }
 0x23d   :  { %4203 = vmatpush.msra.mxu1 %v11862_v42  ;;  %4327 = vmatpush.msra.mxu3 %v4326_v47  ;;  %v16504_v42 = vand.u32 4294901760, %v12007_v62  ;;  %v4350_v56 = vand.u32 4294901760, %v4349_v13  ;;  %v4356_v62 = vand.u32 4294901760, %v4355_v7 }
 0x23e   :  { %4174 = vmatpush.msra.mxu0 %v16503_v26  ;;  %4246 = vmatpush.msra.mxu2 %v12168_v53 }
 0x23f   :  { %4205 = vmatpush.msra.mxu1 %v11877_v12  ;;  %4333 = vmatpush.msra.mxu3 %v4332_v35  ;;  %v4257_v12 = vand.u32 4294901760, %v4256_v28 }
 0x240   :  { %4178 = vmatpush.msra.mxu0 %v16504_v42  ;;  %4248 = vmatpush.msra.mxu2 %v12190_v43 }
 0x241   :  { %4207 = vmatpush.msra.mxu1 %v11892_v2  ;;  %4339 = vmatpush.msra.mxu3 %v4338_v46  ;;  %v16505_v2 = vand.u32 4294901760, %v12000_v36  ;;  %v217_v46 = vld [vmem:[%s16074_s1 + $0x620] sm:$0xff] }
 0x242   :  { %4180 = vmatmul.f32.vlgmr.msra.gmra.mxu0 %v11903_v11  ;;  %4250 = vmatpush.msra.mxu2 %v12206_v30 }
 0x243   :  { %4365 = vmatpush.msrb.mxu0 %v12000_v36  ;;  %4209 = vmatpush.msra.mxu1 %v11909_v61  ;;  %v16506_v61 = vand.u32 4294901760, %v12024_v50  ;;  %v16508_v36 = vand.u32 4294901760, %v12037_v54 }
 0x244   :  { %4345 = vmatpush.msra.mxu3 %v4344_v10  ;;  %4252 = vmatpush.msra.mxu2 %v12222_v33  ;;  %v216_v10 = vld [vmem:[%s16074_s1 + $0x618] sm:$0xff] }
 0x245   :  { %4368 = vmatpush.msrb.mxu0 %v12024_v50  ;;  %4211 = vmatpush.msra.mxu1 %v11921_v51  ;;  %v16507_v51 = vld [vmem:[#allocation5_spill] sm:$0xff]  ;;  %v16514_v50 = vand.u32 4294901760, %v12138_v29 }
 0x246   :  { %4351 = vmatpush.msra.mxu3 %v4350_v56  ;;  %4258 = vmatmul.f32.vlgmr.msra.gmra.mxu2 %v4257_v12  ;;  %v12505_v56 = vand.u32 4294901760, %v217_v46 }
 0x247   :  { %4371 = vmatpush.msrb.mxu0 %v12037_v54  ;;  %4459 = vmatpush.msrb.mxu2 %v16505_v2 }
 0x248   :  { %4213 = vmatpush.msra.mxu1 %v11948_v15  ;;  %4357 = vmatpush.msra.mxu3 %v4356_v62  ;;  %v16509_v15 = vand.u32 4294901760, %v12045_v4 }
 0x249   :  { %4359 = vmatmul.f32.vlgmr.msra.gmra.mxu3 %v12209_v3  ;;  %4374 = vmatpush.msrb.mxu0 %v12045_v4  ;;  %v16512_v4 = vand.u32 4294901760, %v12101_v16 }
 0x24a   :  { %4463 = vmatpush.msrb.mxu2 %v16506_v61  ;;  %4526 = vmatpush.msrb.mxu3 %v11964_v57  ;;  %v215_v61 = vld [vmem:[%s16074_s1 + $0x610] sm:$0xff] }
 0x24b   :  { %4215 = vmatpush.msra.mxu1 %v16507_v51  ;;  %4377 = vmatpush.msrb.mxu0 %v12059_v0 }
 0x24c   :  { %4217 = vmatmul.f32.vlgmr.msra.gmra.mxu1 %v11903_v11  ;;  %4467 = vmatpush.msrb.mxu2 %v16508_v36  ;;  %v16510_v11 = vand.u32 4294901760, %v12059_v0 }
 0x24d   :  { %4418 = vmatpush.msrb.mxu1 %v11964_v57  ;;  %4528 = vmatpush.msrb.mxu3 %v11989_v44  ;;  %v16511_v57 = vand.u32 4294901760, %v12084_v20 }
 0x24e   :  { %4380 = vmatpush.msrb.mxu0 %v12084_v20  ;;  %4471 = vmatpush.msrb.mxu2 %v16509_v15  ;;  %v12522_v15 = vand.u32 4294901760, %v216_v10 }
 0x24f   :  { %4420 = vmatpush.msrb.mxu1 %v11989_v44  ;;  %4530 = vmatpush.msrb.mxu3 %v12009_v19  ;;  %v225_v44 = vld [vmem:[%s16074_s1 + $0x660] sm:$0xff] }
 0x250   :  { %4383 = vmatpush.msrb.mxu0 %v12101_v16  ;;  %4475 = vmatpush.msrb.mxu2 %v16510_v11  ;;  %v223_v16 = vld [vmem:[%s16074_s1 + $0x650] sm:$0xff] }
 0x251   :  { %4422 = vmatpush.msrb.mxu1 %v12009_v19  ;;  %4532 = vmatpush.msrb.mxu3 %v12017_v14  ;;  %v16513_v19 = vand.u32 4294901760, %v12123_v40 }
 0x252   :  { %4386 = vmatpush.msrb.mxu0 %v12123_v40  ;;  %4479 = vmatpush.msrb.mxu2 %v16511_v57 }
 0x253   :  { %4424 = vmatpush.msrb.mxu1 %v12017_v14  ;;  %4534 = vmatpush.msrb.mxu3 %v12029_v22 }
 0x254   :  { %4389 = vmatpush.msrb.mxu0 %v12138_v29  ;;  %4483 = vmatpush.msrb.mxu2 %v16512_v4 }
 0x255   :  { %4426 = vmatpush.msrb.mxu1 %v12029_v22  ;;  %4536 = vmatpush.msrb.mxu3 %v12052_v18  ;;  %v228_v22 = vld [vmem:[%s16074_s1 + $0x678] sm:$0xff] }
 0x256   :  { %4392 = vmatpush.msrb.mxu0 %v12153_v63  ;;  %4487 = vmatpush.msrb.mxu2 %v16513_v19  ;;  %v12349_v40 = vand.u32 4294901760, %v228_v22  ;;  %v222_v63 = vld [vmem:[%s16074_s1 + $0x648] sm:$0xff] }
 0x257   :  { %4428 = vmatpush.msrb.mxu1 %v12052_v18  ;;  %4538 = vmatpush.msrb.mxu3 %v12070_v5  ;;  %v227_v18 = vld [vmem:[%s16074_s1 + $0x670] sm:$0xff] }
 0x258   :  { %4395 = vmatpush.msrb.mxu0 %v12166_v38  ;;  %4491 = vmatpush.msrb.mxu2 %v16514_v50  ;;  %v12359_v54 = vand.u32 4294901760, %v227_v18  ;;  %v12372_v14 = vsub.f32 %v228_v22, %v12349_v40  ;;  %v12534_v50 = vand.u32 4294901760, %v215_v61 }
 0x259   :  { %4430 = vmatpush.msrb.mxu1 %v12070_v5  ;;  %4540 = vmatpush.msrb.mxu3 %v12086_v41  ;;  %v226_v5 = vld [vmem:[%s16074_s1 + $0x668] sm:$0xff] }
 0x25a   :  { %4398 = vmatpush.msrb.mxu0 %v12182_v27  ;;  %4495 = vmatpush.msrb.mxu2 %v4318_v60  ;;  %v12369_v0 = vand.u32 4294901760, %v226_v5  ;;  %v12385_v20 = vsub.f32 %v227_v18, %v12359_v54  ;;  %v4605_v29 = vand.u32 4294901760, %v12372_v14  ;;  %v221_v60 = vld [vmem:[%s16074_s1 + $0x640] sm:$0xff]  ;;  %v12429_v27 = vand.u32 4294901760, %v222_v63 }
 0x25b   :  { %4432 = vmatpush.msrb.mxu1 %v12086_v41  ;;  %4542 = vmatpush.msrb.mxu3 %v12103_v1  ;;  %v224_v41 = vld [vmem:[%s16074_s1 + $0x658] sm:$0xff]  ;;  %v12538_v18 = vsub.f32 %v217_v46, %v12505_v56 }
 0x25c   :  { %4401 = vmatpush.msrb.mxu0 %v12198_v45  ;;  %4499 = vmatpush.msrb.mxu2 %v4324_v31  ;;  %v12404_v45 = vand.u32 4294901760, %v223_v16 }
 0x25d   :  { %4434 = vmatpush.msrb.mxu1 %v12103_v1  ;;  %4544 = vmatpush.msrb.mxu3 %v12125_v6  ;;  %v12393_v1 = vand.u32 4294901760, %v224_v41 }
 0x25e   :  { %4404 = vmatpush.msrb.mxu0 %v12220_v55  ;;  %4503 = vmatpush.msrb.mxu2 %v4330_v25  ;;  %v12435_v55 = vsub.f32 %v223_v16, %v12404_v45 }
 0x25f   :  { %4436 = vmatpush.msrb.mxu1 %v12125_v6  ;;  %4546 = vmatpush.msrb.mxu3 %v12140_v58  ;;  %v12382_v6 = vand.u32 4294901760, %v225_v44  ;;  %v12419_v38 = vsub.f32 %v224_v41, %v12393_v1 }
 0x260   :  { %4407 = vmatpush.msrb.mxu0 %v12233_v17  ;;  %4507 = vmatpush.msrb.mxu2 %v4336_v9  ;;  %v220_v9 = vld [vmem:[%s16074_s1 + $0x638] sm:$0xff]  ;;  %v12445_v17 = vand.u32 4294901760, %v221_v60 }
 0x261   :  { %4438 = vmatpush.msrb.mxu1 %v12140_v58  ;;  %4548 = vmatpush.msrb.mxu3 %v12155_v59  ;;  %v12399_v58 = vsub.f32 %v226_v5, %v12369_v0  ;;  %v12413_v25 = vsub.f32 %v225_v44, %v12382_v6  ;;  %v12459_v32 = vand.u32 4294901760, %v220_v9  ;;  %v214_v5 = vld [vmem:[%s16074_s1 + $0x608] sm:$0xff] }
 0x262   :  { %4410 = vmatpush.msrb.mxu0 %v12248_v21  ;;  %4511 = vmatpush.msrb.mxu2 %v4342_v34  ;;  %v16223_v34 = vand.u32 4294901760, %v12419_v38  ;;  %v219_v21 = vld [vmem:[%s16074_s1 + $0x630] sm:$0xff] }
 0x263   :  { %4440 = vmatpush.msrb.mxu1 %v12155_v59  ;;  %4550 = vmatpush.msrb.mxu3 %v12168_v53  ;;  %v4611_v59 = vand.u32 4294901760, %v12385_v20  ;;  %v4617_v31 = vand.u32 4294901760, %v12399_v58  ;;  %v16226_v8 = vand.u32 4294901760, %v12413_v25  ;;  %v12475_v24 = vand.u32 4294901760, %v219_v21 }
 0x264   :  { %4413 = vmatmul.f32.vlgmr.msrb.gmra.mxu0 %v12237_v52  ;;  %4515 = vmatpush.msrb.mxu2 %v4348_v48  ;;  %v16221_v48 = vand.u32 4294901760, %v12435_v55  ;;  %v12494_v52 = vsub.f32 %v220_v9, %v12459_v32  ;;  %v12561_v9 = vand.u32 4294901760, %v214_v5 }
 0x265   :  { %4563 = vmatpush.msra.mxu0 %v12349_v40  ;;  %4442 = vmatpush.msrb.mxu1 %v12168_v53  ;;  %v4606_v53 = vsub.f32 %v12372_v14, %v4605_v29  ;;  %v4618_v23 = vsub.f32 %v12399_v58, %v4617_v31  ;;  %v4624_v39 = vsub.f32 %v12413_v25, %v16226_v8 }
 0x266   :  { %4552 = vmatpush.msrb.mxu3 %v12190_v43  ;;  %4519 = vmatpush.msrb.mxu2 %v4354_v37  ;;  %v12478_v37 = vsub.f32 %v221_v60, %v12445_v17  ;;  %v4636_v42 = vsub.f32 %v12435_v55, %v16221_v48  ;;  %v12509_v62 = vsub.f32 %v219_v21, %v12475_v24  ;;  %v16217_v11 = vand.u32 4294901760, %v12494_v52 }
 0x267   :  { %4565 = vmatpush.msra.mxu0 %v12359_v54  ;;  %4444 = vmatpush.msrb.mxu1 %v12190_v43  ;;  %v4612_v43 = vsub.f32 %v12385_v20, %v4611_v59  ;;  %v4607_v47 = vand.u32 4294901760, %v4606_v53  ;;  %v4619_v26 = vand.u32 4294901760, %v4618_v23  ;;  %v4625_v7 = vand.u32 4294901760, %v4624_v39  ;;  %v244_v53 = vld [vmem:[%s16074_s1 + $0x6f8] sm:$0xff] }
 0x268   :  { %4554 = vmatpush.msrb.mxu3 %v12206_v30  ;;  %4521 = vmatmul.f32.vlgmr.msrb.gmra.mxu2 %v12209_v3  ;;  %v16218_v12 = vand.u32 4294901760, %v12478_v37  ;;  %v4637_v4 = vand.u32 4294901760, %v4636_v42  ;;  %v16216_v22 = vand.u32 4294901760, %v12509_v62  ;;  %v4654_v16 = vsub.f32 %v12494_v52, %v16217_v11 }
 0x269   :  { %4567 = vmatpush.msra.mxu0 %v12369_v0  ;;  %4706 = vmatpush.msra.mxu2 %v12372_v14  ;;  %v4613_v35 = vand.u32 4294901760, %v4612_v43  ;;  %v12554_v60 = vsub.f32 %v216_v10, %v12522_v15  ;;  %v213_v43 = vld [vmem:[%s16074_s1 + $0x600] sm:$0xff]  ;;  %v16213_v23 = vand.u32 4294901760, %v12538_v18  ;;  %v12577_v39 = vand.u32 4294901760, %v244_v53  ;;  %v236_v14 = vld [vmem:[%s16074_s1 + $0x6b8] sm:$0xff] }
 0x26a   :  { %4446 = vmatpush.msrb.mxu1 %v12206_v30  ;;  %4556 = vmatpush.msrb.mxu3 %v12222_v33  ;;  %v12462_v30 = vsub.f32 %v222_v63, %v12429_v27  ;;  %v4648_v19 = vsub.f32 %v12478_v37, %v16218_v12  ;;  %v4655_v46 = vand.u32 4294901760, %v4654_v16  ;;  %v12592_v10 = vsub.f32 %v214_v5, %v12561_v9 }
 0x26b   :  { %4558 = vmatmul.f32.vlgmr.msrb.gmra.mxu3 %v12209_v3  ;;  %4569 = vmatpush.msra.mxu0 %v12382_v6  ;;  %v218_v3 = vld [vmem:[%s16074_s1 + $0x628] sm:$0xff]  ;;  %v16215_v42 = vand.u32 4294901760, %v12554_v60 }
 0x26c   :  { %4709 = vmatpush.msra.mxu2 %v12385_v20  ;;  %4759 = vmatpush.msra.mxu3 %v12349_v40  ;;  %v12490_v13 = vand.u32 4294901760, %v218_v3  ;;  %v16220_v28 = vand.u32 4294901760, %v12462_v30  ;;  %v4649_v21 = vand.u32 4294901760, %v4648_v19  ;;  %v241_v19 = vld [vmem:[%s16074_s1 + $0x6e0] sm:$0xff]  ;;  %v235_v20 = vld [vmem:[%s16074_s1 + $0x6b0] sm:$0xff] }
 0x26d   :  { %4448 = vmatpush.msrb.mxu1 %v12222_v33  ;;  %4571 = vmatpush.msra.mxu0 %v12393_v1  ;;  %v4630_v33 = vsub.f32 %v12419_v38, %v16223_v34 }
 0x26e   :  { %4452 = vmatmul.f32.vlgmr.msrb.gmra.mxu1 %v4255_v49  ;;  %4712 = vmatpush.msra.mxu2 %v12399_v58  ;;  %v432_v49 = vld.sshfl [vmem:[#allocation1 + $0x20] sm:$0xff pattern:$0x73625140]  ;;  %v4642_v36 = vsub.f32 %v12462_v30, %v16220_v28  ;;  %v12526_v57 = vsub.f32 %v218_v3, %v12490_v13  ;;  %v12572_v3 = vsub.f32 %v215_v61, %v12534_v50 }
 0x26f   :  { %4608 = vmatpush.msra.mxu1 %v4607_v47  ;;  %4761 = vmatpush.msra.mxu3 %v12359_v54  ;;  %v4631_v2 = vand.u32 4294901760, %v4630_v33  ;;  %v12516_v51 = vand.u32 4294901760, %v432_v49  ;;  %v4660_v47 = vsub.f32 %v12509_v62, %v16216_v22  ;;  %v243_v33 = vld [vmem:[%s16074_s1 + $0x6f0] sm:$0xff]  ;;  %v4672_v61 = vsub.f32 %v12538_v18, %v16213_v23 }
 0x270   :  { %4573 = vmatpush.msra.mxu0 %v12404_v45  ;;  %4715 = vmatpush.msra.mxu2 %v12413_v25  ;;  %v4643_v41 = vand.u32 4294901760, %v4642_v36  ;;  %v16214_v63 = vand.u32 4294901760, %v12526_v57  ;;  %v16219_v36 = vand.u32 4294901760, %v12572_v3 }
 0x271   :  { %4614 = vmatpush.msra.mxu1 %v4613_v35  ;;  %4763 = vmatpush.msra.mxu3 %v12369_v0  ;;  %v12546_v44 = vsub.f32 %v432_v49, %v12516_v51  ;;  %v12586_v49 = vand.u32 4294901760, %v213_v43 }
 0x272   :  { %4575 = vmatpush.msra.mxu0 %v12429_v27  ;;  %4718 = vmatpush.msra.mxu2 %v12419_v38 }
 0x273   :  { %4620 = vmatpush.msra.mxu1 %v4619_v26  ;;  %4765 = vmatpush.msra.mxu3 %v12382_v6  ;;  %v4596_v35 = vand.u32 4294901760, %v12546_v44  ;;  %v4666_v26 = vsub.f32 %v12526_v57, %v16214_v63  ;;  %v240_v63 = vld [vmem:[%s16074_s1 + $0x6d8] sm:$0xff] }
 0x274   :  { %4577 = vmatpush.msra.mxu0 %v12445_v17  ;;  %4721 = vmatpush.msra.mxu2 %v12435_v55  ;;  %v12642_v12 = vand.u32 4294901760, %v240_v63 }
 0x275   :  { %4626 = vmatpush.msra.mxu1 %v4625_v7  ;;  %4767 = vmatpush.msra.mxu3 %v12393_v1  ;;  %v242_v7 = vld [vmem:[%s16074_s1 + $0x6e8] sm:$0xff]  ;;  %v4597_v5 = vsub.f32 %v12546_v44, %v4596_v35  ;;  %v4667_v16 = vand.u32 4294901760, %v4666_v26  ;;  %v4673_v26 = vand.u32 4294901760, %v4672_v61 }
 0x276   :  { %4579 = vmatpush.msra.mxu0 %v12459_v32  ;;  %4724 = vmatpush.msra.mxu2 %v12462_v30  ;;  %v12622_v23 = vand.u32 4294901760, %v242_v7 }
 0x277   :  { %4632 = vmatpush.msra.mxu1 %v4631_v2  ;;  %4769 = vmatpush.msra.mxu3 %v12404_v45  ;;  %v4661_v2 = vand.u32 4294901760, %v4660_v47  ;;  %v12620_v47 = vsub.f32 %v213_v43, %v12586_v49  ;;  %v4684_v43 = vsub.f32 %v12572_v3, %v16219_v36  ;;  %v4598_v22 = vand.u32 4294901760, %v4597_v5 }
 0x278   :  { %4581 = vmatpush.msra.mxu0 %v12475_v24  ;;  %4727 = vmatpush.msra.mxu2 %v12478_v37  ;;  %v12650_v36 = vsub.f32 %v242_v7, %v12622_v23 }
 0x279   :  { %4638 = vmatpush.msra.mxu1 %v4637_v4  ;;  %4771 = vmatpush.msra.mxu3 %v12429_v27  ;;  %v12602_v4 = vand.u32 4294901760, %v243_v33  ;;  %v4685_v7 = vand.u32 4294901760, %v4684_v43 }
 0x27a   :  { %4583 = vmatpush.msra.mxu0 %v12490_v13  ;;  %4730 = vmatpush.msra.mxu2 %v12494_v52  ;;  %v16227_v43 = vand.u32 4294901760, %v12650_v36 }
 0x27b   :  { %4644 = vmatpush.msra.mxu1 %v4643_v41  ;;  %4773 = vmatpush.msra.mxu3 %v12445_v17  ;;  %v12613_v41 = vsub.f32 %v244_v53, %v12577_v39  ;;  %v16222_v53 = vand.u32 4294901760, %v12592_v10 }
 0x27c   :  { %4585 = vmatpush.msra.mxu0 %v12505_v56  ;;  %4733 = vmatpush.msra.mxu2 %v12509_v62 }
 0x27d   :  { %4650 = vmatpush.msra.mxu1 %v4649_v21  ;;  %4775 = vmatpush.msra.mxu3 %v12459_v32  ;;  %v4678_v21 = vsub.f32 %v12554_v60, %v16215_v42  ;;  %v12637_v42 = vsub.f32 %v243_v33, %v12602_v4  ;;  %v16224_v11 = vand.u32 4294901760, %v12613_v41  ;;  %v16225_v33 = vand.u32 4294901760, %v12620_v47 }
 0x27e   :  { %4587 = vmatpush.msra.mxu0 %v12522_v15  ;;  %4736 = vmatpush.msra.mxu2 %v12526_v57  ;;  %v4690_v5 = vsub.f32 %v12592_v10, %v16222_v53  ;;  %v12672_v53 = vsub.f32 %v240_v63, %v12642_v12 }
 0x27f   :  { %4656 = vmatpush.msra.mxu1 %v4655_v46  ;;  %4777 = vmatpush.msra.mxu3 %v12475_v24  ;;  %v12630_v46 = vand.u32 4294901760, %v241_v19  ;;  %v4679_v61 = vand.u32 4294901760, %v4678_v21  ;;  %v16228_v21 = vand.u32 4294901760, %v12637_v42 }
 0x280   :  { %4589 = vmatpush.msra.mxu0 %v12534_v50  ;;  %4739 = vmatpush.msra.mxu2 %v12538_v18  ;;  %v4691_v63 = vand.u32 4294901760, %v4690_v5  ;;  %v16230_v8 = vand.u32 4294901760, %v12672_v53 }
 0x281   :  { %4662 = vmatpush.msra.mxu1 %v4661_v2  ;;  %4779 = vmatpush.msra.mxu3 %v12490_v13  ;;  %v239_v2 = vld [vmem:[%s16074_s1 + $0x6d0] sm:$0xff]  ;;  %v12658_v28 = vsub.f32 %v241_v19, %v12630_v46  ;;  %v4947_v19 = vsub.f32 %v12613_v41, %v16224_v11 }
 0x282   :  { %4591 = vmatpush.msra.mxu0 %v12561_v9  ;;  %4742 = vmatpush.msra.mxu2 %v12554_v60  ;;  %v12665_v48 = vand.u32 4294901760, %v239_v2 }
 0x283   :  { %4668 = vmatpush.msra.mxu1 %v4667_v16  ;;  %4781 = vmatpush.msra.mxu3 %v12505_v56  ;;  %v238_v16 = vld [vmem:[%s16074_s1 + $0x6c8] sm:$0xff]  ;;  %v16229_v11 = vand.u32 4294901760, %v12658_v28  ;;  %v4948_v5 = vand.u32 4294901760, %v4947_v19  ;;  %v12716_v19 = vand.u32 4294901760, %v236_v14 }
 0x284   :  { %4593 = vmatpush.msra.mxu0 %v12586_v49  ;;  %4745 = vmatpush.msra.mxu2 %v12572_v3  ;;  %v12683_v34 = vand.u32 4294901760, %v238_v16 }
 0x285   :  { %4674 = vmatpush.msra.mxu1 %v4673_v26  ;;  %4783 = vmatpush.msra.mxu3 %v12522_v15  ;;  %v237_v26 = vld [vmem:[%s16074_s1 + $0x6c0] sm:$0xff]  ;;  %v4965_v58 = vsub.f32 %v12658_v28, %v16229_v11  ;;  %v4971_v11 = vsub.f32 %v12672_v53, %v16230_v8 }
 0x286   :  { %4599 = vmatmul.f32.vlgmr.msra.gmra.mxu0 %v4598_v22  ;;  %4748 = vmatpush.msra.mxu2 %v12592_v10  ;;  %v4696_v22 = vsub.f32 %v12620_v47, %v16225_v33  ;;  %v12699_v33 = vand.u32 4294901760, %v237_v26 }
 0x287   :  { %4800 = vmatpush.msrb.mxu0 %v4605_v29  ;;  %4680 = vmatpush.msra.mxu1 %v4679_v61  ;;  %v4953_v29 = vsub.f32 %v12637_v42, %v16228_v21  ;;  %v12697_v61 = vsub.f32 %v239_v2, %v12665_v48  ;;  %v4959_v2 = vsub.f32 %v12650_v36, %v16227_v43  ;;  %v12733_v21 = vand.u32 4294901760, %v235_v20 }
 0x288   :  { %4785 = vmatpush.msra.mxu3 %v12534_v50  ;;  %4751 = vmatpush.msra.mxu2 %v12620_v47  ;;  %v4972_v8 = vand.u32 4294901760, %v4971_v11  ;;  %v16518_v11 = vand.u32 4294901760, %v12462_v30  ;;  %v230_v30 = vld [vmem:[%s16074_s1 + $0x688] sm:$0xff] }
 0x289   :  { %4804 = vmatpush.msrb.mxu0 %v4611_v59  ;;  %4686 = vmatpush.msra.mxu1 %v4685_v7  ;;  %v4697_v59 = vand.u32 4294901760, %v4696_v22  ;;  %v12714_v7 = vsub.f32 %v238_v16, %v12683_v34  ;;  %v16515_v22 = vand.u32 4294901760, %v12413_v25  ;;  %v4954_v16 = vand.u32 4294901760, %v4953_v29  ;;  %v233_v25 = vld [vmem:[%s16074_s1 + $0x6a0] sm:$0xff] }
 0x28a   :  { %4787 = vmatpush.msra.mxu3 %v12561_v9  ;;  %4754 = vmatmul.f32.vlgmr.msra.gmra.mxu2 %v12546_v44  ;;  %v16231_v43 = vand.u32 4294901760, %v12697_v61  ;;  %v16516_v44 = vand.u32 4294901760, %v12419_v38  ;;  %v12746_v29 = vsub.f32 %v236_v14, %v12716_v19 }
 0x28b   :  { %4808 = vmatpush.msrb.mxu0 %v4617_v31  ;;  %4904 = vmatpush.msrb.mxu2 %v12577_v39  ;;  %v234_v31 = vld [vmem:[%s16074_s1 + $0x6a8] sm:$0xff] }
 0x28c   :  { %4692 = vmatpush.msra.mxu1 %v4691_v63  ;;  %4789 = vmatpush.msra.mxu3 %v12586_v49  ;;  %v12731_v63 = vsub.f32 %v237_v26, %v12699_v33  ;;  %v16232_v26 = vand.u32 4294901760, %v12714_v7  ;;  %v4977_v38 = vsub.f32 %v12697_v61, %v16231_v43 }
 0x28d   :  { %4793 = vmatmul.f32.vlgmr.msra.gmra.mxu3 %v4596_v35  ;;  %4812 = vmatpush.msrb.mxu0 %v16515_v22  ;;  %v4960_v35 = vand.u32 4294901760, %v4959_v2  ;;  %v12748_v22 = vand.u32 4294901760, %v234_v31  ;;  %v12761_v2 = vsub.f32 %v235_v20, %v12733_v21 }
 0x28e   :  { %4906 = vmatpush.msrb.mxu2 %v12602_v4  ;;  %4949 = vmatpush.msrb.mxu3 %v4948_v5  ;;  %v4966_v5 = vand.u32 4294901760, %v4965_v58  ;;  %v16233_v14 = vand.u32 4294901760, %v12731_v63  ;;  %v16517_v58 = vand.u32 4294901760, %v12435_v55  ;;  %v231_v55 = vld [vmem:[%s16074_s1 + $0x690] sm:$0xff] }
 0x28f   :  { %4698 = vmatpush.msra.mxu1 %v4697_v59  ;;  %4816 = vmatpush.msrb.mxu0 %v16516_v44  ;;  %v232_v59 = vld [vmem:[%s16074_s1 + $0x698] sm:$0xff]  ;;  %v12763_v44 = vand.u32 4294901760, %v233_v25  ;;  %v12774_v20 = vsub.f32 %v234_v31, %v12748_v22 }
 0x290   :  { %4700 = vmatmul.f32.vlgmr.msra.gmra.mxu1 %v12516_v51  ;;  %4908 = vmatpush.msrb.mxu2 %v12622_v23  ;;  %v12776_v43 = vand.u32 4294901760, %v232_v59  ;;  %v4989_v31 = vsub.f32 %v12731_v63, %v16233_v14 }
 0x291   :  { %4867 = vmatpush.msrb.mxu1 %v12349_v40  ;;  %4955 = vmatpush.msrb.mxu3 %v4954_v16  ;;  %v4983_v40 = vsub.f32 %v12714_v7, %v16232_v26  ;;  %v16234_v16 = vand.u32 4294901760, %v12746_v29  ;;  %v16519_v26 = vand.u32 4294901760, %v12478_v37  ;;  %v229_v37 = vld [vmem:[%s16074_s1 + $0x680] sm:$0xff] }
 0x292   :  { %4820 = vmatpush.msrb.mxu0 %v16517_v58  ;;  %4910 = vmatpush.msrb.mxu2 %v12630_v46  ;;  %v12790_v58 = vsub.f32 %v233_v25, %v12763_v44  ;;  %v12806_v14 = vsub.f32 %v232_v59, %v12776_v43 }
 0x293   :  { %4869 = vmatpush.msrb.mxu1 %v12359_v54  ;;  %4961 = vmatpush.msrb.mxu3 %v4960_v35  ;;  %v4978_v54 = vand.u32 4294901760, %v4977_v38  ;;  %v16235_v35 = vand.u32 4294901760, %v12761_v2  ;;  %v4995_v25 = vsub.f32 %v12746_v29, %v16234_v16  ;;  %v16521_v38 = vand.u32 4294901760, %v12509_v62 }
 0x294   :  { %4824 = vmatpush.msrb.mxu0 %v16518_v11  ;;  %4912 = vmatpush.msrb.mxu2 %v12642_v12  ;;  %v433_v11 = vld.sshfl [vmem:[#allocation1 + $0x28] sm:$0xff pattern:$0x73625140]  ;;  %v5012_v16 = vand.u32 4294901760, %v12790_v58  ;;  %v16523_v62 = vand.u32 4294901760, %v12526_v57 }
 0x295   :  { %4871 = vmatpush.msrb.mxu1 %v12369_v0  ;;  %4967 = vmatpush.msrb.mxu3 %v4966_v5  ;;  %v12798_v0 = vand.u32 4294901760, %v231_v55  ;;  %v4984_v5 = vand.u32 4294901760, %v4983_v40  ;;  %v4990_v40 = vand.u32 4294901760, %v4989_v31  ;;  %v5001_v59 = vsub.f32 %v12761_v2, %v16235_v35 }
 0x296   :  { %4828 = vmatpush.msrb.mxu0 %v16519_v26  ;;  %4914 = vmatpush.msrb.mxu2 %v12665_v48  ;;  %v16520_v26 = vand.u32 4294901760, %v12494_v52  ;;  %v5018_v35 = vand.u32 4294901760, %v12806_v14 }
 0x297   :  { %4873 = vmatpush.msrb.mxu1 %v12382_v6  ;;  %4973 = vmatpush.msrb.mxu3 %v4972_v8  ;;  %v12814_v6 = vand.u32 4294901760, %v230_v30  ;;  %v12816_v8 = vand.u32 4294901760, %v433_v11  ;;  %v12827_v52 = vsub.f32 %v231_v55, %v12798_v0 }
 0x298   :  { %4832 = vmatpush.msrb.mxu0 %v16520_v26  ;;  %4916 = vmatpush.msrb.mxu2 %v12683_v34  ;;  %v12829_v26 = vand.u32 4294901760, %v229_v37 }
 0x299   :  { %4875 = vmatpush.msrb.mxu1 %v12393_v1  ;;  %4979 = vmatpush.msrb.mxu3 %v4978_v54  ;;  %v4996_v1 = vand.u32 4294901760, %v4995_v25  ;;  %v16522_v54 = vand.u32 4294901760, %v12774_v20  ;;  %v12840_v55 = vsub.f32 %v230_v30, %v12814_v6  ;;  %v16524_v25 = vand.u32 4294901760, %v12538_v18 }
 0x29a   :  { %4836 = vmatpush.msrb.mxu0 %v16521_v38  ;;  %4918 = vmatpush.msrb.mxu2 %v12699_v33  ;;  %v12843_v38 = vsub.f32 %v433_v11, %v12816_v8  ;;  %v5024_v57 = vand.u32 4294901760, %v12827_v52  ;;  %v12854_v30 = vsub.f32 %v229_v37, %v12829_v26  ;;  %v5019_v11 = vsub.f32 %v12806_v14, %v5018_v35 }
 0x29b   :  { %4877 = vmatpush.msrb.mxu1 %v12404_v45  ;;  %4985 = vmatpush.msrb.mxu3 %v4984_v5  ;;  %v5007_v31 = vsub.f32 %v12774_v20, %v16522_v54  ;;  %v5002_v45 = vand.u32 4294901760, %v5001_v59  ;;  %v5013_v5 = vsub.f32 %v12790_v58, %v5012_v16  ;;  %v5030_v18 = vand.u32 4294901760, %v12840_v55 }
 0x29c   :  { %4840 = vmatpush.msrb.mxu0 %v16523_v62  ;;  %4920 = vmatpush.msrb.mxu2 %v12716_v19  ;;  %v4937_v59 = vand.u32 4294901760, %v12843_v38  ;;  %v5020_v54 = vand.u32 4294901760, %v5019_v11 }
 0x29d   :  { %4879 = vmatpush.msrb.mxu1 %v12429_v27  ;;  %4991 = vmatpush.msrb.mxu3 %v4990_v40  ;;  %v5008_v27 = vand.u32 4294901760, %v5007_v31  ;;  %v16525_v40 = vand.u32 4294901760, %v12554_v60  ;;  %v5014_v37 = vand.u32 4294901760, %v5013_v5  ;;  %v5025_v60 = vsub.f32 %v12827_v52, %v5024_v57  ;;  %v252_v5 = vld [vmem:[%s16074_s1 + $0x738] sm:$0xff] }
 0x29e   :  { %4844 = vmatpush.msrb.mxu0 %v16524_v25  ;;  %4922 = vmatpush.msrb.mxu2 %v12733_v21  ;;  %v16527_v31 = vand.u32 4294901760, %v12592_v10 }
 0x29f   :  { %4881 = vmatpush.msrb.mxu1 %v12445_v17  ;;  %4997 = vmatpush.msrb.mxu3 %v4996_v1  ;;  %v16526_v17 = vand.u32 4294901760, %v12572_v3  ;;  %v5036_v1 = vand.u32 4294901760, %v12854_v30  ;;  %v4938_v3 = vsub.f32 %v12843_v38, %v4937_v59  ;;  %v5026_v10 = vand.u32 4294901760, %v5025_v60 }
 0x2a0   :  { %4848 = vmatpush.msrb.mxu0 %v16525_v40  ;;  %4924 = vmatpush.msrb.mxu2 %v12748_v22 }
 0x2a1   :  { %4883 = vmatpush.msrb.mxu1 %v12459_v32  ;;  %5003 = vmatpush.msrb.mxu3 %v5002_v45  ;;  %v5031_v32 = vsub.f32 %v12840_v55, %v5030_v18  ;;  %v5037_v62 = vsub.f32 %v12854_v30, %v5036_v1 }
 0x2a2   :  { %4852 = vmatpush.msrb.mxu0 %v16526_v17  ;;  %4926 = vmatpush.msrb.mxu2 %v12763_v44 }
 0x2a3   :  { %4885 = vmatpush.msrb.mxu1 %v12475_v24  ;;  %5009 = vmatpush.msrb.mxu3 %v5008_v27  ;;  %v16528_v24 = vand.u32 4294901760, %v12620_v47  ;;  %v5032_v45 = vand.u32 4294901760, %v5031_v32  ;;  %v5038_v47 = vand.u32 4294901760, %v5037_v62  ;;  %v251_v27 = vld [vmem:[%s16074_s1 + $0x730] sm:$0xff]  ;;  %v248_v62 = vld [vmem:[%s16074_s1 + $0x718] sm:$0xff] }
 0x2a4   :  { %4856 = vmatpush.msrb.mxu0 %v16527_v31  ;;  %4928 = vmatpush.msrb.mxu2 %v12776_v43  ;;  %v249_v31 = vld [vmem:[%s16074_s1 + $0x720] sm:$0xff] }
 0x2a5   :  { %4887 = vmatpush.msrb.mxu1 %v12490_v13  ;;  %5015 = vmatpush.msrb.mxu3 %v5014_v37  ;;  %v4939_v13 = vand.u32 4294901760, %v4938_v3 }
 0x2a6   :  { %4860 = vmatpush.msrb.mxu0 %v16528_v24  ;;  %4930 = vmatpush.msrb.mxu2 %v12798_v0 }
 0x2a7   :  { %4889 = vmatpush.msrb.mxu1 %v12505_v56  ;;  %5021 = vmatpush.msrb.mxu3 %v5020_v54  ;;  %v16529_v56 = vand.u32 4294901760, %v12613_v41 }
 0x2a8   :  { %4862 = vmatmul.f32.vlgmr.msrb.gmra.mxu0 %v12516_v51  ;;  %4932 = vmatpush.msrb.mxu2 %v12814_v6 }
 0x2a9   :  { %5047 = vmatpush.msra.mxu0 %v12613_v41  ;;  %4891 = vmatpush.msrb.mxu1 %v12522_v15  ;;  %v16530_v15 = vand.u32 4294901760, %v12637_v42 }
 0x2aa   :  { %5027 = vmatpush.msrb.mxu3 %v5026_v10  ;;  %4934 = vmatpush.msrb.mxu2 %v12829_v26 }
 0x2ab   :  { %5050 = vmatpush.msra.mxu0 %v12637_v42  ;;  %4893 = vmatpush.msrb.mxu1 %v12534_v50  ;;  %v16531_v50 = vand.u32 4294901760, %v12650_v36  ;;  %v16538_v42 = vand.u32 4294901760, %v12761_v2 }
 0x2ac   :  { %5033 = vmatpush.msrb.mxu3 %v5032_v45  ;;  %4940 = vmatmul.f32.vlgmr.msrb.gmra.mxu2 %v4939_v13  ;;  %v13111_v13 = vand.u32 4294901760, %v249_v31 }
 0x2ad   :  { %5053 = vmatpush.msra.mxu0 %v12650_v36  ;;  %5141 = vmatpush.msra.mxu2 %v16529_v56 }
 0x2ae   :  { %4895 = vmatpush.msrb.mxu1 %v12561_v9  ;;  %5039 = vmatpush.msrb.mxu3 %v5038_v47  ;;  %v16532_v9 = vand.u32 4294901760, %v12658_v28 }
 0x2af   :  { %5041 = vmatmul.f32.vlgmr.msrb.gmra.mxu3 %v12816_v8  ;;  %5056 = vmatpush.msra.mxu0 %v12658_v28  ;;  %v16535_v28 = vand.u32 4294901760, %v12714_v7 }
 0x2b0   :  { %5145 = vmatpush.msra.mxu2 %v16530_v15  ;;  %5208 = vmatpush.msra.mxu3 %v12577_v39 }
 0x2b1   :  { %4897 = vmatpush.msrb.mxu1 %v12586_v49  ;;  %5059 = vmatpush.msra.mxu0 %v12672_v53  ;;  %v16537_v49 = vand.u32 4294901760, %v12746_v29 }
 0x2b2   :  { %4899 = vmatmul.f32.vlgmr.msrb.gmra.mxu1 %v12516_v51  ;;  %5149 = vmatpush.msra.mxu2 %v16531_v50  ;;  %v16533_v51 = vand.u32 4294901760, %v12672_v53  ;;  %v257_v53 = vld [vmem:[%s16074_s1 + $0x760] sm:$0xff]  ;;  %v247_v50 = vld [vmem:[%s16074_s1 + $0x710] sm:$0xff] }
 0x2b3   :  { %5100 = vmatpush.msra.mxu1 %v12577_v39  ;;  %5210 = vmatpush.msra.mxu3 %v12602_v4  ;;  %v16534_v39 = vand.u32 4294901760, %v12697_v61 }
 0x2b4   :  { %5062 = vmatpush.msra.mxu0 %v12697_v61  ;;  %5153 = vmatpush.msra.mxu2 %v16532_v9  ;;  %v256_v61 = vld [vmem:[%s16074_s1 + $0x758] sm:$0xff] }
 0x2b5   :  { %5102 = vmatpush.msra.mxu1 %v12602_v4  ;;  %5212 = vmatpush.msra.mxu3 %v12622_v23  ;;  %v258_v4 = vld [vmem:[%s16074_s1 + $0x768] sm:$0xff] }
 0x2b6   :  { %5065 = vmatpush.msra.mxu0 %v12714_v7  ;;  %5157 = vmatpush.msra.mxu2 %v16533_v51 }
 0x2b7   :  { %5104 = vmatpush.msra.mxu1 %v12622_v23  ;;  %5214 = vmatpush.msra.mxu3 %v12630_v46  ;;  %v16536_v23 = vand.u32 4294901760, %v12731_v63 }
 0x2b8   :  { %5068 = vmatpush.msra.mxu0 %v12731_v63  ;;  %5161 = vmatpush.msra.mxu2 %v16534_v39  ;;  %v12999_v63 = vand.u32 4294901760, %v256_v61  ;;  %v13128_v39 = vand.u32 4294901760, %v248_v62 }
 0x2b9   :  { %5106 = vmatpush.msra.mxu1 %v12630_v46  ;;  %5216 = vmatpush.msra.mxu3 %v12642_v12  ;;  %v12975_v46 = vand.u32 4294901760, %v258_v4 }
 0x2ba   :  { %5071 = vmatpush.msra.mxu0 %v12746_v29  ;;  %5165 = vmatpush.msra.mxu2 %v16535_v28 }
 0x2bb   :  { %5108 = vmatpush.msra.mxu1 %v12642_v12  ;;  %5218 = vmatpush.msra.mxu3 %v12665_v48  ;;  %v260_v12 = vld [vmem:[%s16074_s1 + $0x778] sm:$0xff] }
 0x2bc   :  { %5074 = vmatpush.msra.mxu0 %v12761_v2  ;;  %5169 = vmatpush.msra.mxu2 %v16536_v23  ;;  %v12955_v36 = vand.u32 4294901760, %v260_v12  ;;  %v254_v2 = vld [vmem:[%s16074_s1 + $0x748] sm:$0xff] }
 0x2bd   :  { %5110 = vmatpush.msra.mxu1 %v12665_v48  ;;  %5220 = vmatpush.msra.mxu3 %v12683_v34  ;;  %v259_v48 = vld [vmem:[%s16074_s1 + $0x770] sm:$0xff] }
 0x2be   :  { %5077 = vmatpush.msra.mxu0 %v12774_v20  ;;  %5173 = vmatpush.msra.mxu2 %v16537_v49  ;;  %v12965_v41 = vand.u32 4294901760, %v259_v48 }
 0x2bf   :  { %5112 = vmatpush.msra.mxu1 %v12683_v34  ;;  %5222 = vmatpush.msra.mxu3 %v12699_v33  ;;  %v16539_v34 = vand.u32 4294901760, %v12774_v20  ;;  %v13025_v20 = vsub.f32 %v256_v61, %v12999_v63 }
 0x2c0   :  { %5080 = vmatpush.msra.mxu0 %v12790_v58  ;;  %5177 = vmatpush.msra.mxu2 %v16538_v42  ;;  %v12991_v7 = vsub.f32 %v259_v48, %v12965_v41  ;;  %v13035_v58 = vand.u32 4294901760, %v254_v2  ;;  %v13140_v42 = vand.u32 4294901760, %v247_v50 }
 0x2c1   :  { %5114 = vmatpush.msra.mxu1 %v12699_v33  ;;  %5224 = vmatpush.msra.mxu3 %v12716_v19  ;;  %v12978_v33 = vsub.f32 %v260_v12, %v12955_v36 }
 0x2c2   :  { %5083 = vmatpush.msra.mxu0 %v12806_v14  ;;  %5181 = vmatpush.msra.mxu2 %v16539_v34  ;;  %v13144_v34 = vsub.f32 %v249_v31, %v13111_v13 }
 0x2c3   :  { %5116 = vmatpush.msra.mxu1 %v12716_v19  ;;  %5226 = vmatpush.msra.mxu3 %v12733_v21  ;;  %v255_v19 = vld [vmem:[%s16074_s1 + $0x750] sm:$0xff]  ;;  %v5287_v29 = vand.u32 4294901760, %v12978_v33 }
 0x2c4   :  { %5086 = vmatpush.msra.mxu0 %v12827_v52  ;;  %5185 = vmatpush.msra.mxu2 %v5012_v16  ;;  %v13010_v14 = vand.u32 4294901760, %v255_v19 }
 0x2c5   :  { %5118 = vmatpush.msra.mxu1 %v12733_v21  ;;  %5228 = vmatpush.msra.mxu3 %v12748_v22  ;;  %v12988_v21 = vand.u32 4294901760, %v257_v53 }
 0x2c6   :  { %5089 = vmatpush.msra.mxu0 %v12840_v55  ;;  %5189 = vmatpush.msra.mxu2 %v5018_v35  ;;  %v253_v35 = vld [vmem:[%s16074_s1 + $0x740] sm:$0xff]  ;;  %v13041_v55 = vsub.f32 %v255_v19, %v13010_v14 }
 0x2c7   :  { %5120 = vmatpush.msra.mxu1 %v12748_v22  ;;  %5230 = vmatpush.msra.mxu3 %v12763_v44  ;;  %v13005_v22 = vsub.f32 %v258_v4, %v12975_v46  ;;  %v13019_v16 = vsub.f32 %v257_v53, %v12988_v21  ;;  %v13051_v25 = vand.u32 4294901760, %v253_v35  ;;  %v246_v4 = vld [vmem:[%s16074_s1 + $0x708] sm:$0xff] }
 0x2c8   :  { %5092 = vmatpush.msra.mxu0 %v12854_v30  ;;  %5193 = vmatpush.msra.mxu2 %v5024_v57  ;;  %v16246_v30 = vand.u32 4294901760, %v13025_v20  ;;  %v16244_v37 = vand.u32 4294901760, %v13041_v55 }
 0x2c9   :  { %5122 = vmatpush.msra.mxu1 %v12763_v44  ;;  %5232 = vmatpush.msra.mxu3 %v12776_v43  ;;  %v5293_v44 = vand.u32 4294901760, %v12991_v7  ;;  %v5299_v52 = vand.u32 4294901760, %v13005_v22  ;;  %v16249_v57 = vand.u32 4294901760, %v13019_v16  ;;  %v13084_v54 = vsub.f32 %v253_v35, %v13051_v25 }
 0x2ca   :  { %5095 = vmatmul.f32.vlgmr.msra.gmra.mxu0 %v12843_v38  ;;  %5197 = vmatpush.msra.mxu2 %v5030_v18  ;;  %v13065_v18 = vand.u32 4294901760, %v252_v5  ;;  %v5318_v10 = vsub.f32 %v13041_v55, %v16244_v37  ;;  %v13160_v35 = vsub.f32 %v248_v62, %v13128_v39 }
 0x2cb   :  { %5245 = vmatpush.msrb.mxu0 %v12955_v36  ;;  %5124 = vmatpush.msra.mxu1 %v12776_v43  ;;  %v5288_v43 = vsub.f32 %v12978_v33, %v5287_v29  ;;  %v5300_v40 = vsub.f32 %v13005_v22, %v5299_v52  ;;  %v5306_v60 = vsub.f32 %v13019_v16, %v16249_v57  ;;  %v16241_v47 = vand.u32 4294901760, %v13084_v54 }
 0x2cc   :  { %5234 = vmatpush.msra.mxu3 %v12798_v0  ;;  %5201 = vmatpush.msra.mxu2 %v5036_v1  ;;  %v13081_v1 = vand.u32 4294901760, %v251_v27  ;;  %v13100_v38 = vsub.f32 %v252_v5, %v13065_v18  ;;  %v5319_v49 = vand.u32 4294901760, %v5318_v10  ;;  %v13167_v5 = vand.u32 4294901760, %v246_v4 }
 0x2cd   :  { %5247 = vmatpush.msrb.mxu0 %v12965_v41  ;;  %5126 = vmatpush.msra.mxu1 %v12798_v0  ;;  %v5294_v0 = vsub.f32 %v12991_v7, %v5293_v44  ;;  %v5289_v11 = vand.u32 4294901760, %v5288_v43  ;;  %v5301_v32 = vand.u32 4294901760, %v5300_v40  ;;  %v5307_v45 = vand.u32 4294901760, %v5306_v60  ;;  %v276_v43 = vld [vmem:[%s16074_s1 + $0x7f8] sm:$0xff] }
 0x2ce   :  { %5236 = vmatpush.msra.mxu3 %v12814_v6  ;;  %5203 = vmatmul.f32.vlgmr.msra.gmra.mxu2 %v12816_v8  ;;  %v13115_v56 = vsub.f32 %v251_v27, %v13081_v1  ;;  %v16240_v28 = vand.u32 4294901760, %v13100_v38  ;;  %v5330_v12 = vsub.f32 %v13084_v54, %v16241_v47  ;;  %v16236_v40 = vand.u32 4294901760, %v13144_v34 }
 0x2cf   :  { %5249 = vmatpush.msrb.mxu0 %v12975_v46  ;;  %5388 = vmatpush.msrb.mxu2 %v12978_v33  ;;  %v5295_v17 = vand.u32 4294901760, %v5294_v0  ;;  %v245_v0 = vld [vmem:[%s16074_s1 + $0x700] sm:$0xff]  ;;  %v13183_v60 = vand.u32 4294901760, %v276_v43  ;;  %v16238_v10 = vand.u32 4294901760, %v13160_v35  ;;  %v13198_v62 = vsub.f32 %v246_v4, %v13167_v5  ;;  %v268_v33 = vld [vmem:[%s16074_s1 + $0x7b8] sm:$0xff] }
 0x2d0   :  { %5128 = vmatpush.msra.mxu1 %v12814_v6  ;;  %5238 = vmatpush.msra.mxu3 %v12829_v26  ;;  %v13068_v6 = vsub.f32 %v254_v2, %v13035_v58  ;;  %v16239_v48 = vand.u32 4294901760, %v13115_v56  ;;  %v5336_v19 = vsub.f32 %v13100_v38, %v16240_v28  ;;  %v5331_v27 = vand.u32 4294901760, %v5330_v12  ;;  %v273_v12 = vld [vmem:[%s16074_s1 + $0x7e0] sm:$0xff] }
 0x2d1   :  { %5240 = vmatmul.f32.vlgmr.msra.gmra.mxu3 %v12816_v8  ;;  %5251 = vmatpush.msrb.mxu0 %v12988_v21  ;;  %v250_v8 = vld [vmem:[%s16074_s1 + $0x728] sm:$0xff] }
 0x2d2   :  { %5391 = vmatpush.msrb.mxu2 %v12991_v7  ;;  %5441 = vmatpush.msrb.mxu3 %v12955_v36  ;;  %v13096_v3 = vand.u32 4294901760, %v250_v8  ;;  %v16243_v24 = vand.u32 4294901760, %v13068_v6  ;;  %v5337_v31 = vand.u32 4294901760, %v5336_v19  ;;  %v267_v7 = vld [vmem:[%s16074_s1 + $0x7b0] sm:$0xff] }
 0x2d3   :  { %5130 = vmatpush.msra.mxu1 %v12829_v26  ;;  %5253 = vmatpush.msrb.mxu0 %v12999_v63  ;;  %v5312_v26 = vsub.f32 %v13025_v20, %v16246_v30  ;;  %v13344_v57 = vand.u32 4294901760, %v267_v7 }
 0x2d4   :  { %5134 = vmatmul.f32.vlgmr.msra.gmra.mxu1 %v4937_v59  ;;  %5394 = vmatpush.msrb.mxu2 %v13005_v22  ;;  %v434_v59 = vld.sshfl [vmem:[#allocation1 + $0x30] sm:$0xff pattern:$0x73625140]  ;;  %v5324_v51 = vsub.f32 %v13068_v6, %v16243_v24  ;;  %v13132_v23 = vsub.f32 %v250_v8, %v13096_v3  ;;  %v13178_v8 = vsub.f32 %v247_v50, %v13140_v42 }
 0x2d5   :  { %5290 = vmatpush.msrb.mxu1 %v5289_v11  ;;  %5443 = vmatpush.msrb.mxu3 %v12965_v41  ;;  %v5313_v15 = vand.u32 4294901760, %v5312_v26  ;;  %v13122_v9 = vand.u32 4294901760, %v434_v59  ;;  %v5342_v11 = vsub.f32 %v13115_v56, %v16239_v48  ;;  %v275_v26 = vld [vmem:[%s16074_s1 + $0x7f0] sm:$0xff]  ;;  %v5354_v50 = vsub.f32 %v13144_v34, %v16236_v40 }
 0x2d6   :  { %5255 = vmatpush.msrb.mxu0 %v13010_v14  ;;  %5397 = vmatpush.msrb.mxu2 %v13019_v16  ;;  %v5325_v61 = vand.u32 4294901760, %v5324_v51  ;;  %v16237_v2 = vand.u32 4294901760, %v13132_v23  ;;  %v16242_v51 = vand.u32 4294901760, %v13178_v8 }
 0x2d7   :  { %5296 = vmatpush.msrb.mxu1 %v5295_v17  ;;  %5445 = vmatpush.msrb.mxu3 %v12975_v46  ;;  %v13152_v53 = vsub.f32 %v434_v59, %v13122_v9  ;;  %v13192_v59 = vand.u32 4294901760, %v245_v0 }
 0x2d8   :  { %5257 = vmatpush.msrb.mxu0 %v13035_v58  ;;  %5400 = vmatpush.msrb.mxu2 %v13025_v20 }
 0x2d9   :  { %5302 = vmatpush.msrb.mxu1 %v5301_v32  ;;  %5447 = vmatpush.msrb.mxu3 %v12988_v21  ;;  %v5278_v17 = vand.u32 4294901760, %v13152_v53  ;;  %v5348_v32 = vsub.f32 %v13132_v23, %v16237_v2  ;;  %16540 = vst [vmem:[#allocation5_spill] sm:$0xff] %v13192_v59  ;;  %v272_v2 = vld [vmem:[%s16074_s1 + $0x7d8] sm:$0xff] }
 0x2da   :  { %5259 = vmatpush.msrb.mxu0 %v13051_v25  ;;  %5403 = vmatpush.msrb.mxu2 %v13041_v55  ;;  %v13248_v47 = vand.u32 4294901760, %v272_v2 }
 0x2db   :  { %5308 = vmatpush.msrb.mxu1 %v5307_v45  ;;  %5449 = vmatpush.msrb.mxu3 %v12999_v63  ;;  %v274_v45 = vld [vmem:[%s16074_s1 + $0x7e8] sm:$0xff]  ;;  %v5279_v4 = vsub.f32 %v13152_v53, %v5278_v17  ;;  %v5349_v19 = vand.u32 4294901760, %v5348_v32  ;;  %v5355_v32 = vand.u32 4294901760, %v5354_v50 }
 0x2dc   :  { %5261 = vmatpush.msrb.mxu0 %v13065_v18  ;;  %5406 = vmatpush.msrb.mxu2 %v13068_v6  ;;  %v13228_v40 = vand.u32 4294901760, %v274_v45 }
 0x2dd   :  { %5314 = vmatpush.msrb.mxu1 %v5313_v15  ;;  %5451 = vmatpush.msrb.mxu3 %v13010_v14  ;;  %v5343_v15 = vand.u32 4294901760, %v5342_v11  ;;  %v13226_v11 = vsub.f32 %v245_v0, %v13192_v59  ;;  %v5366_v0 = vsub.f32 %v13178_v8, %v16242_v51  ;;  %v5280_v48 = vand.u32 4294901760, %v5279_v4 }
 0x2de   :  { %5263 = vmatpush.msrb.mxu0 %v13081_v1  ;;  %5409 = vmatpush.msrb.mxu2 %v13084_v54  ;;  %v13256_v51 = vsub.f32 %v274_v45, %v13228_v40 }
 0x2df   :  { %5320 = vmatpush.msrb.mxu1 %v5319_v49  ;;  %5453 = vmatpush.msrb.mxu3 %v13035_v58  ;;  %v13208_v49 = vand.u32 4294901760, %v275_v26  ;;  %v5367_v45 = vand.u32 4294901760, %v5366_v0 }
 0x2e0   :  { %5265 = vmatpush.msrb.mxu0 %v13096_v3  ;;  %5412 = vmatpush.msrb.mxu2 %v13100_v38  ;;  %v16250_v0 = vand.u32 4294901760, %v13256_v51 }
 0x2e1   :  { %5326 = vmatpush.msrb.mxu1 %v5325_v61  ;;  %5455 = vmatpush.msrb.mxu3 %v13051_v25  ;;  %v13219_v61 = vsub.f32 %v276_v43, %v13183_v60  ;;  %v16245_v43 = vand.u32 4294901760, %v13198_v62 }
 0x2e2   :  { %5267 = vmatpush.msrb.mxu0 %v13111_v13  ;;  %5415 = vmatpush.msrb.mxu2 %v13115_v56 }
 0x2e3   :  { %5332 = vmatpush.msrb.mxu1 %v5331_v27  ;;  %5457 = vmatpush.msrb.mxu3 %v13065_v18  ;;  %v5360_v27 = vsub.f32 %v13160_v35, %v16238_v10  ;;  %v13243_v10 = vsub.f32 %v275_v26, %v13208_v49  ;;  %v16247_v28 = vand.u32 4294901760, %v13219_v61  ;;  %v16248_v26 = vand.u32 4294901760, %v13226_v11 }
 0x2e4   :  { %5269 = vmatpush.msrb.mxu0 %v13128_v39  ;;  %5418 = vmatpush.msrb.mxu2 %v13132_v23  ;;  %v5372_v4 = vsub.f32 %v13198_v62, %v16245_v43  ;;  %v13278_v43 = vsub.f32 %v272_v2, %v13248_v47 }
 0x2e5   :  { %5338 = vmatpush.msrb.mxu1 %v5337_v31  ;;  %5459 = vmatpush.msrb.mxu3 %v13081_v1  ;;  %v13236_v31 = vand.u32 4294901760, %v273_v12  ;;  %v5361_v50 = vand.u32 4294901760, %v5360_v27  ;;  %v16251_v27 = vand.u32 4294901760, %v13243_v10 }
 0x2e6   :  { %5271 = vmatpush.msrb.mxu0 %v13140_v42  ;;  %5421 = vmatpush.msrb.mxu2 %v13144_v34  ;;  %v5373_v2 = vand.u32 4294901760, %v5372_v4 }
 0x2e7   :  { %5344 = vmatpush.msrb.mxu1 %v5343_v15  ;;  %5461 = vmatpush.msrb.mxu3 %v13096_v3  ;;  %v271_v15 = vld [vmem:[%s16074_s1 + $0x7d0] sm:$0xff]  ;;  %v13264_v24 = vsub.f32 %v273_v12, %v13236_v31  ;;  %v5629_v12 = vsub.f32 %v13219_v61, %v16247_v28 }
 0x2e8   :  { %5273 = vmatpush.msrb.mxu0 %v13167_v5  ;;  %5424 = vmatpush.msrb.mxu2 %v13160_v35  ;;  %v13271_v37 = vand.u32 4294901760, %v271_v15 }
 0x2e9   :  { %5350 = vmatpush.msrb.mxu1 %v5349_v19  ;;  %5463 = vmatpush.msrb.mxu3 %v13111_v13  ;;  %v270_v19 = vld [vmem:[%s16074_s1 + $0x7c8] sm:$0xff]  ;;  %v16252_v28 = vand.u32 4294901760, %v13264_v24  ;;  %v5630_v4 = vand.u32 4294901760, %v5629_v12  ;;  %v13322_v12 = vand.u32 4294901760, %v268_v33 }
 0x2ea   :  { %5275 = vmatpush.msrb.mxu0 %v13192_v59  ;;  %5427 = vmatpush.msrb.mxu2 %v13178_v8  ;;  %v13289_v30 = vand.u32 4294901760, %v270_v19 }
 0x2eb   :  { %5356 = vmatpush.msrb.mxu1 %v5355_v32  ;;  %5465 = vmatpush.msrb.mxu3 %v13128_v39  ;;  %v269_v32 = vld [vmem:[%s16074_s1 + $0x7c0] sm:$0xff]  ;;  %v5647_v22 = vsub.f32 %v13264_v24, %v16252_v28 }
 0x2ec   :  { %5281 = vmatmul.f32.vlgmr.msrb.gmra.mxu0 %v5280_v48  ;;  %5430 = vmatpush.msrb.mxu2 %v13198_v62  ;;  %v5378_v48 = vsub.f32 %v13226_v11, %v16248_v26  ;;  %v13305_v26 = vand.u32 4294901760, %v269_v32 }
 0x2ed   :  { %5482 = vmatpush.msra.mxu0 %v5287_v29  ;;  %5362 = vmatpush.msrb.mxu1 %v5361_v50  ;;  %v5635_v29 = vsub.f32 %v13243_v10, %v16251_v27  ;;  %v13303_v50 = vsub.f32 %v271_v15, %v13271_v37  ;;  %v5641_v15 = vsub.f32 %v13256_v51, %v16250_v0  ;;  %v13334_v0 = vld.sshfl [vmem:[#allocation1 + $0x38] sm:$0xff pattern:$0x73625140] }
 0x2ee   :  { %5467 = vmatpush.msrb.mxu3 %v13140_v42  ;;  %5433 = vmatpush.msrb.mxu2 %v13226_v11  ;;  %v13342_v28 = vsub.f32 %v269_v32, %v13305_v26 }
 0x2ef   :  { %5486 = vmatpush.msra.mxu0 %v5293_v44  ;;  %5368 = vmatpush.msrb.mxu1 %v5367_v45  ;;  %v5379_v44 = vand.u32 4294901760, %v5378_v48  ;;  %v13320_v45 = vsub.f32 %v270_v19, %v13289_v30  ;;  %v20_v48 = vld [vmem:[%s16073_s0 + $0x28] sm:$0xff]  ;;  %v16541_v19 = vand.u32 4294901760, %v13019_v16  ;;  %v16254_v27 = vand.u32 4294901760, %v13303_v50  ;;  %v265_v16 = vld [vmem:[%s16074_s1 + $0x7a0] sm:$0xff] }
 0x2f0   :  { %5469 = vmatpush.msrb.mxu3 %v13167_v5  ;;  %5436 = vmatmul.f32.vlgmr.msrb.gmra.mxu2 %v13152_v53  ;;  %437 = vst [vmem:[#allocation1 + $0x20] ss:$4 sm:$0xff] %v20_v48  ;;  %v5642_v32 = vand.u32 4294901760, %v5641_v15  ;;  %v13357_v48 = vsub.f32 %v268_v33, %v13322_v12  ;;  %v16255_v33 = vand.u32 4294901760, %v13342_v28  ;;  %v13374_v15 = vand.u32 4294901760, %v265_v16 }
 0x2f1   :  { %5490 = vmatpush.msra.mxu0 %v5299_v52  ;;  %5586 = vmatpush.msra.mxu2 %v13183_v60  ;;  %v266_v52 = vld [vmem:[%s16074_s1 + $0x7a8] sm:$0xff] }
 0x2f2   :  { %5374 = vmatpush.msrb.mxu1 %v5373_v2  ;;  %5471 = vmatpush.msrb.mxu3 %v13192_v59  ;;  %v5636_v2 = vand.u32 4294901760, %v5635_v29  ;;  %v16542_v59 = vand.u32 4294901760, %v13278_v43  ;;  %v16257_v29 = vand.u32 4294901760, %v13320_v45 }
 0x2f3   :  { %5475 = vmatmul.f32.vlgmr.msrb.gmra.mxu3 %v5278_v17  ;;  %5494 = vmatpush.msra.mxu0 %v16541_v19  ;;  %v16543_v17 = vand.u32 4294901760, %v13025_v20  ;;  %v13359_v19 = vand.u32 4294901760, %v266_v52  ;;  %v5659_v20 = vsub.f32 %v13303_v50, %v16254_v27 }
 0x2f4   :  { %5588 = vmatpush.msra.mxu2 %v13208_v49  ;;  %5631 = vmatpush.msra.mxu3 %v5630_v4  ;;  %v5653_v53 = vsub.f32 %v13278_v43, %v16542_v59  ;;  %v5648_v59 = vand.u32 4294901760, %v5647_v22  ;;  %v264_v4 = vld [vmem:[%s16074_s1 + $0x798] sm:$0xff]  ;;  %v16544_v22 = vand.u32 4294901760, %v13041_v55  ;;  %v263_v55 = vld [vmem:[%s16074_s1 + $0x790] sm:$0xff] }
 0x2f5   :  { %5380 = vmatpush.msrb.mxu1 %v5379_v44  ;;  %5498 = vmatpush.msra.mxu0 %v16543_v17  ;;  %v13372_v44 = vsub.f32 %v267_v7, %v13344_v57  ;;  %v13385_v7 = vsub.f32 %v266_v52, %v13359_v19  ;;  %v13387_v27 = vand.u32 4294901760, %v264_v4  ;;  %v5671_v52 = vsub.f32 %v13342_v28, %v16255_v33 }
 0x2f6   :  { %5382 = vmatmul.f32.vlgmr.msrb.gmra.mxu1 %v13122_v9  ;;  %5590 = vmatpush.msra.mxu2 %v13228_v40  ;;  %v5654_v17 = vand.u32 4294901760, %v5653_v53  ;;  %v16545_v53 = vand.u32 4294901760, %v13068_v6  ;;  %v262_v6 = vld [vmem:[%s16074_s1 + $0x788] sm:$0xff] }
 0x2f7   :  { %5549 = vmatpush.msra.mxu1 %v12955_v36  ;;  %5637 = vmatpush.msra.mxu3 %v5636_v2  ;;  %v5665_v36 = vsub.f32 %v13320_v45, %v16257_v29  ;;  %v16256_v2 = vand.u32 4294901760, %v13357_v48  ;;  %v13417_v33 = vsub.f32 %v264_v4, %v13387_v27 }
 0x2f8   :  { %5502 = vmatpush.msra.mxu0 %v16544_v22  ;;  %5592 = vmatpush.msra.mxu2 %v13236_v31  ;;  %v13401_v22 = vsub.f32 %v265_v16, %v13374_v15 }
 0x2f9   :  { %5551 = vmatpush.msra.mxu1 %v12965_v41  ;;  %5643 = vmatpush.msra.mxu3 %v5642_v32  ;;  %v5660_v41 = vand.u32 4294901760, %v5659_v20  ;;  %v5682_v32 = vand.u32 4294901760, %v13372_v44  ;;  %v5677_v16 = vsub.f32 %v13357_v48, %v16256_v2  ;;  %v5688_v20 = vand.u32 4294901760, %v13385_v7 }
 0x2fa   :  { %5506 = vmatpush.msra.mxu0 %v16545_v53  ;;  %5594 = vmatpush.msra.mxu2 %v13248_v47  ;;  %v16546_v53 = vand.u32 4294901760, %v13084_v54  ;;  %v261_v54 = vld [vmem:[%s16074_s1 + $0x780] sm:$0xff]  ;;  %v5694_v2 = vand.u32 4294901760, %v13401_v22 }
 0x2fb   :  { %5553 = vmatpush.msra.mxu1 %v12975_v46  ;;  %5649 = vmatpush.msra.mxu3 %v5648_v59  ;;  %v13409_v46 = vand.u32 4294901760, %v263_v55  ;;  %v5666_v59 = vand.u32 4294901760, %v5665_v36  ;;  %v5672_v36 = vand.u32 4294901760, %v5671_v52  ;;  %v5683_v4 = vsub.f32 %v13372_v44, %v5682_v32 }
 0x2fc   :  { %5510 = vmatpush.msra.mxu0 %v16546_v53  ;;  %5596 = vmatpush.msra.mxu2 %v13271_v37  ;;  %v16547_v53 = vand.u32 4294901760, %v13100_v38  ;;  %v16548_v38 = vand.u32 4294901760, %v13115_v56  ;;  %v13441_v29 = vand.u32 4294901760, %v261_v54  ;;  %v5700_v52 = vand.u32 4294901760, %v13417_v33 }
 0x2fd   :  { %5555 = vmatpush.msra.mxu1 %v12988_v21  ;;  %5655 = vmatpush.msra.mxu3 %v5654_v17  ;;  %v13425_v21 = vand.u32 4294901760, %v262_v6  ;;  %v13428_v17 = vand.u32 4294901760, %v13334_v0  ;;  %v16549_v56 = vand.u32 4294901760, %v13132_v23  ;;  %v16550_v23 = vand.u32 4294901760, %v13144_v34 }
 0x2fe   :  { %5514 = vmatpush.msra.mxu0 %v16547_v53  ;;  %5598 = vmatpush.msra.mxu2 %v13289_v30  ;;  %v13439_v53 = vsub.f32 %v263_v55, %v13409_v46 }
 0x2ff   :  { %5557 = vmatpush.msra.mxu1 %v12999_v63  ;;  %5661 = vmatpush.msra.mxu3 %v5660_v41  ;;  %v5678_v63 = vand.u32 4294901760, %v5677_v16  ;;  %v5689_v41 = vsub.f32 %v13385_v7, %v5688_v20  ;;  %v13452_v55 = vsub.f32 %v262_v6, %v13425_v21  ;;  %v13467_v16 = vsub.f32 %v261_v54, %v13441_v29 }
 0x300   :  { %5518 = vmatpush.msra.mxu0 %v16548_v38  ;;  %5600 = vmatpush.msra.mxu2 %v13305_v26  ;;  %v13456_v38 = vsub.f32 %v13334_v0, %v13428_v17  ;;  %v5706_v6 = vand.u32 4294901760, %v13439_v53  ;;  %v5701_v0 = vsub.f32 %v13417_v33, %v5700_v52 }
 0x301   :  { %5559 = vmatpush.msra.mxu1 %v13010_v14  ;;  %5667 = vmatpush.msra.mxu3 %v5666_v59  ;;  %v5684_v14 = vand.u32 4294901760, %v5683_v4  ;;  %v5695_v59 = vsub.f32 %v13401_v22, %v5694_v2  ;;  %v5712_v34 = vand.u32 4294901760, %v13452_v55 }
 0x302   :  { %5522 = vmatpush.msra.mxu0 %v16549_v56  ;;  %5602 = vmatpush.msra.mxu2 %v13322_v12  ;;  %v5619_v4 = vand.u32 4294901760, %v13456_v38  ;;  %v16553_v56 = vand.u32 4294901760, %v13198_v62 }
 0x303   :  { %5561 = vmatpush.msra.mxu1 %v13035_v58  ;;  %5673 = vmatpush.msra.mxu3 %v5672_v36  ;;  %v5690_v58 = vand.u32 4294901760, %v5689_v41  ;;  %v16551_v36 = vand.u32 4294901760, %v13160_v35  ;;  %v5696_v54 = vand.u32 4294901760, %v5695_v59  ;;  %v5707_v35 = vsub.f32 %v13439_v53, %v5706_v6 }
 0x304   :  { %5526 = vmatpush.msra.mxu0 %v16550_v23  ;;  %5604 = vmatpush.msra.mxu2 %v13344_v57  ;;  %v5702_v41 = vand.u32 4294901760, %v5701_v0 }
 0x305   :  { %5563 = vmatpush.msra.mxu1 %v13051_v25  ;;  %5679 = vmatpush.msra.mxu3 %v5678_v63  ;;  %v16552_v25 = vand.u32 4294901760, %v13178_v8  ;;  %v5718_v63 = vand.u32 4294901760, %v13467_v16  ;;  %v5620_v8 = vsub.f32 %v13456_v38, %v5619_v4  ;;  %v5708_v62 = vand.u32 4294901760, %v5707_v35 }
 0x306   :  { %5530 = vmatpush.msra.mxu0 %v16551_v36  ;;  %5606 = vmatpush.msra.mxu2 %v13359_v19 }
 0x307   :  { %5565 = vmatpush.msra.mxu1 %v13065_v18  ;;  %5685 = vmatpush.msra.mxu3 %v5684_v14  ;;  %v5713_v18 = vsub.f32 %v13452_v55, %v5712_v34  ;;  %v5719_v14 = vsub.f32 %v13467_v16, %v5718_v63 }
 0x308   :  { %5534 = vmatpush.msra.mxu0 %v16552_v25  ;;  %5608 = vmatpush.msra.mxu2 %v13374_v15 }
 0x309   :  { %5567 = vmatpush.msra.mxu1 %v13081_v1  ;;  %5691 = vmatpush.msra.mxu3 %v5690_v58  ;;  %v16554_v1 = vand.u32 4294901760, %v13226_v11  ;;  %v5714_v59 = vand.u32 4294901760, %v5713_v18  ;;  %v5720_v11 = vand.u32 4294901760, %v5719_v14 }
 0x30a   :  { %5538 = vmatpush.msra.mxu0 %v16553_v56  ;;  %5610 = vmatpush.msra.mxu2 %v13387_v27 }
 0x30b   :  { %5569 = vmatpush.msra.mxu1 %v13096_v3  ;;  %5697 = vmatpush.msra.mxu3 %v5696_v54  ;;  %v5621_v3 = vand.u32 4294901760, %v5620_v8 }
 0x30c   :  { %5542 = vmatpush.msra.mxu0 %v16554_v1  ;;  %5612 = vmatpush.msra.mxu2 %v13409_v46 }
 0x30d   :  { %5571 = vmatpush.msra.mxu1 %v13111_v13  ;;  %5703 = vmatpush.msra.mxu3 %v5702_v41  ;;  %v16555_v13 = vand.u32 4294901760, %v13219_v61  ;;  %v281_v41 = vld [vmem:[%s16074_s1 + $0x820] sm:$0xff] }
 0x30e   :  { %5544 = vmatmul.f32.vlgmr.msra.gmra.mxu0 %v13122_v9  ;;  %5614 = vmatpush.msra.mxu2 %v13425_v21 }
 0x30f   :  { %5729 = vmatpush.msrb.mxu0 %v13219_v61  ;;  %5573 = vmatpush.msra.mxu1 %v13128_v39  ;;  %v16556_v39 = vand.u32 4294901760, %v13243_v10  ;;  %v16558_v61 = vand.u32 4294901760, %v13256_v51 }
 0x310   :  { %5709 = vmatpush.msra.mxu3 %v5708_v62  ;;  %5616 = vmatpush.msra.mxu2 %v13441_v29  ;;  %v280_v62 = vld [vmem:[%s16074_s1 + $0x818] sm:$0xff] }
 0x311   :  { %5732 = vmatpush.msrb.mxu0 %v13243_v10  ;;  %5575 = vmatpush.msra.mxu1 %v13140_v42  ;;  %v16557_v42 = vld [vmem:[#allocation5_spill] sm:$0xff]  ;;  %v16564_v10 = vand.u32 4294901760, %v13357_v48 }
 0x312   :  { %5715 = vmatpush.msra.mxu3 %v5714_v59  ;;  %5622 = vmatmul.f32.vlgmr.msra.gmra.mxu2 %v5621_v3  ;;  %v13724_v59 = vand.u32 4294901760, %v281_v41 }
 0x313   :  { %5735 = vmatpush.msrb.mxu0 %v13256_v51  ;;  %5823 = vmatpush.msrb.mxu2 %v16555_v13 }
 0x314   :  { %5577 = vmatpush.msra.mxu1 %v13167_v5  ;;  %5721 = vmatpush.msra.mxu3 %v5720_v11  ;;  %v16559_v5 = vand.u32 4294901760, %v13264_v24 }
 0x315   :  { %5723 = vmatmul.f32.vlgmr.msra.gmra.mxu3 %v13428_v17  ;;  %5738 = vmatpush.msrb.mxu0 %v13264_v24  ;;  %v16562_v24 = vand.u32 4294901760, %v13320_v45 }
 0x316   :  { %5827 = vmatpush.msrb.mxu2 %v16556_v39  ;;  %5890 = vmatpush.msrb.mxu3 %v13183_v60  ;;  %v279_v39 = vld [vmem:[%s16074_s1 + $0x810] sm:$0xff] }
 0x317   :  { %5579 = vmatpush.msra.mxu1 %v16557_v42  ;;  %5741 = vmatpush.msrb.mxu0 %v13278_v43 }
 0x318   :  { %5581 = vmatmul.f32.vlgmr.msra.gmra.mxu1 %v13122_v9  ;;  %5831 = vmatpush.msrb.mxu2 %v16558_v61  ;;  %v16560_v9 = vand.u32 4294901760, %v13278_v43 }
 0x319   :  { %5782 = vmatpush.msrb.mxu1 %v13183_v60  ;;  %5892 = vmatpush.msrb.mxu3 %v13208_v49  ;;  %v16561_v60 = vand.u32 4294901760, %v13303_v50 }
 0x31a   :  { %5744 = vmatpush.msrb.mxu0 %v13303_v50  ;;  %5835 = vmatpush.msrb.mxu2 %v16559_v5  ;;  %v13741_v5 = vand.u32 4294901760, %v280_v62 }
 0x31b   :  { %5784 = vmatpush.msrb.mxu1 %v13208_v49  ;;  %5894 = vmatpush.msrb.mxu3 %v13228_v40  ;;  %v289_v49 = vld [vmem:[%s16074_s1 + $0x860] sm:$0xff] }
 0x31c   :  { %5747 = vmatpush.msrb.mxu0 %v13320_v45  ;;  %5839 = vmatpush.msrb.mxu2 %v16560_v9  ;;  %v287_v45 = vld [vmem:[%s16074_s1 + $0x850] sm:$0xff] }
 0x31d   :  { %5786 = vmatpush.msrb.mxu1 %v13228_v40  ;;  %5896 = vmatpush.msrb.mxu3 %v13236_v31  ;;  %v16563_v40 = vand.u32 4294901760, %v13342_v28 }
 0x31e   :  { %5750 = vmatpush.msrb.mxu0 %v13342_v28  ;;  %5843 = vmatpush.msrb.mxu2 %v16561_v60 }
 0x31f   :  { %5788 = vmatpush.msrb.mxu1 %v13236_v31  ;;  %5898 = vmatpush.msrb.mxu3 %v13248_v47 }
 0x320   :  { %5753 = vmatpush.msrb.mxu0 %v13357_v48  ;;  %5847 = vmatpush.msrb.mxu2 %v16562_v24 }
 0x321   :  { %5790 = vmatpush.msrb.mxu1 %v13248_v47  ;;  %5900 = vmatpush.msrb.mxu3 %v13271_v37  ;;  %v292_v47 = vld [vmem:[%s16074_s1 + $0x878] sm:$0xff] }
 0x322   :  { %5756 = vmatpush.msrb.mxu0 %v13372_v44  ;;  %5851 = vmatpush.msrb.mxu2 %v16563_v40  ;;  %v13568_v28 = vand.u32 4294901760, %v292_v47  ;;  %v286_v44 = vld [vmem:[%s16074_s1 + $0x848] sm:$0xff] }
 0x323   :  { %5792 = vmatpush.msrb.mxu1 %v13271_v37  ;;  %5902 = vmatpush.msrb.mxu3 %v13289_v30  ;;  %v291_v37 = vld [vmem:[%s16074_s1 + $0x870] sm:$0xff] }
 0x324   :  { %5759 = vmatpush.msrb.mxu0 %v13385_v7  ;;  %5855 = vmatpush.msrb.mxu2 %v16564_v10  ;;  %v13578_v51 = vand.u32 4294901760, %v291_v37  ;;  %v13591_v31 = vsub.f32 %v292_v47, %v13568_v28  ;;  %v13753_v10 = vand.u32 4294901760, %v279_v39 }
 0x325   :  { %5794 = vmatpush.msrb.mxu1 %v13289_v30  ;;  %5904 = vmatpush.msrb.mxu3 %v13305_v26  ;;  %v290_v30 = vld [vmem:[%s16074_s1 + $0x868] sm:$0xff] }
 0x326   :  { %5762 = vmatpush.msrb.mxu0 %v13401_v22  ;;  %5859 = vmatpush.msrb.mxu2 %v5682_v32  ;;  %v13588_v43 = vand.u32 4294901760, %v290_v30  ;;  %v13604_v50 = vsub.f32 %v291_v37, %v13578_v51  ;;  %v5969_v48 = vand.u32 4294901760, %v13591_v31  ;;  %v285_v32 = vld [vmem:[%s16074_s1 + $0x840] sm:$0xff]  ;;  %v13648_v22 = vand.u32 4294901760, %v286_v44 }
 0x327   :  { %5796 = vmatpush.msrb.mxu1 %v13305_v26  ;;  %5906 = vmatpush.msrb.mxu3 %v13322_v12  ;;  %v288_v26 = vld [vmem:[%s16074_s1 + $0x858] sm:$0xff]  ;;  %v13757_v37 = vsub.f32 %v281_v41, %v13724_v59 }
 0x328   :  { %5765 = vmatpush.msrb.mxu0 %v13417_v33  ;;  %5863 = vmatpush.msrb.mxu2 %v5688_v20  ;;  %v13623_v33 = vand.u32 4294901760, %v287_v45 }
 0x329   :  { %5798 = vmatpush.msrb.mxu1 %v13322_v12  ;;  %5908 = vmatpush.msrb.mxu3 %v13344_v57  ;;  %v13612_v12 = vand.u32 4294901760, %v288_v26 }
 0x32a   :  { %5768 = vmatpush.msrb.mxu0 %v13439_v53  ;;  %5867 = vmatpush.msrb.mxu2 %v5694_v2  ;;  %v13654_v53 = vsub.f32 %v287_v45, %v13623_v33 }
 0x32b   :  { %5800 = vmatpush.msrb.mxu1 %v13344_v57  ;;  %5910 = vmatpush.msrb.mxu3 %v13359_v19  ;;  %v13601_v57 = vand.u32 4294901760, %v289_v49  ;;  %v13638_v7 = vsub.f32 %v288_v26, %v13612_v12 }
 0x32c   :  { %5771 = vmatpush.msrb.mxu0 %v13452_v55  ;;  %5871 = vmatpush.msrb.mxu2 %v5700_v52  ;;  %v284_v52 = vld [vmem:[%s16074_s1 + $0x838] sm:$0xff]  ;;  %v13664_v55 = vand.u32 4294901760, %v285_v32 }
 0x32d   :  { %5802 = vmatpush.msrb.mxu1 %v13359_v19  ;;  %5912 = vmatpush.msrb.mxu3 %v13374_v15  ;;  %v13618_v19 = vsub.f32 %v290_v30, %v13588_v43  ;;  %v13632_v2 = vsub.f32 %v289_v49, %v13601_v57  ;;  %v13678_v36 = vand.u32 4294901760, %v284_v52  ;;  %v278_v30 = vld [vmem:[%s16074_s1 + $0x808] sm:$0xff] }
 0x32e   :  { %5774 = vmatpush.msrb.mxu0 %v13467_v16  ;;  %5875 = vmatpush.msrb.mxu2 %v5706_v6  ;;  %v16267_v6 = vand.u32 4294901760, %v13638_v7  ;;  %v283_v16 = vld [vmem:[%s16074_s1 + $0x830] sm:$0xff] }
 0x32f   :  { %5804 = vmatpush.msrb.mxu1 %v13374_v15  ;;  %5914 = vmatpush.msrb.mxu3 %v13387_v27  ;;  %v5975_v15 = vand.u32 4294901760, %v13604_v50  ;;  %v5981_v20 = vand.u32 4294901760, %v13618_v19  ;;  %v16269_v23 = vand.u32 4294901760, %v13632_v2  ;;  %v13694_v35 = vand.u32 4294901760, %v283_v16 }
 0x330   :  { %5777 = vmatmul.f32.vlgmr.msrb.gmra.mxu0 %v13456_v38  ;;  %5879 = vmatpush.msrb.mxu2 %v5712_v34  ;;  %v16266_v34 = vand.u32 4294901760, %v13654_v53  ;;  %v13713_v38 = vsub.f32 %v284_v52, %v13678_v36  ;;  %v13780_v52 = vand.u32 4294901760, %v278_v30 }
 0x331   :  { %5927 = vmatpush.msra.mxu0 %v13568_v28  ;;  %5806 = vmatpush.msrb.mxu1 %v13387_v27  ;;  %v5970_v27 = vsub.f32 %v13591_v31, %v5969_v48  ;;  %v5982_v0 = vsub.f32 %v13618_v19, %v5981_v20  ;;  %v5988_v25 = vsub.f32 %v13632_v2, %v16269_v23 }
 0x332   :  { %5916 = vmatpush.msrb.mxu3 %v13409_v46  ;;  %5883 = vmatpush.msrb.mxu2 %v5718_v63  ;;  %v13697_v63 = vsub.f32 %v285_v32, %v13664_v55  ;;  %v6000_v1 = vsub.f32 %v13654_v53, %v16266_v34  ;;  %v13728_v11 = vsub.f32 %v283_v16, %v13694_v35  ;;  %v16262_v9 = vand.u32 4294901760, %v13713_v38 }
 0x333   :  { %5929 = vmatpush.msra.mxu0 %v13578_v51  ;;  %5808 = vmatpush.msrb.mxu1 %v13409_v46  ;;  %v5976_v46 = vsub.f32 %v13604_v50, %v5975_v15  ;;  %v5971_v58 = vand.u32 4294901760, %v5970_v27  ;;  %v5983_v56 = vand.u32 4294901760, %v5982_v0  ;;  %v5989_v14 = vand.u32 4294901760, %v5988_v25  ;;  %v308_v27 = vld [vmem:[%s16074_s1 + $0x8f8] sm:$0xff] }
 0x334   :  { %5918 = vmatpush.msrb.mxu3 %v13425_v21  ;;  %5885 = vmatmul.f32.vlgmr.msrb.gmra.mxu2 %v13428_v17  ;;  %v16263_v3 = vand.u32 4294901760, %v13697_v63  ;;  %v6001_v24 = vand.u32 4294901760, %v6000_v1  ;;  %v16261_v47 = vand.u32 4294901760, %v13728_v11  ;;  %v6018_v45 = vsub.f32 %v13713_v38, %v16262_v9 }
 0x335   :  { %5931 = vmatpush.msra.mxu0 %v13588_v43  ;;  %6070 = vmatpush.msra.mxu2 %v13591_v31  ;;  %v5977_v54 = vand.u32 4294901760, %v5976_v46  ;;  %v13773_v32 = vsub.f32 %v280_v62, %v13741_v5  ;;  %v277_v46 = vld [vmem:[%s16074_s1 + $0x800] sm:$0xff]  ;;  %v16258_v0 = vand.u32 4294901760, %v13757_v37  ;;  %v13796_v25 = vand.u32 4294901760, %v308_v27  ;;  %v300_v31 = vld [vmem:[%s16074_s1 + $0x8b8] sm:$0xff] }
 0x336   :  { %5810 = vmatpush.msrb.mxu1 %v13425_v21  ;;  %5920 = vmatpush.msrb.mxu3 %v13441_v29  ;;  %v13681_v21 = vsub.f32 %v286_v44, %v13648_v22  ;;  %v6012_v40 = vsub.f32 %v13697_v63, %v16263_v3  ;;  %v6019_v41 = vand.u32 4294901760, %v6018_v45  ;;  %v13811_v62 = vsub.f32 %v278_v30, %v13780_v52 }
 0x337   :  { %5922 = vmatmul.f32.vlgmr.msrb.gmra.mxu3 %v13428_v17  ;;  %5933 = vmatpush.msra.mxu0 %v13601_v57  ;;  %v282_v17 = vld [vmem:[%s16074_s1 + $0x828] sm:$0xff]  ;;  %v16260_v1 = vand.u32 4294901760, %v13773_v32 }
 0x338   :  { %6073 = vmatpush.msra.mxu2 %v13604_v50  ;;  %6123 = vmatpush.msra.mxu3 %v13568_v28  ;;  %v13709_v18 = vand.u32 4294901760, %v282_v17  ;;  %v16265_v8 = vand.u32 4294901760, %v13681_v21  ;;  %v6013_v16 = vand.u32 4294901760, %v6012_v40  ;;  %v305_v40 = vld [vmem:[%s16074_s1 + $0x8e0] sm:$0xff] }
 0x339   :  { %5812 = vmatpush.msrb.mxu1 %v13441_v29  ;;  %5935 = vmatpush.msra.mxu0 %v13612_v12  ;;  %v5994_v29 = vsub.f32 %v13638_v7, %v16267_v6  ;;  %v13886_v6 = vpop.f32.mrf.mxu0 }
 0x33a   :  { %5816 = vmatmul.f32.vlgmr.msrb.gmra.mxu1 %v5619_v4  ;;  %6076 = vmatpush.msra.mxu2 %v13618_v19  ;;  %v438_v4 = vld.sshfl [vmem:[#allocation1] sm:$0xff pattern:$0x73625140]  ;;  %v6006_v61 = vsub.f32 %v13681_v21, %v16265_v8  ;;  %v13745_v60 = vsub.f32 %v282_v17, %v13709_v18  ;;  %v13791_v17 = vsub.f32 %v279_v39, %v13753_v10 }
 0x33b   :  { %5972 = vmatpush.msra.mxu1 %v5971_v58  ;;  %6125 = vmatpush.msra.mxu3 %v13578_v51  ;;  %v5995_v13 = vand.u32 4294901760, %v5994_v29  ;;  %v13735_v42 = vand.u32 4294901760, %v438_v4  ;;  %v6024_v58 = vsub.f32 %v13728_v11, %v16261_v47  ;;  %v307_v29 = vld [vmem:[%s16074_s1 + $0x8f0] sm:$0xff]  ;;  %v6036_v39 = vsub.f32 %v13757_v37, %v16258_v0  ;;  %16565 = vst [vmem:[#allocation5_spill] sm:$0xff] %v13886_v6 }
 0x33c   :  { %5937 = vmatpush.msra.mxu0 %v13623_v33  ;;  %6079 = vmatpush.msra.mxu2 %v13632_v2  ;;  %v6007_v26 = vand.u32 4294901760, %v6006_v61  ;;  %v16259_v44 = vand.u32 4294901760, %v13745_v60  ;;  %v16264_v61 = vand.u32 4294901760, %v13791_v17 }
 0x33d   :  { %5978 = vmatpush.msra.mxu1 %v5977_v54  ;;  %6127 = vmatpush.msra.mxu3 %v13588_v43  ;;  %v13765_v49 = vsub.f32 %v438_v4, %v13735_v42  ;;  %v13805_v4 = vand.u32 4294901760, %v277_v46 }
 0x33e   :  { %5939 = vmatpush.msra.mxu0 %v13648_v22  ;;  %6082 = vmatpush.msra.mxu2 %v13638_v7 }
 0x33f   :  { %5984 = vmatpush.msra.mxu1 %v5983_v56  ;;  %6129 = vmatpush.msra.mxu3 %v13601_v57  ;;  %v16272_v54 = vand.u32 4294901760, %v13765_v49  ;;  %v6030_v56 = vsub.f32 %v13745_v60, %v16259_v44  ;;  %v304_v44 = vld [vmem:[%s16074_s1 + $0x8d8] sm:$0xff] }
 0x340   :  { %5941 = vmatpush.msra.mxu0 %v13664_v55  ;;  %6085 = vmatpush.msra.mxu2 %v13654_v53  ;;  %v13861_v3 = vand.u32 4294901760, %v304_v44 }
 0x341   :  { %5990 = vmatpush.msra.mxu1 %v5989_v14  ;;  %6131 = vmatpush.msra.mxu3 %v13612_v12  ;;  %v306_v14 = vld [vmem:[%s16074_s1 + $0x8e8] sm:$0xff]  ;;  %v5961_v30 = vsub.f32 %v13765_v49, %v16272_v54  ;;  %v6031_v45 = vand.u32 4294901760, %v6030_v56  ;;  %v6037_v56 = vand.u32 4294901760, %v6036_v39 }
 0x342   :  { %5943 = vmatpush.msra.mxu0 %v13678_v36  ;;  %6088 = vmatpush.msra.mxu2 %v13681_v21  ;;  %v13841_v0 = vand.u32 4294901760, %v306_v14 }
 0x343   :  { %5996 = vmatpush.msra.mxu1 %v5995_v13  ;;  %6133 = vmatpush.msra.mxu3 %v13623_v33  ;;  %v6025_v13 = vand.u32 4294901760, %v6024_v58  ;;  %v13839_v58 = vsub.f32 %v277_v46, %v13805_v4  ;;  %v6048_v46 = vsub.f32 %v13791_v17, %v16264_v61  ;;  %v5962_v47 = vand.u32 4294901760, %v5961_v30 }
 0x344   :  { %5945 = vmatpush.msra.mxu0 %v13694_v35  ;;  %6091 = vmatpush.msra.mxu2 %v13697_v63  ;;  %v13869_v61 = vsub.f32 %v306_v14, %v13841_v0 }
 0x345   :  { %6002 = vmatpush.msra.mxu1 %v6001_v24  ;;  %6135 = vmatpush.msra.mxu3 %v13648_v22  ;;  %v13821_v24 = vand.u32 4294901760, %v307_v29  ;;  %v6049_v14 = vand.u32 4294901760, %v6048_v46 }
 0x346   :  { %5947 = vmatpush.msra.mxu0 %v13709_v18  ;;  %6094 = vmatpush.msra.mxu2 %v13713_v38  ;;  %v16274_v46 = vand.u32 4294901760, %v13869_v61 }
 0x347   :  { %6008 = vmatpush.msra.mxu1 %v6007_v26  ;;  %6137 = vmatpush.msra.mxu3 %v13664_v55  ;;  %v13832_v26 = vsub.f32 %v308_v27, %v13796_v25  ;;  %v16268_v27 = vand.u32 4294901760, %v13811_v62 }
 0x348   :  { %5949 = vmatpush.msra.mxu0 %v13724_v59  ;;  %6097 = vmatpush.msra.mxu2 %v13728_v11 }
 0x349   :  { %6014 = vmatpush.msra.mxu1 %v6013_v16  ;;  %6139 = vmatpush.msra.mxu3 %v13678_v36  ;;  %v6042_v16 = vsub.f32 %v13773_v32, %v16260_v1  ;;  %v13856_v1 = vsub.f32 %v307_v29, %v13821_v24  ;;  %v16270_v9 = vand.u32 4294901760, %v13832_v26  ;;  %v16271_v29 = vand.u32 4294901760, %v13839_v58 }
 0x34a   :  { %5951 = vmatpush.msra.mxu0 %v13741_v5  ;;  %6100 = vmatpush.msra.mxu2 %v13745_v60  ;;  %v6054_v30 = vsub.f32 %v13811_v62, %v16268_v27  ;;  %v13893_v27 = vsub.f32 %v304_v44, %v13861_v3 }
 0x34b   :  { %6020 = vmatpush.msra.mxu1 %v6019_v41  ;;  %6141 = vmatpush.msra.mxu3 %v13694_v35  ;;  %v13849_v41 = vand.u32 4294901760, %v305_v40  ;;  %v6043_v39 = vand.u32 4294901760, %v6042_v16  ;;  %v16273_v16 = vand.u32 4294901760, %v13856_v1 }
 0x34c   :  { %5953 = vmatpush.msra.mxu0 %v13753_v10  ;;  %6103 = vmatpush.msra.mxu2 %v13757_v37  ;;  %v6055_v44 = vand.u32 4294901760, %v6054_v30  ;;  %v13922_v30 = vpop.f32.mrf.mxu2 }
 0x34d   :  { %6026 = vmatpush.msra.mxu1 %v6025_v13  ;;  %6143 = vmatpush.msra.mxu3 %v13709_v18  ;;  %v303_v13 = vld [vmem:[%s16074_s1 + $0x8d0] sm:$0xff]  ;;  %v13877_v8 = vsub.f32 %v305_v40, %v13849_v41  ;;  %v6311_v40 = vsub.f32 %v13832_v26, %v16270_v9  ;;  %16566 = vst [vmem:[#allocation6_spill] sm:$0xff] %v13922_v30 }
 0x34e   :  { %5955 = vmatpush.msra.mxu0 %v13780_v52  ;;  %6106 = vmatpush.msra.mxu2 %v13773_v32  ;;  %v13884_v34 = vand.u32 4294901760, %v303_v13 }
 0x34f   :  { %6032 = vmatpush.msra.mxu1 %v6031_v45  ;;  %6145 = vmatpush.msra.mxu3 %v13724_v59  ;;  %v302_v45 = vld [vmem:[%s16074_s1 + $0x8c8] sm:$0xff]  ;;  %v16275_v9 = vand.u32 4294901760, %v13877_v8  ;;  %v6312_v54 = vand.u32 4294901760, %v6311_v40  ;;  %v13939_v40 = vand.u32 4294901760, %v300_v31 }
 0x350   :  { %5957 = vmatpush.msra.mxu0 %v13805_v4  ;;  %6109 = vmatpush.msra.mxu2 %v13791_v17  ;;  %v13904_v23 = vand.u32 4294901760, %v302_v45 }
 0x351   :  { %6038 = vmatpush.msra.mxu1 %v6037_v56  ;;  %6147 = vmatpush.msra.mxu3 %v13741_v5  ;;  %v301_v56 = vld [vmem:[%s16074_s1 + $0x8c0] sm:$0xff]  ;;  %v6329_v19 = vsub.f32 %v13877_v8, %v16275_v9  ;;  %v16570_v9 = vand.u32 4294901760, %v13893_v27 }
 0x352   :  { %5963 = vmatmul.f32.vlgmr.msra.gmra.mxu0 %v5962_v47  ;;  %6112 = vmatpush.msra.mxu2 %v13811_v62  ;;  %v6060_v47 = vsub.f32 %v13839_v58, %v16271_v29  ;;  %v13920_v29 = vand.u32 4294901760, %v301_v56 }
 0x353   :  { %6164 = vmatpush.msrb.mxu0 %v5969_v48  ;;  %6044 = vmatpush.msra.mxu1 %v6043_v39  ;;  %v6317_v48 = vsub.f32 %v13856_v1, %v16273_v16  ;;  %v13918_v39 = vsub.f32 %v303_v13, %v13884_v34  ;;  %v13937_v16 = vsub.f32 %v302_v45, %v13904_v23  ;;  %v16569_v45 = vand.u32 4294901760, %v13632_v2  ;;  %v297_v2 = vld [vmem:[%s16074_s1 + $0x8a0] sm:$0xff] }
 0x354   :  { %6149 = vmatpush.msra.mxu3 %v13753_v10  ;;  %6115 = vmatpush.msra.mxu2 %v13839_v58  ;;  %v6061_v13 = vand.u32 4294901760, %v6060_v47  ;;  %v13948_v47 = vpop.f32.mrf.mxu3  ;;  %v13956_v30 = vsub.f32 %v301_v56, %v13920_v29 }
 0x355   :  { %6168 = vmatpush.msrb.mxu0 %v5975_v15  ;;  %6050 = vmatpush.msra.mxu1 %v6049_v14  ;;  %v299_v15 = vld [vmem:[%s16074_s1 + $0x8b0] sm:$0xff]  ;;  %v6323_v14 = vsub.f32 %v13869_v61, %v16274_v46  ;;  %16567 = vst [vmem:[#allocation7_spill] sm:$0xff] %v13948_v47  ;;  %v16568_v46 = vand.u32 4294901760, %v13765_v49  ;;  %v6318_v50 = vand.u32 4294901760, %v6317_v48  ;;  %v6335_v47 = vsub.f32 %v13893_v27, %v16570_v9 }
 0x356   :  { %6151 = vmatpush.msra.mxu3 %v13780_v52  ;;  %6118 = vmatmul.f32.vlgmr.msra.gmra.mxu2 %v13765_v49  ;;  %v13958_v6 = vand.u32 4294901760, %v299_v15  ;;  %v16571_v49 = vand.u32 4294901760, %v13638_v7  ;;  %v13971_v48 = vsub.f32 %v300_v31, %v13939_v40  ;;  %v6330_v9 = vand.u32 4294901760, %v6329_v19  ;;  %v296_v7 = vld [vmem:[%s16074_s1 + $0x898] sm:$0xff] }
 0x357   :  { %6172 = vmatpush.msrb.mxu0 %v5981_v20  ;;  %6268 = vmatpush.msrb.mxu2 %v13796_v25  ;;  %v298_v20 = vld [vmem:[%s16074_s1 + $0x8a8] sm:$0xff]  ;;  %v16573_v19 = vand.u32 4294901760, %v13654_v53  ;;  %v6336_v56 = vand.u32 4294901760, %v6335_v47  ;;  %v295_v53 = vld [vmem:[%s16074_s1 + $0x890] sm:$0xff]  ;;  %v16575_v47 = vand.u32 4294901760, %v13681_v21 }
 0x358   :  { %6056 = vmatpush.msra.mxu1 %v6055_v44  ;;  %6153 = vmatpush.msra.mxu3 %v13805_v4  ;;  %v16276_v44 = vand.u32 4294901760, %v13918_v39  ;;  %v294_v21 = vld [vmem:[%s16074_s1 + $0x888] sm:$0xff] }
 0x359   :  { %6157 = vmatmul.f32.vlgmr.msra.gmra.mxu3 %v16568_v46  ;;  %6176 = vmatpush.msrb.mxu0 %v16569_v45  ;;  %v6324_v46 = vand.u32 4294901760, %v6323_v14  ;;  %v13973_v45 = vand.u32 4294901760, %v298_v20  ;;  %v13988_v14 = vsub.f32 %v299_v15, %v13958_v6 }
 0x35a   :  { %6270 = vmatpush.msrb.mxu2 %v13821_v24  ;;  %6313 = vmatpush.msrb.mxu3 %v6312_v54  ;;  %v13975_v54 = vpop.f32.mrf.mxu1  ;;  %v6341_v31 = vsub.f32 %v13918_v39, %v16276_v44  ;;  %v16577_v44 = vand.u32 4294901760, %v13697_v63  ;;  %v293_v63 = vld [vmem:[%s16074_s1 + $0x880] sm:$0xff] }
 0x35b   :  { %6062 = vmatpush.msra.mxu1 %v6061_v13  ;;  %6180 = vmatpush.msrb.mxu0 %v16571_v49  ;;  %16572 = vst [vmem:[#allocation8_spill] sm:$0xff] %v13975_v54  ;;  %v13990_v49 = vand.u32 4294901760, %v297_v2  ;;  %v14001_v15 = vsub.f32 %v298_v20, %v13973_v45  ;;  %v14003_v13 = vand.u32 4294901760, %v296_v7  ;;  %v16581_v54 = vand.u32 4294901760, %v13728_v11 }
 0x35c   :  { %6064 = vmatmul.f32.vlgmr.msra.gmra.mxu1 %v13735_v42  ;;  %6272 = vmatpush.msrb.mxu2 %v13841_v0  ;;  %v16583_v11 = vand.u32 4294901760, %v13745_v60 }
 0x35d   :  { %6231 = vmatpush.msrb.mxu1 %v13568_v28  ;;  %6319 = vmatpush.msrb.mxu3 %v6318_v50  ;;  %v16574_v28 = vand.u32 4294901760, %v13937_v16 }
 0x35e   :  { %6184 = vmatpush.msrb.mxu0 %v16573_v19  ;;  %6274 = vmatpush.msrb.mxu2 %v13849_v41  ;;  %v14033_v19 = vsub.f32 %v296_v7, %v14003_v13  ;;  %v16580_v7 = vand.u32 4294901760, %v13988_v14 }
 0x35f   :  { %6233 = vmatpush.msrb.mxu1 %v13578_v51  ;;  %6325 = vmatpush.msrb.mxu3 %v6324_v46  ;;  %v6347_v50 = vsub.f32 %v13937_v16, %v16574_v28  ;;  %v6342_v51 = vand.u32 4294901760, %v6341_v31  ;;  %v16576_v46 = vand.u32 4294901760, %v13956_v30  ;;  %v14017_v28 = vsub.f32 %v297_v2, %v13990_v49 }
 0x360   :  { %6188 = vmatpush.msrb.mxu0 %v16575_v47  ;;  %6276 = vmatpush.msrb.mxu2 %v13861_v3  ;;  %v439_v47 = vld.sshfl [vmem:[#allocation1 + $0x8] sm:$0xff pattern:$0x73625140]  ;;  %v16578_v31 = vand.u32 4294901760, %v13971_v48 }
 0x361   :  { %6235 = vmatpush.msrb.mxu1 %v13588_v43  ;;  %6331 = vmatpush.msrb.mxu3 %v6330_v9  ;;  %v6353_v20 = vsub.f32 %v13956_v30, %v16576_v46  ;;  %v14025_v43 = vand.u32 4294901760, %v295_v53  ;;  %v6348_v9 = vand.u32 4294901760, %v6347_v50  ;;  %v6376_v46 = vand.u32 4294901760, %v14017_v28 }
 0x362   :  { %6192 = vmatpush.msrb.mxu0 %v16577_v44  ;;  %6278 = vmatpush.msrb.mxu2 %v13884_v34  ;;  %v6359_v2 = vsub.f32 %v13971_v48, %v16578_v31  ;;  %v16579_v44 = vand.u32 4294901760, %v13713_v38  ;;  %v6365_v31 = vsub.f32 %v13988_v14, %v16580_v7  ;;  %v6382_v7 = vand.u32 4294901760, %v14033_v19 }
 0x363   :  { %6237 = vmatpush.msrb.mxu1 %v13601_v57  ;;  %6337 = vmatpush.msrb.mxu3 %v6336_v56  ;;  %v14041_v57 = vand.u32 4294901760, %v294_v21  ;;  %v14043_v56 = vand.u32 4294901760, %v439_v47  ;;  %v6354_v50 = vand.u32 4294901760, %v6353_v20  ;;  %v14054_v38 = vsub.f32 %v295_v53, %v14025_v43 }
 0x364   :  { %6196 = vmatpush.msrb.mxu0 %v16579_v44  ;;  %6280 = vmatpush.msrb.mxu2 %v13904_v23  ;;  %v14056_v44 = vand.u32 4294901760, %v293_v63 }
 0x365   :  { %6239 = vmatpush.msrb.mxu1 %v13612_v12  ;;  %6343 = vmatpush.msrb.mxu3 %v6342_v51  ;;  %v6360_v12 = vand.u32 4294901760, %v6359_v2  ;;  %v16582_v51 = vand.u32 4294901760, %v14001_v15  ;;  %v14070_v53 = vsub.f32 %v439_v47, %v14043_v56  ;;  %v16584_v2 = vand.u32 4294901760, %v13757_v37 }
 0x366   :  { %6200 = vmatpush.msrb.mxu0 %v16581_v54  ;;  %6282 = vmatpush.msrb.mxu2 %v13920_v29  ;;  %v14067_v54 = vsub.f32 %v294_v21, %v14041_v57  ;;  %v6388_v60 = vand.u32 4294901760, %v14054_v38  ;;  %v14081_v21 = vsub.f32 %v293_v63, %v14056_v44  ;;  %v6383_v47 = vsub.f32 %v14033_v19, %v6382_v7 }
 0x367   :  { %6241 = vmatpush.msrb.mxu1 %v13623_v33  ;;  %6349 = vmatpush.msrb.mxu3 %v6348_v9  ;;  %v6371_v20 = vsub.f32 %v14001_v15, %v16582_v51  ;;  %v6366_v33 = vand.u32 4294901760, %v6365_v31  ;;  %v6377_v9 = vsub.f32 %v14017_v28, %v6376_v46  ;;  %v6301_v31 = vand.u32 4294901760, %v14070_v53 }
 0x368   :  { %6204 = vmatpush.msrb.mxu0 %v16583_v11  ;;  %6284 = vmatpush.msrb.mxu2 %v13939_v40  ;;  %v6394_v37 = vand.u32 4294901760, %v14067_v54  ;;  %v6384_v51 = vand.u32 4294901760, %v6383_v47 }
 0x369   :  { %6243 = vmatpush.msrb.mxu1 %v13648_v22  ;;  %6355 = vmatpush.msrb.mxu3 %v6354_v50  ;;  %v6372_v22 = vand.u32 4294901760, %v6371_v20  ;;  %v16585_v50 = vand.u32 4294901760, %v13773_v32  ;;  %v6378_v63 = vand.u32 4294901760, %v6377_v9  ;;  %v6389_v32 = vsub.f32 %v14054_v38, %v6388_v60 }
 0x36a   :  { %6208 = vmatpush.msrb.mxu0 %v16584_v2  ;;  %6286 = vmatpush.msrb.mxu2 %v13958_v6  ;;  %v16587_v20 = vand.u32 4294901760, %v13811_v62  ;;  %v16589_v2 = vand.u32 4294901760, %v13832_v26 }
 0x36b   :  { %6245 = vmatpush.msrb.mxu1 %v13664_v55  ;;  %6361 = vmatpush.msrb.mxu3 %v6360_v12  ;;  %v16586_v55 = vand.u32 4294901760, %v13791_v17  ;;  %v6400_v12 = vand.u32 4294901760, %v14081_v21  ;;  %v6302_v17 = vsub.f32 %v14070_v53, %v6301_v31  ;;  %v6390_v62 = vand.u32 4294901760, %v6389_v32  ;;  %v315_v32 = vld [vmem:[%s16074_s1 + $0x930] sm:$0xff] }
 0x36c   :  { %6212 = vmatpush.msrb.mxu0 %v16585_v50  ;;  %6288 = vmatpush.msrb.mxu2 %v13973_v45 }
 0x36d   :  { %6247 = vmatpush.msrb.mxu1 %v13678_v36  ;;  %6367 = vmatpush.msrb.mxu3 %v6366_v33  ;;  %v6395_v36 = vsub.f32 %v14067_v54, %v6394_v37  ;;  %v6401_v11 = vsub.f32 %v14081_v21, %v6400_v12  ;;  %v14118_v33 = vpop.f32.mrf.mxu0  ;;  %v6303_v9 = vand.u32 4294901760, %v6302_v17  ;;  %v8672_v17 = vld [vmem:[%s16075_s2] ss:$0 sm:$0xff] }
 0x36e   :  { %6216 = vmatpush.msrb.mxu0 %v16586_v55  ;;  %6290 = vmatpush.msrb.mxu2 %v13990_v49 }
 0x36f   :  { %6249 = vmatpush.msrb.mxu1 %v13694_v35  ;;  %6373 = vmatpush.msrb.mxu3 %v6372_v22  ;;  %v16588_v35 = vand.u32 4294901760, %v13839_v58  ;;  %v6402_v58 = vand.u32 4294901760, %v6401_v11 }
 0x370   :  { %6220 = vmatpush.msrb.mxu0 %v16587_v20  ;;  %6292 = vmatpush.msrb.mxu2 %v14003_v13 }
 0x371   :  { %6251 = vmatpush.msrb.mxu1 %v13709_v18  ;;  %6379 = vmatpush.msrb.mxu3 %v6378_v63  ;;  %v6396_v18 = vand.u32 4294901760, %v6395_v36 }
 0x372   :  { %6224 = vmatpush.msrb.mxu0 %v16588_v35  ;;  %6294 = vmatpush.msrb.mxu2 %v14025_v43  ;;  %v314_v35 = vld [vmem:[%s16074_s1 + $0x928] sm:$0xff] }
 0x373   :  { %6253 = vmatpush.msrb.mxu1 %v13724_v59  ;;  %6385 = vmatpush.msrb.mxu3 %v6384_v51  ;;  %v14127_v59 = vpop.f32.mrf.mxu2 }
 0x374   :  { %6226 = vmatmul.f32.vlgmr.msrb.gmra.mxu0 %v13735_v42  ;;  %6296 = vmatpush.msrb.mxu2 %v14041_v57 }
 0x375   :  { %6411 = vmatpush.msra.mxu0 %v13832_v26  ;;  %6255 = vmatpush.msrb.mxu1 %v13741_v5  ;;  %v14133_v5 = vpop.f32.mrf.mxu3  ;;  %v14142_v26 = vpop.f32.mrf.mxu1 }
 0x376   :  { %6391 = vmatpush.msrb.mxu3 %v6390_v62  ;;  %6298 = vmatpush.msrb.mxu2 %v14056_v44 }
 0x377   :  { %6414 = vmatpush.msra.mxu0 %v13856_v1  ;;  %6257 = vmatpush.msrb.mxu1 %v13753_v10  ;;  %v16590_v10 = vand.u32 4294901760, %v13856_v1  ;;  %v16592_v1 = vand.u32 4294901760, %v13877_v8 }
 0x378   :  { %6397 = vmatpush.msrb.mxu3 %v6396_v18  ;;  %6304 = vmatmul.f32.vlgmr.msrb.gmra.mxu2 %v6303_v9  ;;  %v14325_v18 = vand.u32 4294901760, %v315_v32 }
 0x379   :  { %6417 = vmatpush.msra.mxu0 %v13869_v61  ;;  %6505 = vmatpush.msra.mxu2 %v16589_v2  ;;  %v313_v2 = vld [vmem:[%s16074_s1 + $0x920] sm:$0xff] }
 0x37a   :  { %6259 = vmatpush.msrb.mxu1 %v13780_v52  ;;  %6403 = vmatpush.msrb.mxu3 %v6402_v58  ;;  %v16591_v52 = vand.u32 4294901760, %v13869_v61  ;;  %v16598_v61 = vand.u32 4294901760, %v13988_v14 }
 0x37b   :  { %6405 = vmatmul.f32.vlgmr.msrb.gmra.mxu3 %v14043_v56  ;;  %6420 = vmatpush.msra.mxu0 %v13877_v8  ;;  %v16595_v8 = vand.u32 4294901760, %v13937_v16  ;;  %v14275_v22 = vpop.f32.mrf.mxu2 }
 0x37c   :  { %6509 = vmatpush.msra.mxu2 %v16590_v10  ;;  %6572 = vmatpush.msra.mxu3 %v13796_v25 }
 0x37d   :  { %6261 = vmatpush.msrb.mxu1 %v13805_v4  ;;  %6423 = vmatpush.msra.mxu0 %v13893_v27  ;;  %v16597_v4 = vand.u32 4294901760, %v13971_v48  ;;  %v14330_v58 = vpop.f32.mrf.mxu1 }
 0x37e   :  { %6263 = vmatmul.f32.vlgmr.msrb.gmra.mxu1 %v13735_v42  ;;  %6513 = vmatpush.msra.mxu2 %v16591_v52  ;;  %v16593_v42 = vand.u32 4294901760, %v13893_v27  ;;  %v322_v27 = vld [vmem:[%s16074_s1 + $0x968] sm:$0xff]  ;;  %v14342_v52 = vand.u32 4294901760, %v314_v35 }
 0x37f   :  { %6464 = vmatpush.msra.mxu1 %v13796_v25  ;;  %6574 = vmatpush.msra.mxu3 %v13821_v24  ;;  %v16594_v25 = vand.u32 4294901760, %v13918_v39 }
 0x380   :  { %6426 = vmatpush.msra.mxu0 %v13918_v39  ;;  %6517 = vmatpush.msra.mxu2 %v16592_v1  ;;  %16600 = vst [vmem:[#allocation9_spill] sm:$0xff] %v14342_v52 }
 0x381   :  { %6466 = vmatpush.msra.mxu1 %v13821_v24  ;;  %6576 = vmatpush.msra.mxu3 %v13841_v0 }
 0x382   :  { %6429 = vmatpush.msra.mxu0 %v13937_v16  ;;  %6521 = vmatpush.msra.mxu2 %v16593_v42  ;;  %v14210_v16 = vand.u32 4294901760, %v322_v27  ;;  %v16601_v42 = vld [vmem:[#allocation5_spill] sm:$0xff] }
 0x383   :  { %6468 = vmatpush.msra.mxu1 %v13841_v0  ;;  %6578 = vmatpush.msra.mxu3 %v13849_v41  ;;  %v16596_v0 = vand.u32 4294901760, %v13956_v30 }
 0x384   :  { %6432 = vmatpush.msra.mxu0 %v13956_v30  ;;  %6525 = vmatpush.msra.mxu2 %v16594_v25  ;;  %v320_v30 = vld [vmem:[%s16074_s1 + $0x958] sm:$0xff]  ;;  %v509_v25 = vadd.f32 %v8672_v17, %v16601_v42 }
 0x385   :  { %6470 = vmatpush.msra.mxu1 %v13849_v41  ;;  %6580 = vmatpush.msra.mxu3 %v13861_v3  ;;  %v340_v42 = vld [vmem:[%s16074_s1 + $0x9f8] sm:$0xff] }
 0x386   :  { %6435 = vmatpush.msra.mxu0 %v13971_v48  ;;  %6529 = vmatpush.msra.mxu2 %v16595_v8  ;;  %v319_v48 = vld [vmem:[%s16074_s1 + $0x950] sm:$0xff] }
 0x387   :  { %6472 = vmatpush.msra.mxu1 %v13861_v3  ;;  %6582 = vmatpush.msra.mxu3 %v13884_v34  ;;  %v324_v3 = vld [vmem:[%s16074_s1 + $0x978] sm:$0xff] }
 0x388   :  { %6438 = vmatpush.msra.mxu0 %v13988_v14  ;;  %6533 = vmatpush.msra.mxu2 %v16596_v0  ;;  %v14190_v24 = vand.u32 4294901760, %v324_v3  ;;  %v14234_v14 = vand.u32 4294901760, %v320_v30  ;;  %v312_v0 = vld [vmem:[%s16074_s1 + $0x918] sm:$0xff] }
 0x389   :  { %6474 = vmatpush.msra.mxu1 %v13884_v34  ;;  %6584 = vmatpush.msra.mxu3 %v13904_v23  ;;  %v323_v34 = vld [vmem:[%s16074_s1 + $0x970] sm:$0xff] }
 0x38a   :  { %6441 = vmatpush.msra.mxu0 %v14001_v15  ;;  %6537 = vmatpush.msra.mxu2 %v16597_v4  ;;  %v14200_v41 = vand.u32 4294901760, %v323_v34  ;;  %v14213_v39 = vsub.f32 %v324_v3, %v14190_v24  ;;  %v14358_v3 = vand.u32 4294901760, %v313_v2 }
 0x38b   :  { %6476 = vmatpush.msra.mxu1 %v13904_v23  ;;  %6586 = vmatpush.msra.mxu3 %v13920_v29  ;;  %v16599_v23 = vand.u32 4294901760, %v14001_v15  ;;  %v14240_v15 = vsub.f32 %v322_v27, %v14210_v16  ;;  %v311_v27 = vld [vmem:[%s16074_s1 + $0x910] sm:$0xff] }
 0x38c   :  { %6444 = vmatpush.msra.mxu0 %v14017_v28  ;;  %6541 = vmatpush.msra.mxu2 %v16598_v61  ;;  %v14247_v28 = vand.u32 4294901760, %v319_v48  ;;  %16602 = vst [vmem:[#allocation5_spill] sm:$0xff] %v14358_v3  ;;  %v14392_v17 = vsub.f32 %v313_v2, %v14358_v3 }
 0x38d   :  { %6478 = vmatpush.msra.mxu1 %v13920_v29  ;;  %6588 = vmatpush.msra.mxu3 %v13939_v40  ;;  %v321_v29 = vld [vmem:[%s16074_s1 + $0x960] sm:$0xff] }
 0x38e   :  { %6447 = vmatpush.msra.mxu0 %v14033_v19  ;;  %6545 = vmatpush.msra.mxu2 %v16599_v23  ;;  %v14242_v19 = vpop.f32.mrf.mxu0  ;;  %v14280_v47 = vsub.f32 %v319_v48, %v14247_v28  ;;  %v14375_v48 = vand.u32 4294901760, %v312_v0 }
 0x38f   :  { %6480 = vmatpush.msra.mxu1 %v13939_v40  ;;  %6590 = vmatpush.msra.mxu3 %v13958_v6  ;;  %v14226_v40 = vsub.f32 %v323_v34, %v14200_v41  ;;  %v14362_v34 = vsub.f32 %v315_v32, %v14325_v18 }
 0x390   :  { %6450 = vmatpush.msra.mxu0 %v14054_v38  ;;  %6549 = vmatpush.msra.mxu2 %v6376_v46  ;;  %16603 = vst [vmem:[#allocation10_spill] sm:$0xff] %v14375_v48 }
 0x391   :  { %6482 = vmatpush.msra.mxu1 %v13958_v6  ;;  %6592 = vmatpush.msra.mxu3 %v13973_v45  ;;  %v14223_v6 = vand.u32 4294901760, %v321_v29  ;;  %v16289_v46 = vand.u32 4294901760, %v14226_v40 }
 0x392   :  { %6453 = vmatpush.msra.mxu0 %v14067_v54  ;;  %6553 = vmatpush.msra.mxu2 %v6382_v7  ;;  %v14262_v7 = vsub.f32 %v320_v30, %v14234_v14  ;;  %v317_v54 = vld [vmem:[%s16074_s1 + $0x940] sm:$0xff] }
 0x393   :  { %6484 = vmatpush.msra.mxu1 %v13973_v45  ;;  %6594 = vmatpush.msra.mxu3 %v13990_v49  ;;  %v16290_v45 = vand.u32 4294901760, %v14213_v39  ;;  %v14256_v38 = vsub.f32 %v321_v29, %v14223_v6  ;;  %v6658_v50 = vsub.f32 %v14226_v40, %v16289_v46 }
 0x394   :  { %6456 = vmatpush.msra.mxu0 %v14081_v21  ;;  %6557 = vmatpush.msra.mxu2 %v6388_v60  ;;  %v16286_v21 = vand.u32 4294901760, %v14240_v15  ;;  %v16284_v55 = vand.u32 4294901760, %v14262_v7 }
 0x395   :  { %6486 = vmatpush.msra.mxu1 %v13990_v49  ;;  %6596 = vmatpush.msra.mxu3 %v14003_v13  ;;  %v318_v49 = vld [vmem:[%s16074_s1 + $0x948] sm:$0xff]  ;;  %v16285_v63 = vand.u32 4294901760, %v14256_v38  ;;  %v6659_v62 = vand.u32 4294901760, %v6658_v50 }
 0x396   :  { %6459 = vmatmul.f32.vlgmr.msra.gmra.mxu0 %v14070_v53  ;;  %6561 = vmatpush.msra.mxu2 %v6394_v37  ;;  %v14272_v60 = vand.u32 4294901760, %v318_v49  ;;  %v14290_v37 = vand.u32 4294901760, %v317_v54  ;;  %v6664_v20 = vsub.f32 %v14240_v15, %v16286_v21 }
 0x397   :  { %6609 = vmatpush.msrb.mxu0 %v14190_v24  ;;  %6488 = vmatpush.msra.mxu1 %v14003_v13  ;;  %v6652_v13 = vsub.f32 %v14213_v39, %v16290_v45  ;;  %v6670_v11 = vsub.f32 %v14256_v38, %v16285_v63 }
 0x398   :  { %6598 = vmatpush.msra.mxu3 %v14025_v43  ;;  %6565 = vmatpush.msra.mxu2 %v6400_v12  ;;  %v14299_v12 = vpop.f32.mrf.mxu3  ;;  %v14309_v36 = vsub.f32 %v318_v49, %v14272_v60  ;;  %v14328_v9 = vsub.f32 %v317_v54, %v14290_v37  ;;  %v6665_v10 = vand.u32 4294901760, %v6664_v20  ;;  %v14379_v54 = vsub.f32 %v314_v35, %v14342_v52  ;;  %v310_v35 = vld [vmem:[%s16074_s1 + $0x908] sm:$0xff] }
 0x399   :  { %6611 = vmatpush.msrb.mxu0 %v14200_v41  ;;  %6490 = vmatpush.msra.mxu1 %v14025_v43  ;;  %v316_v43 = vld [vmem:[%s16074_s1 + $0x938] sm:$0xff]  ;;  %v6653_v51 = vand.u32 4294901760, %v6652_v13  ;;  %v6671_v4 = vand.u32 4294901760, %v6670_v11  ;;  %v16604_v13 = vld [vmem:[#allocation8_spill] sm:$0xff]  ;;  %v16277_v20 = vand.u32 4294901760, %v14362_v34 }
 0x39a   :  { %6600 = vmatpush.msra.mxu3 %v14041_v57  ;;  %6567 = vmatmul.f32.vlgmr.msra.gmra.mxu2 %v14043_v56  ;;  %v16280_v1 = vand.u32 4294901760, %v14309_v36  ;;  %v16279_v61 = vand.u32 4294901760, %v14328_v9  ;;  %v16282_v2 = vand.u32 4294901760, %v14379_v54 }
 0x39b   :  { %6613 = vmatpush.msrb.mxu0 %v14210_v16  ;;  %6752 = vmatpush.msrb.mxu2 %v14213_v39 }
 0x39c   :  { %6492 = vmatpush.msra.mxu1 %v14041_v57  ;;  %6602 = vmatpush.msra.mxu3 %v14056_v44  ;;  %v14306_v57 = vand.u32 4294901760, %v316_v43  ;;  %v6688_v30 = vsub.f32 %v14309_v36, %v16280_v1  ;;  %v6694_v32 = vsub.f32 %v14328_v9, %v16279_v61  ;;  %v16609_v61 = vld [vmem:[#allocation7_spill] sm:$0xff] }
 0x39d   :  { %6604 = vmatmul.f32.vlgmr.msra.gmra.mxu3 %v14043_v56  ;;  %6615 = vmatpush.msrb.mxu0 %v14223_v6  ;;  %v16281_v56 = vand.u32 4294901760, %v14280_v47 }
 0x39e   :  { %6755 = vmatpush.msrb.mxu2 %v14226_v40  ;;  %6805 = vmatpush.msrb.mxu3 %v14190_v24  ;;  %v14346_v53 = vsub.f32 %v316_v43, %v14306_v57  ;;  %v610_v43 = vadd.f32 %v16604_v13, %v509_v25  ;;  %v6689_v11 = vand.u32 4294901760, %v6688_v30  ;;  %v16605_v25 = vld [vmem:[#allocation6_spill] sm:$0xff]  ;;  %v16283_v30 = vand.u32 4294901760, %v14392_v17 }
 0x39f   :  { %6494 = vmatpush.msra.mxu1 %v14056_v44  ;;  %6617 = vmatpush.msrb.mxu0 %v14234_v14  ;;  %v6676_v44 = vsub.f32 %v14262_v7, %v16284_v55  ;;  %v6682_v8 = vsub.f32 %v14280_v47, %v16281_v56 }
 0x3a0   :  { %6498 = vmatmul.f32.vlgmr.msra.gmra.mxu1 %v6301_v31  ;;  %6758 = vmatpush.msrb.mxu2 %v14240_v15  ;;  %v440_v31 = vld.sshfl [vmem:[#allocation1 + $0x10] sm:$0xff pattern:$0x73625140]  ;;  %v16278_v49 = vand.u32 4294901760, %v14346_v53 }
 0x3a1   :  { %6654 = vmatpush.msrb.mxu1 %v6653_v51  ;;  %6807 = vmatpush.msrb.mxu3 %v14200_v41  ;;  %v6677_v23 = vand.u32 4294901760, %v6676_v44  ;;  %v14369_v29 = vand.u32 4294901760, %v440_v31  ;;  %v6683_v50 = vand.u32 4294901760, %v6682_v8  ;;  %v14388_v51 = vand.u32 4294901760, %v311_v27 }
 0x3a2   :  { %6619 = vmatpush.msrb.mxu0 %v14247_v28  ;;  %6761 = vmatpush.msrb.mxu2 %v14256_v38  ;;  %v6700_v44 = vsub.f32 %v14346_v53, %v16278_v49  ;;  %v14416_v8 = vand.u32 4294901760, %v310_v35 }
 0x3a3   :  { %6660 = vmatpush.msrb.mxu1 %v6659_v62  ;;  %6809 = vmatpush.msrb.mxu3 %v14210_v16  ;;  %v14400_v62 = vsub.f32 %v440_v31, %v14369_v29  ;;  %v664_v31 = vadd.f32 %v16605_v25, %v610_v43  ;;  %v14427_v13 = vsub.f32 %v311_v27, %v14388_v51  ;;  %v14432_v25 = vand.u32 4294901760, %v340_v42 }
 0x3a4   :  { %6621 = vmatpush.msrb.mxu0 %v14272_v60  ;;  %6764 = vmatpush.msrb.mxu2 %v14262_v7  ;;  %16606 = vst [vmem:[#allocation8_spill] sm:$0xff] %v14416_v8  ;;  %v6712_v27 = vsub.f32 %v14379_v54, %v16282_v2  ;;  %v14448_v56 = vsub.f32 %v310_v35, %v14416_v8  ;;  %v337_v35 = vld [vmem:[%s16074_s1 + $0x9e0] sm:$0xff] }
 0x3a5   :  { %6666 = vmatpush.msrb.mxu1 %v6665_v10  ;;  %6811 = vmatpush.msrb.mxu3 %v14223_v6  ;;  %v14408_v10 = vsub.f32 %v312_v0, %v14375_v48  ;;  %v6695_v0 = vand.u32 4294901760, %v6694_v32  ;;  %v16287_v43 = vand.u32 4294901760, %v14400_v62  ;;  %16607 = vst [vmem:[#allocation6_spill] sm:$0xff] %v14432_v25  ;;  %v6701_v32 = vand.u32 4294901760, %v6700_v44 }
 0x3a6   :  { %6623 = vmatpush.msrb.mxu0 %v14290_v37  ;;  %6767 = vmatpush.msrb.mxu2 %v14280_v47  ;;  %v703_v1 = vadd.f32 %v16609_v61, %v664_v31  ;;  %v6718_v2 = vsub.f32 %v14392_v17, %v16283_v30  ;;  %v16291_v61 = vand.u32 4294901760, %v14427_v13  ;;  %v6713_v30 = vand.u32 4294901760, %v6712_v27 }
 0x3a7   :  { %6672 = vmatpush.msrb.mxu1 %v6671_v4  ;;  %6813 = vmatpush.msrb.mxu3 %v14234_v14  ;;  %v309_v4 = vld [vmem:[%s16074_s1 + $0x900] sm:$0xff]  ;;  %v16288_v49 = vand.u32 4294901760, %v14408_v10  ;;  %v14487_v27 = vand.u32 4294901760, %v337_v35 }
 0x3a8   :  { %6625 = vmatpush.msrb.mxu0 %v14306_v57  ;;  %6770 = vmatpush.msrb.mxu2 %v14309_v36 }
 0x3a9   :  { %6678 = vmatpush.msrb.mxu1 %v6677_v23  ;;  %6815 = vmatpush.msrb.mxu3 %v14247_v28  ;;  %v6706_v23 = vsub.f32 %v14362_v34, %v16277_v20  ;;  %v14441_v20 = vand.u32 4294901760, %v309_v4  ;;  %v6724_v55 = vsub.f32 %v14408_v10, %v16288_v49  ;;  %v6730_v49 = vsub.f32 %v14427_v13, %v16291_v61 }
 0x3aa   :  { %6627 = vmatpush.msrb.mxu0 %v14325_v18  ;;  %6773 = vmatpush.msrb.mxu2 %v14328_v9 }
 0x3ab   :  { %6684 = vmatpush.msrb.mxu1 %v6683_v50  ;;  %6817 = vmatpush.msrb.mxu3 %v14272_v60  ;;  %v339_v50 = vld [vmem:[%s16074_s1 + $0x9f0] sm:$0xff]  ;;  %16608 = vst [vmem:[#allocation11_spill] sm:$0xff] %v14441_v20  ;;  %v6707_v44 = vand.u32 4294901760, %v6706_v23  ;;  %v14469_v23 = vsub.f32 %v340_v42, %v14432_v25  ;;  %v14476_v63 = vsub.f32 %v309_v4, %v14441_v20  ;;  %v6719_v4 = vand.u32 4294901760, %v6718_v2 }
 0x3ac   :  { %6629 = vmatpush.msrb.mxu0 %v14342_v52  ;;  %6776 = vmatpush.msrb.mxu2 %v14346_v53  ;;  %v14458_v31 = vand.u32 4294901760, %v339_v50  ;;  %v772_v42 = vadd.f32 %v14118_v33, %v703_v1  ;;  %v335_v2 = vld [vmem:[%s16074_s1 + $0x9d0] sm:$0xff] }
 0x3ad   :  { %6690 = vmatpush.msrb.mxu1 %v6689_v11  ;;  %6819 = vmatpush.msrb.mxu3 %v14290_v37  ;;  %v338_v11 = vld [vmem:[%s16074_s1 + $0x9e8] sm:$0xff]  ;;  %16610 = vst [vmem:[#allocation7_spill] sm:$0xff] %v14469_v23 }
 0x3ae   :  { %6631 = vmatpush.msrb.mxu0 %v14358_v3  ;;  %6779 = vmatpush.msrb.mxu2 %v14362_v34  ;;  %v14478_v21 = vand.u32 4294901760, %v338_v11  ;;  %v14494_v46 = vsub.f32 %v339_v50, %v14458_v31  ;;  %v14525_v50 = vpop.f32.mrf.mxu0 }
 0x3af   :  { %6696 = vmatpush.msrb.mxu1 %v6695_v0  ;;  %6821 = vmatpush.msrb.mxu3 %v14306_v57  ;;  %v6643_v0 = vsub.f32 %v14400_v62, %v16287_v43  ;;  %v336_v43 = vld [vmem:[%s16074_s1 + $0x9d8] sm:$0xff] }
 0x3b0   :  { %6633 = vmatpush.msrb.mxu0 %v14375_v48  ;;  %6782 = vmatpush.msrb.mxu2 %v14379_v54  ;;  %v14499_v45 = vand.u32 4294901760, %v336_v43  ;;  %v14507_v61 = vsub.f32 %v338_v11, %v14478_v21  ;;  %v6731_v11 = vand.u32 4294901760, %v6730_v49  ;;  %v333_v49 = vld [vmem:[%s16074_s1 + $0x9c0] sm:$0xff] }
 0x3b1   :  { %6702 = vmatpush.msrb.mxu1 %v6701_v32  ;;  %6823 = vmatpush.msrb.mxu3 %v14325_v18  ;;  %v6644_v33 = vand.u32 4294901760, %v6643_v0  ;;  %v809_v32 = vadd.f32 %v14142_v26, %v772_v42  ;;  %v16611_v0 = vand.u32 4294901760, %v14448_v56  ;;  %v14523_v42 = vand.u32 4294901760, %v335_v2 }
 0x3b2   :  { %6635 = vmatpush.msrb.mxu0 %v14388_v51  ;;  %6785 = vmatpush.msrb.mxu2 %v14392_v17  ;;  %v16615_v26 = vand.u32 4294901760, %v14476_v63 }
 0x3b3   :  { %6708 = vmatpush.msrb.mxu1 %v6707_v44  ;;  %6825 = vmatpush.msrb.mxu3 %v14342_v52  ;;  %v6725_v44 = vand.u32 4294901760, %v6724_v55  ;;  %v6736_v1 = vsub.f32 %v14448_v56, %v16611_v0  ;;  %v334_v55 = vld [vmem:[%s16074_s1 + $0x9c8] sm:$0xff] }
 0x3b4   :  { %6637 = vmatpush.msrb.mxu0 %v14416_v8  ;;  %6788 = vmatpush.msrb.mxu2 %v14408_v10  ;;  %v14543_v52 = vand.u32 4294901760, %v334_v55 }
 0x3b5   :  { %6714 = vmatpush.msrb.mxu1 %v6713_v30  ;;  %6827 = vmatpush.msrb.mxu3 %v14358_v3  ;;  %v14516_v30 = vsub.f32 %v337_v35, %v14487_v27  ;;  %v16613_v35 = vand.u32 4294901760, %v14469_v23  ;;  %v14532_v3 = vsub.f32 %v336_v43, %v14499_v45  ;;  %v6737_v43 = vand.u32 4294901760, %v6736_v1  ;;  %v14562_v1 = vpop.f32.mrf.mxu2 }
 0x3b6   :  { %6639 = vmatpush.msrb.mxu0 %v14441_v20  ;;  %6791 = vmatpush.msrb.mxu2 %v14427_v13 }
 0x3b7   :  { %16612 = vst [vmem:[#allocation12_spill] sm:$0xff] %v14516_v30  ;;  %6720 = vmatpush.msrb.mxu1 %v6719_v4  ;;  %6829 = vmatpush.msrb.mxu3 %v14375_v48  ;;  %v6993_v0 = vsub.f32 %v14469_v23, %v16613_v35  ;;  %v16614_v4 = vand.u32 4294901760, %v14213_v39  ;;  %v16300_v48 = vand.u32 4294901760, %v14507_v61  ;;  %v850_v35 = vadd.f32 %v14127_v59, %v809_v32  ;;  %v332_v39 = vld [vmem:[%s16074_s1 + $0x9b8] sm:$0xff] }
 0x3b8   :  { %6645 = vmatmul.f32.vlgmr.msrb.gmra.mxu0 %v6644_v33  ;;  %6794 = vmatpush.msrb.mxu2 %v14448_v56  ;;  %v6742_v33 = vsub.f32 %v14476_v63, %v16615_v26  ;;  %v16617_v26 = vand.u32 4294901760, %v14494_v46  ;;  %v14558_v59 = vsub.f32 %v335_v2, %v14523_v42  ;;  %v14560_v32 = vand.u32 4294901760, %v333_v49 }
 0x3b9   :  { %6846 = vmatpush.msra.mxu0 %v16614_v4  ;;  %6726 = vmatpush.msrb.mxu1 %v6725_v44  ;;  %v16616_v44 = vand.u32 4294901760, %v14226_v40  ;;  %v6994_v23 = vand.u32 4294901760, %v6993_v0  ;;  %v14579_v0 = vand.u32 4294901760, %v332_v39  ;;  %v951_v40 = vadd.f32 %v14133_v5, %v850_v35 }
 0x3ba   :  { %6831 = vmatpush.msrb.mxu3 %v14388_v51  ;;  %6797 = vmatpush.msrb.mxu2 %v14476_v63  ;;  %v6999_v4 = vsub.f32 %v14494_v46, %v16617_v26  ;;  %v6743_v2 = vand.u32 4294901760, %v6742_v33  ;;  %v7005_v26 = vsub.f32 %v14507_v61, %v16300_v48  ;;  %v330_v33 = vld [vmem:[%s16074_s1 + $0x9a8] sm:$0xff]  ;;  %v16621_v48 = vand.u32 4294901760, %v14256_v38  ;;  %v329_v38 = vld [vmem:[%s16074_s1 + $0x9a0] sm:$0xff] }
 0x3bb   :  { %6850 = vmatpush.msra.mxu0 %v16616_v44  ;;  %6732 = vmatpush.msrb.mxu1 %v6731_v11  ;;  %v331_v11 = vld [vmem:[%s16074_s1 + $0x9b0] sm:$0xff]  ;;  %v16618_v44 = vand.u32 4294901760, %v14240_v15  ;;  %v16619_v15 = vand.u32 4294901760, %v14516_v30  ;;  %v7022_v35 = vand.u32 4294901760, %v14558_v59 }
 0x3bc   :  { %6833 = vmatpush.msrb.mxu3 %v14416_v8  ;;  %6800 = vmatmul.f32.vlgmr.msrb.gmra.mxu2 %v14400_v62  ;;  %v14577_v8 = vsub.f32 %v334_v55, %v14543_v52  ;;  %v16620_v55 = vand.u32 4294901760, %v14400_v62  ;;  %v7000_v5 = vand.u32 4294901760, %v6999_v4 }
 0x3bd   :  { %6854 = vmatpush.msra.mxu0 %v16618_v44  ;;  %6950 = vmatpush.msra.mxu2 %v14432_v25  ;;  %v7011_v44 = vsub.f32 %v14516_v30, %v16619_v15  ;;  %v14589_v25 = vpop.f32.mrf.mxu3  ;;  %v1005_v15 = vadd.f32 %v14242_v19, %v951_v40  ;;  %v16622_v30 = vand.u32 4294901760, %v14532_v3  ;;  %v14613_v19 = vsub.f32 %v332_v39, %v14579_v0 }
 0x3be   :  { %6738 = vmatpush.msrb.mxu1 %v6737_v43  ;;  %6835 = vmatpush.msrb.mxu3 %v14441_v20  ;;  %v14597_v43 = vsub.f32 %v333_v49, %v14560_v32  ;;  %v14599_v20 = vand.u32 4294901760, %v331_v11  ;;  %v7006_v49 = vand.u32 4294901760, %v7005_v26  ;;  %v16304_v4 = vand.u32 4294901760, %v14577_v8 }
 0x3bf   :  { %6839 = vmatmul.f32.vlgmr.msrb.gmra.mxu3 %v16620_v55  ;;  %6858 = vmatpush.msra.mxu0 %v16621_v48  ;;  %v7017_v62 = vsub.f32 %v14532_v3, %v16622_v30  ;;  %v16623_v48 = vand.u32 4294901760, %v14262_v7  ;;  %v14615_v40 = vand.u32 4294901760, %v330_v33  ;;  %v1291_v55 = vpop.f32.mrf.mxu1  ;;  %v7012_v30 = vand.u32 4294901760, %v7011_v44  ;;  %v328_v7 = vld [vmem:[%s16074_s1 + $0x998] sm:$0xff] }
 0x3c0   :  { %6952 = vmatpush.msra.mxu2 %v14458_v31  ;;  %6995 = vmatpush.msra.mxu3 %v6994_v23  ;;  %v1044_v23 = vadd.f32 %v14330_v58, %v1005_v15  ;;  %v7023_v39 = vsub.f32 %v14558_v59, %v7022_v35  ;;  %v14629_v58 = vsub.f32 %v331_v11, %v14599_v20  ;;  %v14631_v26 = vand.u32 4294901760, %v329_v38 }
 0x3c1   :  { %6744 = vmatpush.msrb.mxu1 %v6743_v2  ;;  %6862 = vmatpush.msra.mxu0 %v16623_v48  ;;  %v16305_v2 = vand.u32 4294901760, %v14597_v43  ;;  %v16624_v44 = vand.u32 4294901760, %v14280_v47  ;;  %v7018_v15 = vand.u32 4294901760, %v7017_v62  ;;  %v14642_v11 = vsub.f32 %v330_v33, %v14615_v40  ;;  %v327_v47 = vld [vmem:[%s16074_s1 + $0x990] sm:$0xff] }
 0x3c2   :  { %6746 = vmatmul.f32.vlgmr.msrb.gmra.mxu1 %v14369_v29  ;;  %6954 = vmatpush.msra.mxu2 %v14478_v21  ;;  %v14644_v48 = vand.u32 4294901760, %v328_v7  ;;  %v1113_v62 = vadd.f32 %v14275_v22, %v1044_v23  ;;  %v326_v22 = vld [vmem:[%s16074_s1 + $0x988] sm:$0xff]  ;;  %v16626_v23 = vand.u32 4294901760, %v14328_v9  ;;  %v325_v9 = vld [vmem:[%s16074_s1 + $0x980] sm:$0xff] }
 0x3c3   :  { %6913 = vmatpush.msra.mxu1 %v14190_v24  ;;  %7001 = vmatpush.msra.mxu3 %v7000_v5  ;;  %v7029_v24 = vsub.f32 %v14577_v8, %v16304_v4  ;;  %v16306_v5 = vand.u32 4294901760, %v14613_v19  ;;  %v7035_v33 = vsub.f32 %v14597_v43, %v16305_v2  ;;  %v14659_v4 = vsub.f32 %v329_v38, %v14631_v26 }
 0x3c4   :  { %6866 = vmatpush.msra.mxu0 %v16624_v44  ;;  %6956 = vmatpush.msra.mxu2 %v14487_v27  ;;  %v7046_v44 = vand.u32 4294901760, %v14629_v58  ;;  %v16627_v2 = vand.u32 4294901760, %v14346_v53  ;;  %v16628_v53 = vand.u32 4294901760, %v14362_v34  ;;  %v16629_v34 = vand.u32 4294901760, %v14379_v54 }
 0x3c5   :  { %6915 = vmatpush.msra.mxu1 %v14200_v41  ;;  %7007 = vmatpush.msra.mxu3 %v7006_v49  ;;  %v16625_v41 = vand.u32 4294901760, %v14309_v36  ;;  %v7024_v49 = vand.u32 4294901760, %v7023_v39  ;;  %v441_v36 = vld.sshfl [vmem:[#allocation1 + $0x18] sm:$0xff pattern:$0x73625140]  ;;  %v7041_v38 = vsub.f32 %v14613_v19, %v16306_v5  ;;  %v7052_v39 = vand.u32 4294901760, %v14642_v11 }
 0x3c6   :  { %6958 = vmatpush.msra.mxu2 %v14499_v45  ;;  %v7058_v5 = vand.u32 4294901760, %v14659_v4 }
 0x3c7   :  { %6870 = vmatpush.msra.mxu0 %v16625_v41  ;;  %6917 = vmatpush.msra.mxu1 %v14210_v16  ;;  %v14667_v16 = vand.u32 4294901760, %v327_v47  ;;  %v14675_v41 = vsub.f32 %v328_v7, %v14644_v48  ;;  %v7036_v7 = vand.u32 4294901760, %v7035_v33 }
 0x3c8   :  { %7013 = vmatpush.msra.mxu3 %v7012_v30  ;;  %6960 = vmatpush.msra.mxu2 %v14523_v42  ;;  %v7030_v30 = vand.u32 4294901760, %v7029_v24  ;;  %v7047_v24 = vsub.f32 %v14629_v58, %v7046_v44 }
 0x3c9   :  { %6874 = vmatpush.msra.mxu0 %v16626_v23  ;;  %6919 = vmatpush.msra.mxu1 %v14223_v6  ;;  %v1150_v23 = vadd.f32 %v14299_v12, %v1113_v62  ;;  %v14684_v6 = vand.u32 4294901760, %v326_v22  ;;  %v14700_v62 = vand.u32 4294901760, %v325_v9 }
 0x3ca   :  { %7019 = vmatpush.msra.mxu3 %v7018_v15  ;;  %6962 = vmatpush.msra.mxu2 %v14543_v52  ;;  %v14686_v15 = vand.u32 4294901760, %v441_v36 }
 0x3cb   :  { %6878 = vmatpush.msra.mxu0 %v16627_v2  ;;  %6921 = vmatpush.msra.mxu1 %v14234_v14  ;;  %v1191_v12 = vadd.f32 %v14525_v50, %v1150_v23  ;;  %v14698_v2 = vsub.f32 %v327_v47, %v14667_v16  ;;  %v7042_v14 = vand.u32 4294901760, %v7041_v38  ;;  %v7064_v50 = vand.u32 4294901760, %v14675_v41 }
 0x3cc   :  { %7025 = vmatpush.msra.mxu3 %v7024_v49  ;;  %6964 = vmatpush.msra.mxu2 %v14560_v32  ;;  %v7053_v49 = vsub.f32 %v14642_v11, %v7052_v39  ;;  %v14711_v47 = vsub.f32 %v326_v22, %v14684_v6  ;;  %v14714_v23 = vsub.f32 %v441_v36, %v14686_v15 }
 0x3cd   :  { %6882 = vmatpush.msra.mxu0 %v16628_v53  ;;  %6923 = vmatpush.msra.mxu1 %v14247_v28  ;;  %v1292_v33 = vadd.f32 %v1291_v55, %v1191_v12  ;;  %v7048_v28 = vand.u32 4294901760, %v7047_v24  ;;  %v16630_v55 = vand.u32 4294901760, %v14392_v17  ;;  %v7070_v54 = vand.u32 4294901760, %v14698_v2  ;;  %v1453_v12 = vpop.f32.mrf.mxu0 }
 0x3ce   :  { %7031 = vmatpush.msra.mxu3 %v7030_v30  ;;  %6966 = vmatpush.msra.mxu2 %v14579_v0  ;;  %v7059_v30 = vsub.f32 %v14659_v4, %v7058_v5  ;;  %v14725_v22 = vsub.f32 %v325_v9, %v14700_v62  ;;  %v7065_v36 = vsub.f32 %v14675_v41, %v7064_v50  ;;  %v16631_v17 = vand.u32 4294901760, %v14408_v10 }
 0x3cf   :  { %6886 = vmatpush.msra.mxu0 %v16629_v34  ;;  %6925 = vmatpush.msra.mxu1 %v14272_v60  ;;  %v7054_v60 = vand.u32 4294901760, %v7053_v49  ;;  %v1346_v38 = vadd.f32 %v14562_v1, %v1292_v33  ;;  %v6983_v9 = vand.u32 4294901760, %v14714_v23  ;;  %v16632_v24 = vand.u32 4294901760, %v14427_v13  ;;  %v1490_v33 = vpop.f32.mrf.mxu1  ;;  %v16634_v34 = vld [vmem:[#allocation9_spill] sm:$0xff] }
 0x3d0   :  { %7037 = vmatpush.msra.mxu3 %v7036_v7  ;;  %6968 = vmatpush.msra.mxu2 %v14599_v20  ;;  %v7076_v7 = vand.u32 4294901760, %v14711_v47  ;;  %v7071_v10 = vsub.f32 %v14698_v2, %v7070_v54  ;;  %v7082_v1 = vand.u32 4294901760, %v14725_v22  ;;  %v7066_v53 = vand.u32 4294901760, %v7065_v36 }
 0x3d1   :  { %6890 = vmatpush.msra.mxu0 %v16630_v55  ;;  %6927 = vmatpush.msra.mxu1 %v14290_v37  ;;  %v7060_v37 = vand.u32 4294901760, %v7059_v30  ;;  %v6984_v49 = vsub.f32 %v14714_v23, %v6983_v9  ;;  %v16636_v30 = vld [vmem:[#allocation5_spill] sm:$0xff] }
 0x3d2   :  { %7043 = vmatpush.msra.mxu3 %v7042_v14  ;;  %6970 = vmatpush.msra.mxu2 %v14615_v40  ;;  %v16633_v14 = vand.u32 4294901760, %v14448_v56  ;;  %v7077_v13 = vsub.f32 %v14711_v47, %v7076_v7  ;;  %v7072_v56 = vand.u32 4294901760, %v7071_v10  ;;  %v1632_v10 = vpop.f32.mrf.mxu3 }
 0x3d3   :  { %6894 = vmatpush.msra.mxu0 %v16631_v17  ;;  %6929 = vmatpush.msra.mxu1 %v14306_v57  ;;  %v1385_v57 = vadd.f32 %v14589_v25, %v1346_v38  ;;  %v16635_v25 = vand.u32 4294901760, %v14476_v63  ;;  %v6985_v36 = vand.u32 4294901760, %v6984_v49  ;;  %v1531_v38 = vpop.f32.mrf.mxu2  ;;  %v16637_v63 = vld [vmem:[#allocation7_spill] sm:$0xff]  ;;  %v16638_v17 = vld [vmem:[#allocation10_spill] sm:$0xff] }
 0x3d4   :  { %7049 = vmatpush.msra.mxu3 %v7048_v28  ;;  %6972 = vmatpush.msra.mxu2 %v14631_v26  ;;  %v7083_v28 = vsub.f32 %v14725_v22, %v7082_v1  ;;  %v16643_v49 = vld [vmem:[#allocation6_spill] sm:$0xff] }
 0x3d5   :  { %6898 = vmatpush.msra.mxu0 %v16632_v24  ;;  %6931 = vmatpush.msra.mxu1 %v14325_v18  ;;  %v1454_v18 = vadd.f32 %v1453_v12, %v1385_v57  ;;  %v16639_v12 = vand.u32 4294901760, %v16637_v63  ;;  %v1686_v57 = vpop.f32.mrf.mxu0 }
 0x3d6   :  { %7055 = vmatpush.msra.mxu3 %v7054_v60  ;;  %6974 = vmatpush.msra.mxu2 %v14644_v48  ;;  %v7078_v60 = vand.u32 4294901760, %v7077_v13 }
 0x3d7   :  { %6902 = vmatpush.msra.mxu0 %v16633_v14  ;;  %6933 = vmatpush.msra.mxu1 %v16634_v34  ;;  %v1491_v55 = vadd.f32 %v1490_v33, %v1454_v18  ;;  %v16641_v14 = vld [vmem:[#allocation12_spill] sm:$0xff]  ;;  %v1725_v33 = vpop.f32.mrf.mxu1  ;;  %v16644_v34 = vld [vmem:[#allocation11_spill] sm:$0xff] }
 0x3d8   :  { %7061 = vmatpush.msra.mxu3 %v7060_v37  ;;  %6976 = vmatpush.msra.mxu2 %v14667_v16  ;;  %v7084_v37 = vand.u32 4294901760, %v7083_v28 }
 0x3d9   :  { %6906 = vmatpush.msra.mxu0 %v16635_v25  ;;  %6935 = vmatpush.msra.mxu1 %v16636_v30  ;;  %v1532_v24 = vadd.f32 %v1531_v38, %v1491_v55  ;;  %v16645_v25 = vand.u32 4294901760, %v14507_v61 }
 0x3da   :  { %7067 = vmatpush.msra.mxu3 %v7066_v53  ;;  %6908 = vmatmul.f32.vlgmr.msra.gmra.mxu0 %v14369_v29  ;;  %v16640_v53 = vld [vmem:[#allocation8_spill] sm:$0xff]  ;;  %v1831_v30 = vpop.f32.mrf.mxu3 }
 0x3db   :  { %6978 = vmatpush.msra.mxu2 %v14684_v6  ;;  %7093 = vmatpush.msrb.mxu0 %v16637_v63  ;;  %v1633_v13 = vadd.f32 %v1632_v10, %v1532_v24  ;;  %v1794_v28 = vpop.f32.mrf.mxu2 }
 0x3dc   :  { %6937 = vmatpush.msra.mxu1 %v16638_v17  ;;  %7073 = vmatpush.msra.mxu3 %v7072_v56 }
 0x3dd   :  { %6980 = vmatpush.msra.mxu2 %v14700_v62  ;;  %7096 = vmatpush.msrb.mxu0 %v14494_v46  ;;  %v1687_v18 = vadd.f32 %v1686_v57, %v1633_v13 }
 0x3de   :  { %6939 = vmatpush.msra.mxu1 %v14388_v51  ;;  %7079 = vmatpush.msra.mxu3 %v7078_v60  ;;  %v16642_v51 = vand.u32 4294901760, %v14494_v46  ;;  %v16646_v46 = vand.u32 4294901760, %v16641_v14  ;;  %v352_v60 = vld [vmem:[%s16074_s1 + $0xa58] sm:$0xff] }
 0x3df   :  { %6986 = vmatmul.f32.vlgmr.msra.gmra.mxu2 %v6985_v36  ;;  %7099 = vmatpush.msrb.mxu0 %v14507_v61  ;;  %v1726_v56 = vadd.f32 %v1725_v33, %v1687_v18  ;;  %v351_v36 = vld [vmem:[%s16074_s1 + $0xa50] sm:$0xff] }
 0x3e0   :  { %7187 = vmatpush.msrb.mxu2 %v16639_v12  ;;  %6941 = vmatpush.msra.mxu1 %v16640_v53  ;;  %v348_v53 = vld [vmem:[%s16074_s1 + $0xa38] sm:$0xff] }
 0x3e1   :  { %7085 = vmatpush.msra.mxu3 %v7084_v37  ;;  %7102 = vmatpush.msrb.mxu0 %v16641_v14  ;;  %v1795_v61 = vadd.f32 %v1794_v28, %v1726_v56 }
 0x3e2   :  { %7087 = vmatmul.f32.vlgmr.msra.gmra.mxu3 %v14686_v15  ;;  %7191 = vmatpush.msrb.mxu2 %v16642_v51 }
 0x3e3   :  { %7254 = vmatpush.msrb.mxu3 %v16643_v49  ;;  %6943 = vmatpush.msra.mxu1 %v16644_v34 }
 0x3e4   :  { %7105 = vmatpush.msrb.mxu0 %v14532_v3  ;;  %6945 = vmatmul.f32.vlgmr.msra.gmra.mxu1 %v14369_v29  ;;  %v16647_v29 = vand.u32 4294901760, %v14532_v3  ;;  %v16648_v3 = vand.u32 4294901760, %v14577_v8 }
 0x3e5   :  { %7195 = vmatpush.msrb.mxu2 %v16645_v25  ;;  %7146 = vmatpush.msrb.mxu1 %v16643_v49  ;;  %v347_v49 = vld [vmem:[%s16074_s1 + $0xa30] sm:$0xff]  ;;  %v14938_v25 = vand.u32 4294901760, %v348_v53 }
 0x3e6   :  { %7256 = vmatpush.msrb.mxu3 %v14458_v31  ;;  %7108 = vmatpush.msrb.mxu0 %v14558_v59  ;;  %v16649_v59 = vand.u32 4294901760, %v14597_v43 }
 0x3e7   :  { %7199 = vmatpush.msrb.mxu2 %v16646_v46  ;;  %7148 = vmatpush.msrb.mxu1 %v14458_v31  ;;  %v1872_v31 = vpop.f32.mrf.mxu0 }
 0x3e8   :  { %7258 = vmatpush.msrb.mxu3 %v14478_v21  ;;  %7111 = vmatpush.msrb.mxu0 %v14577_v8  ;;  %v16650_v8 = vand.u32 4294901760, %v14613_v19 }
 0x3e9   :  { %7203 = vmatpush.msrb.mxu2 %v16647_v29  ;;  %7150 = vmatpush.msrb.mxu1 %v14478_v21  ;;  %v1832_v21 = vadd.f32 %v1831_v30, %v1795_v61  ;;  %v14954_v61 = vand.u32 4294901760, %v347_v49 }
 0x3ea   :  { %7260 = vmatpush.msrb.mxu3 %v14487_v27  ;;  %7114 = vmatpush.msrb.mxu0 %v14597_v43 }
 0x3eb   :  { %7207 = vmatpush.msrb.mxu2 %v7022_v35  ;;  %7152 = vmatpush.msrb.mxu1 %v14487_v27  ;;  %v1973_v35 = vpop.f32.mrf.mxu1  ;;  %v1873_v27 = vadd.f32 %v1872_v31, %v1832_v21  ;;  %v345_v31 = vld [vmem:[%s16074_s1 + $0xa20] sm:$0xff] }
 0x3ec   :  { %7262 = vmatpush.msrb.mxu3 %v14499_v45  ;;  %7117 = vmatpush.msrb.mxu0 %v14613_v19  ;;  %v2027_v19 = vpop.f32.mrf.mxu2 }
 0x3ed   :  { %7211 = vmatpush.msrb.mxu2 %v16648_v3  ;;  %7154 = vmatpush.msrb.mxu1 %v14499_v45  ;;  %v356_v45 = vld [vmem:[%s16074_s1 + $0xa78] sm:$0xff]  ;;  %v1974_v43 = vadd.f32 %v1973_v35, %v1873_v27  ;;  %v442_v27 = vld.sshfl [vmem:[#allocation1 + $0x20] sm:$0xff pattern:$0x73625140] }
 0x3ee   :  { %7264 = vmatpush.msrb.mxu3 %v14523_v42  ;;  %7120 = vmatpush.msrb.mxu0 %v14629_v58  ;;  %v14828_v55 = vand.u32 4294901760, %v356_v45 }
 0x3ef   :  { %7215 = vmatpush.msrb.mxu2 %v16649_v59  ;;  %7156 = vmatpush.msrb.mxu1 %v14523_v42  ;;  %v355_v42 = vld [vmem:[%s16074_s1 + $0xa70] sm:$0xff] }
 0x3f0   :  { %7266 = vmatpush.msrb.mxu3 %v14543_v52  ;;  %7123 = vmatpush.msrb.mxu0 %v14642_v11  ;;  %v14838_v58 = vand.u32 4294901760, %v355_v42  ;;  %v353_v11 = vld [vmem:[%s16074_s1 + $0xa60] sm:$0xff] }
 0x3f1   :  { %7219 = vmatpush.msrb.mxu2 %v16650_v8  ;;  %7158 = vmatpush.msrb.mxu1 %v14543_v52  ;;  %v354_v52 = vld [vmem:[%s16074_s1 + $0xa68] sm:$0xff] }
 0x3f2   :  { %7268 = vmatpush.msrb.mxu3 %v14560_v32  ;;  %7126 = vmatpush.msrb.mxu0 %v14659_v4  ;;  %v2135_v4 = vpop.f32.mrf.mxu0 }
 0x3f3   :  { %7223 = vmatpush.msrb.mxu2 %v7046_v44  ;;  %7160 = vmatpush.msrb.mxu1 %v14560_v32  ;;  %v2028_v32 = vadd.f32 %v2027_v19, %v1974_v43  ;;  %v2066_v44 = vpop.f32.mrf.mxu3  ;;  %v344_v43 = vld [vmem:[%s16074_s1 + $0xa18] sm:$0xff]  ;;  %v14984_v19 = vand.u32 4294901760, %v345_v31 }
 0x3f4   :  { %7270 = vmatpush.msrb.mxu3 %v14579_v0  ;;  %7129 = vmatpush.msrb.mxu0 %v14675_v41  ;;  %v14872_v41 = vand.u32 4294901760, %v352_v60  ;;  %v2213_v10 = vpop.f32.mrf.mxu2 }
 0x3f5   :  { %7227 = vmatpush.msrb.mxu2 %v7052_v39  ;;  %7162 = vmatpush.msrb.mxu1 %v14579_v0  ;;  %v14848_v0 = vand.u32 4294901760, %v354_v52  ;;  %v14851_v39 = vsub.f32 %v356_v45, %v14828_v55  ;;  %v2067_v38 = vadd.f32 %v2066_v44, %v2028_v32  ;;  %v14988_v32 = vsub.f32 %v347_v49, %v14954_v61 }
 0x3f6   :  { %7272 = vmatpush.msrb.mxu3 %v14599_v20  ;;  %7132 = vmatpush.msrb.mxu0 %v14698_v2  ;;  %v14883_v2 = vand.u32 4294901760, %v351_v36 }
 0x3f7   :  { %7231 = vmatpush.msrb.mxu2 %v7058_v5  ;;  %7164 = vmatpush.msrb.mxu1 %v14599_v20  ;;  %v14861_v20 = vand.u32 4294901760, %v353_v11  ;;  %v14864_v5 = vsub.f32 %v355_v42, %v14838_v58  ;;  %v14878_v63 = vsub.f32 %v354_v52, %v14848_v0  ;;  %v2136_v17 = vadd.f32 %v2135_v4, %v2067_v38 }
 0x3f8   :  { %7274 = vmatpush.msrb.mxu3 %v14615_v40  ;;  %7135 = vmatpush.msrb.mxu0 %v14711_v47  ;;  %v14898_v47 = vsub.f32 %v352_v60, %v14872_v41  ;;  %v343_v60 = vld [vmem:[%s16074_s1 + $0xa10] sm:$0xff]  ;;  %v14995_v4 = vand.u32 4294901760, %v442_v27 }
 0x3f9   :  { %7235 = vmatpush.msrb.mxu2 %v7064_v50  ;;  %7166 = vmatpush.msrb.mxu1 %v14615_v40  ;;  %v2172_v40 = vpop.f32.mrf.mxu1  ;;  %v7333_v50 = vand.u32 4294901760, %v14851_v39  ;;  %v14892_v37 = vsub.f32 %v353_v11, %v14861_v20 }
 0x3fa   :  { %7276 = vmatpush.msrb.mxu3 %v14631_v26  ;;  %7138 = vmatpush.msrb.mxu0 %v14725_v22  ;;  %v2173_v24 = vadd.f32 %v2172_v40, %v2136_v17  ;;  %v16319_v22 = vand.u32 4294901760, %v14878_v63  ;;  %v16315_v51 = vand.u32 4294901760, %v14898_v47  ;;  %v2368_v46 = vpop.f32.mrf.mxu0  ;;  %v15001_v40 = vand.u32 4294901760, %v344_v43 }
 0x3fb   :  { %7239 = vmatpush.msrb.mxu2 %v7070_v54  ;;  %7168 = vmatpush.msrb.mxu1 %v14631_v26  ;;  %v350_v54 = vld [vmem:[%s16074_s1 + $0xa48] sm:$0xff]  ;;  %v7339_v26 = vand.u32 4294901760, %v14864_v5  ;;  %v16317_v14 = vand.u32 4294901760, %v14892_v37  ;;  %v2314_v33 = vpop.f32.mrf.mxu3  ;;  %v15025_v49 = vsub.f32 %v442_v27, %v14995_v4 }
 0x3fc   :  { %7278 = vmatpush.msrb.mxu3 %v14644_v48  ;;  %7141 = vmatmul.f32.vlgmr.msrb.gmra.mxu0 %v14714_v23  ;;  %v14908_v12 = vand.u32 4294901760, %v350_v54  ;;  %v2214_v13 = vadd.f32 %v2213_v10, %v2173_v24  ;;  %v7346_v18 = vsub.f32 %v14878_v63, %v16319_v22  ;;  %v15013_v10 = vand.u32 4294901760, %v343_v60 }
 0x3fd   :  { %7243 = vmatpush.msrb.mxu2 %v7076_v7  ;;  %7291 = vmatpush.msra.mxu0 %v14828_v55  ;;  %v349_v7 = vld [vmem:[%s16074_s1 + $0xa40] sm:$0xff]  ;;  %v7352_v29 = vsub.f32 %v14892_v37, %v16317_v14 }
 0x3fe   :  { %7170 = vmatpush.msrb.mxu1 %v14644_v48  ;;  %7280 = vmatpush.msrb.mxu3 %v14667_v16  ;;  %v7334_v48 = vsub.f32 %v14851_v39, %v7333_v50  ;;  %v14924_v57 = vand.u32 4294901760, %v349_v7  ;;  %v2315_v3 = vadd.f32 %v2314_v33, %v2214_v13  ;;  %v7347_v59 = vand.u32 4294901760, %v7346_v18 }
 0x3ff   :  { %7247 = vmatpush.msrb.mxu2 %v7082_v1  ;;  %7293 = vmatpush.msra.mxu0 %v14838_v58  ;;  %v14914_v1 = vsub.f32 %v351_v36, %v14883_v2  ;;  %v7353_v42 = vand.u32 4294901760, %v7352_v29  ;;  %v2476_v36 = vpop.f32.mrf.mxu2  ;;  %v15051_v27 = vsub.f32 %v343_v60, %v15013_v10 }
 0x400   :  { %7172 = vmatpush.msrb.mxu1 %v14667_v16  ;;  %7282 = vmatpush.msrb.mxu3 %v14684_v6  ;;  %v7340_v16 = vsub.f32 %v14864_v5, %v7339_v26  ;;  %v7335_v34 = vand.u32 4294901760, %v7334_v48  ;;  %v14957_v30 = vsub.f32 %v349_v7, %v14924_v57  ;;  %v2369_v8 = vadd.f32 %v2368_v46, %v2315_v3  ;;  %v341_v3 = vld [vmem:[%s16074_s1 + $0xa00] sm:$0xff] }
 0x401   :  { %7249 = vmatmul.f32.vlgmr.msrb.gmra.mxu2 %v14686_v15  ;;  %7295 = vmatpush.msra.mxu0 %v14848_v0  ;;  %v16314_v56 = vand.u32 4294901760, %v14914_v1  ;;  %v2407_v21 = vpop.f32.mrf.mxu1  ;;  %v16309_v48 = vand.u32 4294901760, %v14988_v32  ;;  %v15033_v46 = vsub.f32 %v344_v43, %v15001_v40 }
 0x402   :  { %7434 = vmatpush.msra.mxu2 %v14851_v39  ;;  %7174 = vmatpush.msrb.mxu1 %v14684_v6  ;;  %v14941_v6 = vsub.f32 %v350_v54, %v14908_v12  ;;  %v7341_v28 = vand.u32 4294901760, %v7340_v16  ;;  %v16312_v52 = vand.u32 4294901760, %v14957_v30  ;;  %v2408_v11 = vadd.f32 %v2407_v21, %v2369_v8  ;;  %v342_v16 = vld [vmem:[%s16074_s1 + $0xa08] sm:$0xff]  ;;  %v364_v39 = vld [vmem:[%s16074_s1 + $0xab8] sm:$0xff] }
 0x403   :  { %7284 = vmatpush.msrb.mxu3 %v14700_v62  ;;  %7297 = vmatpush.msra.mxu0 %v14861_v20  ;;  %v7364_v45 = vsub.f32 %v14914_v1, %v16314_v56  ;;  %v2513_v33 = vpop.f32.mrf.mxu3  ;;  %v15040_v29 = vand.u32 4294901760, %v342_v16  ;;  %v7388_v21 = vsub.f32 %v14988_v32, %v16309_v48 }
 0x404   :  { %7286 = vmatmul.f32.vlgmr.msrb.gmra.mxu3 %v14686_v15  ;;  %7437 = vmatpush.msra.mxu2 %v14864_v5  ;;  %v346_v15 = vld [vmem:[%s16074_s1 + $0xa28] sm:$0xff]  ;;  %v16313_v23 = vand.u32 4294901760, %v14941_v6  ;;  %v7376_v7 = vsub.f32 %v14957_v30, %v16312_v52  ;;  %v2477_v13 = vadd.f32 %v2476_v36, %v2408_v11  ;;  %v15065_v36 = vand.u32 4294901760, %v341_v3  ;;  %v363_v5 = vld [vmem:[%s16074_s1 + $0xab0] sm:$0xff] }
 0x405   :  { %7487 = vmatpush.msra.mxu3 %v14828_v55  ;;  %7176 = vmatpush.msrb.mxu1 %v14700_v62  ;;  %v7358_v62 = vsub.f32 %v14898_v47, %v16315_v51  ;;  %v14969_v35 = vand.u32 4294901760, %v346_v15  ;;  %v7365_v24 = vand.u32 4294901760, %v7364_v45  ;;  %v16318_v45 = vand.u32 4294901760, %v15025_v49 }
 0x406   :  { %7299 = vmatpush.msra.mxu0 %v14872_v41  ;;  %7180 = vmatmul.f32.vlgmr.msrb.gmra.mxu1 %v6983_v9  ;;  %v14973_v9 = vsub.f32 %v348_v53, %v14938_v25  ;;  %v7370_v38 = vsub.f32 %v14941_v6, %v16313_v23  ;;  %v15017_v53 = vsub.f32 %v345_v31, %v14984_v19  ;;  %v7377_v31 = vand.u32 4294901760, %v7376_v7 }
 0x407   :  { %7440 = vmatpush.msra.mxu2 %v14878_v63  ;;  %7336 = vmatpush.msra.mxu1 %v7335_v34  ;;  %v7359_v44 = vand.u32 4294901760, %v7358_v62  ;;  %v15005_v54 = vsub.f32 %v346_v15, %v14969_v35  ;;  %v2554_v62 = vpop.f32.mrf.mxu0  ;;  %v2514_v8 = vadd.f32 %v2513_v33, %v2477_v13  ;;  %16652 = vst [vmem:[#allocation5_spill] sm:$0xff] %v15065_v36  ;;  %v370_v13 = vld [vmem:[%s16074_s1 + $0xae8] sm:$0xff]  ;;  %v7389_v33 = vand.u32 4294901760, %v7388_v21 }
 0x408   :  { %7489 = vmatpush.msra.mxu3 %v14838_v58  ;;  %7301 = vmatpush.msra.mxu0 %v14883_v2  ;;  %v16310_v17 = vand.u32 4294901760, %v14973_v9  ;;  %v7371_v34 = vand.u32 4294901760, %v7370_v38  ;;  %v16311_v38 = vand.u32 4294901760, %v15033_v46  ;;  %v15071_v7 = vsub.f32 %v342_v16, %v15040_v29  ;;  %v369_v16 = vld [vmem:[%s16074_s1 + $0xae0] sm:$0xff] }
 0x409   :  { %7443 = vmatpush.msra.mxu2 %v14892_v37  ;;  %7342 = vmatpush.msra.mxu1 %v7341_v28  ;;  %v16308_v15 = vand.u32 4294901760, %v15005_v54  ;;  %v372_v28 = vld [vmem:[%s16074_s1 + $0xaf8] sm:$0xff]  ;;  %v2655_v11 = vpop.f32.mrf.mxu1  ;;  %v15101_v48 = vand.u32 4294901760, %v370_v13 }
 0x40a   :  { %7491 = vmatpush.msra.mxu3 %v14848_v0  ;;  %7303 = vmatpush.msra.mxu0 %v14908_v12  ;;  %v7382_v18 = vsub.f32 %v14973_v9, %v16310_v17  ;;  %v15056_v43 = vand.u32 4294901760, %v372_v28  ;;  %v368_v17 = vld [vmem:[%s16074_s1 + $0xad8] sm:$0xff] }
 0x40b   :  { %7446 = vmatpush.msra.mxu2 %v14898_v47  ;;  %7348 = vmatpush.msra.mxu1 %v7347_v59  ;;  %v16307_v59 = vand.u32 4294901760, %v15017_v53  ;;  %v7394_v60 = vsub.f32 %v15005_v54, %v16308_v15  ;;  %16653 = vst [vmem:[#allocation7_spill] sm:$0xff] %v15101_v48  ;;  %v15121_v51 = vand.u32 4294901760, %v368_v17 }
 0x40c   :  { %7493 = vmatpush.msra.mxu3 %v14861_v20  ;;  %7305 = vmatpush.msra.mxu0 %v14924_v57  ;;  %16651 = vst [vmem:[#allocation9_spill] sm:$0xff] %v15056_v43  ;;  %v15092_v21 = vsub.f32 %v372_v28, %v15056_v43  ;;  %v16320_v28 = vand.u32 4294901760, %v15071_v7 }
 0x40d   :  { %7449 = vmatpush.msra.mxu2 %v14914_v1  ;;  %7354 = vmatpush.msra.mxu1 %v7353_v42  ;;  %v371_v42 = vld [vmem:[%s16074_s1 + $0xaf0] sm:$0xff]  ;;  %v7395_v15 = vand.u32 4294901760, %v7394_v60 }
 0x40e   :  { %7495 = vmatpush.msra.mxu3 %v14872_v41  ;;  %7307 = vmatpush.msra.mxu0 %v14938_v25  ;;  %v16321_v56 = vand.u32 4294901760, %v15092_v21 }
 0x40f   :  { %7452 = vmatpush.msra.mxu2 %v14941_v6  ;;  %7360 = vmatpush.msra.mxu1 %v7359_v44  ;;  %v7383_v44 = vand.u32 4294901760, %v7382_v18  ;;  %v16316_v18 = vand.u32 4294901760, %v15051_v27 }
 0x410   :  { %7497 = vmatpush.msra.mxu3 %v14883_v2  ;;  %7309 = vmatpush.msra.mxu0 %v14954_v61 }
 0x411   :  { %7455 = vmatpush.msra.mxu2 %v14957_v30  ;;  %7366 = vmatpush.msra.mxu1 %v7365_v24  ;;  %v2555_v24 = vadd.f32 %v2554_v62, %v2514_v8  ;;  %v15081_v62 = vand.u32 4294901760, %v371_v42 }
 0x412   :  { %7499 = vmatpush.msra.mxu3 %v14908_v12  ;;  %7311 = vmatpush.msra.mxu0 %v14969_v35 }
 0x413   :  { %7458 = vmatpush.msra.mxu2 %v14973_v9  ;;  %7372 = vmatpush.msra.mxu1 %v7371_v34  ;;  %v7400_v34 = vsub.f32 %v15017_v53, %v16307_v59  ;;  %v2656_v8 = vadd.f32 %v2655_v11, %v2555_v24  ;;  %v2709_v59 = vpop.f32.mrf.mxu2  ;;  %v7406_v11 = vsub.f32 %v15033_v46, %v16311_v38 }
 0x414   :  { %7501 = vmatpush.msra.mxu3 %v14924_v57  ;;  %7313 = vmatpush.msra.mxu0 %v14984_v19  ;;  %v15099_v24 = vsub.f32 %v341_v3, %v15065_v36  ;;  %v7412_v3 = vsub.f32 %v15051_v27, %v16316_v18  ;;  %v15116_v38 = vsub.f32 %v371_v42, %v15081_v62 }
 0x415   :  { %7461 = vmatpush.msra.mxu2 %v14988_v32  ;;  %7378 = vmatpush.msra.mxu1 %v7377_v31  ;;  %v7325_v31 = vsub.f32 %v15025_v49, %v16318_v45  ;;  %v7401_v60 = vand.u32 4294901760, %v7400_v34  ;;  %v2710_v52 = vadd.f32 %v2709_v59, %v2656_v8  ;;  %v2748_v34 = vpop.f32.mrf.mxu3  ;;  %v7407_v42 = vand.u32 4294901760, %v7406_v11  ;;  %v2817_v11 = vpop.f32.mrf.mxu0 }
 0x416   :  { %7503 = vmatpush.msra.mxu3 %v14938_v25  ;;  %7315 = vmatpush.msra.mxu0 %v15001_v40  ;;  %v16322_v59 = vand.u32 4294901760, %v15099_v24  ;;  %v15129_v8 = vsub.f32 %v370_v13, %v15101_v48  ;;  %v7413_v13 = vand.u32 4294901760, %v7412_v3  ;;  %v2854_v3 = vpop.f32.mrf.mxu1 }
 0x417   :  { %7464 = vmatpush.msra.mxu2 %v15005_v54  ;;  %7384 = vmatpush.msra.mxu1 %v7383_v44  ;;  %v15109_v44 = vand.u32 4294901760, %v369_v16  ;;  %v7326_v23 = vand.u32 4294901760, %v7325_v31  ;;  %v7418_v31 = vsub.f32 %v15071_v7, %v16320_v28  ;;  %v2749_v22 = vadd.f32 %v2748_v34, %v2710_v52 }
 0x418   :  { %7505 = vmatpush.msra.mxu3 %v14954_v61  ;;  %7317 = vmatpush.msra.mxu0 %v15013_v10  ;;  %v15151_v28 = vsub.f32 %v368_v17, %v15121_v51  ;;  %v16323_v52 = vand.u32 4294901760, %v15129_v8 }
 0x419   :  { %7467 = vmatpush.msra.mxu2 %v15017_v53  ;;  %7390 = vmatpush.msra.mxu1 %v7389_v33  ;;  %v367_v33 = vld [vmem:[%s16074_s1 + $0xad0] sm:$0xff]  ;;  %v15137_v18 = vsub.f32 %v369_v16, %v15109_v44  ;;  %v7675_v16 = vsub.f32 %v15092_v21, %v16321_v56  ;;  %v2818_v56 = vadd.f32 %v2817_v11, %v2749_v22  ;;  %v7419_v17 = vand.u32 4294901760, %v7418_v31 }
 0x41a   :  { %7507 = vmatpush.msra.mxu3 %v14969_v35  ;;  %7319 = vmatpush.msra.mxu0 %v15040_v29  ;;  %v15144_v45 = vand.u32 4294901760, %v367_v33 }
 0x41b   :  { %7470 = vmatpush.msra.mxu2 %v15033_v46  ;;  %7396 = vmatpush.msra.mxu1 %v7395_v15  ;;  %v366_v15 = vld [vmem:[%s16074_s1 + $0xac8] sm:$0xff]  ;;  %v2855_v31 = vadd.f32 %v2854_v3, %v2818_v56  ;;  %v7687_v56 = vsub.f32 %v15129_v8, %v16323_v52  ;;  %v16658_v52 = vand.u32 4294901760, %v14892_v37  ;;  %v361_v37 = vld [vmem:[%s16074_s1 + $0xaa0] sm:$0xff] }
 0x41c   :  { %7509 = vmatpush.msra.mxu3 %v14984_v19  ;;  %7321 = vmatpush.msra.mxu0 %v15065_v36  ;;  %v15162_v34 = vand.u32 4294901760, %v366_v15  ;;  %v15176_v22 = vsub.f32 %v367_v33, %v15144_v45 }
 0x41d   :  { %7473 = vmatpush.msra.mxu2 %v15051_v27  ;;  %7402 = vmatpush.msra.mxu1 %v7401_v60  ;;  %v365_v60 = vld [vmem:[%s16074_s1 + $0xac0] sm:$0xff] }
 0x41e   :  { %7511 = vmatpush.msra.mxu3 %v15001_v40  ;;  %7327 = vmatmul.f32.vlgmr.msra.gmra.mxu0 %v7326_v23  ;;  %v7424_v23 = vsub.f32 %v15099_v24, %v16322_v59  ;;  %v15178_v11 = vand.u32 4294901760, %v365_v60  ;;  %v7676_v59 = vand.u32 4294901760, %v7675_v16  ;;  %v15193_v3 = vsub.f32 %v366_v15, %v15162_v34 }
 0x41f   :  { %7476 = vmatpush.msra.mxu2 %v15071_v7  ;;  %7528 = vmatpush.msrb.mxu0 %v7333_v50  ;;  %v16654_v50 = vand.u32 4294901760, %v15116_v38  ;;  %v15195_v16 = vand.u32 4294901760, %v364_v39  ;;  %v16329_v14 = vand.u32 4294901760, %v15176_v22 }
 0x420   :  { %7408 = vmatpush.msra.mxu1 %v7407_v42  ;;  %7513 = vmatpush.msra.mxu3 %v15013_v10  ;;  %v7425_v33 = vand.u32 4294901760, %v7424_v23  ;;  %v362_v23 = vld [vmem:[%s16074_s1 + $0xaa8] sm:$0xff] }
 0x421   :  { %7479 = vmatpush.msra.mxu2 %v15099_v24  ;;  %7532 = vmatpush.msrb.mxu0 %v7339_v26  ;;  %v7681_v42 = vsub.f32 %v15116_v38, %v16654_v50  ;;  %v2895_v26 = vpop.f32.mrf.mxu2  ;;  %v16656_v50 = vand.u32 4294901760, %v15137_v18 }
 0x422   :  { %7414 = vmatpush.msra.mxu1 %v7413_v13  ;;  %7515 = vmatpush.msra.mxu3 %v15040_v29  ;;  %v16655_v13 = vand.u32 4294901760, %v14878_v63 }
 0x423   :  { %7482 = vmatmul.f32.vlgmr.msra.gmra.mxu2 %v15025_v49  ;;  %v7693_v63 = vsub.f32 %v15137_v18, %v16656_v50  ;;  %v7682_v15 = vand.u32 4294901760, %v7681_v42  ;;  %v16659_v50 = vand.u32 4294901760, %v15151_v28  ;;  %v16660_v42 = vand.u32 4294901760, %v14898_v47 }
 0x424   :  { %7536 = vmatpush.msrb.mxu0 %v16655_v13  ;;  %7632 = vmatpush.msrb.mxu2 %v15056_v43  ;;  %v16657_v13 = vand.u32 4294901760, %v15025_v49  ;;  %v2896_v43 = vadd.f32 %v2895_v26, %v2855_v31  ;;  %v15225_v31 = vsub.f32 %v364_v39, %v15195_v16  ;;  %v7705_v47 = vsub.f32 %v15176_v22, %v16329_v14 }
 0x425   :  { %7420 = vmatpush.msra.mxu1 %v7419_v17  ;;  %7517 = vmatpush.msra.mxu3 %v15065_v36  ;;  %v15210_v17 = vsub.f32 %v365_v60, %v15178_v11  ;;  %v15212_v36 = vand.u32 4294901760, %v363_v5  ;;  %v7699_v49 = vsub.f32 %v15151_v28, %v16659_v50  ;;  %v7688_v60 = vand.u32 4294901760, %v7687_v56  ;;  %v3050_v50 = vpop.f32.mrf.mxu0 }
 0x426   :  { %7521 = vmatmul.f32.vlgmr.msra.gmra.mxu3 %v16657_v13  ;;  %7540 = vmatpush.msrb.mxu0 %v16658_v52  ;;  %v2996_v52 = vpop.f32.mrf.mxu3  ;;  %v7694_v26 = vand.u32 4294901760, %v7693_v63  ;;  %v16661_v13 = vand.u32 4294901760, %v14914_v1  ;;  %v359_v1 = vld [vmem:[%s16074_s1 + $0xa90] sm:$0xff] }
 0x427   :  { %7634 = vmatpush.msrb.mxu2 %v15081_v62  ;;  %7677 = vmatpush.msrb.mxu3 %v7676_v59  ;;  %v15227_v59 = vand.u32 4294901760, %v362_v23  ;;  %v15240_v56 = vsub.f32 %v363_v5, %v15212_v36  ;;  %v2997_v63 = vadd.f32 %v2996_v52, %v2896_v43  ;;  %v16330_v5 = vand.u32 4294901760, %v15225_v31 }
 0x428   :  { %7426 = vmatpush.msra.mxu1 %v7425_v33  ;;  %7544 = vmatpush.msrb.mxu0 %v16660_v42  ;;  %v360_v33 = vld [vmem:[%s16074_s1 + $0xa98] sm:$0xff]  ;;  %v15242_v42 = vand.u32 4294901760, %v361_v37  ;;  %v16663_v52 = vand.u32 4294901760, %v14941_v6  ;;  %v358_v6 = vld [vmem:[%s16074_s1 + $0xa88] sm:$0xff] }
 0x429   :  { %7428 = vmatmul.f32.vlgmr.msra.gmra.mxu1 %v14995_v4  ;;  %7636 = vmatpush.msrb.mxu2 %v15101_v48  ;;  %v7700_v48 = vand.u32 4294901760, %v7699_v49  ;;  %v15253_v39 = vsub.f32 %v362_v23, %v15227_v59  ;;  %v15255_v43 = vand.u32 4294901760, %v360_v33  ;;  %v3051_v49 = vadd.f32 %v3050_v50, %v2997_v63  ;;  %v443_v50 = vld.sshfl [vmem:[#allocation1 + $0x28] sm:$0xff pattern:$0x73625140] }
 0x42a   :  { %7595 = vmatpush.msrb.mxu1 %v14828_v55  ;;  %7683 = vmatpush.msrb.mxu3 %v7682_v15  ;;  %v3089_v55 = vpop.f32.mrf.mxu1  ;;  %v16662_v15 = vand.u32 4294901760, %v15193_v3 }
 0x42b   :  { %7548 = vmatpush.msrb.mxu0 %v16661_v13  ;;  %7638 = vmatpush.msrb.mxu2 %v15109_v44  ;;  %v16331_v13 = vand.u32 4294901760, %v15240_v56  ;;  %v3090_v63 = vadd.f32 %v3089_v55, %v3051_v49  ;;  %v15285_v55 = vsub.f32 %v360_v33, %v15255_v43  ;;  %v16666_v49 = vand.u32 4294901760, %v14973_v9 }
 0x42c   :  { %7597 = vmatpush.msrb.mxu1 %v14838_v58  ;;  %7689 = vmatpush.msrb.mxu3 %v7688_v60  ;;  %v7711_v14 = vsub.f32 %v15193_v3, %v16662_v15  ;;  %v7706_v58 = vand.u32 4294901760, %v7705_v47  ;;  %v16664_v60 = vand.u32 4294901760, %v15210_v17  ;;  %v15269_v15 = vsub.f32 %v361_v37, %v15242_v42 }
 0x42d   :  { %7552 = vmatpush.msrb.mxu0 %v16663_v52  ;;  %7640 = vmatpush.msrb.mxu2 %v15121_v51  ;;  %v16665_v52 = vand.u32 4294901760, %v14957_v30  ;;  %v7723_v37 = vsub.f32 %v15225_v31, %v16330_v5  ;;  %v357_v30 = vld [vmem:[%s16074_s1 + $0xa80] sm:$0xff]  ;;  %v7729_v33 = vsub.f32 %v15240_v56, %v16331_v13  ;;  %v16667_v9 = vand.u32 4294901760, %v14988_v32 }
 0x42e   :  { %7599 = vmatpush.msrb.mxu1 %v14848_v0  ;;  %7695 = vmatpush.msrb.mxu3 %v7694_v26  ;;  %v7717_v23 = vsub.f32 %v15210_v17, %v16664_v60  ;;  %v15277_v0 = vand.u32 4294901760, %v359_v1  ;;  %v3158_v26 = vpop.f32.mrf.mxu2  ;;  %v7712_v47 = vand.u32 4294901760, %v7711_v14  ;;  %v15295_v14 = vand.u32 4294901760, %v443_v50 }
 0x42f   :  { %7556 = vmatpush.msrb.mxu0 %v16665_v52  ;;  %7642 = vmatpush.msrb.mxu2 %v15144_v45  ;;  %v7740_v52 = vand.u32 4294901760, %v15269_v15  ;;  %v3159_v5 = vadd.f32 %v3158_v26, %v3090_v63  ;;  %v15308_v60 = vand.u32 4294901760, %v357_v30  ;;  %v7746_v63 = vand.u32 4294901760, %v15285_v55 }
 0x430   :  { %7601 = vmatpush.msrb.mxu1 %v14861_v20  ;;  %7701 = vmatpush.msrb.mxu3 %v7700_v48  ;;  %v15293_v20 = vand.u32 4294901760, %v358_v6  ;;  %v7718_v48 = vand.u32 4294901760, %v7717_v23  ;;  %v16668_v23 = vand.u32 4294901760, %v15253_v39  ;;  %v16669_v32 = vand.u32 4294901760, %v15005_v54 }
 0x431   :  { %7560 = vmatpush.msrb.mxu0 %v16666_v49  ;;  %7644 = vmatpush.msrb.mxu2 %v15162_v34  ;;  %v15306_v49 = vsub.f32 %v359_v1, %v15277_v0  ;;  %v15322_v26 = vsub.f32 %v443_v50, %v15295_v14  ;;  %v16670_v54 = vand.u32 4294901760, %v15017_v53  ;;  %v15333_v50 = vsub.f32 %v357_v30, %v15308_v60 }
 0x432   :  { %7603 = vmatpush.msrb.mxu1 %v14872_v41  ;;  %7707 = vmatpush.msrb.mxu3 %v7706_v58  ;;  %v3195_v41 = vpop.f32.mrf.mxu3  ;;  %v7724_v58 = vand.u32 4294901760, %v7723_v37  ;;  %v7735_v13 = vsub.f32 %v15253_v39, %v16668_v23  ;;  %v15319_v1 = vsub.f32 %v358_v6, %v15293_v20  ;;  %v7741_v37 = vsub.f32 %v15269_v15, %v7740_v52  ;;  %v3337_v23 = vpop.f32.mrf.mxu1 }
 0x433   :  { %7564 = vmatpush.msrb.mxu0 %v16667_v9  ;;  %7646 = vmatpush.msrb.mxu2 %v15178_v11  ;;  %v3196_v9 = vadd.f32 %v3195_v41, %v3159_v5  ;;  %v7752_v6 = vand.u32 4294901760, %v15306_v49  ;;  %v16671_v53 = vand.u32 4294901760, %v15033_v46  ;;  %v7665_v30 = vand.u32 4294901760, %v15322_v26 }
 0x434   :  { %7605 = vmatpush.msrb.mxu1 %v14883_v2  ;;  %7713 = vmatpush.msrb.mxu3 %v7712_v47  ;;  %v3236_v2 = vpop.f32.mrf.mxu0  ;;  %v7730_v47 = vand.u32 4294901760, %v7729_v33  ;;  %v7758_v33 = vand.u32 4294901760, %v15319_v1 }
 0x435   :  { %7568 = vmatpush.msrb.mxu0 %v16669_v32  ;;  %7648 = vmatpush.msrb.mxu2 %v15195_v16  ;;  %v3237_v5 = vadd.f32 %v3236_v2, %v3196_v9  ;;  %v7753_v46 = vsub.f32 %v15306_v49, %v7752_v6 }
 0x436   :  { %7607 = vmatpush.msrb.mxu1 %v14908_v12  ;;  %7719 = vmatpush.msrb.mxu3 %v7718_v48  ;;  %v7736_v12 = vand.u32 4294901760, %v7735_v13  ;;  %v7747_v48 = vsub.f32 %v15285_v55, %v7746_v63  ;;  %v16672_v13 = vand.u32 4294901760, %v15051_v27  ;;  %v3391_v32 = vpop.f32.mrf.mxu2  ;;  %v7759_v27 = vsub.f32 %v15319_v1, %v7758_v33 }
 0x437   :  { %7572 = vmatpush.msrb.mxu0 %v16670_v54  ;;  %7650 = vmatpush.msrb.mxu2 %v15212_v36  ;;  %v3338_v41 = vadd.f32 %v3337_v23, %v3237_v5 }
 0x438   :  { %7609 = vmatpush.msrb.mxu1 %v14924_v57  ;;  %7725 = vmatpush.msrb.mxu3 %v7724_v58  ;;  %v7742_v57 = vand.u32 4294901760, %v7741_v37  ;;  %v7764_v58 = vand.u32 4294901760, %v15333_v50  ;;  %v7748_v2 = vand.u32 4294901760, %v7747_v48 }
 0x439   :  { %7576 = vmatpush.msrb.mxu0 %v16671_v53  ;;  %7652 = vmatpush.msrb.mxu2 %v15227_v59  ;;  %v3392_v37 = vadd.f32 %v3391_v32, %v3338_v41  ;;  %v16675_v53 = vand.u32 4294901760, %v15092_v21  ;;  %v16676_v41 = vand.u32 4294901760, %v15116_v38 }
 0x43a   :  { %7611 = vmatpush.msrb.mxu1 %v14938_v25  ;;  %7731 = vmatpush.msrb.mxu3 %v7730_v47  ;;  %v16673_v25 = vand.u32 4294901760, %v15071_v7  ;;  %v7666_v47 = vsub.f32 %v15322_v26, %v7665_v30  ;;  %v7754_v7 = vand.u32 4294901760, %v7753_v46  ;;  %v7765_v9 = vsub.f32 %v15333_v50, %v7764_v58  ;;  %v3430_v54 = vpop.f32.mrf.mxu3  ;;  %v3536_v5 = vpop.f32.mrf.mxu1 }
 0x43b   :  { %7580 = vmatpush.msrb.mxu0 %v16672_v13  ;;  %7654 = vmatpush.msrb.mxu2 %v15242_v42  ;;  %v16678_v13 = vld [vmem:[#allocation5_spill] sm:$0xff] }
 0x43c   :  { %7613 = vmatpush.msrb.mxu1 %v14954_v61  ;;  %7737 = vmatpush.msrb.mxu3 %v7736_v12  ;;  %v16674_v61 = vand.u32 4294901760, %v15099_v24  ;;  %v7667_v23 = vand.u32 4294901760, %v7666_v47  ;;  %v3499_v12 = vpop.f32.mrf.mxu0  ;;  %v3431_v24 = vadd.f32 %v3430_v54, %v3392_v37  ;;  %v7766_v48 = vand.u32 4294901760, %v7765_v9 }
 0x43d   :  { %7584 = vmatpush.msrb.mxu0 %v16673_v25  ;;  %7656 = vmatpush.msrb.mxu2 %v15255_v43 }
 0x43e   :  { %7615 = vmatpush.msrb.mxu1 %v14969_v35  ;;  %7743 = vmatpush.msrb.mxu3 %v7742_v57  ;;  %v7760_v35 = vand.u32 4294901760, %v7759_v27 }
 0x43f   :  { %7588 = vmatpush.msrb.mxu0 %v16674_v61  ;;  %7658 = vmatpush.msrb.mxu2 %v15277_v0 }
 0x440   :  { %7617 = vmatpush.msrb.mxu1 %v14984_v19  ;;  %7749 = vmatpush.msrb.mxu3 %v7748_v2  ;;  %v3500_v19 = vadd.f32 %v3499_v12, %v3431_v24  ;;  %v16681_v2 = vld [vmem:[#allocation7_spill] sm:$0xff]  ;;  %v383_v24 = vld [vmem:[%s16074_s1 + $0xb50] sm:$0xff] }
 0x441   :  { %7590 = vmatmul.f32.vlgmr.msrb.gmra.mxu0 %v14995_v4  ;;  %7660 = vmatpush.msrb.mxu2 %v15293_v20 }
 0x442   :  { %7775 = vmatpush.msra.mxu0 %v15092_v21  ;;  %7619 = vmatpush.msrb.mxu1 %v15001_v40  ;;  %v3537_v57 = vadd.f32 %v3536_v5, %v3500_v19  ;;  %v3577_v40 = vpop.f32.mrf.mxu2  ;;  %v3678_v46 = vpop.f32.mrf.mxu3  ;;  %v15489_v5 = vand.u32 4294901760, %v383_v24 }
 0x443   :  { %7755 = vmatpush.msrb.mxu3 %v7754_v7  ;;  %7662 = vmatpush.msrb.mxu2 %v15308_v60 }
 0x444   :  { %7778 = vmatpush.msra.mxu0 %v15116_v38  ;;  %7621 = vmatpush.msrb.mxu1 %v15013_v10  ;;  %v16677_v10 = vld [vmem:[#allocation9_spill] sm:$0xff]  ;;  %v3578_v21 = vadd.f32 %v3577_v40, %v3537_v57  ;;  %v16680_v38 = vand.u32 4294901760, %v15137_v18  ;;  %v3732_v32 = vpop.f32.mrf.mxu0  ;;  %v15520_v40 = vsub.f32 %v383_v24, %v15489_v5 }
 0x445   :  { %7761 = vmatpush.msrb.mxu3 %v7760_v35  ;;  %7668 = vmatmul.f32.vlgmr.msrb.gmra.mxu2 %v7667_v23  ;;  %v384_v23 = vld [vmem:[%s16074_s1 + $0xb58] sm:$0xff] }
 0x446   :  { %7781 = vmatpush.msra.mxu0 %v15129_v8  ;;  %7869 = vmatpush.msra.mxu2 %v16675_v53  ;;  %v3679_v25 = vadd.f32 %v3678_v46, %v3578_v21 }
 0x447   :  { %7623 = vmatpush.msrb.mxu1 %v15040_v29  ;;  %7767 = vmatpush.msrb.mxu3 %v7766_v48  ;;  %v16679_v29 = vand.u32 4294901760, %v15129_v8  ;;  %v3771_v8 = vpop.f32.mrf.mxu1 }
 0x448   :  { %7769 = vmatmul.f32.vlgmr.msrb.gmra.mxu3 %v15295_v14  ;;  %7784 = vmatpush.msra.mxu0 %v15137_v18  ;;  %v3733_v27 = vadd.f32 %v3732_v32, %v3679_v25  ;;  %v16683_v18 = vand.u32 4294901760, %v15176_v22 }
 0x449   :  { %7873 = vmatpush.msra.mxu2 %v16676_v41  ;;  %7936 = vmatpush.msra.mxu3 %v16677_v10 }
 0x44a   :  { %7625 = vmatpush.msrb.mxu1 %v16678_v13  ;;  %7787 = vmatpush.msra.mxu0 %v15151_v28  ;;  %v3840_v47 = vpop.f32.mrf.mxu2  ;;  %v3877_v37 = vpop.f32.mrf.mxu3 }
 0x44b   :  { %7627 = vmatmul.f32.vlgmr.msrb.gmra.mxu1 %v14995_v4  ;;  %7877 = vmatpush.msra.mxu2 %v16679_v29  ;;  %v16682_v4 = vand.u32 4294901760, %v15151_v28  ;;  %v16684_v28 = vand.u32 4294901760, %v15193_v3 }
 0x44c   :  { %7828 = vmatpush.msra.mxu1 %v16677_v10  ;;  %7938 = vmatpush.msra.mxu3 %v15081_v62 }
 0x44d   :  { %7790 = vmatpush.msra.mxu0 %v15176_v22  ;;  %7881 = vmatpush.msra.mxu2 %v16680_v38  ;;  %v16685_v22 = vand.u32 4294901760, %v15210_v17  ;;  %v379_v38 = vld [vmem:[%s16074_s1 + $0xb30] sm:$0xff] }
 0x44e   :  { %7830 = vmatpush.msra.mxu1 %v15081_v62  ;;  %7940 = vmatpush.msra.mxu3 %v16681_v2  ;;  %v3772_v62 = vadd.f32 %v3771_v8, %v3733_v27  ;;  %v16339_v8 = vand.u32 4294901760, %v15520_v40 }
 0x44f   :  { %7793 = vmatpush.msra.mxu0 %v15193_v3  ;;  %7885 = vmatpush.msra.mxu2 %v16682_v4  ;;  %v16686_v3 = vand.u32 4294901760, %v15225_v31  ;;  %v4019_v9 = vpop.f32.mrf.mxu1 }
 0x450   :  { %7832 = vmatpush.msra.mxu1 %v16681_v2  ;;  %7942 = vmatpush.msra.mxu3 %v15109_v44 }
 0x451   :  { %7796 = vmatpush.msra.mxu0 %v15210_v17  ;;  %7889 = vmatpush.msra.mxu2 %v16683_v18  ;;  %v387_v17 = vld [vmem:[%s16074_s1 + $0xb70] sm:$0xff] }
 0x452   :  { %7834 = vmatpush.msra.mxu1 %v15109_v44  ;;  %7944 = vmatpush.msra.mxu3 %v15121_v51  ;;  %v3841_v44 = vadd.f32 %v3840_v47, %v3772_v62 }
 0x453   :  { %7799 = vmatpush.msra.mxu0 %v15225_v31  ;;  %7893 = vmatpush.msra.mxu2 %v16684_v28  ;;  %v3918_v31 = vpop.f32.mrf.mxu0  ;;  %v15560_v28 = vand.u32 4294901760, %v379_v38 }
 0x454   :  { %7836 = vmatpush.msra.mxu1 %v15121_v51  ;;  %7946 = vmatpush.msra.mxu3 %v15144_v45  ;;  %v388_v51 = vld [vmem:[%s16074_s1 + $0xb78] sm:$0xff]  ;;  %v3878_v7 = vadd.f32 %v3877_v37, %v3841_v44 }
 0x455   :  { %7802 = vmatpush.msra.mxu0 %v15240_v56  ;;  %7897 = vmatpush.msra.mxu2 %v16685_v22  ;;  %v15434_v61 = vand.u32 4294901760, %v388_v51  ;;  %v377_v22 = vld [vmem:[%s16074_s1 + $0xb20] sm:$0xff] }
 0x456   :  { %7838 = vmatpush.msra.mxu1 %v15144_v45  ;;  %7948 = vmatpush.msra.mxu3 %v15162_v34  ;;  %v16687_v45 = vand.u32 4294901760, %v15240_v56  ;;  %v386_v56 = vld [vmem:[%s16074_s1 + $0xb68] sm:$0xff]  ;;  %v3919_v54 = vadd.f32 %v3918_v31, %v3878_v7 }
 0x457   :  { %7805 = vmatpush.msra.mxu0 %v15253_v39  ;;  %7901 = vmatpush.msra.mxu2 %v16686_v3  ;;  %v15454_v35 = vand.u32 4294901760, %v386_v56  ;;  %v4218_v41 = vpop.f32.mrf.mxu1 }
 0x458   :  { %7840 = vmatpush.msra.mxu1 %v15162_v34  ;;  %7950 = vmatpush.msra.mxu3 %v15178_v11  ;;  %v16688_v34 = vand.u32 4294901760, %v15253_v39  ;;  %v385_v39 = vld [vmem:[%s16074_s1 + $0xb60] sm:$0xff]  ;;  %v4020_v12 = vadd.f32 %v4019_v9, %v3919_v54  ;;  %v15594_v9 = vsub.f32 %v379_v38, %v15560_v28 }
 0x459   :  { %7808 = vmatpush.msra.mxu0 %v15269_v15  ;;  %7905 = vmatpush.msra.mxu2 %v16687_v45  ;;  %v4073_v15 = vpop.f32.mrf.mxu2  ;;  %v8046_v45 = vsub.f32 %v15520_v40, %v16339_v8 }
 0x45a   :  { %7842 = vmatpush.msra.mxu1 %v15178_v11  ;;  %7952 = vmatpush.msra.mxu3 %v15195_v16  ;;  %v15444_v11 = vand.u32 4294901760, %v387_v17  ;;  %v4074_v48 = vadd.f32 %v4073_v15, %v4020_v12 }
 0x45b   :  { %7811 = vmatpush.msra.mxu0 %v15285_v55  ;;  %7909 = vmatpush.msra.mxu2 %v16688_v34  ;;  %v15478_v55 = vand.u32 4294901760, %v384_v23  ;;  %v4181_v53 = vpop.f32.mrf.mxu0  ;;  %v15590_v34 = vand.u32 4294901760, %v377_v22 }
 0x45c   :  { %7844 = vmatpush.msra.mxu1 %v15195_v16  ;;  %7954 = vmatpush.msra.mxu3 %v15212_v36  ;;  %v15457_v16 = vsub.f32 %v388_v51, %v15434_v61 }
 0x45d   :  { %7814 = vmatpush.msra.mxu0 %v15306_v49  ;;  %7913 = vmatpush.msra.mxu2 %v7740_v52  ;;  %v15470_v52 = vsub.f32 %v387_v17, %v15444_v11  ;;  %v382_v49 = vld [vmem:[%s16074_s1 + $0xb48] sm:$0xff]  ;;  %v376_v17 = vld [vmem:[%s16074_s1 + $0xb18] sm:$0xff] }
 0x45e   :  { %7846 = vmatpush.msra.mxu1 %v15212_v36  ;;  %7956 = vmatpush.msra.mxu3 %v15227_v59  ;;  %v15467_v36 = vand.u32 4294901760, %v385_v39  ;;  %v15514_v57 = vand.u32 4294901760, %v382_v49  ;;  %v15607_v24 = vand.u32 4294901760, %v376_v17 }
 0x45f   :  { %7817 = vmatpush.msra.mxu0 %v15319_v1  ;;  %7917 = vmatpush.msra.mxu2 %v7746_v63  ;;  %v15484_v63 = vsub.f32 %v386_v56, %v15454_v35  ;;  %v15504_v1 = vsub.f32 %v384_v23, %v15478_v55 }
 0x460   :  { %7848 = vmatpush.msra.mxu1 %v15227_v59  ;;  %7958 = vmatpush.msra.mxu3 %v15242_v42  ;;  %v8015_v59 = vand.u32 4294901760, %v15457_v16  ;;  %v15498_v19 = vsub.f32 %v385_v39, %v15467_v36  ;;  %v375_v39 = vld [vmem:[%s16074_s1 + $0xb10] sm:$0xff] }
 0x461   :  { %7820 = vmatpush.msra.mxu0 %v15333_v50  ;;  %7921 = vmatpush.msra.mxu2 %v7752_v6  ;;  %v8021_v6 = vand.u32 4294901760, %v15470_v52  ;;  %v16346_v50 = vand.u32 4294901760, %v15484_v63  ;;  %v16340_v46 = vand.u32 4294901760, %v15504_v1  ;;  %v4259_v27 = vpop.f32.mrf.mxu2 }
 0x462   :  { %7850 = vmatpush.msra.mxu1 %v15242_v42  ;;  %7960 = vmatpush.msra.mxu3 %v15255_v43  ;;  %v4112_v42 = vpop.f32.mrf.mxu3  ;;  %v16341_v21 = vand.u32 4294901760, %v15498_v19 }
 0x463   :  { %7823 = vmatmul.f32.vlgmr.msra.gmra.mxu0 %v15322_v26  ;;  %7925 = vmatpush.msra.mxu2 %v7758_v33  ;;  %v381_v33 = vld [vmem:[%s16074_s1 + $0xb40] sm:$0xff]  ;;  %v8022_v10 = vsub.f32 %v15470_v52, %v8021_v6  ;;  %v8028_v2 = vsub.f32 %v15484_v63, %v16346_v50  ;;  %v4414_v12 = vpop.f32.mrf.mxu0 }
 0x464   :  { %7973 = vmatpush.msrb.mxu0 %v15434_v61  ;;  %7852 = vmatpush.msra.mxu1 %v15255_v43  ;;  %v8016_v43 = vsub.f32 %v15457_v16, %v8015_v59  ;;  %v15530_v13 = vand.u32 4294901760, %v381_v33  ;;  %v8034_v62 = vsub.f32 %v15498_v19, %v16341_v21 }
 0x465   :  { %7962 = vmatpush.msra.mxu3 %v15277_v0  ;;  %7929 = vmatpush.msra.mxu2 %v7764_v58  ;;  %v4113_v58 = vadd.f32 %v4112_v42, %v4074_v48  ;;  %v8023_v18 = vand.u32 4294901760, %v8022_v10  ;;  %v8029_v44 = vand.u32 4294901760, %v8028_v2  ;;  %v374_v10 = vld [vmem:[%s16074_s1 + $0xb08] sm:$0xff] }
 0x466   :  { %7975 = vmatpush.msrb.mxu0 %v15444_v11  ;;  %7854 = vmatpush.msra.mxu1 %v15277_v0  ;;  %v380_v0 = vld [vmem:[%s16074_s1 + $0xb38] sm:$0xff]  ;;  %v8017_v32 = vand.u32 4294901760, %v8016_v43  ;;  %v15563_v47 = vsub.f32 %v381_v33, %v15530_v13  ;;  %v8035_v7 = vand.u32 4294901760, %v8034_v62  ;;  %v8047_v33 = vand.u32 4294901760, %v8046_v45 }
 0x467   :  { %7964 = vmatpush.msra.mxu3 %v15293_v20  ;;  %7931 = vmatmul.f32.vlgmr.msra.gmra.mxu2 %v15295_v14  ;;  %v4182_v29 = vadd.f32 %v4181_v53, %v4113_v58  ;;  %v15544_v25 = vand.u32 4294901760, %v380_v0  ;;  %v4453_v53 = vpop.f32.mrf.mxu1  ;;  %v15619_v58 = vand.u32 4294901760, %v375_v39  ;;  %v15646_v62 = vand.u32 4294901760, %v374_v10 }
 0x468   :  { %7977 = vmatpush.msrb.mxu0 %v15454_v35  ;;  %8116 = vmatpush.msrb.mxu2 %v15457_v16  ;;  %v16336_v56 = vand.u32 4294901760, %v15563_v47  ;;  %v396_v16 = vld [vmem:[%s16074_s1 + $0xbb8] sm:$0xff] }
 0x469   :  { %7856 = vmatpush.msra.mxu1 %v15293_v20  ;;  %7966 = vmatpush.msra.mxu3 %v15308_v60  ;;  %v15547_v20 = vsub.f32 %v382_v49, %v15514_v57  ;;  %v4219_v4 = vadd.f32 %v4218_v41, %v4182_v29  ;;  %v15579_v26 = vsub.f32 %v380_v0, %v15544_v25  ;;  %v16334_v0 = vand.u32 4294901760, %v15594_v9 }
 0x46a   :  { %7968 = vmatmul.f32.vlgmr.msra.gmra.mxu3 %v15295_v14  ;;  %7979 = vmatpush.msrb.mxu0 %v15467_v36  ;;  %v378_v14 = vld [vmem:[%s16074_s1 + $0xb28] sm:$0xff]  ;;  %v4360_v31 = vpop.f32.mrf.mxu3  ;;  %v8058_v43 = vsub.f32 %v15563_v47, %v16336_v56  ;;  %v15623_v41 = vsub.f32 %v377_v22, %v15590_v34  ;;  %16689 = vst [vmem:[#allocation10_spill] sm:$0xff] %v15646_v62  ;;  %v4522_v22 = vpop.f32.mrf.mxu2  ;;  %v400_v56 = vld [vmem:[%s16074_s1 + $0xbd8] sm:$0xff] }
 0x46b   :  { %8119 = vmatpush.msrb.mxu2 %v15470_v52  ;;  %8169 = vmatpush.msrb.mxu3 %v15434_v61  ;;  %v15575_v3 = vand.u32 4294901760, %v378_v14  ;;  %v16337_v51 = vand.u32 4294901760, %v15547_v20  ;;  %v4260_v37 = vadd.f32 %v4259_v27, %v4219_v4  ;;  %v16335_v48 = vand.u32 4294901760, %v15579_v26  ;;  %v404_v27 = vld [vmem:[%s16074_s1 + $0xbf8] sm:$0xff]  ;;  %v395_v52 = vld [vmem:[%s16074_s1 + $0xbb0] sm:$0xff] }
 0x46c   :  { %7858 = vmatpush.msra.mxu1 %v15308_v60  ;;  %7981 = vmatpush.msrb.mxu0 %v15478_v55  ;;  %v8040_v60 = vsub.f32 %v15504_v1, %v16340_v46  ;;  %v15657_v45 = vsub.f32 %v375_v39, %v15619_v58  ;;  %v15727_v21 = vand.u32 4294901760, %v400_v56 }
 0x46d   :  { %7862 = vmatmul.f32.vlgmr.msra.gmra.mxu1 %v7665_v30  ;;  %8122 = vmatpush.msrb.mxu2 %v15484_v63  ;;  %v444_v30 = vld.sshfl [vmem:[#allocation1 + $0x30] sm:$0xff pattern:$0x73625140]  ;;  %v8052_v15 = vsub.f32 %v15547_v20, %v16337_v51  ;;  %v15611_v49 = vsub.f32 %v378_v14, %v15575_v3  ;;  %v4361_v42 = vadd.f32 %v4360_v31, %v4260_v37  ;;  %v16332_v37 = vand.u32 4294901760, %v15623_v41 }
 0x46e   :  { %8018 = vmatpush.msrb.mxu1 %v8017_v32  ;;  %8171 = vmatpush.msrb.mxu3 %v15444_v11  ;;  %v8041_v54 = vand.u32 4294901760, %v8040_v60  ;;  %v15601_v23 = vand.u32 4294901760, %v444_v30  ;;  %v8064_v2 = vsub.f32 %v15579_v26, %v16335_v48  ;;  %v15639_v14 = vsub.f32 %v376_v17, %v15607_v24  ;;  %v373_v60 = vld [vmem:[%s16074_s1 + $0xb00] sm:$0xff] }
 0x46f   :  { %7983 = vmatpush.msrb.mxu0 %v15489_v5  ;;  %8125 = vmatpush.msrb.mxu2 %v15498_v19  ;;  %v4415_v29 = vadd.f32 %v4414_v12, %v4361_v42  ;;  %v8053_v32 = vand.u32 4294901760, %v8052_v15  ;;  %v16333_v4 = vand.u32 4294901760, %v15611_v49  ;;  %v15662_v31 = vand.u32 4294901760, %v404_v27  ;;  %v4701_v51 = vpop.f32.mrf.mxu1 }
 0x470   :  { %8024 = vmatpush.msrb.mxu1 %v8023_v18  ;;  %8173 = vmatpush.msrb.mxu3 %v15454_v35  ;;  %v15631_v38 = vsub.f32 %v444_v30, %v15601_v23  ;;  %v8070_v30 = vsub.f32 %v15594_v9, %v16334_v0  ;;  %v15671_v12 = vand.u32 4294901760, %v373_v60  ;;  %v16338_v15 = vand.u32 4294901760, %v15639_v14 }
 0x471   :  { %7985 = vmatpush.msrb.mxu0 %v15514_v57  ;;  %8128 = vmatpush.msrb.mxu2 %v15504_v1  ;;  %v4454_v18 = vadd.f32 %v4453_v53, %v4415_v29  ;;  %16690 = vst [vmem:[#allocation8_spill] sm:$0xff] %v15662_v31  ;;  %v8076_v39 = vsub.f32 %v15611_v49, %v16333_v4  ;;  %v402_v53 = vld [vmem:[%s16074_s1 + $0xbe8] sm:$0xff] }
 0x472   :  { %8030 = vmatpush.msrb.mxu1 %v8029_v44  ;;  %8175 = vmatpush.msrb.mxu3 %v15467_v36  ;;  %v8059_v44 = vand.u32 4294901760, %v8058_v43  ;;  %v16344_v17 = vand.u32 4294901760, %v15631_v38  ;;  %16691 = vst [vmem:[#allocation12_spill] sm:$0xff] %v15671_v12  ;;  %v4559_v43 = vpop.f32.mrf.mxu3  ;;  %v8071_v29 = vand.u32 4294901760, %v8070_v30  ;;  %v4600_v30 = vpop.f32.mrf.mxu0  ;;  %v8088_v4 = vsub.f32 %v15639_v14, %v16338_v15 }
 0x473   :  { %7987 = vmatpush.msrb.mxu0 %v15530_v13  ;;  %8131 = vmatpush.msrb.mxu2 %v15520_v40  ;;  %v4523_v42 = vadd.f32 %v4522_v22, %v4454_v18  ;;  %v15705_v0 = vsub.f32 %v373_v60, %v15671_v12  ;;  %v15707_v48 = vand.u32 4294901760, %v402_v53 }
 0x474   :  { %8036 = vmatpush.msrb.mxu1 %v8035_v7  ;;  %8177 = vmatpush.msrb.mxu3 %v15478_v55  ;;  %v403_v7 = vld [vmem:[%s16074_s1 + $0xbf0] sm:$0xff]  ;;  %v8007_v22 = vsub.f32 %v15631_v38, %v16344_v17 }
 0x475   :  { %7989 = vmatpush.msrb.mxu0 %v15544_v25  ;;  %8134 = vmatpush.msrb.mxu2 %v15547_v20  ;;  %v15687_v18 = vand.u32 4294901760, %v403_v7 }
 0x476   :  { %8042 = vmatpush.msrb.mxu1 %v8041_v54  ;;  %8179 = vmatpush.msrb.mxu3 %v15489_v5  ;;  %v8065_v54 = vand.u32 4294901760, %v8064_v2  ;;  %v16342_v2 = vand.u32 4294901760, %v15657_v45 }
 0x477   :  { %7991 = vmatpush.msrb.mxu0 %v15560_v28  ;;  %8137 = vmatpush.msrb.mxu2 %v15563_v47  ;;  %v15722_v8 = vsub.f32 %v403_v7, %v15687_v18  ;;  %v16347_v7 = vand.u32 4294901760, %v15705_v0 }
 0x478   :  { %8048 = vmatpush.msrb.mxu1 %v8047_v33  ;;  %8181 = vmatpush.msrb.mxu3 %v15514_v57  ;;  %v15677_v33 = vsub.f32 %v374_v10, %v15646_v62  ;;  %v401_v10 = vld [vmem:[%s16074_s1 + $0xbe0] sm:$0xff]  ;;  %v8094_v15 = vsub.f32 %v15657_v45, %v16342_v2 }
 0x479   :  { %7993 = vmatpush.msrb.mxu0 %v15575_v3  ;;  %8140 = vmatpush.msrb.mxu2 %v15579_v26 }
 0x47a   :  { %8054 = vmatpush.msrb.mxu1 %v8053_v32  ;;  %8183 = vmatpush.msrb.mxu3 %v15530_v13  ;;  %v8082_v32 = vsub.f32 %v15623_v41, %v16332_v37  ;;  %v8077_v37 = vand.u32 4294901760, %v8076_v39  ;;  %v15715_v39 = vand.u32 4294901760, %v401_v10 }
 0x47b   :  { %7995 = vmatpush.msrb.mxu0 %v15590_v34  ;;  %8143 = vmatpush.msrb.mxu2 %v15594_v9 }
 0x47c   :  { %8060 = vmatpush.msrb.mxu1 %v8059_v44  ;;  %8185 = vmatpush.msrb.mxu3 %v15544_v25  ;;  %v15698_v44 = vsub.f32 %v404_v27, %v15662_v31  ;;  %v4560_v27 = vadd.f32 %v4559_v43, %v4523_v42  ;;  %v8083_v60 = vand.u32 4294901760, %v8082_v32  ;;  %v8008_v43 = vand.u32 4294901760, %v8007_v22 }
 0x47d   :  { %7997 = vmatpush.msrb.mxu0 %v15607_v24  ;;  %8146 = vmatpush.msrb.mxu2 %v15611_v49  ;;  %v8089_v32 = vand.u32 4294901760, %v8088_v4  ;;  %v15743_v2 = vsub.f32 %v401_v10, %v15715_v39  ;;  %v398_v4 = vld [vmem:[%s16074_s1 + $0xbc8] sm:$0xff] }
 0x47e   :  { %8066 = vmatpush.msrb.mxu1 %v8065_v54  ;;  %8187 = vmatpush.msrb.mxu3 %v15560_v28  ;;  %v16343_v54 = vand.u32 4294901760, %v15677_v33  ;;  %v4601_v42 = vadd.f32 %v4600_v30, %v4560_v27  ;;  %v16345_v46 = vand.u32 4294901760, %v15698_v44  ;;  %v15735_v30 = vsub.f32 %v402_v53, %v15707_v48 }
 0x47f   :  { %7999 = vmatpush.msrb.mxu0 %v15619_v58  ;;  %8149 = vmatpush.msrb.mxu2 %v15623_v41  ;;  %v16348_v53 = vand.u32 4294901760, %v15722_v8  ;;  %v15768_v17 = vand.u32 4294901760, %v398_v4 }
 0x480   :  { %8072 = vmatpush.msrb.mxu1 %v8071_v29  ;;  %8189 = vmatpush.msrb.mxu3 %v15575_v3  ;;  %v399_v29 = vld [vmem:[%s16074_s1 + $0xbd0] sm:$0xff]  ;;  %v4702_v27 = vadd.f32 %v4701_v51, %v4601_v42  ;;  %v8100_v22 = vsub.f32 %v15677_v33, %v16343_v54  ;;  %v8095_v51 = vand.u32 4294901760, %v8094_v15  ;;  %v8357_v10 = vsub.f32 %v15698_v44, %v16345_v46 }
 0x481   :  { %8001 = vmatpush.msrb.mxu0 %v15646_v62  ;;  %8152 = vmatpush.msrb.mxu2 %v15639_v14  ;;  %v15750_v42 = vand.u32 4294901760, %v399_v29  ;;  %v15757_v54 = vsub.f32 %v400_v56, %v15727_v21  ;;  %v8106_v15 = vsub.f32 %v15705_v0, %v16347_v7  ;;  %16692 = vst [vmem:[#allocation6_spill] sm:$0xff] %v15768_v17 }
 0x482   :  { %8078 = vmatpush.msrb.mxu1 %v8077_v37  ;;  %8191 = vmatpush.msrb.mxu3 %v15590_v34  ;;  %v4755_v37 = vpop.f32.mrf.mxu2  ;;  %v8101_v56 = vand.u32 4294901760, %v8100_v22  ;;  %v8358_v22 = vand.u32 4294901760, %v8357_v10  ;;  %v15799_v50 = vsub.f32 %v398_v4, %v15768_v17  ;;  %v15801_v10 = vand.u32 4294901760, %v396_v16 }
 0x483   :  { %8003 = vmatpush.msrb.mxu0 %v15671_v12  ;;  %8155 = vmatpush.msrb.mxu2 %v15657_v45  ;;  %v4756_v46 = vadd.f32 %v4755_v37, %v4702_v27  ;;  %v15782_v27 = vsub.f32 %v399_v29, %v15750_v42  ;;  %v8107_v29 = vand.u32 4294901760, %v8106_v15  ;;  %v394_v15 = vld [vmem:[%s16074_s1 + $0xba8] sm:$0xff]  ;;  %v16696_v4 = vand.u32 4294901760, %v15498_v19  ;;  %v393_v19 = vld [vmem:[%s16074_s1 + $0xba0] sm:$0xff] }
 0x484   :  { %8084 = vmatpush.msrb.mxu1 %v8083_v60  ;;  %8193 = vmatpush.msrb.mxu3 %v15607_v24  ;;  %v397_v60 = vld [vmem:[%s16074_s1 + $0xbc0] sm:$0xff] }
 0x485   :  { %8009 = vmatmul.f32.vlgmr.msrb.gmra.mxu0 %v8008_v43  ;;  %8158 = vmatpush.msrb.mxu2 %v15677_v33  ;;  %v16350_v43 = vand.u32 4294901760, %v15735_v30  ;;  %v15784_v37 = vand.u32 4294901760, %v397_v60 }
 0x486   :  { %8210 = vmatpush.msra.mxu0 %v8015_v59  ;;  %8090 = vmatpush.msrb.mxu1 %v8089_v32  ;;  %v4794_v59 = vpop.f32.mrf.mxu3  ;;  %v8363_v32 = vsub.f32 %v15722_v8, %v16348_v53 }
 0x487   :  { %8195 = vmatpush.msrb.mxu3 %v15619_v58  ;;  %8161 = vmatpush.msrb.mxu2 %v15705_v0  ;;  %v8369_v53 = vsub.f32 %v15735_v30, %v16350_v43  ;;  %v4795_v7 = vadd.f32 %v4794_v59, %v4756_v46  ;;  %v16695_v43 = vand.u32 4294901760, %v15631_v38  ;;  %v16355_v46 = vand.u32 4294901760, %v15782_v27 }
 0x488   :  { %8214 = vmatpush.msra.mxu0 %v8021_v6  ;;  %8096 = vmatpush.msrb.mxu1 %v8095_v51  ;;  %v4863_v6 = vpop.f32.mrf.mxu0  ;;  %v16693_v51 = vand.u32 4294901760, %v15484_v63  ;;  %v15818_v59 = vand.u32 4294901760, %v395_v52 }
 0x489   :  { %8197 = vmatpush.msrb.mxu3 %v15646_v62  ;;  %8164 = vmatmul.f32.vlgmr.msrb.gmra.mxu2 %v15631_v38  ;;  %v16694_v62 = vand.u32 4294901760, %v15743_v2 }
 0x48a   :  { %8218 = vmatpush.msra.mxu0 %v16693_v51  ;;  %8314 = vmatpush.msra.mxu2 %v15662_v31  ;;  %v4900_v51 = vpop.f32.mrf.mxu1  ;;  %v8364_v31 = vand.u32 4294901760, %v8363_v32  ;;  %v16354_v32 = vand.u32 4294901760, %v15799_v50 }
 0x48b   :  { %8102 = vmatpush.msrb.mxu1 %v8101_v56  ;;  %8199 = vmatpush.msrb.mxu3 %v15671_v12  ;;  %v8375_v63 = vsub.f32 %v15743_v2, %v16694_v62  ;;  %v15816_v56 = vsub.f32 %v397_v60, %v15784_v37  ;;  %v4864_v62 = vadd.f32 %v4863_v6, %v4795_v7  ;;  %v16697_v12 = vand.u32 4294901760, %v15757_v54 }
 0x48c   :  { %8203 = vmatmul.f32.vlgmr.msrb.gmra.mxu3 %v16695_v43  ;;  %8222 = vmatpush.msra.mxu0 %v16696_v4  ;;  %v16698_v43 = vand.u32 4294901760, %v15504_v1  ;;  %v8370_v60 = vand.u32 4294901760, %v8369_v53  ;;  %v15831_v7 = vsub.f32 %v396_v16, %v15801_v10  ;;  %v15833_v6 = vand.u32 4294901760, %v394_v15  ;;  %v4941_v1 = vpop.f32.mrf.mxu2 }
 0x48d   :  { %8316 = vmatpush.msra.mxu2 %v15687_v18  ;;  %8359 = vmatpush.msra.mxu3 %v8358_v22  ;;  %v8381_v38 = vsub.f32 %v15757_v54, %v16697_v12  ;;  %v4901_v22 = vadd.f32 %v4900_v51, %v4864_v62  ;;  %v8376_v12 = vand.u32 4294901760, %v8375_v63  ;;  %v8387_v53 = vsub.f32 %v15782_v27, %v16355_v46 }
 0x48e   :  { %8108 = vmatpush.msrb.mxu1 %v8107_v29  ;;  %8226 = vmatpush.msra.mxu0 %v16698_v43  ;;  %v392_v29 = vld [vmem:[%s16074_s1 + $0xb98] sm:$0xff]  ;;  %v16356_v16 = vand.u32 4294901760, %v15816_v56  ;;  %v15846_v51 = vsub.f32 %v395_v52, %v15818_v59  ;;  %v15848_v4 = vand.u32 4294901760, %v393_v19  ;;  %v16699_v63 = vand.u32 4294901760, %v15520_v40  ;;  %v391_v40 = vld [vmem:[%s16074_s1 + $0xb90] sm:$0xff] }
 0x48f   :  { %8110 = vmatmul.f32.vlgmr.msrb.gmra.mxu1 %v15601_v23  ;;  %8318 = vmatpush.msra.mxu2 %v15707_v48  ;;  %v8382_v62 = vand.u32 4294901760, %v8381_v38  ;;  %v15859_v52 = vsub.f32 %v394_v15, %v15833_v6  ;;  %v15861_v43 = vand.u32 4294901760, %v392_v29  ;;  %v16700_v38 = vand.u32 4294901760, %v15547_v20  ;;  %v390_v20 = vld [vmem:[%s16074_s1 + $0xb88] sm:$0xff] }
 0x490   :  { %8277 = vmatpush.msra.mxu1 %v15434_v61  ;;  %8365 = vmatpush.msra.mxu3 %v8364_v31  ;;  %v8393_v61 = vsub.f32 %v15799_v50, %v16354_v32  ;;  %v16357_v31 = vand.u32 4294901760, %v15831_v7  ;;  %v8399_v15 = vsub.f32 %v15816_v56, %v16356_v16  ;;  %v15875_v46 = vsub.f32 %v393_v19, %v15848_v4 }
 0x491   :  { %8230 = vmatpush.msra.mxu0 %v16699_v63  ;;  %8320 = vmatpush.msra.mxu2 %v15715_v39  ;;  %v4942_v63 = vadd.f32 %v4941_v1, %v4901_v22  ;;  %v445_v22 = vld.sshfl [vmem:[#allocation1 + $0x38] sm:$0xff pattern:$0x73625140]  ;;  %v16701_v1 = vand.u32 4294901760, %v15563_v47  ;;  %v15891_v16 = vsub.f32 %v392_v29, %v15861_v43  ;;  %v389_v47 = vld [vmem:[%s16074_s1 + $0xb80] sm:$0xff]  ;;  %v16702_v32 = vand.u32 4294901760, %v15579_v26 }
 0x492   :  { %8279 = vmatpush.msra.mxu1 %v15444_v11  ;;  %8371 = vmatpush.msra.mxu3 %v8370_v60  ;;  %v5042_v11 = vpop.f32.mrf.mxu3  ;;  %v8388_v60 = vand.u32 4294901760, %v8387_v53  ;;  %v8394_v53 = vand.u32 4294901760, %v8393_v61  ;;  %v8405_v19 = vsub.f32 %v15831_v7, %v16357_v31  ;;  %v5135_v61 = vpop.f32.mrf.mxu1  ;;  %v8400_v29 = vand.u32 4294901760, %v8399_v15  ;;  %s8699_s1 = smov [#allocation2]  }
 0x493   :  { %8234 = vmatpush.msra.mxu0 %v16700_v38  ;;  %8322 = vmatpush.msra.mxu2 %v15727_v21  ;;  %v16703_v31 = vand.u32 4294901760, %v15846_v51  ;;  %v16704_v26 = vand.u32 4294901760, %v15594_v9  ;;  %v8428_v15 = vand.u32 4294901760, %v15891_v16  ;;  %v16706_v9 = vand.u32 4294901760, %v15611_v49  ;;  %s8660_s22 = sshll.u32 %s8699_s1, 4  ;;  %s8661_s22 = int_to_ptr.vmem [resolvable:$true] %s8660_s22 }
 0x494   :  { %8281 = vmatpush.msra.mxu1 %v15454_v35  ;;  %8377 = vmatpush.msra.mxu3 %v8376_v12  ;;  %v15883_v35 = vand.u32 4294901760, %v391_v40  ;;  %v5096_v12 = vpop.f32.mrf.mxu0  ;;  %v16707_v49 = vand.u32 4294901760, %v15623_v41 }
 0x495   :  { %8238 = vmatpush.msra.mxu0 %v16701_v1  ;;  %8324 = vmatpush.msra.mxu2 %v15750_v42  ;;  %v5043_v1 = vadd.f32 %v5042_v11, %v4942_v63  ;;  %v8411_v38 = vsub.f32 %v15846_v51, %v16703_v31  ;;  %v8422_v63 = vand.u32 4294901760, %v15875_v46 }
 0x496   :  { %8283 = vmatpush.msra.mxu1 %v15467_v36  ;;  %8383 = vmatpush.msra.mxu3 %v8382_v62  ;;  %v15899_v36 = vand.u32 4294901760, %v390_v20  ;;  %v15901_v62 = vand.u32 4294901760, %v445_v22 }
 0x497   :  { %8242 = vmatpush.msra.mxu0 %v16702_v32  ;;  %8326 = vmatpush.msra.mxu2 %v15768_v17  ;;  %v5097_v11 = vadd.f32 %v5096_v12, %v5043_v1  ;;  %v15912_v32 = vsub.f32 %v391_v40, %v15883_v35  ;;  %v15914_v17 = vand.u32 4294901760, %v389_v47 }
 0x498   :  { %8285 = vmatpush.msra.mxu1 %v15478_v55  ;;  %8389 = vmatpush.msra.mxu3 %v8388_v60  ;;  %v8406_v55 = vand.u32 4294901760, %v8405_v19  ;;  %v16705_v60 = vand.u32 4294901760, %v15859_v52  ;;  %v15925_v40 = vsub.f32 %v390_v20, %v15899_v36  ;;  %v15928_v1 = vsub.f32 %v445_v22, %v15901_v62 }
 0x499   :  { %8246 = vmatpush.msra.mxu0 %v16704_v26  ;;  %8328 = vmatpush.msra.mxu2 %v15784_v37  ;;  %v5136_v12 = vadd.f32 %v5135_v61, %v5097_v11  ;;  %v8423_v19 = vsub.f32 %v15875_v46, %v8422_v63  ;;  %v8434_v20 = vand.u32 4294901760, %v15912_v32  ;;  %v15939_v61 = vsub.f32 %v389_v47, %v15914_v17 }
 0x49a   :  { %8287 = vmatpush.msra.mxu1 %v15489_v5  ;;  %8395 = vmatpush.msra.mxu3 %v8394_v53  ;;  %v8417_v31 = vsub.f32 %v15859_v52, %v16705_v60  ;;  %v5204_v5 = vpop.f32.mrf.mxu2  ;;  %v8412_v53 = vand.u32 4294901760, %v8411_v38  ;;  %v8429_v22 = vsub.f32 %v15891_v16, %v8428_v15  ;;  %v8440_v41 = vand.u32 4294901760, %v15925_v40  ;;  %v5241_v47 = vpop.f32.mrf.mxu3 }
 0x49b   :  { %8250 = vmatpush.msra.mxu0 %v16706_v9  ;;  %8330 = vmatpush.msra.mxu2 %v15801_v10  ;;  %v5205_v38 = vadd.f32 %v5204_v5, %v5136_v12  ;;  %v8347_v11 = vand.u32 4294901760, %v15928_v1  ;;  %v16709_v26 = vand.u32 4294901760, %v15657_v45  ;;  %v5383_v5 = vpop.f32.mrf.mxu1 }
 0x49c   :  { %8289 = vmatpush.msra.mxu1 %v15514_v57  ;;  %8401 = vmatpush.msra.mxu3 %v8400_v29  ;;  %v8418_v57 = vand.u32 4294901760, %v8417_v31  ;;  %v16708_v29 = vand.u32 4294901760, %v15639_v14  ;;  %v8435_v14 = vsub.f32 %v15912_v32, %v8434_v20  ;;  %v5282_v60 = vpop.f32.mrf.mxu0  ;;  %v8430_v31 = vand.u32 4294901760, %v8429_v22 }
 0x49d   :  { %8254 = vmatpush.msra.mxu0 %v16707_v49  ;;  %8332 = vmatpush.msra.mxu2 %v15818_v59  ;;  %v5242_v12 = vadd.f32 %v5241_v47, %v5205_v38  ;;  %v8441_v45 = vsub.f32 %v15925_v40, %v8440_v41  ;;  %v8348_v9 = vsub.f32 %v15928_v1, %v8347_v11  ;;  %v16713_v47 = vld [vmem:[#allocation10_spill] sm:$0xff] }
 0x49e   :  { %8291 = vmatpush.msra.mxu1 %v15530_v13  ;;  %8407 = vmatpush.msra.mxu3 %v8406_v55  ;;  %v8424_v13 = vand.u32 4294901760, %v8423_v19  ;;  %v8446_v55 = vand.u32 4294901760, %v15939_v61 }
 0x49f   :  { %8258 = vmatpush.msra.mxu0 %v16708_v29  ;;  %8334 = vmatpush.msra.mxu2 %v15833_v6  ;;  %v16712_v29 = vand.u32 4294901760, %v15698_v44 }
 0x4a0   :  { %8293 = vmatpush.msra.mxu1 %v15544_v25  ;;  %8413 = vmatpush.msra.mxu3 %v8412_v53  ;;  %v16710_v25 = vand.u32 4294901760, %v15677_v33  ;;  %v16711_v53 = vand.u32 4294901760, %v15705_v0  ;;  %v8436_v33 = vand.u32 4294901760, %v8435_v14  ;;  %v8447_v19 = vsub.f32 %v15939_v61, %v8446_v55 }
 0x4a1   :  { %8262 = vmatpush.msra.mxu0 %v16709_v26  ;;  %8336 = vmatpush.msra.mxu2 %v15848_v4  ;;  %v16715_v26 = vld [vmem:[#allocation8_spill] sm:$0xff] }
 0x4a2   :  { %8295 = vmatpush.msra.mxu1 %v15560_v28  ;;  %8419 = vmatpush.msra.mxu3 %v8418_v57  ;;  %v5283_v28 = vadd.f32 %v5282_v60, %v5242_v12  ;;  %v8349_v57 = vand.u32 4294901760, %v8348_v9  ;;  %v5437_v22 = vpop.f32.mrf.mxu2  ;;  %v8448_v0 = vand.u32 4294901760, %v8447_v19  ;;  %v5476_v38 = vpop.f32.mrf.mxu3  ;;  %v16716_v60 = vld [vmem:[#allocation12_spill] sm:$0xff] }
 0x4a3   :  { %8266 = vmatpush.msra.mxu0 %v16710_v25  ;;  %8338 = vmatpush.msra.mxu2 %v15861_v43  ;;  %v5582_v14 = vpop.f32.mrf.mxu1 }
 0x4a4   :  { %8297 = vmatpush.msra.mxu1 %v15575_v3  ;;  %8425 = vmatpush.msra.mxu3 %v8424_v13  ;;  %v5384_v49 = vadd.f32 %v5383_v5, %v5283_v28  ;;  %v8442_v3 = vand.u32 4294901760, %v8441_v45 }
 0x4a5   :  { %8270 = vmatpush.msra.mxu0 %v16711_v53  ;;  %8340 = vmatpush.msra.mxu2 %v15883_v35 }
 0x4a6   :  { %8299 = vmatpush.msra.mxu1 %v15590_v34  ;;  %8431 = vmatpush.msra.mxu3 %v8430_v31  ;;  %v5438_v34 = vadd.f32 %v5437_v22, %v5384_v49  ;;  %v16717_v31 = vand.u32 4294901760, %v15735_v30 }
 0x4a7   :  { %8272 = vmatmul.f32.vlgmr.msra.gmra.mxu0 %v15601_v23  ;;  %8342 = vmatpush.msra.mxu2 %v15899_v36 }
 0x4a8   :  { %8457 = vmatpush.msrb.mxu0 %v15698_v44  ;;  %8301 = vmatpush.msra.mxu1 %v15607_v24  ;;  %v5545_v24 = vpop.f32.mrf.mxu0  ;;  %v5477_v13 = vadd.f32 %v5476_v38, %v5438_v34 }
 0x4a9   :  { %8437 = vmatpush.msra.mxu3 %v8436_v33  ;;  %8344 = vmatpush.msra.mxu2 %v15914_v17 }
 0x4aa   :  { %8460 = vmatpush.msrb.mxu0 %v15722_v8  ;;  %8303 = vmatpush.msra.mxu1 %v15619_v58  ;;  %v16714_v58 = vand.u32 4294901760, %v15722_v8  ;;  %v5546_v44 = vadd.f32 %v5545_v24, %v5477_v13  ;;  %v16718_v8 = vand.u32 4294901760, %v15743_v2  ;;  %v5623_v25 = vpop.f32.mrf.mxu2  ;;  %v5724_v45 = vpop.f32.mrf.mxu3 }
 0x4ab   :  { %8443 = vmatpush.msra.mxu3 %v8442_v3  ;;  %8350 = vmatmul.f32.vlgmr.msra.gmra.mxu2 %v8349_v57  ;;  %v5817_v9 = vpop.f32.mrf.mxu1 }
 0x4ac   :  { %8463 = vmatpush.msrb.mxu0 %v15735_v30  ;;  %8551 = vmatpush.msrb.mxu2 %v16712_v29  ;;  %v5583_v12 = vadd.f32 %v5582_v14, %v5546_v44 }
 0x4ad   :  { %8305 = vmatpush.msra.mxu1 %v16713_v47  ;;  %8449 = vmatpush.msra.mxu3 %v8448_v0 }
 0x4ae   :  { %8451 = vmatmul.f32.vlgmr.msra.gmra.mxu3 %v15901_v62  ;;  %8466 = vmatpush.msrb.mxu0 %v15743_v2  ;;  %v5624_v30 = vadd.f32 %v5623_v25, %v5583_v12  ;;  %v16720_v2 = vand.u32 4294901760, %v15782_v27 }
 0x4af   :  { %8555 = vmatpush.msrb.mxu2 %v16714_v58  ;;  %8618 = vmatpush.msrb.mxu3 %v16715_v26 }
 0x4b0   :  { %8307 = vmatpush.msra.mxu1 %v16716_v60  ;;  %8469 = vmatpush.msrb.mxu0 %v15757_v54 }
 0x4b1   :  { %8309 = vmatmul.f32.vlgmr.msra.gmra.mxu1 %v15601_v23  ;;  %8559 = vmatpush.msrb.mxu2 %v16717_v31  ;;  %v16719_v23 = vand.u32 4294901760, %v15757_v54  ;;  %v5778_v54 = vpop.f32.mrf.mxu0 }
 0x4b2   :  { %8510 = vmatpush.msrb.mxu1 %v16715_v26  ;;  %8620 = vmatpush.msrb.mxu3 %v15687_v18  ;;  %v5886_v28 = vpop.f32.mrf.mxu2 }
 0x4b3   :  { %8472 = vmatpush.msrb.mxu0 %v15782_v27  ;;  %8563 = vmatpush.msrb.mxu2 %v16718_v8  ;;  %v16722_v27 = vand.u32 4294901760, %v15816_v56 }
 0x4b4   :  { %8512 = vmatpush.msrb.mxu1 %v15687_v18  ;;  %8622 = vmatpush.msrb.mxu3 %v15707_v48  ;;  %v16721_v18 = vand.u32 4294901760, %v15799_v50 }
 0x4b5   :  { %8475 = vmatpush.msrb.mxu0 %v15799_v50  ;;  %8567 = vmatpush.msrb.mxu2 %v16719_v23  ;;  %v16724_v50 = vand.u32 4294901760, %v15831_v7 }
 0x4b6   :  { %8514 = vmatpush.msrb.mxu1 %v15707_v48  ;;  %8624 = vmatpush.msrb.mxu3 %v15715_v39  ;;  %v5725_v48 = vadd.f32 %v5724_v45, %v5624_v30 }
 0x4b7   :  { %8478 = vmatpush.msrb.mxu0 %v15816_v56  ;;  %8571 = vmatpush.msrb.mxu2 %v16720_v2  ;;  %v16725_v56 = vand.u32 4294901760, %v15846_v51 }
 0x4b8   :  { %8516 = vmatpush.msrb.mxu1 %v15715_v39  ;;  %8626 = vmatpush.msrb.mxu3 %v15727_v21  ;;  %v16723_v39 = vld [vmem:[#allocation6_spill] sm:$0xff]  ;;  %v5779_v5 = vadd.f32 %v5778_v54, %v5725_v48 }
 0x4b9   :  { %8481 = vmatpush.msrb.mxu0 %v15831_v7  ;;  %8575 = vmatpush.msrb.mxu2 %v16721_v18 }
 0x4ba   :  { %8518 = vmatpush.msrb.mxu1 %v15727_v21  ;;  %8628 = vmatpush.msrb.mxu3 %v15750_v42  ;;  %v5818_v21 = vadd.f32 %v5817_v9, %v5779_v5 }
 0x4bb   :  { %8484 = vmatpush.msrb.mxu0 %v15846_v51  ;;  %8579 = vmatpush.msrb.mxu2 %v16722_v27  ;;  %v5923_v51 = vpop.f32.mrf.mxu3 }
 0x4bc   :  { %8520 = vmatpush.msrb.mxu1 %v15750_v42  ;;  %8630 = vmatpush.msrb.mxu3 %v16723_v39  ;;  %v16726_v42 = vand.u32 4294901760, %v15859_v52  ;;  %v5887_v7 = vadd.f32 %v5886_v28, %v5818_v21 }
 0x4bd   :  { %8487 = vmatpush.msrb.mxu0 %v15859_v52  ;;  %8583 = vmatpush.msrb.mxu2 %v16724_v50 }
 0x4be   :  { %8522 = vmatpush.msrb.mxu1 %v16723_v39  ;;  %8632 = vmatpush.msrb.mxu3 %v15784_v37 }
 0x4bf   :  { %8490 = vmatpush.msrb.mxu0 %v15875_v46  ;;  %8587 = vmatpush.msrb.mxu2 %v16725_v56  ;;  %v6065_v46 = vpop.f32.mrf.mxu1 }
 0x4c0   :  { %8524 = vmatpush.msrb.mxu1 %v15784_v37  ;;  %8634 = vmatpush.msrb.mxu3 %v15801_v10  ;;  %v5964_v37 = vpop.f32.mrf.mxu0 }
 0x4c1   :  { %8493 = vmatpush.msrb.mxu0 %v15891_v16  ;;  %8591 = vmatpush.msrb.mxu2 %v16726_v42  ;;  %v6119_v16 = vpop.f32.mrf.mxu2 }
 0x4c2   :  { %8526 = vmatpush.msrb.mxu1 %v15801_v10  ;;  %8636 = vmatpush.msrb.mxu3 %v15818_v59  ;;  %v5924_v10 = vadd.f32 %v5923_v51, %v5887_v7 }
 0x4c3   :  { %8496 = vmatpush.msrb.mxu0 %v15912_v32  ;;  %8595 = vmatpush.msrb.mxu2 %v8422_v63  ;;  %v6158_v52 = vpop.f32.mrf.mxu3 }
 0x4c4   :  { %8528 = vmatpush.msrb.mxu1 %v15818_v59  ;;  %8638 = vmatpush.msrb.mxu3 %v15833_v6  ;;  %v5965_v59 = vadd.f32 %v5964_v37, %v5924_v10 }
 0x4c5   :  { %8499 = vmatpush.msrb.mxu0 %v15925_v40  ;;  %8599 = vmatpush.msrb.mxu2 %v8428_v15 }
 0x4c6   :  { %8530 = vmatpush.msrb.mxu1 %v15833_v6  ;;  %8640 = vmatpush.msrb.mxu3 %v15848_v4  ;;  %v6066_v6 = vadd.f32 %v6065_v46, %v5965_v59 }
 0x4c7   :  { %8502 = vmatpush.msrb.mxu0 %v15939_v61  ;;  %8603 = vmatpush.msrb.mxu2 %v8434_v20 }
 0x4c8   :  { %8532 = vmatpush.msrb.mxu1 %v15848_v4  ;;  %8642 = vmatpush.msrb.mxu3 %v15861_v43  ;;  %v6120_v4 = vadd.f32 %v6119_v16, %v6066_v6 }
 0x4c9   :  { %8505 = vmatmul.f32.vlgmr.msrb.gmra.mxu0 %v15928_v1  ;;  %8607 = vmatpush.msrb.mxu2 %v8440_v41  ;;  %v6305_v40 = vpop.f32.mrf.mxu2 }
 0x4ca   :  { %8534 = vmatpush.msrb.mxu1 %v15861_v43  ;;  %8644 = vmatpush.msrb.mxu3 %v15883_v35  ;;  %v6227_v43 = vpop.f32.mrf.mxu0  ;;  %v6159_v63 = vadd.f32 %v6158_v52, %v6120_v4 }
 0x4cb   :  { %8611 = vmatpush.msrb.mxu2 %v8446_v55  ;;  %v6406_v61 = vpop.f32.mrf.mxu3 }
 0x4cc   :  { %8536 = vmatpush.msrb.mxu1 %v15883_v35  ;;  %8646 = vmatpush.msrb.mxu3 %v15899_v36  ;;  %v6264_v35 = vpop.f32.mrf.mxu1  ;;  %v6228_v32 = vadd.f32 %v6227_v43, %v6159_v63 }
 0x4cd   :  { %8613 = vmatmul.f32.vlgmr.msrb.gmra.mxu2 %v15901_v62 }
 0x4ce   :  { %8538 = vmatpush.msrb.mxu1 %v15899_v36  ;;  %8648 = vmatpush.msrb.mxu3 %v15914_v17  ;;  %v6265_v15 = vadd.f32 %v6264_v35, %v6228_v32 }
 0x4cf   :  { %8650 = vmatmul.f32.vlgmr.msrb.gmra.mxu3 %v15901_v62 }
 0x4d0   :  { %8540 = vmatpush.msrb.mxu1 %v15914_v17  ;;  %v6306_v20 = vadd.f32 %v6305_v40, %v6265_v15 }
 0x4d1   :  { %8544 = vmatmul.f32.vlgmr.msrb.gmra.mxu1 %v8347_v11  ;;  %v6568_v62 = vpop.f32.mrf.mxu2 }
 0x4d2   :  { %v6460_v36 = vpop.f32.mrf.mxu0  ;;  %v6407_v41 = vadd.f32 %v6406_v61, %v6306_v20 }
 0x4d3   :  { %v6605_v49 = vpop.f32.mrf.mxu3 }
 0x4d4   :  { %v6499_v55 = vpop.f32.mrf.mxu1  ;;  %v6461_v53 = vadd.f32 %v6460_v36, %v6407_v41 }
 0x4d6   :  { %v6500_v33 = vadd.f32 %v6499_v55, %v6461_v53 }
 0x4d8   :  { %v6569_v19 = vadd.f32 %v6568_v62, %v6500_v33 }
 0x4d9   :  { %v6801_v22 = vpop.f32.mrf.mxu2 }
 0x4da   :  { %v6646_v17 = vpop.f32.mrf.mxu0  ;;  %v6606_v3 = vadd.f32 %v6605_v49, %v6569_v19 }
 0x4db   :  { %v6840_v34 = vpop.f32.mrf.mxu3 }
 0x4dc   :  { %v6747_v1 = vpop.f32.mrf.mxu1  ;;  %v6647_v11 = vadd.f32 %v6646_v17, %v6606_v3 }
 0x4de   :  { %v6748_v57 = vadd.f32 %v6747_v1, %v6647_v11 }
 0x4e0   :  { %v6802_v0 = vadd.f32 %v6801_v22, %v6748_v57 }
 0x4e1   :  { %v6987_v58 = vpop.f32.mrf.mxu2 }
 0x4e2   :  { %v6909_v38 = vpop.f32.mrf.mxu0  ;;  %v6841_v29 = vadd.f32 %v6840_v34, %v6802_v0 }
 0x4e3   :  { %v7088_v14 = vpop.f32.mrf.mxu3 }
 0x4e4   :  { %v6946_v47 = vpop.f32.mrf.mxu1  ;;  %v6910_v24 = vadd.f32 %v6909_v38, %v6841_v29 }
 0x4e6   :  { %v6947_v13 = vadd.f32 %v6946_v47, %v6910_v24 }
 0x4e8   :  { %v6988_v26 = vadd.f32 %v6987_v58, %v6947_v13 }
 0x4e9   :  { %v7250_v25 = vpop.f32.mrf.mxu2 }
 0x4ea   :  { %v7142_v60 = vpop.f32.mrf.mxu0  ;;  %v7089_v44 = vadd.f32 %v7088_v14, %v6988_v26 }
 0x4eb   :  { %v7287_v30 = vpop.f32.mrf.mxu3 }
 0x4ec   :  { %v7181_v31 = vpop.f32.mrf.mxu1  ;;  %v7143_v12 = vadd.f32 %v7142_v60, %v7089_v44 }
 0x4ee   :  { %v7182_v8 = vadd.f32 %v7181_v31, %v7143_v12 }
 0x4f0   :  { %v7251_v23 = vadd.f32 %v7250_v25, %v7182_v8 }
 0x4f1   :  { %v7483_v27 = vpop.f32.mrf.mxu2 }
 0x4f2   :  { %v7328_v2 = vpop.f32.mrf.mxu0  ;;  %v7288_v45 = vadd.f32 %v7287_v30, %v7251_v23 }
 0x4f3   :  { %v7522_v39 = vpop.f32.mrf.mxu3 }
 0x4f4   :  { %v7429_v18 = vpop.f32.mrf.mxu1  ;;  %v7329_v54 = vadd.f32 %v7328_v2, %v7288_v45 }
 0x4f6   :  { %v7430_v48 = vadd.f32 %v7429_v18, %v7329_v54 }
 0x4f8   :  { %v7484_v9 = vadd.f32 %v7483_v27, %v7430_v48 }
 0x4f9   :  { %v7669_v42 = vpop.f32.mrf.mxu2 }
 0x4fa   :  { %v7591_v5 = vpop.f32.mrf.mxu0  ;;  %v7523_v50 = vadd.f32 %v7522_v39, %v7484_v9 }
 0x4fb   :  { %v7770_v51 = vpop.f32.mrf.mxu3 }
 0x4fc   :  { %v7628_v21 = vpop.f32.mrf.mxu1  ;;  %v7592_v56 = vadd.f32 %v7591_v5, %v7523_v50 }
 0x4fe   :  { %v7629_v28 = vadd.f32 %v7628_v21, %v7592_v56 }
 0x500   :  { %v7670_v7 = vadd.f32 %v7669_v42, %v7629_v28 }
 0x501   :  { %v7932_v16 = vpop.f32.mrf.mxu2 }
 0x502   :  { %v7824_v37 = vpop.f32.mrf.mxu0  ;;  %v7771_v10 = vadd.f32 %v7770_v51, %v7670_v7 }
 0x503   :  { %v7969_v52 = vpop.f32.mrf.mxu3 }
 0x504   :  { %v7863_v46 = vpop.f32.mrf.mxu1  ;;  %v7825_v59 = vadd.f32 %v7824_v37, %v7771_v10 }
 0x506   :  { %v7864_v6 = vadd.f32 %v7863_v46, %v7825_v59 }
 0x508   :  { %v7933_v4 = vadd.f32 %v7932_v16, %v7864_v6 }
 0x50a   :  { %v8010_v43 = vpop.f32.mrf.mxu0  ;;  %v7970_v63 = vadd.f32 %v7969_v52, %v7933_v4 }
 0x50c   :  { %v8111_v35 = vpop.f32.mrf.mxu1  ;;  %v8011_v32 = vadd.f32 %v8010_v43, %v7970_v63  ;;  %v8165_v40 = vpop.f32.mrf.mxu2 }
 0x50e   :  { %v8112_v15 = vadd.f32 %v8111_v35, %v8011_v32 }
 0x50f   :  { %v8204_v61 = vpop.f32.mrf.mxu3 }
 0x510   :  { %v8166_v20 = vadd.f32 %v8165_v40, %v8112_v15 }
 0x512   :  { %v8205_v41 = vadd.f32 %v8204_v61, %v8166_v20 }
 0x524   :  { %v8273_v36 = vpop.f32.mrf.mxu0 }
 0x525   :  { %v8274_v53 = vadd.f32 %v8273_v36, %v8205_v41 }
 0x52e   :  { %v8310_v55 = vpop.f32.mrf.mxu1  ;;  %v8351_v62 = vpop.f32.mrf.mxu2 }
 0x52f   :  { %v8311_v33 = vadd.f32 %v8310_v55, %v8274_v53 }
 0x531   :  { %v8352_v19 = vadd.f32 %v8351_v62, %v8311_v33  ;;  %v8452_v49 = vpop.f32.mrf.mxu3 }
 0x533   :  { %v8453_v3 = vadd.f32 %v8452_v49, %v8352_v19 }
 0x546   :  { %v8506_v17 = vpop.f32.mrf.mxu0 }
 0x547   :  { %v8507_v1 = vadd.f32 %v8506_v17, %v8453_v3 }
 0x54e   :  { %v8545_v11 = vpop.f32.mrf.mxu1 }
 0x54f   :  { %v8546_v57 = vadd.f32 %v8545_v11, %v8507_v1 }
 0x550   :  { %v8614_v22 = vpop.f32.mrf.mxu2 }
 0x551   :  { %v8615_v0 = vadd.f32 %v8614_v22, %v8546_v57 }
 0x552   :  { %v8651_v34 = vpop.f32.mrf.mxu3 }
 0x553   :  { %v8652_v38 = vadd.f32 %v8651_v34, %v8615_v0 }
 0x555   :  { %8654 = vst [vmem:[#allocation2] sm:$0x3] %v8652_v38 }
 0x556   :  { %8665 = dma.vmem_to_hbm [thread:$0]  %s8661_s22, 32, %s8663_s25, [#allocation3]  }
 0x557   :  { %8697 = dma.done.wait [#allocation3], 32  }
 0x558   :  { %8698 = vsyncadd [#allocation3], 4294967264 }
 0x559   :  { %8670 = vsyncpa [#allocation3], 1 }

</bundles_post_ra>
